<compile_context>
chip_gen: v7x
topology: tpu7x:2x2x1
jax: 0.10.0
libtpu: 0.0.40
codegen_flags: <defaults>
</compile_context>

<pallas_src>
import functools

import jax
import jax.numpy as jnp
from jax import lax
from jax.experimental import pallas as pl
from jax.experimental.pallas import tpu as pltpu

# Scoped VMEM limit: <= default on v6e/v7x (harmless everywhere).  Raise toward
# 64-96 MiB on v6e / keep <= ~48 MiB on v7x when blocks become much larger.
_VMEM_LIMIT = 32 * 1024 * 1024


def _compiler_params():
    return pltpu.CompilerParams(
        dimension_semantics=("parallel",),
        vmem_limit_bytes=_VMEM_LIMIT,
    )


# ----------------------------- Pallas kernels ------------------------------ #
def _tap_conv_kernel(a_ref, w_ref, b_ref, o_ref, *, offsets, lout, act):
    """Per-tap conv on a flattened zero-padded NHWC activation.

    a_ref : (Hp*Wp, Cin)    flattened padded activation (row = padded pixel)
    w_ref : (T, Cin, Cout)  one weight matrix per kernel tap
    b_ref : (1, Cout)       f32 bias
    o_ref : (lout, Cout)    flat output rows (ragged right-edge columns are
                            sliced off by the wrapper)
    """
    cout = w_ref.shape[-1]
    acc = jnp.zeros((lout, cout), jnp.float32)
    for t, off in enumerate(offsets):
        acc += jnp.dot(a_ref[pl.ds(off, lout), :], w_ref[t],
                       preferred_element_type=jnp.float32)
    acc = acc + b_ref[...]
    if act == "relu":
        acc = jnp.maximum(acc, 0.0)
    o_ref[...] = acc.astype(o_ref.dtype)


def _gated_out_kernel(a_ref, wg_ref, bg_ref, wo_ref, bo_ref, o_ref, gpad_ref,
                      *, offsets, lout, wp, w_valid, co_g):
    """Fused GatedConv2d(3x3, pad 1) + Conv2d(3x3, pad 1) on one padded image.

    a_ref   : (Hp*Wp, Cin)      padded + flattened 72-ch activation
    wg_ref  : (9, Cin, 2*co_g)  feat||gate weights, one matrix per tap
    bg_ref  : (1, 2*co_g)       f32 feat||gate bias
    wo_ref  : (9, co_g, Cout)   output-conv weights per tap
    bo_ref  : (1, Cout)         f32 output-conv bias
    o_ref   : (lout, Cout)      flat output rows
    gpad_ref: (Hp*Wp, co_g)     VMEM scratch = zero-padded gated intermediate
    """
    # --- gated conv: one fused feat||gate matmul per tap --------------------
    acc = jnp.zeros((lout, 2 * co_g), jnp.float32)
    for t, off in enumerate(offsets):
        acc += jnp.dot(a_ref[pl.ds(off, lout), :], wg_ref[t],
                       preferred_element_type=jnp.float32)
    acc = acc + bg_ref[...]
    feat = acc[:, :co_g]
    gate = acc[:, co_g:]
    feat = jnp.where(feat > 0, feat, 0.2 * feat)          # LeakyReLU(0.2), f32
    g = feat * jax.nn.sigmoid(gate)                       # f32 epilogue (v5e-safe)

    # Mask the ragged right-edge columns so they become the zero pad ring of
    # the second conv, then scatter into the zero-padded VMEM scratch.
    col = lax.broadcasted_iota(jnp.int32, (lout, 1), 0) % wp
    g = jnp.where(col < w_valid, g, 0.0)

    n_rows = gpad_ref.shape[0]
    head = wp + 1
    tail = n_rows - head - lout
    gpad_ref[pl.ds(0, head), :] = jnp.zeros((head, co_g), gpad_ref.dtype)
    gpad_ref[pl.ds(head, lout), :] = g.astype(gpad_ref.dtype)
    gpad_ref[pl.ds(head + lout, tail), :] = jnp.zeros((tail, co_g), gpad_ref.dtype)

    # --- output conv over the VMEM-resident gated intermediate --------------
    cout = wo_ref.shape[-1]
    acc2 = jnp.zeros((lout, cout), jnp.float32)
    for t, off in enumerate(offsets):
        acc2 += jnp.dot(gpad_ref[pl.ds(off, lout), :], wo_ref[t],
                        preferred_element_type=jnp.float32)
    o_ref[...] = (acc2 + bo_ref[...]).astype(o_ref.dtype)


# ------------------------------ pallas wrappers ----------------------------- #
def _flat_tap_conv(a_flat, w_taps, bias, offsets, lout, out_dtype, act):
    n, m, cin = a_flat.shape
    t, _, cout = w_taps.shape
    kernel = functools.partial(_tap_conv_kernel, offsets=offsets, lout=lout, act=act)
    return pl.pallas_call(
        kernel,
        out_shape=jax.ShapeDtypeStruct((n, lout, cout), out_dtype),
        grid=(n,),
        in_specs=[
            pl.BlockSpec((None, m, cin), lambda i: (i, 0, 0)),
            pl.BlockSpec((t, w_taps.shape[1], cout), lambda i: (0, 0, 0)),
            pl.BlockSpec((1, cout), lambda i: (0, 0)),
        ],
        out_specs=pl.BlockSpec((None, lout, cout), lambda i: (i, 0, 0)),
        compiler_params=_compiler_params(),
    )(a_flat, w_taps, bias.reshape(1, -1).astype(jnp.float32))


def _fused_gated_out(a_flat, wg_taps, bg, wo_taps, bo, offsets, lout, wp, w_valid):
    n, m, cin = a_flat.shape
    _, _, cg2 = wg_taps.shape
    co_g = cg2 // 2
    cout = wo_taps.shape[-1]
    kernel = functools.partial(_gated_out_kernel, offsets=offsets, lout=lout,
                               wp=wp, w_valid=w_valid, co_g=co_g)
    return pl.pallas_call(
        kernel,
        out_shape=jax.ShapeDtypeStruct((n, lout, cout), jnp.float32),
        grid=(n,),
        in_specs=[
            pl.BlockSpec((None, m, cin), lambda i: (i, 0, 0)),
            pl.BlockSpec(wg_taps.shape, lambda i: (0, 0, 0)),
            pl.BlockSpec((1, cg2), lambda i: (0, 0)),
            pl.BlockSpec(wo_taps.shape, lambda i: (0, 0, 0)),
            pl.BlockSpec((1, cout), lambda i: (0, 0)),
        ],
        out_specs=pl.BlockSpec((None, lout, cout), lambda i: (i, 0, 0)),
        scratch_shapes=[pltpu.VMEM((m, co_g), a_flat.dtype)],
        compiler_params=_compiler_params(),
    )(a_flat, wg_taps, bg.reshape(1, -1).astype(jnp.float32),
      wo_taps, bo.reshape(1, -1).astype(jnp.float32))


# ------------------------------ weight prep --------------------------------- #
def _conv3x3_tap_weights(w_oihw, cin_pad=None):
    # (Cout, Cin, 3, 3) -> (9, Cin[_pad], Cout), tap index t = kh*3 + kw.
    co, ci, kh, kw = w_oihw.shape
    w = jnp.transpose(w_oihw, (2, 3, 1, 0)).reshape(kh * kw, ci, co)
    if cin_pad is not None and cin_pad > ci:
        w = jnp.pad(w, ((0, 0), (0, cin_pad - ci), (0, 0)))
    return w


def _tconv_subpixel_weights(w_iohw):
    # ConvTranspose2d(k=4, s=2, p=1) == 4 phase-wise 2x2 convs on the input.
    # Returns (4, Cin, 4*Cout): tap t = a*2 + b, phase g = 2*py + px occupies
    # output columns [g*Cout, (g+1)*Cout).
    k_sel = ((3, 1), (2, 0))   # kernel-tap index used by (phase, window-offset)
    taps = []
    for a in range(2):
        for b in range(2):
            cols = []
            for py in range(2):
                for px in range(2):
                    cols.append(w_iohw[:, :, k_sel[py][a], k_sel[px][b]])  # (Ci, Co)
            taps.append(jnp.concatenate(cols, axis=1))                     # (Ci, 4*Co)
    return jnp.stack(taps, axis=0)


# ------------------------------ SegProjector -------------------------------- #
def init_seg_projector_params(key, in_channel, out_channel):
    ks = jax.random.split(key, 8)
    s = 0.05
    return {
        # nn.ConvTranspose2d(in_channel, 64, 4, 2, 1): weight (Cin, Cout, 4, 4)
        "tconv_w": s * jax.random.normal(ks[0], (in_channel, 64, 4, 4), jnp.float32),
        "tconv_b": s * jax.random.normal(ks[1], (64,), jnp.float32),
        # GatedConv2d(67, 32, 3, 1, 1, bias=True)
        "gc_conv_w": s * jax.random.normal(ks[2], (32, 67, 3, 3), jnp.float32),
        "gc_conv_b": s * jax.random.normal(ks[3], (32,), jnp.float32),
        "gc_gate_w": s * jax.random.normal(ks[4], (32, 67, 3, 3), jnp.float32),
        "gc_gate_b": s * jax.random.normal(ks[5], (32,), jnp.float32),
        # nn.Conv2d(32, out_channel, 3, 1, 1)
        "out_w": s * jax.random.normal(ks[6], (out_channel, 32, 3, 3), jnp.float32),
        "out_b": s * jax.random.normal(ks[7], (out_channel,), jnp.float32),
    }


def seg_projector_forward(params, x, in_image, use_bf16=True):
    """x: (N, Cin, H, W), in_image: (N, 3, 2H, 2W) -> (N, out_channel, 2H, 2W)."""
    cdt = jnp.bfloat16 if use_bf16 else jnp.float32
    n, ci, h, w = x.shape
    co_t = params["tconv_w"].shape[1]          # 64
    out_ch = params["out_w"].shape[0]

    # NCHW -> NHWC once at the module boundary.
    x_nhwc = jnp.transpose(x, (0, 2, 3, 1)).astype(cdt)
    img_nhwc = jnp.transpose(in_image, (0, 2, 3, 1)).astype(cdt)

    # ---- TConv: sub-pixel ConvTranspose2d(ci, 64, 4, 2, 1) + ReLU ----------
    wp_t = w + 2
    a_t = jnp.pad(x_nhwc, ((0, 0), (1, 1), (1, 1), (0, 0))).reshape(n, (h + 2) * wp_t, ci)
    w_t = _tconv_subpixel_weights(params["tconv_w"]).astype(cdt)       # (4, ci, 4*co_t)
    b_t = jnp.tile(params["tconv_b"], 4)                               # (4*co_t,)
    offs_t = tuple(a * wp_t + b for a in range(2) for b in range(2))
    lout_t = (h + 1) * wp_t - 1
    y_t = _flat_tap_conv(a_t, w_t, b_t, offs_t, lout_t, cdt, act="relu")
    # Un-flatten + interleave the 4 phases (depth-to-space).
    y_t = jnp.pad(y_t, ((0, 0), (0, 1), (0, 0)))
    y_t = y_t.reshape(n, h + 1, wp_t, 4, co_t)[:, :, : w + 1]
    phases = [y_t[:, py: py + h, px: px + w, 2 * py + px, :]
              for py in (0, 1) for px in (0, 1)]
    t_out = (jnp.stack(phases, axis=3).reshape(n, h, w, 2, 2, co_t)
             .transpose(0, 1, 3, 2, 4, 5).reshape(n, 2 * h, 2 * w, co_t))

    # ---- channel concat (NHWC), padded 67 -> 72 (8-aligned) ----------------
    c_img = img_nhwc.shape[-1]
    c_cat = co_t + c_img
    c_pad = ((c_cat + 7) // 8) * 8
    h_cat = jnp.concatenate(
        [t_out, img_nhwc, jnp.zeros((n, 2 * h, 2 * w, c_pad - c_cat), cdt)], axis=-1)

    # ---- fused GatedConv2d(67->32, 3x3, p=1) + Conv2d(32->out, 3x3, p=1) ---
    ho, wo = 2 * h, 2 * w
    wp = wo + 2
    a_g = jnp.pad(h_cat, ((0, 0), (1, 1), (1, 1), (0, 0))).reshape(n, (ho + 2) * wp, c_pad)
    wf_taps = _conv3x3_tap_weights(params["gc_conv_w"], c_pad)
    wgt_taps = _conv3x3_tap_weights(params["gc_gate_w"], c_pad)
    wg_taps = jnp.concatenate([wf_taps, wgt_taps], axis=-1).astype(cdt)  # (9, c_pad, 64)
    bg = jnp.concatenate([params["gc_conv_b"], params["gc_gate_b"]])
    wo_taps = _conv3x3_tap_weights(params["out_w"]).astype(cdt)          # (9, 32, out_ch)
    offs = tuple(a * wp + b for a in range(3) for b in range(3))
    lout = ho * wp - 2
    y = _fused_gated_out(a_g, wg_taps, bg, wo_taps, params["out_b"],
                         offs, lout, wp, wo)                             # (n, lout, out_ch)
    y = jnp.pad(y, ((0, 0), (0, 2), (0, 0))).reshape(n, ho, wp, out_ch)[:, :, :wo, :]

    # NHWC -> NCHW at the module boundary.
    return jnp.transpose(y, (0, 3, 1, 2))


# ------------------------- pure-lax reference check ------------------------- #
def _reference_forward(params, x, in_image):
    dn = ("NCHW", "OIHW", "NCHW")
    w_eq = jnp.transpose(jnp.flip(params["tconv_w"], (2, 3)), (1, 0, 2, 3))
    h = lax.conv_general_dilated(
        x, w_eq, (1, 1), ((2, 2), (2, 2)), lhs_dilation=(2, 2), dimension_numbers=dn
    ) + params["tconv_b"][None, :, None, None]
    h = jnp.maximum(h, 0.0)
    h = jnp.concatenate([h, in_image], axis=1)
    feat = lax.conv_general_dilated(h, params["gc_conv_w"], (1, 1), ((1, 1), (1, 1)),
                                    dimension_numbers=dn) + params["gc_conv_b"][None, :, None, None]
    feat = jnp.where(feat > 0, feat, 0.2 * feat)
    gate = jax.nn.sigmoid(
        lax.conv_general_dilated(h, params["gc_gate_w"], (1, 1), ((1, 1), (1, 1)),
                                 dimension_numbers=dn) + params["gc_gate_b"][None, :, None, None]
    )
    h = feat * gate
    return lax.conv_general_dilated(h, params["out_w"], (1, 1), ((1, 1), (1, 1)),
                                    dimension_numbers=dn) + params["out_b"][None, :, None, None]


if __name__ == "__main__":
    key = jax.random.PRNGKey(0)
    k_p, k_x, k_img = jax.random.split(key, 3)

    in_channel, out_channel = 4, 8
    n, h, w = 2, 8, 8

    params = init_seg_projector_params(k_p, in_channel, out_channel)
    x = jax.random.normal(k_x, (n, in_channel, h, w), jnp.float32)
    in_image = jax.random.normal(k_img, (n, 3, 2 * h, 2 * w), jnp.float32)

    fwd = jax.jit(seg_projector_forward, static_argnames=("use_bf16",))
    ref = jax.block_until_ready(_reference_forward(params, x, in_image))

    # f32 path: exact-semantics check against the lax reference.
    out_f32 = jax.block_until_ready(fwd(params, x, in_image, use_bf16=False))
    assert out_f32.shape == (n, out_channel, 2 * h, 2 * w), out_f32.shape
    assert jnp.allclose(out_f32, ref, atol=1e-4, rtol=1e-4), "f32 mismatch vs lax reference"

    # bf16 fast path (bf16 MXU inputs, f32 accumulation / epilogue).
    out_bf16 = jax.block_until_ready(fwd(params, x, in_image, use_bf16=True))
    assert out_bf16.shape == (n, out_channel, 2 * h, 2 * w), out_bf16.shape
    assert jnp.allclose(out_bf16, ref, atol=5e-2, rtol=5e-2), "bf16 path diverged"

    print("KERNEL_OK")
</pallas_src>

<mosaic_0001>
module attributes {stable_mosaic.version = 11 : i64} {
  func.func @_tap_conv_kernel(%arg0: i32, %arg1: memref<1x100x4xf32, #tpu.memory_space<vmem>>, %arg2: memref<4x4x256xf32, #tpu.memory_space<vmem>>, %arg3: memref<1x256xf32, #tpu.memory_space<vmem>>, %arg4: memref<1x89x256xf32, #tpu.memory_space<vmem>>) attributes {dimension_semantics = [#tpu.dimension_semantics<parallel>], iteration_bounds = array<i64: 2>, scalar_prefetch = 0 : i64, scratch_operands = 0 : i64, tpu.core_type = #tpu.core_type<tc>, window_params = [{transform_indices = @transform_0, window_bounds = array<i64: 1, 100, 4>}, {pipeline_mode = #tpu.pipeline_mode<synchronous>, transform_indices = @transform_1, window_bounds = array<i64: 4, 4, 256>}, {pipeline_mode = #tpu.pipeline_mode<synchronous>, transform_indices = @transform_2, window_bounds = array<i64: 1, 256>}, {transform_indices = @transform_3, window_bounds = array<i64: 1, 89, 256>}]} {
    %cst = arith.constant 0.000000e+00 : f32
    %0 = vector.broadcast %cst : f32 to vector<89x256xf32>
    %c0 = arith.constant 0 : index
    %c0_0 = arith.constant 0 : index
    %c0_1 = arith.constant 0 : index
    %1 = vector.load %arg1[%c0, %c0_0, %c0_1] : memref<1x100x4xf32, #tpu.memory_space<vmem>>, vector<1x89x4xf32>
    %2 = vector.shape_cast %1 : vector<1x89x4xf32> to vector<89x4xf32>
    %c0_2 = arith.constant 0 : index
    %c0_3 = arith.constant 0 : index
    %c0_4 = arith.constant 0 : index
    %3 = vector.load %arg2[%c0_2, %c0_3, %c0_4] : memref<4x4x256xf32, #tpu.memory_space<vmem>>, vector<1x4x256xf32>
    %4 = vector.shape_cast %3 : vector<1x4x256xf32> to vector<4x256xf32>
    %cst_5 = arith.constant dense<0.000000e+00> : vector<89x256xf32>
    %5 = tpu.matmul %2, %4, %cst_5 {dimension_numbers = #tpu.dot_dimension_numbers<[1], [0], [0], [1], [0, 0, 1, 1], [], []>} : vector<89x4xf32>, vector<4x256xf32>, vector<89x256xf32> -> vector<89x256xf32>
    %6 = arith.addf %0, %5 : vector<89x256xf32>
    %c0_6 = arith.constant 0 : index
    %c1 = arith.constant 1 : index
    %c0_7 = arith.constant 0 : index
    %7 = vector.load %arg1[%c0_6, %c1, %c0_7] : memref<1x100x4xf32, #tpu.memory_space<vmem>>, vector<1x89x4xf32>
    %8 = vector.shape_cast %7 : vector<1x89x4xf32> to vector<89x4xf32>
    %c1_8 = arith.constant 1 : index
    %c0_9 = arith.constant 0 : index
    %c0_10 = arith.constant 0 : index
    %9 = vector.load %arg2[%c1_8, %c0_9, %c0_10] : memref<4x4x256xf32, #tpu.memory_space<vmem>>, vector<1x4x256xf32>
    %10 = vector.shape_cast %9 : vector<1x4x256xf32> to vector<4x256xf32>
    %cst_11 = arith.constant dense<0.000000e+00> : vector<89x256xf32>
    %11 = tpu.matmul %8, %10, %cst_11 {dimension_numbers = #tpu.dot_dimension_numbers<[1], [0], [0], [1], [0, 0, 1, 1], [], []>} : vector<89x4xf32>, vector<4x256xf32>, vector<89x256xf32> -> vector<89x256xf32>
    %12 = arith.addf %6, %11 : vector<89x256xf32>
    %c0_12 = arith.constant 0 : index
    %c10 = arith.constant 10 : index
    %c0_13 = arith.constant 0 : index
    %13 = vector.load %arg1[%c0_12, %c10, %c0_13] : memref<1x100x4xf32, #tpu.memory_space<vmem>>, vector<1x89x4xf32>
    %14 = vector.shape_cast %13 : vector<1x89x4xf32> to vector<89x4xf32>
    %c2 = arith.constant 2 : index
    %c0_14 = arith.constant 0 : index
    %c0_15 = arith.constant 0 : index
    %15 = vector.load %arg2[%c2, %c0_14, %c0_15] : memref<4x4x256xf32, #tpu.memory_space<vmem>>, vector<1x4x256xf32>
    %16 = vector.shape_cast %15 : vector<1x4x256xf32> to vector<4x256xf32>
    %cst_16 = arith.constant dense<0.000000e+00> : vector<89x256xf32>
    %17 = tpu.matmul %14, %16, %cst_16 {dimension_numbers = #tpu.dot_dimension_numbers<[1], [0], [0], [1], [0, 0, 1, 1], [], []>} : vector<89x4xf32>, vector<4x256xf32>, vector<89x256xf32> -> vector<89x256xf32>
    %18 = arith.addf %12, %17 : vector<89x256xf32>
    %c0_17 = arith.constant 0 : index
    %c11 = arith.constant 11 : index
    %c0_18 = arith.constant 0 : index
    %19 = vector.load %arg1[%c0_17, %c11, %c0_18] : memref<1x100x4xf32, #tpu.memory_space<vmem>>, vector<1x89x4xf32>
    %20 = vector.shape_cast %19 : vector<1x89x4xf32> to vector<89x4xf32>
    %c3 = arith.constant 3 : index
    %c0_19 = arith.constant 0 : index
    %c0_20 = arith.constant 0 : index
    %21 = vector.load %arg2[%c3, %c0_19, %c0_20] : memref<4x4x256xf32, #tpu.memory_space<vmem>>, vector<1x4x256xf32>
    %22 = vector.shape_cast %21 : vector<1x4x256xf32> to vector<4x256xf32>
    %cst_21 = arith.constant dense<0.000000e+00> : vector<89x256xf32>
    %23 = tpu.matmul %20, %22, %cst_21 {dimension_numbers = #tpu.dot_dimension_numbers<[1], [0], [0], [1], [0, 0, 1, 1], [], []>} : vector<89x4xf32>, vector<4x256xf32>, vector<89x256xf32> -> vector<89x256xf32>
    %24 = arith.addf %18, %23 : vector<89x256xf32>
    %c0_22 = arith.constant 0 : index
    %c0_23 = arith.constant 0 : index
    %25 = vector.load %arg3[%c0_22, %c0_23] : memref<1x256xf32, #tpu.memory_space<vmem>>, vector<1x256xf32>
    %26 = vector.broadcast %25 : vector<1x256xf32> to vector<89x256xf32>
    %27 = arith.addf %24, %26 : vector<89x256xf32>
    %cst_24 = arith.constant 0.000000e+00 : f32
    %28 = vector.broadcast %cst_24 : f32 to vector<89x256xf32>
    %29 = arith.maximumf %27, %28 : vector<89x256xf32>
    %c0_25 = arith.constant 0 : index
    %c0_26 = arith.constant 0 : index
    %c0_27 = arith.constant 0 : index
    %30 = vector.load %arg4[%c0_25, %c0_26, %c0_27] : memref<1x89x256xf32, #tpu.memory_space<vmem>>, vector<1x89x256xf32>
    %31 = vector.shape_cast %30 : vector<1x89x256xf32> to vector<89x256xf32>
    %32 = vector.shape_cast %29 : vector<89x256xf32> to vector<1x89x256xf32>
    tpu.vector_store %arg4[%c0_25, %c0_26, %c0_27], %32 {strides = array<i32>} : memref<1x89x256xf32, #tpu.memory_space<vmem>>, vector<1x89x256xf32>,
    return
  }
  func.func @transform_0(%arg0: i32) -> (i32, i32, i32) {
    %c0_i32 = arith.constant 0 : i32
    %c0_i32_0 = arith.constant 0 : i32
    %c0_i32_1 = arith.constant 0 : i32
    return %arg0, %c0_i32, %c0_i32_0 : i32, i32, i32
  }
  func.func @transform_1(%arg0: i32) -> (i32, i32, i32) {
    %c0_i32 = arith.constant 0 : i32
    %c0_i32_0 = arith.constant 0 : i32
    %c0_i32_1 = arith.constant 0 : i32
    %c0_i32_2 = arith.constant 0 : i32
    return %c0_i32, %c0_i32_0, %c0_i32_1 : i32, i32, i32
  }
  func.func @transform_2(%arg0: i32) -> (i32, i32) {
    %c0_i32 = arith.constant 0 : i32
    %c0_i32_0 = arith.constant 0 : i32
    %c0_i32_1 = arith.constant 0 : i32
    return %c0_i32, %c0_i32_0 : i32, i32
  }
  func.func @transform_3(%arg0: i32) -> (i32, i32, i32) {
    %c0_i32 = arith.constant 0 : i32
    %c0_i32_0 = arith.constant 0 : i32
    %c0_i32_1 = arith.constant 0 : i32
    return %arg0, %c0_i32, %c0_i32_0 : i32, i32, i32
  }
}

module attributes {stable_mosaic.version = 11 : i64} {
  func.func @_gated_out_kernel(%arg0: i32, %arg1: memref<1x324x72xf32, #tpu.memory_space<vmem>>, %arg2: memref<9x72x64xf32, #tpu.memory_space<vmem>>, %arg3: memref<1x64xf32, #tpu.memory_space<vmem>>, %arg4: memref<9x32x8xf32, #tpu.memory_space<vmem>>, %arg5: memref<1x8xf32, #tpu.memory_space<vmem>>, %arg6: memref<1x286x8xf32, #tpu.memory_space<vmem>>, %arg7: memref<324x32xf32, #tpu.memory_space<vmem>>) attributes {dimension_semantics = [#tpu.dimension_semantics<parallel>], iteration_bounds = array<i64: 2>, scalar_prefetch = 0 : i64, scratch_operands = 1 : i64, tpu.core_type = #tpu.core_type<tc>, window_params = [{transform_indices = @transform_0, window_bounds = array<i64: 1, 324, 72>}, {pipeline_mode = #tpu.pipeline_mode<synchronous>, transform_indices = @transform_1, window_bounds = array<i64: 9, 72, 64>}, {pipeline_mode = #tpu.pipeline_mode<synchronous>, transform_indices = @transform_2, window_bounds = array<i64: 1, 64>}, {pipeline_mode = #tpu.pipeline_mode<synchronous>, transform_indices = @transform_3, window_bounds = array<i64: 9, 32, 8>}, {pipeline_mode = #tpu.pipeline_mode<synchronous>, transform_indices = @transform_4, window_bounds = array<i64: 1, 8>}, {transform_indices = @transform_5, window_bounds = array<i64: 1, 286, 8>}]} {
    %cst = arith.constant 0.000000e+00 : f32
    %0 = vector.broadcast %cst : f32 to vector<286x64xf32>
    %c0 = arith.constant 0 : index
    %c0_0 = arith.constant 0 : index
    %c0_1 = arith.constant 0 : index
    %1 = vector.load %arg1[%c0, %c0_0, %c0_1] : memref<1x324x72xf32, #tpu.memory_space<vmem>>, vector<1x286x72xf32>
    %2 = vector.shape_cast %1 : vector<1x286x72xf32> to vector<286x72xf32>
    %c0_2 = arith.constant 0 : index
    %c0_3 = arith.constant 0 : index
    %c0_4 = arith.constant 0 : index
    %3 = vector.load %arg2[%c0_2, %c0_3, %c0_4] : memref<9x72x64xf32, #tpu.memory_space<vmem>>, vector<1x72x64xf32>
    %4 = vector.shape_cast %3 : vector<1x72x64xf32> to vector<72x64xf32>
    %cst_5 = arith.constant dense<0.000000e+00> : vector<286x64xf32>
    %5 = tpu.matmul %2, %4, %cst_5 {dimension_numbers = #tpu.dot_dimension_numbers<[1], [0], [0], [1], [0, 0, 1, 1], [], []>} : vector<286x72xf32>, vector<72x64xf32>, vector<286x64xf32> -> vector<286x64xf32>
    %6 = arith.addf %0, %5 : vector<286x64xf32>
    %c0_6 = arith.constant 0 : index
    %c1 = arith.constant 1 : index
    %c0_7 = arith.constant 0 : index
    %7 = vector.load %arg1[%c0_6, %c1, %c0_7] : memref<1x324x72xf32, #tpu.memory_space<vmem>>, vector<1x286x72xf32>
    %8 = vector.shape_cast %7 : vector<1x286x72xf32> to vector<286x72xf32>
    %c1_8 = arith.constant 1 : index
    %c0_9 = arith.constant 0 : index
    %c0_10 = arith.constant 0 : index
    %9 = vector.load %arg2[%c1_8, %c0_9, %c0_10] : memref<9x72x64xf32, #tpu.memory_space<vmem>>, vector<1x72x64xf32>
    %10 = vector.shape_cast %9 : vector<1x72x64xf32> to vector<72x64xf32>
    %cst_11 = arith.constant dense<0.000000e+00> : vector<286x64xf32>
    %11 = tpu.matmul %8, %10, %cst_11 {dimension_numbers = #tpu.dot_dimension_numbers<[1], [0], [0], [1], [0, 0, 1, 1], [], []>} : vector<286x72xf32>, vector<72x64xf32>, vector<286x64xf32> -> vector<286x64xf32>
    %12 = arith.addf %6, %11 : vector<286x64xf32>
    %c0_12 = arith.constant 0 : index
    %c2 = arith.constant 2 : index
    %c0_13 = arith.constant 0 : index
    %13 = vector.load %arg1[%c0_12, %c2, %c0_13] : memref<1x324x72xf32, #tpu.memory_space<vmem>>, vector<1x286x72xf32>
    %14 = vector.shape_cast %13 : vector<1x286x72xf32> to vector<286x72xf32>
    %c2_14 = arith.constant 2 : index
    %c0_15 = arith.constant 0 : index
    %c0_16 = arith.constant 0 : index
    %15 = vector.load %arg2[%c2_14, %c0_15, %c0_16] : memref<9x72x64xf32, #tpu.memory_space<vmem>>, vector<1x72x64xf32>
    %16 = vector.shape_cast %15 : vector<1x72x64xf32> to vector<72x64xf32>
    %cst_17 = arith.constant dense<0.000000e+00> : vector<286x64xf32>
    %17 = tpu.matmul %14, %16, %cst_17 {dimension_numbers = #tpu.dot_dimension_numbers<[1], [0], [0], [1], [0, 0, 1, 1], [], []>} : vector<286x72xf32>, vector<72x64xf32>, vector<286x64xf32> -> vector<286x64xf32>
    %18 = arith.addf %12, %17 : vector<286x64xf32>
    %c0_18 = arith.constant 0 : index
    %c18 = arith.constant 18 : index
    %c0_19 = arith.constant 0 : index
    %19 = vector.load %arg1[%c0_18, %c18, %c0_19] : memref<1x324x72xf32, #tpu.memory_space<vmem>>, vector<1x286x72xf32>
    %20 = vector.shape_cast %19 : vector<1x286x72xf32> to vector<286x72xf32>
    %c3 = arith.constant 3 : index
    %c0_20 = arith.constant 0 : index
    %c0_21 = arith.constant 0 : index
    %21 = vector.load %arg2[%c3, %c0_20, %c0_21] : memref<9x72x64xf32, #tpu.memory_space<vmem>>, vector<1x72x64xf32>
    %22 = vector.shape_cast %21 : vector<1x72x64xf32> to vector<72x64xf32>
    %cst_22 = arith.constant dense<0.000000e+00> : vector<286x64xf32>
    %23 = tpu.matmul %20, %22, %cst_22 {dimension_numbers = #tpu.dot_dimension_numbers<[1], [0], [0], [1], [0, 0, 1, 1], [], []>} : vector<286x72xf32>, vector<72x64xf32>, vector<286x64xf32> -> vector<286x64xf32>
    %24 = arith.addf %18, %23 : vector<286x64xf32>
    %c0_23 = arith.constant 0 : index
    %c19 = arith.constant 19 : index
    %c0_24 = arith.constant 0 : index
    %25 = vector.load %arg1[%c0_23, %c19, %c0_24] : memref<1x324x72xf32, #tpu.memory_space<vmem>>, vector<1x286x72xf32>
    %26 = vector.shape_cast %25 : vector<1x286x72xf32> to vector<286x72xf32>
    %c4 = arith.constant 4 : index
    %c0_25 = arith.constant 0 : index
    %c0_26 = arith.constant 0 : index
    %27 = vector.load %arg2[%c4, %c0_25, %c0_26] : memref<9x72x64xf32, #tpu.memory_space<vmem>>, vector<1x72x64xf32>
    %28 = vector.shape_cast %27 : vector<1x72x64xf32> to vector<72x64xf32>
    %cst_27 = arith.constant dense<0.000000e+00> : vector<286x64xf32>
    %29 = tpu.matmul %26, %28, %cst_27 {dimension_numbers = #tpu.dot_dimension_numbers<[1], [0], [0], [1], [0, 0, 1, 1], [], []>} : vector<286x72xf32>, vector<72x64xf32>, vector<286x64xf32> -> vector<286x64xf32>
    %30 = arith.addf %24, %29 : vector<286x64xf32>
    %c0_28 = arith.constant 0 : index
    %c20 = arith.constant 20 : index
    %c0_29 = arith.constant 0 : index
    %31 = vector.load %arg1[%c0_28, %c20, %c0_29] : memref<1x324x72xf32, #tpu.memory_space<vmem>>, vector<1x286x72xf32>
    %32 = vector.shape_cast %31 : vector<1x286x72xf32> to vector<286x72xf32>
    %c5 = arith.constant 5 : index
    %c0_30 = arith.constant 0 : index
    %c0_31 = arith.constant 0 : index
    %33 = vector.load %arg2[%c5, %c0_30, %c0_31] : memref<9x72x64xf32, #tpu.memory_space<vmem>>, vector<1x72x64xf32>
    %34 = vector.shape_cast %33 : vector<1x72x64xf32> to vector<72x64xf32>
    %cst_32 = arith.constant dense<0.000000e+00> : vector<286x64xf32>
    %35 = tpu.matmul %32, %34, %cst_32 {dimension_numbers = #tpu.dot_dimension_numbers<[1], [0], [0], [1], [0, 0, 1, 1], [], []>} : vector<286x72xf32>, vector<72x64xf32>, vector<286x64xf32> -> vector<286x64xf32>
    %36 = arith.addf %30, %35 : vector<286x64xf32>
    %c0_33 = arith.constant 0 : index
    %c36 = arith.constant 36 : index
    %c0_34 = arith.constant 0 : index
    %37 = vector.load %arg1[%c0_33, %c36, %c0_34] : memref<1x324x72xf32, #tpu.memory_space<vmem>>, vector<1x286x72xf32>
    %38 = vector.shape_cast %37 : vector<1x286x72xf32> to vector<286x72xf32>
    %c6 = arith.constant 6 : index
    %c0_35 = arith.constant 0 : index
    %c0_36 = arith.constant 0 : index
    %39 = vector.load %arg2[%c6, %c0_35, %c0_36] : memref<9x72x64xf32, #tpu.memory_space<vmem>>, vector<1x72x64xf32>
    %40 = vector.shape_cast %39 : vector<1x72x64xf32> to vector<72x64xf32>
    %cst_37 = arith.constant dense<0.000000e+00> : vector<286x64xf32>
    %41 = tpu.matmul %38, %40, %cst_37 {dimension_numbers = #tpu.dot_dimension_numbers<[1], [0], [0], [1], [0, 0, 1, 1], [], []>} : vector<286x72xf32>, vector<72x64xf32>, vector<286x64xf32> -> vector<286x64xf32>
    %42 = arith.addf %36, %41 : vector<286x64xf32>
    %c0_38 = arith.constant 0 : index
    %c37 = arith.constant 37 : index
    %c0_39 = arith.constant 0 : index
    %43 = vector.load %arg1[%c0_38, %c37, %c0_39] : memref<1x324x72xf32, #tpu.memory_space<vmem>>, vector<1x286x72xf32>
    %44 = vector.shape_cast %43 : vector<1x286x72xf32> to vector<286x72xf32>
    %c7 = arith.constant 7 : index
    %c0_40 = arith.constant 0 : index
    %c0_41 = arith.constant 0 : index
    %45 = vector.load %arg2[%c7, %c0_40, %c0_41] : memref<9x72x64xf32, #tpu.memory_space<vmem>>, vector<1x72x64xf32>
    %46 = vector.shape_cast %45 : vector<1x72x64xf32> to vector<72x64xf32>
    %cst_42 = arith.constant dense<0.000000e+00> : vector<286x64xf32>
    %47 = tpu.matmul %44, %46, %cst_42 {dimension_numbers = #tpu.dot_dimension_numbers<[1], [0], [0], [1], [0, 0, 1, 1], [], []>} : vector<286x72xf32>, vector<72x64xf32>, vector<286x64xf32> -> vector<286x64xf32>
    %48 = arith.addf %42, %47 : vector<286x64xf32>
    %c0_43 = arith.constant 0 : index
    %c38 = arith.constant 38 : index
    %c0_44 = arith.constant 0 : index
    %49 = vector.load %arg1[%c0_43, %c38, %c0_44] : memref<1x324x72xf32, #tpu.memory_space<vmem>>, vector<1x286x72xf32>
    %50 = vector.shape_cast %49 : vector<1x286x72xf32> to vector<286x72xf32>
    %c8 = arith.constant 8 : index
    %c0_45 = arith.constant 0 : index
    %c0_46 = arith.constant 0 : index
    %51 = vector.load %arg2[%c8, %c0_45, %c0_46] : memref<9x72x64xf32, #tpu.memory_space<vmem>>, vector<1x72x64xf32>
    %52 = vector.shape_cast %51 : vector<1x72x64xf32> to vector<72x64xf32>
    %cst_47 = arith.constant dense<0.000000e+00> : vector<286x64xf32>
    %53 = tpu.matmul %50, %52, %cst_47 {dimension_numbers = #tpu.dot_dimension_numbers<[1], [0], [0], [1], [0, 0, 1, 1], [], []>} : vector<286x72xf32>, vector<72x64xf32>, vector<286x64xf32> -> vector<286x64xf32>
    %54 = arith.addf %48, %53 : vector<286x64xf32>
    %c0_48 = arith.constant 0 : index
    %c0_49 = arith.constant 0 : index
    %55 = vector.load %arg3[%c0_48, %c0_49] : memref<1x64xf32, #tpu.memory_space<vmem>>, vector<1x64xf32>
    %56 = vector.broadcast %55 : vector<1x64xf32> to vector<286x64xf32>
    %57 = arith.addf %54, %56 : vector<286x64xf32>
    %58 = vector.extract_strided_slice %57 {offsets = [0, 0], sizes = [286, 32], strides = [1, 1]} : vector<286x64xf32> to vector<286x32xf32>
    %59 = vector.extract_strided_slice %57 {offsets = [0, 32], sizes = [286, 32], strides = [1, 1]} : vector<286x64xf32> to vector<286x32xf32>
    %cst_50 = arith.constant 0.000000e+00 : f32
    %60 = vector.broadcast %cst_50 : f32 to vector<286x32xf32>
    %61 = arith.cmpf ogt, %58, %60 : vector<286x32xf32>
    %cst_51 = arith.constant 2.000000e-01 : f32
    %62 = vector.broadcast %cst_51 : f32 to vector<286x32xf32>
    %63 = arith.mulf %62, %58 : vector<286x32xf32>
    %64 = arith.select %61, %58, %63 : vector<286x32xi1>, vector<286x32xf32>
    %65 = arith.negf %59 : vector<286x32xf32>
    %66 = math.exp %65 : vector<286x32xf32>
    %cst_52 = arith.constant 1.000000e+00 : f32
    %67 = vector.broadcast %cst_52 : f32 to vector<286x32xf32>
    %68 = arith.addf %67, %66 : vector<286x32xf32>
    %69 = arith.divf %67, %68 : vector<286x32xf32>
    %70 = arith.mulf %64, %69 : vector<286x32xf32>
    %71 = tpu.iota {dimensions = array<i32: 0>} : vector<286x1xi32>
    %c18_i32 = arith.constant 18 : i32
    %c0_i32 = arith.constant 0 : i32
    %72 = arith.cmpi eq, %c18_i32, %c0_i32 : i32
    %c1_i32 = arith.constant 1 : i32
    %73 = arith.select %72, %c1_i32, %c18_i32 : i32
    %74 = vector.broadcast %73 : i32 to vector<286x1xi32>
    %75 = arith.remsi %71, %74 : vector<286x1xi32>
    %c0_i32_53 = arith.constant 0 : i32
    %76 = vector.broadcast %c0_i32_53 : i32 to vector<286x1xi32>
    %77 = arith.cmpi ne, %75, %76 : vector<286x1xi32>
    %c0_i32_54 = arith.constant 0 : i32
    %78 = vector.broadcast %c0_i32_54 : i32 to vector<286x1xi32>
    %79 = arith.cmpi slt, %75, %78 : vector<286x1xi32>
    %c0_i32_55 = arith.constant 0 : i32
    %80 = arith.cmpi slt, %73, %c0_i32_55 : i32
    %81 = vector.broadcast %80 : i1 to vector<286x1xi1>
    %82 = vector.broadcast %81 : vector<286x1xi1> to vector<286x1xi1>
    %83 = arith.xori %79, %82 : vector<286x1xi1>
    %84 = arith.andi %83, %77 : vector<286x1xi1>
    %85 = vector.broadcast %73 : i32 to vector<286x1xi32>
    %86 = arith.addi %75, %85 : vector<286x1xi32>
    %87 = arith.select %84, %86, %75 : vector<286x1xi1>, vector<286x1xi32>
    %c16_i32 = arith.constant 16 : i32
    %88 = vector.broadcast %c16_i32 : i32 to vector<286x1xi32>
    %89 = arith.cmpi slt, %87, %88 : vector<286x1xi32>
    %cst_56 = arith.constant 0.000000e+00 : f32
    %90 = vector.shape_cast %89 : vector<286x1xi1> to vector<286x1xi1>
    %91 = vector.broadcast %90 : vector<286x1xi1> to vector<286x32xi1>
    %92 = vector.broadcast %cst_56 : f32 to vector<286x32xf32>
    %93 = arith.select %91, %70, %92 : vector<286x32xi1>, vector<286x32xf32>
    %cst_57 = arith.constant 0.000000e+00 : f32
    %94 = vector.broadcast %cst_57 : f32 to vector<19x32xf32>
    %c0_58 = arith.constant 0 : index
    %c0_59 = arith.constant 0 : index
    %95 = vector.load %arg7[%c0_58, %c0_59] : memref<324x32xf32, #tpu.memory_space<vmem>>, vector<19x32xf32>
    tpu.vector_store %arg7[%c0_58, %c0_59], %94 {strides = array<i32>} : memref<324x32xf32, #tpu.memory_space<vmem>>, vector<19x32xf32>,
    %c19_60 = arith.constant 19 : index
    %c0_61 = arith.constant 0 : index
    %96 = vector.load %arg7[%c19_60, %c0_61] : memref<324x32xf32, #tpu.memory_space<vmem>>, vector<286x32xf32>
    tpu.vector_store %arg7[%c19_60, %c0_61], %93 {strides = array<i32>} : memref<324x32xf32, #tpu.memory_space<vmem>>, vector<286x32xf32>,
    %cst_62 = arith.constant 0.000000e+00 : f32
    %97 = vector.broadcast %cst_62 : f32 to vector<19x32xf32>
    %c305 = arith.constant 305 : index
    %c0_63 = arith.constant 0 : index
    %98 = vector.load %arg7[%c305, %c0_63] : memref<324x32xf32, #tpu.memory_space<vmem>>, vector<19x32xf32>
    tpu.vector_store %arg7[%c305, %c0_63], %97 {strides = array<i32>} : memref<324x32xf32, #tpu.memory_space<vmem>>, vector<19x32xf32>,
    %cst_64 = arith.constant 0.000000e+00 : f32
    %99 = vector.broadcast %cst_64 : f32 to vector<286x8xf32>
    %c0_65 = arith.constant 0 : index
    %c0_66 = arith.constant 0 : index
    %100 = vector.load %arg7[%c0_65, %c0_66] : memref<324x32xf32, #tpu.memory_space<vmem>>, vector<286x32xf32>
    %c0_67 = arith.constant 0 : index
    %c0_68 = arith.constant 0 : index
    %c0_69 = arith.constant 0 : index
    %101 = vector.load %arg4[%c0_67, %c0_68, %c0_69] : memref<9x32x8xf32, #tpu.memory_space<vmem>>, vector<1x32x8xf32>
    %102 = vector.shape_cast %101 : vector<1x32x8xf32> to vector<32x8xf32>
    %cst_70 = arith.constant dense<0.000000e+00> : vector<286x8xf32>
    %103 = tpu.matmul %100, %102, %cst_70 {dimension_numbers = #tpu.dot_dimension_numbers<[1], [0], [0], [1], [0, 0, 1, 1], [], []>} : vector<286x32xf32>, vector<32x8xf32>, vector<286x8xf32> -> vector<286x8xf32>
    %104 = arith.addf %99, %103 : vector<286x8xf32>
    %c1_71 = arith.constant 1 : index
    %c0_72 = arith.constant 0 : index
    %105 = vector.load %arg7[%c1_71, %c0_72] : memref<324x32xf32, #tpu.memory_space<vmem>>, vector<286x32xf32>
    %c1_73 = arith.constant 1 : index
    %c0_74 = arith.constant 0 : index
    %c0_75 = arith.constant 0 : index
    %106 = vector.load %arg4[%c1_73, %c0_74, %c0_75] : memref<9x32x8xf32, #tpu.memory_space<vmem>>, vector<1x32x8xf32>
    %107 = vector.shape_cast %106 : vector<1x32x8xf32> to vector<32x8xf32>
    %cst_76 = arith.constant dense<0.000000e+00> : vector<286x8xf32>
    %108 = tpu.matmul %105, %107, %cst_76 {dimension_numbers = #tpu.dot_dimension_numbers<[1], [0], [0], [1], [0, 0, 1, 1], [], []>} : vector<286x32xf32>, vector<32x8xf32>, vector<286x8xf32> -> vector<286x8xf32>
    %109 = arith.addf %104, %108 : vector<286x8xf32>
    %c2_77 = arith.constant 2 : index
    %c0_78 = arith.constant 0 : index
    %110 = vector.load %arg7[%c2_77, %c0_78] : memref<324x32xf32, #tpu.memory_space<vmem>>, vector<286x32xf32>
    %c2_79 = arith.constant 2 : index
    %c0_80 = arith.constant 0 : index
    %c0_81 = arith.constant 0 : index
    %111 = vector.load %arg4[%c2_79, %c0_80, %c0_81] : memref<9x32x8xf32, #tpu.memory_space<vmem>>, vector<1x32x8xf32>
    %112 = vector.shape_cast %111 : vector<1x32x8xf32> to vector<32x8xf32>
    %cst_82 = arith.constant dense<0.000000e+00> : vector<286x8xf32>
    %113 = tpu.matmul %110, %112, %cst_82 {dimension_numbers = #tpu.dot_dimension_numbers<[1], [0], [0], [1], [0, 0, 1, 1], [], []>} : vector<286x32xf32>, vector<32x8xf32>, vector<286x8xf32> -> vector<286x8xf32>
    %114 = arith.addf %109, %113 : vector<286x8xf32>
    %c18_83 = arith.constant 18 : index
    %c0_84 = arith.constant 0 : index
    %115 = vector.load %arg7[%c18_83, %c0_84] : memref<324x32xf32, #tpu.memory_space<vmem>>, vector<286x32xf32>
    %c3_85 = arith.constant 3 : index
    %c0_86 = arith.constant 0 : index
    %c0_87 = arith.constant 0 : index
    %116 = vector.load %arg4[%c3_85, %c0_86, %c0_87] : memref<9x32x8xf32, #tpu.memory_space<vmem>>, vector<1x32x8xf32>
    %117 = vector.shape_cast %116 : vector<1x32x8xf32> to vector<32x8xf32>
    %cst_88 = arith.constant dense<0.000000e+00> : vector<286x8xf32>
    %118 = tpu.matmul %115, %117, %cst_88 {dimension_numbers = #tpu.dot_dimension_numbers<[1], [0], [0], [1], [0, 0, 1, 1], [], []>} : vector<286x32xf32>, vector<32x8xf32>, vector<286x8xf32> -> vector<286x8xf32>
    %119 = arith.addf %114, %118 : vector<286x8xf32>
    %c19_89 = arith.constant 19 : index
    %c0_90 = arith.constant 0 : index
    %120 = vector.load %arg7[%c19_89, %c0_90] : memref<324x32xf32, #tpu.memory_space<vmem>>, vector<286x32xf32>
    %c4_91 = arith.constant 4 : index
    %c0_92 = arith.constant 0 : index
    %c0_93 = arith.constant 0 : index
    %121 = vector.load %arg4[%c4_91, %c0_92, %c0_93] : memref<9x32x8xf32, #tpu.memory_space<vmem>>, vector<1x32x8xf32>
    %122 = vector.shape_cast %121 : vector<1x32x8xf32> to vector<32x8xf32>
    %cst_94 = arith.constant dense<0.000000e+00> : vector<286x8xf32>
    %123 = tpu.matmul %120, %122, %cst_94 {dimension_numbers = #tpu.dot_dimension_numbers<[1], [0], [0], [1], [0, 0, 1, 1], [], []>} : vector<286x32xf32>, vector<32x8xf32>, vector<286x8xf32> -> vector<286x8xf32>
    %124 = arith.addf %119, %123 : vector<286x8xf32>
    %c20_95 = arith.constant 20 : index
    %c0_96 = arith.constant 0 : index
    %125 = vector.load %arg7[%c20_95, %c0_96] : memref<324x32xf32, #tpu.memory_space<vmem>>, vector<286x32xf32>
    %c5_97 = arith.constant 5 : index
    %c0_98 = arith.constant 0 : index
    %c0_99 = arith.constant 0 : index
    %126 = vector.load %arg4[%c5_97, %c0_98, %c0_99] : memref<9x32x8xf32, #tpu.memory_space<vmem>>, vector<1x32x8xf32>
    %127 = vector.shape_cast %126 : vector<1x32x8xf32> to vector<32x8xf32>
    %cst_100 = arith.constant dense<0.000000e+00> : vector<286x8xf32>
    %128 = tpu.matmul %125, %127, %cst_100 {dimension_numbers = #tpu.dot_dimension_numbers<[1], [0], [0], [1], [0, 0, 1, 1], [], []>} : vector<286x32xf32>, vector<32x8xf32>, vector<286x8xf32> -> vector<286x8xf32>
    %129 = arith.addf %124, %128 : vector<286x8xf32>
    %c36_101 = arith.constant 36 : index
    %c0_102 = arith.constant 0 : index
    %130 = vector.load %arg7[%c36_101, %c0_102] : memref<324x32xf32, #tpu.memory_space<vmem>>, vector<286x32xf32>
    %c6_103 = arith.constant 6 : index
    %c0_104 = arith.constant 0 : index
    %c0_105 = arith.constant 0 : index
    %131 = vector.load %arg4[%c6_103, %c0_104, %c0_105] : memref<9x32x8xf32, #tpu.memory_space<vmem>>, vector<1x32x8xf32>
    %132 = vector.shape_cast %131 : vector<1x32x8xf32> to vector<32x8xf32>
    %cst_106 = arith.constant dense<0.000000e+00> : vector<286x8xf32>
    %133 = tpu.matmul %130, %132, %cst_106 {dimension_numbers = #tpu.dot_dimension_numbers<[1], [0], [0], [1], [0, 0, 1, 1], [], []>} : vector<286x32xf32>, vector<32x8xf32>, vector<286x8xf32> -> vector<286x8xf32>
    %134 = arith.addf %129, %133 : vector<286x8xf32>
    %c37_107 = arith.constant 37 : index
    %c0_108 = arith.constant 0 : index
    %135 = vector.load %arg7[%c37_107, %c0_108] : memref<324x32xf32, #tpu.memory_space<vmem>>, vector<286x32xf32>
    %c7_109 = arith.constant 7 : index
    %c0_110 = arith.constant 0 : index
    %c0_111 = arith.constant 0 : index
    %136 = vector.load %arg4[%c7_109, %c0_110, %c0_111] : memref<9x32x8xf32, #tpu.memory_space<vmem>>, vector<1x32x8xf32>
    %137 = vector.shape_cast %136 : vector<1x32x8xf32> to vector<32x8xf32>
    %cst_112 = arith.constant dense<0.000000e+00> : vector<286x8xf32>
    %138 = tpu.matmul %135, %137, %cst_112 {dimension_numbers = #tpu.dot_dimension_numbers<[1], [0], [0], [1], [0, 0, 1, 1], [], []>} : vector<286x32xf32>, vector<32x8xf32>, vector<286x8xf32> -> vector<286x8xf32>
    %139 = arith.addf %134, %138 : vector<286x8xf32>
    %c38_113 = arith.constant 38 : index
    %c0_114 = arith.constant 0 : index
    %140 = vector.load %arg7[%c38_113, %c0_114] : memref<324x32xf32, #tpu.memory_space<vmem>>, vector<286x32xf32>
    %c8_115 = arith.constant 8 : index
    %c0_116 = arith.constant 0 : index
    %c0_117 = arith.constant 0 : index
    %141 = vector.load %arg4[%c8_115, %c0_116, %c0_117] : memref<9x32x8xf32, #tpu.memory_space<vmem>>, vector<1x32x8xf32>
    %142 = vector.shape_cast %141 : vector<1x32x8xf32> to vector<32x8xf32>
    %cst_118 = arith.constant dense<0.000000e+00> : vector<286x8xf32>
    %143 = tpu.matmul %140, %142, %cst_118 {dimension_numbers = #tpu.dot_dimension_numbers<[1], [0], [0], [1], [0, 0, 1, 1], [], []>} : vector<286x32xf32>, vector<32x8xf32>, vector<286x8xf32> -> vector<286x8xf32>
    %144 = arith.addf %139, %143 : vector<286x8xf32>
    %c0_119 = arith.constant 0 : index
    %c0_120 = arith.constant 0 : index
    %145 = vector.load %arg5[%c0_119, %c0_120] : memref<1x8xf32, #tpu.memory_space<vmem>>, vector<1x8xf32>
    %146 = vector.broadcast %145 : vector<1x8xf32> to vector<286x8xf32>
    %147 = arith.addf %144, %146 : vector<286x8xf32>
    %c0_121 = arith.constant 0 : index
    %c0_122 = arith.constant 0 : index
    %c0_123 = arith.constant 0 : index
    %148 = vector.load %arg6[%c0_121, %c0_122, %c0_123] : memref<1x286x8xf32, #tpu.memory_space<vmem>>, vector<1x286x8xf32>
    %149 = vector.shape_cast %148 : vector<1x286x8xf32> to vector<286x8xf32>
    %150 = vector.shape_cast %147 : vector<286x8xf32> to vector<1x286x8xf32>
    tpu.vector_store %arg6[%c0_121, %c0_122, %c0_123], %150 {strides = array<i32>} : memref<1x286x8xf32, #tpu.memory_space<vmem>>, vector<1x286x8xf32>,
    return
  }
  func.func @transform_0(%arg0: i32) -> (i32, i32, i32) {
    %c0_i32 = arith.constant 0 : i32
    %c0_i32_0 = arith.constant 0 : i32
    %c0_i32_1 = arith.constant 0 : i32
    return %arg0, %c0_i32, %c0_i32_0 : i32, i32, i32
  }
  func.func @transform_1(%arg0: i32) -> (i32, i32, i32) {
    %c0_i32 = arith.constant 0 : i32
    %c0_i32_0 = arith.constant 0 : i32
    %c0_i32_1 = arith.constant 0 : i32
    %c0_i32_2 = arith.constant 0 : i32
    return %c0_i32, %c0_i32_0, %c0_i32_1 : i32, i32, i32
  }
  func.func @transform_2(%arg0: i32) -> (i32, i32) {
    %c0_i32 = arith.constant 0 : i32
    %c0_i32_0 = arith.constant 0 : i32
    %c0_i32_1 = arith.constant 0 : i32
    return %c0_i32, %c0_i32_0 : i32, i32
  }
  func.func @transform_3(%arg0: i32) -> (i32, i32, i32) {
    %c0_i32 = arith.constant 0 : i32
    %c0_i32_0 = arith.constant 0 : i32
    %c0_i32_1 = arith.constant 0 : i32
    %c0_i32_2 = arith.constant 0 : i32
    return %c0_i32, %c0_i32_0, %c0_i32_1 : i32, i32, i32
  }
  func.func @transform_4(%arg0: i32) -> (i32, i32) {
    %c0_i32 = arith.constant 0 : i32
    %c0_i32_0 = arith.constant 0 : i32
    %c0_i32_1 = arith.constant 0 : i32
    return %c0_i32, %c0_i32_0 : i32, i32
  }
  func.func @transform_5(%arg0: i32) -> (i32, i32, i32) {
    %c0_i32 = arith.constant 0 : i32
    %c0_i32_0 = arith.constant 0 : i32
    %c0_i32_1 = arith.constant 0 : i32
    return %arg0, %c0_i32, %c0_i32_0 : i32, i32, i32
  }
}

</mosaic_0001>

<bundles_post_ra>
// kernel: tile.8
= control target key start
LH: loop header
LB: loop body
LE: loop exit
PB: predicated region body
PF: predicated region fallthrough
CT: control target
= control target key end

     0   :  { %s22_s0 = inlined_call_operand.vmem [shape: f32[64], index: 0, kind: input, shape index: {}]   ;;  %s23_s1 = inlined_call_operand.vmem [shape: f32[4,64], index: 1, kind: output, shape index: {}]  }
   0x1   :  { %v4_v0 = vld [vmem:[%s22_s0] ss:$0 sm:$0xff] }
   0x2   :  { %5 = vst [vmem:[%s23_s1] sm:$0xf] %v4_v0 }

// kernel: tile.9
= control target key start
LH: loop header
LB: loop body
LE: loop exit
PB: predicated region body
PF: predicated region fallthrough
CT: control target
= control target key end

     0   :  { %s6_s8 = smov 3  ;;  %vm8_vm0 = vcmask 523264   ;;  %s30_s9 = smov 64   ;;  %vm15_vm1 = vcmask 1048064   ;;  %s50_s0 = inlined_call_operand.vmem [shape: f32[4,64], index: 0, kind: input, shape index: {}]   ;;  %s51_s1 = inlined_call_operand.vmem [shape: f32[1,256], index: 1, kind: output, shape index: {}]  }
   0x1   :  { %v4_v0 = vld [vmem:[%s50_s0] sm:$0xf]  ;;  %s11_s0 = smov 3 }
   0x2   :  { %5 = vst [vmem:[#allocation1] sm:$0xf] %v4_v0 }
   0x9   :  { %v12_v1 = vld [vmem:[#allocation1 + $0x1] ss:$2 sm:%s11_s0]   ;;  %v7_v2 = vld [vmem:[#allocation1] ss:$2 sm:%s6_s8]  }
   0xa   :  { %13 = vrot.lane.b32.xlu0 %v12_v1, %s30_s9  ;;  %9 = vst.msk [vmem:[#allocation0] ss:$8 sm:$0x3] %vm8_vm0, %v7_v2  }
  0x7c   :  { %v14_v3 = vpop.permute.xlu0 %13  }
  0x7d   :  { %16 = vst.msk [vmem:[#allocation0] ss:$8 sm:$0x3] %vm15_vm1, %v14_v3  }
  0x84   :  { %v20_v4 = vld [vmem:[#allocation0] sm:$0x1]  ;;  %v24_v5 = vld [vmem:[#allocation0 + $0x8] sm:$0x1] }
  0x85   :  { %22 = vst [vmem:[%s51_s1] sm:$0x1] %v20_v4  ;;  %28 = vst [vmem:[%s51_s1 + $0x1] sm:$0x1] %v24_v5 }

// kernel: seg_projector_forward.2
= control target key start
LH: loop header
LB: loop body
LE: loop exit
PB: predicated region body
PF: predicated region fallthrough
CT: control target
= control target key end

     0   :  { %s1315_s12 = smov 0   ;;  %s1559_s0 = inlined_call_operand.vmem [shape: f32[2,100,4], index: 0, kind: input, shape index: {}]   ;;  %s1560_s1 = inlined_call_operand.vmem [shape: f32[4,4,256], index: 1, kind: input, shape index: {}]   ;;  %s1561_s2 = inlined_call_operand.vmem [shape: f32[1,256], index: 2, kind: input, shape index: {}]   ;;  %s1562_s3 = inlined_call_operand.vmem [shape: f32[2,89,256], index: 3, kind: output, shape index: {}]  }
   0x1 LB: > { %s1131_s13 = sadd.s32 4294967295, %s1292_s12   ;;  %p1135_p0 = scmp.ge.s32.totalorder %s1292_s12, 1  ;;  %s1292_s12 = sphi %s1315_s12, %s13_s12  }
   0x2   : > { %p137_p1 = scmp.lt.s32.totalorder %s1292_s12, 3 }
   0x4   : > { %p138_p2 = pnand %p1135_p0, %p137_p1 }
   0x5   : > { %v1138_v0 = vld [vmem:[%s1560_s1 + $0x8] sm:$0xff] (!%p138_p2)  ;;  %vm237_vm0 = vcmask (!%p138_p2), 1043456   ;;  %v1167_v1 = vld [vmem:[%s1560_s1 + $0x10] sm:$0xff] (!%p138_p2)  ;;  %v183_v2 = vld [vmem:[%s1560_s1] sm:$0xff] (!%p138_p2)  ;;  %p161_p3 = scmp.lt.s32.totalorder (!%p138_p2), %s1131_s13, 1  ;;  %v1294_v5 = vmov (!%p138_p2), 0.0   ;;  %v994_v57 = vlaneseq (!%p138_p2) }
   0x6   : > { %141 = sbr.rel (%p138_p2) target bundleno = 330 (0x14a), region = 32  ;;  %v199_v3 = vcombine.high (!%p138_p2), %v1138_v0, %v1138_v0  ;;  %v573_v4 = vcombine.high (!%p138_p2), %v1167_v1, %v1167_v1  ;;  %306 = vmatprep.mubr.f32.mxu1 (!%p138_p2), %v1294_v5  ;;  %v380_v6 = vcombine.high (!%p138_p2), %v183_v2, %v183_v2  ;;  %678 = vmatprep.mubr.f32.mxu0 (!%p138_p2), %v1294_v5  ;;  %v1182_v7 = vld [vmem:[%s1560_s1 + $0x18] sm:$0xff] (!%p138_p2)  ;;  %vm200_vm1 = vcmask (!%p138_p2), 31744   ;;  %v992_v60 = vld [vmem:[%s1561_s2] sm:$0x3] (!%p138_p2) }
   0x7   : > { %v790_v8 = vcombine.high (!%p138_p2), %v1182_v7, %v1182_v7  ;;  %v995_v58 = vshrl.u32 (!%p138_p2), %v994_v57, 7 }
   0x8   : > { %1139 = vmatprep.subr.msk.mxu1 (!%p138_p2), %vm237_vm0, %v199_v3  ;;  %1168 = vmatprep.subr.msk.mxu0 (!%p138_p2), %vm237_vm0, %v573_v4 }
   0x9   : > { %1140 = vmatpush1.msk.msra.mxu1 (!%p138_p2), %vm237_vm0, %v1138_v0  ;;  %1169 = vmatpush1.msk.msra.mxu0 (!%p138_p2), %vm237_vm0, %v1167_v1  ;;  %v996_v59 = vsub.s32 (!%p138_p2), 0, %v995_v58  ;;  %v1000_v61 = vsub.s32 (!%p138_p2), 1, %v995_v58 }
   0xa   : > { %1153 = vmatprep.subr.msk.mxu1 (!%p138_p2), %vm237_vm0, %v380_v6  ;;  %1183 = vmatprep.subr.msk.mxu0 (!%p138_p2), %vm237_vm0, %v790_v8 }
   0xb   : > { %v1498_v62 = vrot.slane (!%p138_p2), %v992_v60, %v996_v59  ;;  %v1501_v1 = vrot.slane (!%p138_p2), %v992_v60, %v1000_v61 }
   0xd   : > { %s1564_s13 = smov (!%p161_p3, %s1131_s13), 1 }
   0xe   : > { %s1271_s22 = smul.u32 104, %s1564_s13 }
   0xf   : > { %s1272_s28 = smul.u32 192, %s1564_s13 }
  0x10   : > { %s1349_s25 = scalar_lea.vmem %s1559_s0, %s1271_s22 }
  0x11   : > { %v184_v9 = vld [vmem:[%s1349_s25 + $0x1] sm:$0xff]  ;;  %v558_v10 = vld [vmem:[%s1349_s25 + $0xa] sm:$0xff]  ;;  %v559_v12 = vld [vmem:[%s1349_s25 + $0x12] sm:$0xff]  ;;  %s1507_s4 = scalar_lea.vmem %s1562_s3, %s1272_s28 }
  0x12   : > { %1141 = vmatmul.mubr.msk.f32.vlgmr.msra.gmra.mrb[0].mxu1 %vm200_vm1, %v184_v9  ;;  %1170 = vmatmul.mubr.msk.f32.vlgmr.msra.gmra.mrb[0].mxu0 %vm200_vm1, %v558_v10  ;;  %v185_v11 = vld [vmem:[%s1349_s25 + $0x9] sm:$0xff]  ;;  %v186_v13 = vld [vmem:[%s1349_s25 + $0x11] sm:$0xff]  ;;  %v560_v14 = vld [vmem:[%s1349_s25 + $0x1a] sm:$0xff] }
  0x13   : > { %1154 = vmatpush1.msk.msra.mxu1 %vm237_vm0, %v183_v2  ;;  %1184 = vmatpush1.msk.msra.mxu0 %vm237_vm0, %v1182_v7  ;;  %v187_v15 = vld [vmem:[%s1349_s25 + $0x19] sm:$0xff]  ;;  %v561_v16 = vld [vmem:[%s1349_s25 + $0x22] sm:$0xff]  ;;  %v562_v18 = vld [vmem:[%s1349_s25 + $0x2a] sm:$0xff] }
  0x14   : > { %312 = vmatprep.mubr.f32.mxu1 %v1294_v5  ;;  %684 = vmatprep.mubr.f32.mxu0 %v1294_v5  ;;  %v188_v17 = vld [vmem:[%s1349_s25 + $0x21] sm:$0xff]  ;;  %v189_v19 = vld [vmem:[%s1349_s25 + $0x29] sm:$0xff]  ;;  %v563_v20 = vld [vmem:[%s1349_s25 + $0x32] sm:$0xff] }
  0x15   : > { %v190_v21 = vld [vmem:[%s1349_s25 + $0x31] sm:$0xff]  ;;  %v564_v22 = vld [vmem:[%s1349_s25 + $0x3a] sm:$0xff]  ;;  %v565_v24 = vld [vmem:[%s1349_s25 + $0x42] sm:$0xff] }
  0x16   : > { %1142 = vmatmul.mubr.msk.f32.gmra.mrb[2].mxu1 %vm200_vm1, %v185_v11  ;;  %1171 = vmatmul.mubr.msk.f32.gmra.mrb[2].mxu0 %vm200_vm1, %v559_v12  ;;  %v191_v23 = vld [vmem:[%s1349_s25 + $0x39] sm:$0xff]  ;;  %v192_v25 = vld [vmem:[%s1349_s25 + $0x41] sm:$0xff]  ;;  %v566_v26 = vld [vmem:[%s1349_s25 + $0x4a] sm:$0xff] }
  0x17   : > { %318 = vmatprep.mubr.f32.mxu1 %v1294_v5  ;;  %690 = vmatprep.mubr.f32.mxu0 %v1294_v5  ;;  %v193_v27 = vld [vmem:[%s1349_s25 + $0x49] sm:$0xff]  ;;  %v567_v28 = vld [vmem:[%s1349_s25 + $0x52] sm:$0xff]  ;;  %v568_v30 = vld [vmem:[%s1349_s25 + $0x5a] sm:$0xff] }
  0x18   : > { %v194_v29 = vld [vmem:[%s1349_s25 + $0x51] sm:$0xff]  ;;  %v195_v31 = vld [vmem:[%s1349_s25 + $0x59] sm:$0x1]  ;;  %v569_v32 = vld [vmem:[%s1349_s25 + $0x62] sm:$0x1] }
  0x19   : > { %v171_v33 = vld [vmem:[%s1349_s25] sm:$0xff]  ;;  %v775_v34 = vld [vmem:[%s1349_s25 + $0xb] sm:$0xff]  ;;  %v776_v36 = vld [vmem:[%s1349_s25 + $0x13] sm:$0xff] }
  0x1a   : > { %1143 = vmatmul.mubr.msk.f32.gmra.mrb[4].mxu1 %vm200_vm1, %v186_v13  ;;  %1172 = vmatmul.mubr.msk.f32.gmra.mrb[4].mxu0 %vm200_vm1, %v560_v14  ;;  %v172_v35 = vld [vmem:[%s1349_s25 + $0x8] sm:$0xff]  ;;  %v173_v37 = vld [vmem:[%s1349_s25 + $0x10] sm:$0xff]  ;;  %v777_v38 = vld [vmem:[%s1349_s25 + $0x1b] sm:$0xff] }
  0x1b   : > { %324 = vmatprep.mubr.f32.mxu1 %v1294_v5  ;;  %696 = vmatprep.mubr.f32.mxu0 %v1294_v5  ;;  %v174_v39 = vld [vmem:[%s1349_s25 + $0x18] sm:$0xff]  ;;  %v778_v40 = vld [vmem:[%s1349_s25 + $0x23] sm:$0xff]  ;;  %v779_v42 = vld [vmem:[%s1349_s25 + $0x2b] sm:$0xff] }
  0x1c   : > { %v175_v41 = vld [vmem:[%s1349_s25 + $0x20] sm:$0xff]  ;;  %v176_v43 = vld [vmem:[%s1349_s25 + $0x28] sm:$0xff]  ;;  %v780_v44 = vld [vmem:[%s1349_s25 + $0x33] sm:$0xff] }
  0x1d   : > { %v177_v45 = vld [vmem:[%s1349_s25 + $0x30] sm:$0xff]  ;;  %v781_v46 = vld [vmem:[%s1349_s25 + $0x3b] sm:$0xff]  ;;  %v782_v48 = vld [vmem:[%s1349_s25 + $0x43] sm:$0xff] }
  0x1e   : > { %1144 = vmatmul.mubr.msk.f32.gmra.mrb[6].mxu1 %vm200_vm1, %v187_v15  ;;  %1173 = vmatmul.mubr.msk.f32.gmra.mrb[6].mxu0 %vm200_vm1, %v561_v16  ;;  %v178_v47 = vld [vmem:[%s1349_s25 + $0x38] sm:$0xff]  ;;  %v179_v49 = vld [vmem:[%s1349_s25 + $0x40] sm:$0xff]  ;;  %v783_v50 = vld [vmem:[%s1349_s25 + $0x4b] sm:$0xff] }
  0x1f   : > { %330 = vmatprep.mubr.f32.mxu1 %v1294_v5  ;;  %702 = vmatprep.mubr.f32.mxu0 %v1294_v5  ;;  %v180_v51 = vld [vmem:[%s1349_s25 + $0x48] sm:$0xff]  ;;  %v784_v52 = vld [vmem:[%s1349_s25 + $0x53] sm:$0xff]  ;;  %v785_v54 = vld [vmem:[%s1349_s25 + $0x5b] sm:$0xff] }
  0x20   : > { %v181_v53 = vld [vmem:[%s1349_s25 + $0x50] sm:$0xff]  ;;  %v182_v55 = vld [vmem:[%s1349_s25 + $0x58] sm:$0x1]  ;;  %v786_v56 = vld [vmem:[%s1349_s25 + $0x63] sm:$0x1] }
  0x22   : > { %1145 = vmatmul.mubr.msk.f32.gmra.mrb[8].mxu1 %vm200_vm1, %v188_v17  ;;  %1174 = vmatmul.mubr.msk.f32.gmra.mrb[8].mxu0 %vm200_vm1, %v562_v18 }
  0x23   : > { %336 = vmatprep.mubr.f32.mxu1 %v1294_v5  ;;  %708 = vmatprep.mubr.f32.mxu0 %v1294_v5 }
  0x26   : > { %1146 = vmatmul.mubr.msk.f32.gmra.mrb[10].mxu1 %vm200_vm1, %v189_v19  ;;  %1175 = vmatmul.mubr.msk.f32.gmra.mrb[10].mxu0 %vm200_vm1, %v563_v20 }
  0x27   : > { %342 = vmatprep.mubr.f32.mxu1 %v1294_v5  ;;  %714 = vmatprep.mubr.f32.mxu0 %v1294_v5 }
  0x2a   : > { %1147 = vmatmul.mubr.msk.f32.gmra.mrb[12].mxu1 %vm200_vm1, %v190_v21  ;;  %1176 = vmatmul.mubr.msk.f32.gmra.mrb[12].mxu0 %vm200_vm1, %v564_v22 }
  0x2b   : > { %348 = vmatprep.mubr.f32.mxu1 %v1294_v5  ;;  %720 = vmatprep.mubr.f32.mxu0 %v1294_v5 }
  0x2e   : > { %1148 = vmatmul.mubr.msk.f32.gmra.mrb[14].mxu1 %vm200_vm1, %v191_v23  ;;  %1177 = vmatmul.mubr.msk.f32.gmra.mrb[14].mxu0 %vm200_vm1, %v565_v24 }
  0x2f   : > { %354 = vmatprep.mubr.f32.mxu1 %v1294_v5  ;;  %726 = vmatprep.mubr.f32.mxu0 %v1294_v5 }
  0x32   : > { %1149 = vmatmul.mubr.msk.f32.gmra.mrb[16].mxu1 %vm200_vm1, %v192_v25  ;;  %1178 = vmatmul.mubr.msk.f32.gmra.mrb[16].mxu0 %vm200_vm1, %v566_v26 }
  0x33   : > { %360 = vmatprep.mubr.f32.mxu1 %v1294_v5  ;;  %732 = vmatprep.mubr.f32.mxu0 %v1294_v5 }
  0x36   : > { %1150 = vmatmul.mubr.msk.f32.gmra.mrb[18].mxu1 %vm200_vm1, %v193_v27  ;;  %1179 = vmatmul.mubr.msk.f32.gmra.mrb[18].mxu0 %vm200_vm1, %v567_v28 }
  0x37   : > { %366 = vmatprep.mubr.f32.mxu1 %v1294_v5  ;;  %738 = vmatprep.mubr.f32.mxu0 %v1294_v5 }
  0x3a   : > { %1151 = vmatmul.mubr.msk.f32.gmra.mrb[20].mxu1 %vm200_vm1, %v194_v29  ;;  %1180 = vmatmul.mubr.msk.f32.gmra.mrb[20].mxu0 %vm200_vm1, %v568_v30 }
  0x3b   : > { %372 = vmatprep.mubr.f32.mxu1 %v1294_v5  ;;  %744 = vmatprep.mubr.f32.mxu0 %v1294_v5 }
  0x3e   : > { %1152 = vmatmul.mubr.msk.f32.gmra.mrb[22].mxu1 %vm200_vm1, %v195_v31  ;;  %1181 = vmatmul.mubr.msk.f32.gmra.mrb[22].mxu0 %vm200_vm1, %v569_v32 }
  0x3f   : > { %485 = vmatprep.mubr.f32.mxu1 %v1294_v5  ;;  %895 = vmatprep.mubr.f32.mxu0 %v1294_v5 }
  0x42   : > { %1155 = vmatmul.mubr.msk.f32.vlgmr.msra.gmra.mrb[0].mxu1 %vm200_vm1, %v171_v33  ;;  %1185 = vmatmul.mubr.msk.f32.vlgmr.msra.gmra.mrb[0].mxu0 %vm200_vm1, %v775_v34 }
  0x43   : > { %491 = vmatprep.mubr.f32.mxu1 %v1294_v5  ;;  %901 = vmatprep.mubr.f32.mxu0 %v1294_v5 }
  0x46   : > { %1156 = vmatmul.mubr.msk.f32.gmra.mrb[2].mxu1 %vm200_vm1, %v172_v35  ;;  %1186 = vmatmul.mubr.msk.f32.gmra.mrb[2].mxu0 %vm200_vm1, %v776_v36 }
  0x47   : > { %497 = vmatprep.mubr.f32.mxu1 %v1294_v5  ;;  %907 = vmatprep.mubr.f32.mxu0 %v1294_v5 }
  0x4a   : > { %1157 = vmatmul.mubr.msk.f32.gmra.mrb[4].mxu1 %vm200_vm1, %v173_v37  ;;  %1187 = vmatmul.mubr.msk.f32.gmra.mrb[4].mxu0 %vm200_vm1, %v777_v38 }
  0x4b   : > { %503 = vmatprep.mubr.f32.mxu1 %v1294_v5  ;;  %913 = vmatprep.mubr.f32.mxu0 %v1294_v5 }
  0x4e   : > { %1158 = vmatmul.mubr.msk.f32.gmra.mrb[6].mxu1 %vm200_vm1, %v174_v39  ;;  %1188 = vmatmul.mubr.msk.f32.gmra.mrb[6].mxu0 %vm200_vm1, %v778_v40 }
  0x4f   : > { %509 = vmatprep.mubr.f32.mxu1 %v1294_v5  ;;  %919 = vmatprep.mubr.f32.mxu0 %v1294_v5 }
  0x52   : > { %1159 = vmatmul.mubr.msk.f32.gmra.mrb[8].mxu1 %vm200_vm1, %v175_v41  ;;  %1189 = vmatmul.mubr.msk.f32.gmra.mrb[8].mxu0 %vm200_vm1, %v779_v42 }
  0x53   : > { %515 = vmatprep.mubr.f32.mxu1 %v1294_v5  ;;  %925 = vmatprep.mubr.f32.mxu0 %v1294_v5 }
  0x56   : > { %1160 = vmatmul.mubr.msk.f32.gmra.mrb[10].mxu1 %vm200_vm1, %v176_v43  ;;  %1190 = vmatmul.mubr.msk.f32.gmra.mrb[10].mxu0 %vm200_vm1, %v780_v44 }
  0x57   : > { %521 = vmatprep.mubr.f32.mxu1 %v1294_v5  ;;  %931 = vmatprep.mubr.f32.mxu0 %v1294_v5 }
  0x5a   : > { %1161 = vmatmul.mubr.msk.f32.gmra.mrb[12].mxu1 %vm200_vm1, %v177_v45  ;;  %1191 = vmatmul.mubr.msk.f32.gmra.mrb[12].mxu0 %vm200_vm1, %v781_v46 }
  0x5b   : > { %527 = vmatprep.mubr.f32.mxu1 %v1294_v5  ;;  %937 = vmatprep.mubr.f32.mxu0 %v1294_v5 }
  0x5e   : > { %1162 = vmatmul.mubr.msk.f32.gmra.mrb[14].mxu1 %vm200_vm1, %v178_v47  ;;  %1192 = vmatmul.mubr.msk.f32.gmra.mrb[14].mxu0 %vm200_vm1, %v782_v48 }
  0x5f   : > { %533 = vmatprep.mubr.f32.mxu1 %v1294_v5  ;;  %943 = vmatprep.mubr.f32.mxu0 %v1294_v5 }
  0x62   : > { %1163 = vmatmul.mubr.msk.f32.gmra.mrb[16].mxu1 %vm200_vm1, %v179_v49  ;;  %1193 = vmatmul.mubr.msk.f32.gmra.mrb[16].mxu0 %vm200_vm1, %v783_v50 }
  0x63   : > { %539 = vmatprep.mubr.f32.mxu1 %v1294_v5  ;;  %949 = vmatprep.mubr.f32.mxu0 %v1294_v5 }
  0x66   : > { %1164 = vmatmul.mubr.msk.f32.gmra.mrb[18].mxu1 %vm200_vm1, %v180_v51  ;;  %1194 = vmatmul.mubr.msk.f32.gmra.mrb[18].mxu0 %vm200_vm1, %v784_v52 }
  0x67   : > { %545 = vmatprep.mubr.f32.mxu1 %v1294_v5  ;;  %955 = vmatprep.mubr.f32.mxu0 %v1294_v5 }
  0x6a   : > { %1165 = vmatmul.mubr.msk.f32.gmra.mrb[20].mxu1 %vm200_vm1, %v181_v53  ;;  %1195 = vmatmul.mubr.msk.f32.gmra.mrb[20].mxu0 %vm200_vm1, %v785_v54 }
  0x6b   : > { %551 = vmatprep.mubr.f32.mxu1 %v1294_v5  ;;  %961 = vmatprep.mubr.f32.mxu0 %v1294_v5 }
  0x6e   : > { %1166 = vmatmul.mubr.msk.f32.gmra.mrb[22].mxu1 %vm200_vm1, %v182_v55  ;;  %1196 = vmatmul.mubr.msk.f32.gmra.mrb[22].mxu0 %vm200_vm1, %v786_v56 }
 0x115   : > { %v487_v63 = vpop.f32.mrb[0].mxu1  ;;  %v897_v0 = vpop.f32.mrb[0].mxu0 }
 0x116   : > { %v1199_v2 = vadd.f32 %v897_v0, %v487_v63  ;;  %v489_v3 = vpop.f32.mrb[1].mxu1  ;;  %v899_v4 = vpop.f32.mrb[1].mxu0 }
 0x117   : > { %v1200_v5 = vadd.f32 %v899_v4, %v489_v3 }
 0x118   : > { %v1004_v6 = vadd.f32 %v1199_v2, %v1498_v62 }
 0x119   : > { %v1005_v7 = vadd.f32 %v1200_v5, %v1501_v1  ;;  %v493_v8 = vpop.f32.mrb[2].mxu1  ;;  %v903_v9 = vpop.f32.mrb[2].mxu0 }
 0x11a   : > { %v1028_v10 = vmax.f32 %v1004_v6, 0.0  ;;  %v1201_v11 = vadd.f32 %v903_v9, %v493_v8  ;;  %v495_v12 = vpop.f32.mrb[3].mxu1  ;;  %v905_v13 = vpop.f32.mrb[3].mxu0 }
 0x11b   : > { %v1029_v14 = vmax.f32 %v1005_v7, 0.0  ;;  %v1202_v15 = vadd.f32 %v905_v13, %v495_v12 }
 0x11c   : > { %1052 = vst [vmem:[%s1507_s4] sm:$0xff] %v1028_v10  ;;  %v1006_v16 = vadd.f32 %v1201_v11, %v1498_v62 }
 0x11d   : > { %1053 = vst [vmem:[%s1507_s4 + $0x8] sm:$0xff] %v1029_v14  ;;  %v1007_v17 = vadd.f32 %v1202_v15, %v1501_v1  ;;  %v499_v18 = vpop.f32.mrb[4].mxu1  ;;  %v909_v19 = vpop.f32.mrb[4].mxu0 }
 0x11e   : > { %v1030_v20 = vmax.f32 %v1006_v16, 0.0  ;;  %v1203_v21 = vadd.f32 %v909_v19, %v499_v18  ;;  %v501_v22 = vpop.f32.mrb[5].mxu1  ;;  %v911_v23 = vpop.f32.mrb[5].mxu0 }
 0x11f   : > { %v1031_v24 = vmax.f32 %v1007_v17, 0.0  ;;  %v1204_v25 = vadd.f32 %v911_v23, %v501_v22 }
 0x120   : > { %1054 = vst [vmem:[%s1507_s4 + $0x10] sm:$0xff] %v1030_v20  ;;  %v1008_v26 = vadd.f32 %v1203_v21, %v1498_v62 }
 0x121   : > { %1055 = vst [vmem:[%s1507_s4 + $0x18] sm:$0xff] %v1031_v24  ;;  %v1009_v27 = vadd.f32 %v1204_v25, %v1501_v1  ;;  %v505_v28 = vpop.f32.mrb[6].mxu1  ;;  %v915_v29 = vpop.f32.mrb[6].mxu0 }
 0x122   : > { %v1032_v30 = vmax.f32 %v1008_v26, 0.0  ;;  %v1205_v31 = vadd.f32 %v915_v29, %v505_v28  ;;  %v507_v32 = vpop.f32.mrb[7].mxu1  ;;  %v917_v33 = vpop.f32.mrb[7].mxu0 }
 0x123   : > { %v1033_v34 = vmax.f32 %v1009_v27, 0.0  ;;  %v1206_v35 = vadd.f32 %v917_v33, %v507_v32 }
 0x124   : > { %1056 = vst [vmem:[%s1507_s4 + $0x20] sm:$0xff] %v1032_v30  ;;  %v1010_v36 = vadd.f32 %v1205_v31, %v1498_v62 }
 0x125   : > { %1057 = vst [vmem:[%s1507_s4 + $0x28] sm:$0xff] %v1033_v34  ;;  %v1011_v37 = vadd.f32 %v1206_v35, %v1501_v1  ;;  %v511_v38 = vpop.f32.mrb[8].mxu1  ;;  %v921_v39 = vpop.f32.mrb[8].mxu0 }
 0x126   : > { %v1034_v40 = vmax.f32 %v1010_v36, 0.0  ;;  %v1207_v41 = vadd.f32 %v921_v39, %v511_v38  ;;  %v513_v42 = vpop.f32.mrb[9].mxu1  ;;  %v923_v43 = vpop.f32.mrb[9].mxu0 }
 0x127   : > { %v1035_v44 = vmax.f32 %v1011_v37, 0.0  ;;  %v1208_v45 = vadd.f32 %v923_v43, %v513_v42 }
 0x128   : > { %1058 = vst [vmem:[%s1507_s4 + $0x30] sm:$0xff] %v1034_v40  ;;  %v1012_v46 = vadd.f32 %v1207_v41, %v1498_v62 }
 0x129   : > { %1059 = vst [vmem:[%s1507_s4 + $0x38] sm:$0xff] %v1035_v44  ;;  %v1013_v47 = vadd.f32 %v1208_v45, %v1501_v1  ;;  %v517_v48 = vpop.f32.mrb[10].mxu1  ;;  %v927_v49 = vpop.f32.mrb[10].mxu0 }
 0x12a   : > { %v1036_v50 = vmax.f32 %v1012_v46, 0.0  ;;  %v1209_v51 = vadd.f32 %v927_v49, %v517_v48  ;;  %v519_v52 = vpop.f32.mrb[11].mxu1  ;;  %v929_v53 = vpop.f32.mrb[11].mxu0 }
 0x12b   : > { %v1037_v54 = vmax.f32 %v1013_v47, 0.0  ;;  %v1210_v55 = vadd.f32 %v929_v53, %v519_v52 }
 0x12c   : > { %1060 = vst [vmem:[%s1507_s4 + $0x40] sm:$0xff] %v1036_v50  ;;  %v1014_v56 = vadd.f32 %v1209_v51, %v1498_v62 }
 0x12d   : > { %1061 = vst [vmem:[%s1507_s4 + $0x48] sm:$0xff] %v1037_v54  ;;  %v1015_v57 = vadd.f32 %v1210_v55, %v1501_v1  ;;  %v523_v58 = vpop.f32.mrb[12].mxu1  ;;  %v933_v59 = vpop.f32.mrb[12].mxu0 }
 0x12e   : > { %v1038_v60 = vmax.f32 %v1014_v56, 0.0  ;;  %v1211_v61 = vadd.f32 %v933_v59, %v523_v58  ;;  %v525_v63 = vpop.f32.mrb[13].mxu1  ;;  %v935_v0 = vpop.f32.mrb[13].mxu0 }
 0x12f   : > { %v1039_v2 = vmax.f32 %v1015_v57, 0.0  ;;  %v1212_v3 = vadd.f32 %v935_v0, %v525_v63 }
 0x130   : > { %1062 = vst [vmem:[%s1507_s4 + $0x50] sm:$0xff] %v1038_v60  ;;  %v1016_v4 = vadd.f32 %v1211_v61, %v1498_v62 }
 0x131   : > { %1063 = vst [vmem:[%s1507_s4 + $0x58] sm:$0xff] %v1039_v2  ;;  %v1017_v5 = vadd.f32 %v1212_v3, %v1501_v1  ;;  %v529_v6 = vpop.f32.mrb[14].mxu1  ;;  %v939_v7 = vpop.f32.mrb[14].mxu0 }
 0x132   : > { %v1040_v8 = vmax.f32 %v1016_v4, 0.0  ;;  %v1213_v9 = vadd.f32 %v939_v7, %v529_v6  ;;  %v531_v10 = vpop.f32.mrb[15].mxu1  ;;  %v941_v11 = vpop.f32.mrb[15].mxu0 }
 0x133   : > { %v1041_v12 = vmax.f32 %v1017_v5, 0.0  ;;  %v1214_v13 = vadd.f32 %v941_v11, %v531_v10 }
 0x134   : > { %1064 = vst [vmem:[%s1507_s4 + $0x60] sm:$0xff] %v1040_v8  ;;  %v1018_v14 = vadd.f32 %v1213_v9, %v1498_v62 }
 0x135   : > { %1065 = vst [vmem:[%s1507_s4 + $0x68] sm:$0xff] %v1041_v12  ;;  %v1019_v15 = vadd.f32 %v1214_v13, %v1501_v1  ;;  %v535_v16 = vpop.f32.mrb[16].mxu1  ;;  %v945_v17 = vpop.f32.mrb[16].mxu0 }
 0x136   : > { %v1042_v18 = vmax.f32 %v1018_v14, 0.0  ;;  %v1215_v19 = vadd.f32 %v945_v17, %v535_v16  ;;  %v537_v20 = vpop.f32.mrb[17].mxu1  ;;  %v947_v21 = vpop.f32.mrb[17].mxu0 }
 0x137   : > { %v1043_v22 = vmax.f32 %v1019_v15, 0.0  ;;  %v1216_v23 = vadd.f32 %v947_v21, %v537_v20 }
 0x138   : > { %1066 = vst [vmem:[%s1507_s4 + $0x70] sm:$0xff] %v1042_v18  ;;  %v1020_v24 = vadd.f32 %v1215_v19, %v1498_v62 }
 0x139   : > { %1067 = vst [vmem:[%s1507_s4 + $0x78] sm:$0xff] %v1043_v22  ;;  %v1021_v25 = vadd.f32 %v1216_v23, %v1501_v1  ;;  %v541_v26 = vpop.f32.mrb[18].mxu1  ;;  %v951_v27 = vpop.f32.mrb[18].mxu0 }
 0x13a   : > { %v1044_v28 = vmax.f32 %v1020_v24, 0.0  ;;  %v1217_v29 = vadd.f32 %v951_v27, %v541_v26  ;;  %v543_v30 = vpop.f32.mrb[19].mxu1  ;;  %v953_v31 = vpop.f32.mrb[19].mxu0 }
 0x13b   : > { %v1045_v32 = vmax.f32 %v1021_v25, 0.0  ;;  %v1218_v33 = vadd.f32 %v953_v31, %v543_v30 }
 0x13c   : > { %1068 = vst [vmem:[%s1507_s4 + $0x80] sm:$0xff] %v1044_v28  ;;  %v1022_v34 = vadd.f32 %v1217_v29, %v1498_v62 }
 0x13d   : > { %1069 = vst [vmem:[%s1507_s4 + $0x88] sm:$0xff] %v1045_v32  ;;  %v1023_v35 = vadd.f32 %v1218_v33, %v1501_v1  ;;  %v547_v36 = vpop.f32.mrb[20].mxu1  ;;  %v957_v37 = vpop.f32.mrb[20].mxu0 }
 0x13e   : > { %v1046_v38 = vmax.f32 %v1022_v34, 0.0  ;;  %v1219_v39 = vadd.f32 %v957_v37, %v547_v36  ;;  %v549_v40 = vpop.f32.mrb[21].mxu1  ;;  %v959_v41 = vpop.f32.mrb[21].mxu0 }
 0x13f   : > { %v1047_v42 = vmax.f32 %v1023_v35, 0.0  ;;  %v1220_v43 = vadd.f32 %v959_v41, %v549_v40 }
 0x140   : > { %1070 = vst [vmem:[%s1507_s4 + $0x90] sm:$0xff] %v1046_v38  ;;  %v1024_v44 = vadd.f32 %v1219_v39, %v1498_v62 }
 0x141   : > { %1071 = vst [vmem:[%s1507_s4 + $0x98] sm:$0xff] %v1047_v42  ;;  %v1025_v45 = vadd.f32 %v1220_v43, %v1501_v1  ;;  %v553_v46 = vpop.f32.mrb[22].mxu1  ;;  %v963_v47 = vpop.f32.mrb[22].mxu0 }
 0x142   : > { %v1048_v48 = vmax.f32 %v1024_v44, 0.0  ;;  %v1221_v49 = vadd.f32 %v963_v47, %v553_v46  ;;  %v555_v50 = vpop.f32.mrb[23].mxu1  ;;  %v965_v51 = vpop.f32.mrb[23].mxu0 }
 0x143   : > { %v1049_v52 = vmax.f32 %v1025_v45, 0.0  ;;  %v1222_v53 = vadd.f32 %v965_v51, %v555_v50 }
 0x144   : > { %1072 = vst [vmem:[%s1507_s4 + $0xa0] sm:$0xff] %v1048_v48  ;;  %v1026_v54 = vadd.f32 %v1221_v49, %v1498_v62 }
 0x145   : > { %1073 = vst [vmem:[%s1507_s4 + $0xa8] sm:$0xff] %v1049_v52  ;;  %v1027_v55 = vadd.f32 %v1222_v53, %v1501_v1 }
 0x146   : > { %v1050_v56 = vmax.f32 %v1026_v54, 0.0 }
 0x147   : > { %v1051_v57 = vmax.f32 %v1027_v55, 0.0 }
 0x148   : > { %1074 = vst [vmem:[%s1507_s4 + $0xb0] sm:$0x1] %v1050_v56 }
 0x149   : > { %1075 = vst [vmem:[%s1507_s4 + $0xb8] sm:$0x1] %v1051_v57 }
 0x14a PF: > { %s13_s12 = sadd.s32 1, %s1292_s12  }
 0x14b   : > { %p10_p4 = scmp.ge.s32.totalorder %s13_s12, 4  }
 0x14d   :  { %12 = sbr.rel (!%p10_p4) target bundleno = 1 (0x1), region = 65 }

// kernel: seg_projector_forward.3
= control target key start
LH: loop header
LB: loop body
LE: loop exit
PB: predicated region body
PF: predicated region fallthrough
CT: control target
= control target key end

     0   :  { %s13180_s18 = smov 0   ;;  %s16731_s0 = inlined_call_operand.vmem [shape: f32[2,324,72], index: 0, kind: input, shape index: {}]   ;;  %s16732_s1 = inlined_call_operand.vmem [shape: f32[9,72,64], index: 1, kind: input, shape index: {}]   ;;  %s16733_s2 = inlined_call_operand.vmem [shape: f32[1,64], index: 2, kind: input, shape index: {}]   ;;  %s16734_s3 = inlined_call_operand.vmem [shape: f32[9,32,8], index: 3, kind: input, shape index: {}]   ;;  %s16735_s4 = inlined_call_operand.vmem [shape: f32[1,8], index: 4, kind: input, shape index: {}]   ;;  %s16736_s5 = inlined_call_operand.vmem [shape: f32[2,286,8], index: 5, kind: output, shape index: {}]  }
   0x1 LB: > { %s9350_s19 = sadd.s32 4294967295, %s13146_s18   ;;  %p9354_p0 = scmp.ge.s32.totalorder %s13146_s18, 1  ;;  %s13146_s18 = sphi %s13180_s18, %s15_s18  }
   0x2   : > { %p187_p1 = scmp.lt.s32.totalorder %s13146_s18, 3 }
   0x4   : > { %p188_p2 = pnand %p9354_p0, %p187_p1 }
   0x6   : > { %191 = sbr.rel (%p188_p2) target bundleno = 1856 (0x740), region = 40 }
   0xd   : > { %v9357_v0 = vld [vmem:[%s16732_s1 + $0x48] sm:$0xff]  ;;  %v9358_v1 = vld [vmem:[%s16732_s1 + $0x50] sm:$0xff]  ;;  %v9359_v2 = vld [vmem:[%s16732_s1 + $0x58] sm:$0xff]  ;;  %p215_p3 = scmp.lt.s32.totalorder %s9350_s19, 1  ;;  %vm316_vm0 = vcmask 588800   ;;  %vm16763_vm1 = vcmask 261120  }
   0xe   : > { %v12120_v3 = vpack.c.bf16 %v9358_v1, %v9357_v0  ;;  %v9360_v4 = vld [vmem:[%s16732_s1 + $0x60] sm:$0xff]  ;;  %v9361_v6 = vld [vmem:[%s16732_s1 + $0x68] sm:$0xff]  ;;  %v9362_v7 = vld [vmem:[%s16732_s1 + $0x70] sm:$0xff]  ;;  %vm5375_vm2 = vcmask 256000   ;;  %s13149_s22 = smov 96  }
   0xf   : > { %v12124_v5 = vpack.c.bf16 %v9360_v4, %v9359_v2  ;;  %s17423_s19 = smov (!%p215_p3, %s9350_s19), 1  ;;  %v12128_v8 = vpack.c.bf16 %v9362_v7, %v9361_v6  ;;  %v9363_v9 = vld [vmem:[%s16732_s1 + $0x78] sm:$0xff]  ;;  %v9364_v10 = vld [vmem:[%s16732_s1 + $0x80] sm:$0xff]  ;;  %v9365_v13 = vld [vmem:[%s16732_s1 + $0x88] sm:$0xff] }
  0x10   : > { %12121 = vmatprep.subr.bf16.mxu0 %v12120_v3  ;;  %s12912_s7 = smul.u32 328, %s17423_s19  ;;  %v12132_v12 = vpack.c.bf16 %v9364_v10, %v9363_v9  ;;  %v261_v14 = vld [vmem:[%s16732_s1] sm:$0xff]  ;;  %v262_v15 = vld [vmem:[%s16732_s1 + $0x8] sm:$0xff]  ;;  %v263_v16 = vld [vmem:[%s16732_s1 + $0x10] sm:$0xff] }
  0x11   : > { %12123 = vmatpush3.bf16.msra.mxu0 %v12120_v3  ;;  %v264_v17 = vld [vmem:[%s16732_s1 + $0x18] sm:$0xff]  ;;  %v12136_v18 = vpack.c.bf16 %v262_v15, %v261_v14  ;;  %v265_v22 = vld [vmem:[%s16732_s1 + $0x20] sm:$0xff]  ;;  %v266_v23 = vld [vmem:[%s16732_s1 + $0x28] sm:$0xff]  ;;  %s12913_s11 = smul.u32 288, %s17423_s19 }
  0x12   : > { %12125 = vmatprep.subr.bf16.mxu0 %v12124_v5  ;;  %s13218_s14 = scalar_lea.vmem %s16731_s0, %s12912_s7  ;;  %v12140_v21 = vpack.c.bf16 %v264_v17, %v263_v16  ;;  %v12144_v26 = vpack.c.bf16 %v266_v23, %v265_v22  ;;  %v267_v27 = vld [vmem:[%s16732_s1 + $0x30] sm:$0xff]  ;;  %v268_v28 = vld [vmem:[%s16732_s1 + $0x38] sm:$0xff]  ;;  %v269_v34 = vld [vmem:[%s16732_s1 + $0x40] sm:$0xff] }
  0x13   : > { %v270_v11 = vld [vmem:[%s13218_s14 + $0x1] sm:$0xff]  ;;  %v271_v19 = vld [vmem:[%s13218_s14 + $0x9] sm:$0xff]  ;;  %v272_v20 = vld [vmem:[%s13218_s14 + $0x11] sm:$0xff]  ;;  %v12148_v31 = vpack.c.bf16 %v268_v28, %v267_v27  ;;  %s16619_s17 = scalar_lea.vmem %s16736_s5, %s12913_s11 }
  0x14   : > { %10932 = vmatprep.mubr.msk.f32.mxu0 %vm316_vm0, %v270_v11  ;;  %v273_v24 = vld [vmem:[%s13218_s14 + $0x19] sm:$0xff]  ;;  %v274_v25 = vld [vmem:[%s13218_s14 + $0x21] sm:$0xff]  ;;  %v275_v29 = vld [vmem:[%s13218_s14 + $0x29] sm:$0xff] }
  0x15   : > { %12127 = vmatpush3.bf16.msra.mxu0 %v12124_v5  ;;  %v276_v30 = vld [vmem:[%s13218_s14 + $0x31] sm:$0xff]  ;;  %v277_v32 = vld [vmem:[%s13218_s14 + $0x39] sm:$0xff]  ;;  %v278_v33 = vld [vmem:[%s13218_s14 + $0x41] sm:$0xff] }
  0x16   : > { %12129 = vmatprep.subr.bf16.mxu0 %v12128_v8  ;;  %v9438_v35 = vld [vmem:[%s16732_s1 + $0x90] sm:$0xff]  ;;  %v9439_v36 = vld [vmem:[%s16732_s1 + $0x98] sm:$0xff]  ;;  %v282_v41 = vld [vmem:[%s13218_s14 + $0x61] sm:$0xff] }
  0x17   : > { %v279_v37 = vld [vmem:[%s13218_s14 + $0x49] sm:$0xff]  ;;  %v280_v38 = vld [vmem:[%s13218_s14 + $0x51] sm:$0xff]  ;;  %v13276_v39 = vpack.c.bf16 %v9439_v36, %v9438_v35  ;;  %v281_v40 = vld [vmem:[%s13218_s14 + $0x59] sm:$0xff] }
  0x18   : > { %v283_v42 = vld [vmem:[%s13218_s14 + $0x69] sm:$0xff]  ;;  %v284_v43 = vld [vmem:[%s13218_s14 + $0x71] sm:$0xff]  ;;  %v285_v44 = vld [vmem:[%s13218_s14 + $0x79] sm:$0xff] }
  0x19   : > { %12131 = vmatpush3.bf16.msra.mxu0 %v12128_v8  ;;  %v286_v45 = vld [vmem:[%s13218_s14 + $0x81] sm:$0xff]  ;;  %v287_v46 = vld [vmem:[%s13218_s14 + $0x89] sm:$0xff]  ;;  %v288_v47 = vld [vmem:[%s13218_s14 + $0x91] sm:$0xff] }
  0x1a   : > { %12133 = vmatprep.subr.bf16.mxu0 %v12132_v12  ;;  %v289_v48 = vld [vmem:[%s13218_s14 + $0x99] sm:$0xff]  ;;  %v290_v49 = vld [vmem:[%s13218_s14 + $0xa1] sm:$0xff]  ;;  %v291_v50 = vld [vmem:[%s13218_s14 + $0xa9] sm:$0xff] }
  0x1b   : > { %v292_v51 = vld [vmem:[%s13218_s14 + $0xb1] sm:$0xff]  ;;  %v293_v52 = vld [vmem:[%s13218_s14 + $0xb9] sm:$0xff]  ;;  %v294_v53 = vld [vmem:[%s13218_s14 + $0xc1] sm:$0xff] }
  0x1c   : > { %v295_v54 = vld [vmem:[%s13218_s14 + $0xc9] sm:$0xff]  ;;  %v296_v55 = vld [vmem:[%s13218_s14 + $0xd1] sm:$0xff]  ;;  %v297_v56 = vld [vmem:[%s13218_s14 + $0xd9] sm:$0xff] }
  0x1d   : > { %12135 = vmatpush3.bf16.msra.mxu0 %v12132_v12  ;;  %v298_v57 = vld [vmem:[%s13218_s14 + $0xe1] sm:$0xff]  ;;  %v299_v58 = vld [vmem:[%s13218_s14 + $0xe9] sm:$0xff]  ;;  %v300_v59 = vld [vmem:[%s13218_s14 + $0xf1] sm:$0xff] }
  0x1e   : > { %10930 = vmatprep.subr.mxu0 %v9365_v13  ;;  %v301_v60 = vld [vmem:[%s13218_s14 + $0xf9] sm:$0xff]  ;;  %v302_v61 = vld [vmem:[%s13218_s14 + $0x101] sm:$0xff]  ;;  %v303_v62 = vld [vmem:[%s13218_s14 + $0x109] sm:$0xff] }
  0x1f   : > { %v304_v63 = vld [vmem:[%s13218_s14 + $0x111] sm:$0xff]  ;;  %v305_v0 = vld [vmem:[%s13218_s14 + $0x119] sm:$0x3f]  ;;  %v225_v1 = vld [vmem:[%s13218_s14] sm:$0xff] }
  0x20   : > { %v9440_v2 = vld [vmem:[%s16732_s1 + $0xa0] sm:$0xff]  ;;  %v9441_v3 = vld [vmem:[%s16732_s1 + $0xa8] sm:$0xff]  ;;  %v227_v5 = vld [vmem:[%s13218_s14 + $0x10] sm:$0xff] }
  0x21   : > { %10931 = vmatpush3.msra.mxu0 %v9365_v13  ;;  %v226_v4 = vld [vmem:[%s13218_s14 + $0x8] sm:$0xff]  ;;  %v12156_v6 = vpack.c.bf16 %v9441_v3, %v9440_v2  ;;  %v9442_v7 = vld [vmem:[%s16732_s1 + $0xb0] sm:$0xff]  ;;  %v9443_v8 = vld [vmem:[%s16732_s1 + $0xb8] sm:$0xff] }
  0x22   : > { %10933 = vmatmul.mubr.msk.f32.vlgmr.msra.gmra.mrb[0].mxu0 %vm316_vm0, %v271_v19  ;;  %12137 = vmatprep.subr.bf16.mxu0 %v12136_v18  ;;  %v228_v9 = vld [vmem:[%s13218_s14 + $0x18] sm:$0xff]  ;;  %v229_v10 = vld [vmem:[%s13218_s14 + $0x20] sm:$0xff]  ;;  %v12160_v11 = vpack.c.bf16 %v9443_v8, %v9442_v7  ;;  %v9445_v13 = vld [vmem:[%s16732_s1 + $0xc8] sm:$0xff] }
  0x23   : > { %12139 = vmatpush3.bf16.msra.mxu0 %v12136_v18  ;;  %10935 = vmatprep.mubr.msk.f32.mxu0 %vm316_vm0, %v272_v20  ;;  %v9444_v12 = vld [vmem:[%s16732_s1 + $0xc0] sm:$0xff]  ;;  %v230_v14 = vld [vmem:[%s13218_s14 + $0x28] sm:$0xff]  ;;  %v231_v15 = vld [vmem:[%s13218_s14 + $0x30] sm:$0xff] }
  0x24   : > { %12141 = vmatprep.subr.bf16.mxu0 %v12140_v21  ;;  %v12164_v16 = vpack.c.bf16 %v9445_v13, %v9444_v12  ;;  %v232_v17 = vld [vmem:[%s13218_s14 + $0x38] sm:$0xff]  ;;  %v233_v18 = vld [vmem:[%s13218_s14 + $0x40] sm:$0xff]  ;;  %v9446_v19 = vld [vmem:[%s16732_s1 + $0xd0] sm:$0xff] }
  0x25   : > { %v9483_v20 = vld [vmem:[%s16732_s1 + $0xd8] sm:$0xff]  ;;  %v234_v22 = vld [vmem:[%s13218_s14 + $0x48] sm:$0xff]  ;;  %v235_v23 = vld [vmem:[%s13218_s14 + $0x50] sm:$0xff] }
  0x26   : > { %10936 = vmatmul.mubr.msk.f32.gmra.mrb[2].mxu0 %vm316_vm0, %v273_v24  ;;  %v238_v27 = vld [vmem:[%s13218_s14 + $0x68] sm:$0xff]  ;;  %v239_v28 = vld [vmem:[%s13218_s14 + $0x70] sm:$0xff]  ;;  %v13483_v2 = vld [vmem:[%s13218_s14 + $0x3a] sm:$0xff] }
  0x27   : > { %10938 = vmatprep.mubr.msk.f32.mxu0 %vm316_vm0, %v274_v25  ;;  %12143 = vmatpush3.bf16.msra.mxu0 %v12140_v21  ;;  %v9484_v21 = vld [vmem:[%s16732_s1 + $0xe0] sm:$0xff]  ;;  %v236_v25 = vld [vmem:[%s13218_s14 + $0x58] sm:$0xff]  ;;  %v246_v35 = vld [vmem:[%s13218_s14 + $0xa8] sm:$0xff] }
  0x28   : > { %12145 = vmatprep.subr.bf16.mxu0 %v12144_v26  ;;  %v13379_v24 = vpack.c.bf16 %v9484_v21, %v9483_v20  ;;  %v247_v36 = vld [vmem:[%s13218_s14 + $0xb0] sm:$0xff]  ;;  %v13486_v3 = vld [vmem:[%s13218_s14 + $0x42] sm:$0xff] }
  0x29   : > { %v13502_v7 = vld [vmem:[%s13218_s14 + $0x4a] sm:$0xff]  ;;  %v13505_v8 = vld [vmem:[%s13218_s14 + $0x52] sm:$0xff] }
  0x2a   : > { %10939 = vmatmul.mubr.msk.f32.gmra.mrb[4].mxu0 %vm316_vm0, %v275_v29  ;;  %v240_v29 = vld [vmem:[%s13218_s14 + $0x78] sm:$0xff]  ;;  %v13522_v12 = vld [vmem:[%s13218_s14 + $0x6a] sm:$0xff] }
  0x2b   : > { %10941 = vmatprep.mubr.msk.f32.mxu0 %vm316_vm0, %v276_v30  ;;  %12147 = vmatpush3.bf16.msra.mxu0 %v12144_v26  ;;  %v237_v26 = vld [vmem:[%s13218_s14 + $0x60] sm:$0xff]  ;;  %v13525_v13 = vld [vmem:[%s13218_s14 + $0x72] sm:$0xff]  ;;  %v13562_v20 = vld [vmem:[%s13218_s14 + $0xaa] sm:$0xff] }
  0x2c   : > { %12149 = vmatprep.subr.bf16.mxu0 %v12148_v31  ;;  %v241_v30 = vld [vmem:[%s13218_s14 + $0x80] sm:$0xff]  ;;  %v13565_v21 = vld [vmem:[%s13218_s14 + $0xb2] sm:$0xff] }
  0x2e   : > { %10942 = vmatmul.mubr.msk.f32.gmra.mrb[6].mxu0 %vm316_vm0, %v277_v32  ;;  %v243_v32 = vld [vmem:[%s13218_s14 + $0x90] sm:$0xff] }
  0x2f   : > { %10944 = vmatprep.mubr.msk.f32.mxu0 %vm316_vm0, %v278_v33  ;;  %12151 = vmatpush3.bf16.msra.mxu0 %v12148_v31  ;;  %v242_v31 = vld [vmem:[%s13218_s14 + $0x88] sm:$0xff]  ;;  %v244_v33 = vld [vmem:[%s13218_s14 + $0x98] sm:$0xff] }
  0x30   : > { %11002 = vmatprep.subr.mxu0 %v269_v34 }
  0x32   : > { %10945 = vmatmul.mubr.msk.f32.gmra.mrb[8].mxu0 %vm316_vm0, %v279_v37  ;;  %v248_v37 = vld [vmem:[%s13218_s14 + $0xb8] sm:$0xff] }
  0x33   : > { %10947 = vmatprep.mubr.msk.f32.mxu0 %vm316_vm0, %v280_v38  ;;  %11003 = vmatpush3.msra.mxu0 %v269_v34  ;;  %v245_v34 = vld [vmem:[%s13218_s14 + $0xa0] sm:$0xff] }
  0x34   : > { %12153 = vmatprep.subr.bf16.mxu0 %v13276_v39  ;;  %v249_v38 = vld [vmem:[%s13218_s14 + $0xc0] sm:$0xff] }
  0x36   : > { %10948 = vmatmul.mubr.msk.f32.gmra.mrb[10].mxu0 %vm316_vm0, %v281_v40  ;;  %v251_v40 = vld [vmem:[%s13218_s14 + $0xd0] sm:$0xff] }
  0x37   : > { %10950 = vmatprep.mubr.msk.f32.mxu0 %vm316_vm0, %v282_v41  ;;  %v252_v41 = vld [vmem:[%s13218_s14 + $0xd8] sm:$0xff] }
  0x3a   : > { %10951 = vmatmul.mubr.msk.f32.gmra.mrb[12].mxu0 %vm316_vm0, %v283_v42  ;;  %v253_v42 = vld [vmem:[%s13218_s14 + $0xe0] sm:$0xff] }
  0x3b   : > { %10953 = vmatprep.mubr.msk.f32.mxu0 %vm316_vm0, %v284_v43  ;;  %v254_v43 = vld [vmem:[%s13218_s14 + $0xe8] sm:$0xff] }
  0x3e   : > { %10954 = vmatmul.mubr.msk.f32.gmra.mrb[14].mxu0 %vm316_vm0, %v285_v44  ;;  %v255_v44 = vld [vmem:[%s13218_s14 + $0xf0] sm:$0xff] }
  0x3f   : > { %10956 = vmatprep.mubr.msk.f32.mxu0 %vm316_vm0, %v286_v45  ;;  %v256_v45 = vld [vmem:[%s13218_s14 + $0xf8] sm:$0xff] }
  0x42   : > { %10957 = vmatmul.mubr.msk.f32.gmra.mrb[16].mxu0 %vm316_vm0, %v287_v46  ;;  %v257_v46 = vld [vmem:[%s13218_s14 + $0x100] sm:$0xff] }
  0x43   : > { %10959 = vmatprep.mubr.msk.f32.mxu0 %vm316_vm0, %v288_v47  ;;  %v258_v47 = vld [vmem:[%s13218_s14 + $0x108] sm:$0xff] }
  0x46   : > { %10960 = vmatmul.mubr.msk.f32.gmra.mrb[18].mxu0 %vm316_vm0, %v289_v48  ;;  %v259_v48 = vld [vmem:[%s13218_s14 + $0x110] sm:$0xff] }
  0x47   : > { %10962 = vmatprep.mubr.msk.f32.mxu0 %vm316_vm0, %v290_v49  ;;  %v260_v49 = vld [vmem:[%s13218_s14 + $0x118] sm:$0x3f] }
  0x4a   : > { %10963 = vmatmul.mubr.msk.f32.gmra.mrb[20].mxu0 %vm316_vm0, %v291_v50  ;;  %v1023_v50 = vld [vmem:[%s13218_s14 + $0x2] sm:$0xff] }
  0x4b   : > { %10965 = vmatprep.mubr.msk.f32.mxu0 %vm316_vm0, %v292_v51  ;;  %v9485_v51 = vld [vmem:[%s16732_s1 + $0xe8] sm:$0xff] }
  0x4e   : > { %10966 = vmatmul.mubr.msk.f32.gmra.mrb[22].mxu0 %vm316_vm0, %v293_v52  ;;  %v9486_v52 = vld [vmem:[%s16732_s1 + $0xf0] sm:$0xff] }
  0x4f   : > { %10968 = vmatprep.mubr.msk.f32.mxu0 %vm316_vm0, %v294_v53  ;;  %v1024_v53 = vld [vmem:[%s13218_s14 + $0xa] sm:$0xff] }
  0x52   : > { %10969 = vmatmul.mubr.msk.f32.gmra.mrb[24].mxu0 %vm316_vm0, %v295_v54  ;;  %v13444_v54 = vld [vmem:[%s13218_s14 + $0x12] sm:$0xff] }
  0x53   : > { %10971 = vmatprep.mubr.msk.f32.mxu0 %vm316_vm0, %v296_v55  ;;  %v12172_v55 = vpack.c.bf16 %v9486_v52, %v9485_v51  ;;  %v1893_v51 = vld [vmem:[%s13218_s14 + $0x13] sm:$0xff] }
  0x54   : > { %v9575_v52 = vld [vmem:[%s16732_s1 + $0x178] sm:$0xff] }
  0x56   : > { %10972 = vmatmul.mubr.msk.f32.gmra.mrb[26].mxu0 %vm316_vm0, %v297_v56  ;;  %v9487_v56 = vld [vmem:[%s16732_s1 + $0xf8] sm:$0xff] }
  0x57   : > { %10974 = vmatprep.mubr.msk.f32.mxu0 %vm316_vm0, %v298_v57  ;;  %v9488_v57 = vld [vmem:[%s16732_s1 + $0x100] sm:$0xff] }
  0x5a   : > { %10975 = vmatmul.mubr.msk.f32.gmra.mrb[28].mxu0 %vm316_vm0, %v299_v58  ;;  %v13457_v58 = vld [vmem:[%s13218_s14 + $0x1a] sm:$0xff] }
  0x5b   : > { %10977 = vmatprep.mubr.msk.f32.mxu0 %vm316_vm0, %v300_v59  ;;  %v13460_v59 = vld [vmem:[%s13218_s14 + $0x22] sm:$0xff] }
  0x5e   : > { %10978 = vmatmul.mubr.msk.f32.gmra.mrb[30].mxu0 %vm316_vm0, %v301_v60  ;;  %v12176_v60 = vpack.c.bf16 %v9488_v57, %v9487_v56  ;;  %v9577_v57 = vld [vmem:[%s16732_s1 + $0x188] sm:$0xff] }
  0x5f   : > { %10980 = vmatprep.mubr.msk.f32.mxu0 %vm316_vm0, %v302_v61  ;;  %v9489_v61 = vld [vmem:[%s16732_s1 + $0x108] sm:$0xff] }
  0x62   : > { %10981 = vmatmul.mubr.msk.f32.gmra.mrb[32].mxu0 %vm316_vm0, %v303_v62  ;;  %v9490_v62 = vld [vmem:[%s16732_s1 + $0x110] sm:$0xff] }
  0x63   : > { %10983 = vmatprep.mubr.msk.f32.mxu0 %vm316_vm0, %v304_v63  ;;  %v13473_v63 = vld [vmem:[%s13218_s14 + $0x2a] sm:$0xff] }
  0x66   : > { %10984 = vmatmul.mubr.msk.f32.gmra.mrb[34].mxu0 %vm316_vm0, %v305_v0  ;;  %v13476_v0 = vld [vmem:[%s13218_s14 + $0x32] sm:$0xff] }
  0x67   : > { %11004 = vmatprep.mubr.msk.f32.mxu0 %vm316_vm0, %v225_v1  ;;  %v12180_v1 = vpack.c.bf16 %v9490_v62, %v9489_v61  ;;  %v9579_v62 = vld [vmem:[%s16732_s1 + $0x198] sm:$0xff] }
  0x6a   : > { %11005 = vmatmul.mubr.msk.f32.vlgmr.msra.gmra.mrb[0].mxu0 %vm316_vm0, %v226_v4  ;;  %v9491_v4 = vld [vmem:[%s16732_s1 + $0x118] sm:$0xff] }
  0x6b   : > { %12155 = vmatpush3.bf16.msra.mxu0 %v13276_v39  ;;  %11007 = vmatprep.mubr.msk.f32.mxu0 %vm316_vm0, %v227_v5  ;;  %v250_v39 = vld [vmem:[%s13218_s14 + $0xc8] sm:$0xff]  ;;  %v9528_v5 = vld [vmem:[%s16732_s1 + $0x120] sm:$0xff] }
  0x6c   : > { %12157 = vmatprep.subr.bf16.mxu0 %v12156_v6 }
  0x6e   : > { %11008 = vmatmul.mubr.msk.f32.gmra.mrb[2].mxu0 %vm316_vm0, %v228_v9 }
  0x6f   : > { %11010 = vmatprep.mubr.msk.f32.mxu0 %vm316_vm0, %v229_v10  ;;  %12159 = vmatpush3.bf16.msra.mxu0 %v12156_v6  ;;  %v9529_v6 = vld [vmem:[%s16732_s1 + $0x128] sm:$0xff]  ;;  %v13512_v10 = vld [vmem:[%s13218_s14 + $0x5a] sm:$0xff] }
  0x70   : > { %12161 = vmatprep.subr.bf16.mxu0 %v12160_v11  ;;  %v12184_v9 = vpack.c.bf16 %v9529_v6, %v9528_v5  ;;  %v9581_v5 = vld [vmem:[%s16732_s1 + $0x1a8] sm:$0xff]  ;;  %v9618_v6 = vld [vmem:[%s16732_s1 + $0x1b0] sm:$0xff] }
  0x72   : > { %11011 = vmatmul.mubr.msk.f32.gmra.mrb[4].mxu0 %vm316_vm0, %v230_v14  ;;  %v13532_v14 = vld [vmem:[%s13218_s14 + $0x7a] sm:$0xff] }
  0x73   : > { %11013 = vmatprep.mubr.msk.f32.mxu0 %vm316_vm0, %v231_v15  ;;  %12163 = vmatpush3.bf16.msra.mxu0 %v12160_v11  ;;  %v13515_v11 = vld [vmem:[%s13218_s14 + $0x62] sm:$0xff] }
  0x74   : > { %12165 = vmatprep.subr.bf16.mxu0 %v12164_v16  ;;  %v13535_v15 = vld [vmem:[%s13218_s14 + $0x82] sm:$0xff] }
  0x76   : > { %11014 = vmatmul.mubr.msk.f32.gmra.mrb[6].mxu0 %vm316_vm0, %v232_v17  ;;  %v13545_v17 = vld [vmem:[%s13218_s14 + $0x92] sm:$0xff] }
  0x77   : > { %11016 = vmatprep.mubr.msk.f32.mxu0 %vm316_vm0, %v233_v18  ;;  %12167 = vmatpush3.bf16.msra.mxu0 %v12164_v16  ;;  %v13542_v16 = vld [vmem:[%s13218_s14 + $0x8a] sm:$0xff]  ;;  %v13552_v18 = vld [vmem:[%s13218_s14 + $0x9a] sm:$0xff] }
  0x78   : > { %11074 = vmatprep.subr.mxu0 %v9446_v19 }
  0x7a   : > { %11017 = vmatmul.mubr.msk.f32.gmra.mrb[8].mxu0 %vm316_vm0, %v234_v22  ;;  %v13572_v22 = vld [vmem:[%s13218_s14 + $0xba] sm:$0xff] }
  0x7b   : > { %11019 = vmatprep.mubr.msk.f32.mxu0 %vm316_vm0, %v235_v23  ;;  %11075 = vmatpush3.msra.mxu0 %v9446_v19  ;;  %v13555_v19 = vld [vmem:[%s13218_s14 + $0xa2] sm:$0xff] }
  0x7c   : > { %12169 = vmatprep.subr.bf16.mxu0 %v13379_v24  ;;  %v13575_v23 = vld [vmem:[%s13218_s14 + $0xc2] sm:$0xff] }
  0x7e   : > { %11020 = vmatmul.mubr.msk.f32.gmra.mrb[10].mxu0 %vm316_vm0, %v236_v25  ;;  %v13585_v25 = vld [vmem:[%s13218_s14 + $0xd2] sm:$0xff] }
  0x7f   : > { %11022 = vmatprep.mubr.msk.f32.mxu0 %vm316_vm0, %v237_v26  ;;  %v13592_v26 = vld [vmem:[%s13218_s14 + $0xda] sm:$0xff] }
  0x82   : > { %11023 = vmatmul.mubr.msk.f32.gmra.mrb[12].mxu0 %vm316_vm0, %v238_v27  ;;  %v13595_v27 = vld [vmem:[%s13218_s14 + $0xe2] sm:$0xff] }
  0x83   : > { %11025 = vmatprep.mubr.msk.f32.mxu0 %vm316_vm0, %v239_v28  ;;  %v13602_v28 = vld [vmem:[%s13218_s14 + $0xea] sm:$0xff] }
  0x86   : > { %11026 = vmatmul.mubr.msk.f32.gmra.mrb[14].mxu0 %vm316_vm0, %v240_v29  ;;  %v13605_v29 = vld [vmem:[%s13218_s14 + $0xf2] sm:$0xff] }
  0x87   : > { %11028 = vmatprep.mubr.msk.f32.mxu0 %vm316_vm0, %v241_v30  ;;  %v1054_v30 = vld [vmem:[%s13218_s14 + $0xfa] sm:$0xff] }
  0x8a   : > { %11029 = vmatmul.mubr.msk.f32.gmra.mrb[16].mxu0 %vm316_vm0, %v242_v31  ;;  %v1055_v31 = vld [vmem:[%s13218_s14 + $0x102] sm:$0xff] }
  0x8b   : > { %11031 = vmatprep.mubr.msk.f32.mxu0 %vm316_vm0, %v243_v32  ;;  %v1056_v32 = vld [vmem:[%s13218_s14 + $0x10a] sm:$0xff] }
  0x8e   : > { %11032 = vmatmul.mubr.msk.f32.gmra.mrb[18].mxu0 %vm316_vm0, %v244_v33  ;;  %v1057_v33 = vld [vmem:[%s13218_s14 + $0x112] sm:$0xff] }
  0x8f   : > { %11034 = vmatprep.mubr.msk.f32.mxu0 %vm316_vm0, %v245_v34  ;;  %v1058_v34 = vld [vmem:[%s13218_s14 + $0x11a] sm:$0x3f] }
  0x92   : > { %11035 = vmatmul.mubr.msk.f32.gmra.mrb[20].mxu0 %vm316_vm0, %v246_v35  ;;  %v9530_v35 = vld [vmem:[%s16732_s1 + $0x130] sm:$0xff] }
  0x93   : > { %11037 = vmatprep.mubr.msk.f32.mxu0 %vm316_vm0, %v247_v36  ;;  %v9531_v36 = vld [vmem:[%s16732_s1 + $0x138] sm:$0xff] }
  0x96   : > { %11038 = vmatmul.mubr.msk.f32.gmra.mrb[22].mxu0 %vm316_vm0, %v248_v37  ;;  %v12188_v37 = vpack.c.bf16 %v9531_v36, %v9530_v35  ;;  %v1928_v35 = vld [vmem:[%s13218_s14 + $0x12b] sm:$0x3f]  ;;  %v2328_v36 = vld [vmem:[%s13218_s14 + $0x14] sm:$0xff] }
  0x97   : > { %11040 = vmatprep.mubr.msk.f32.mxu0 %vm316_vm0, %v249_v38  ;;  %v9532_v38 = vld [vmem:[%s16732_s1 + $0x140] sm:$0xff] }
  0x9a   : > { %11041 = vmatmul.mubr.msk.f32.gmra.mrb[24].mxu0 %vm316_vm0, %v250_v39  ;;  %v9533_v39 = vld [vmem:[%s16732_s1 + $0x148] sm:$0xff] }
  0x9b   : > { %11043 = vmatprep.mubr.msk.f32.mxu0 %vm316_vm0, %v251_v40  ;;  %v12192_v40 = vpack.c.bf16 %v9533_v39, %v9532_v38  ;;  %v9621_v38 = vld [vmem:[%s16732_s1 + $0x1c8] sm:$0xff]  ;;  %v2329_v39 = vld [vmem:[%s13218_s14 + $0x1c] sm:$0xff] }
  0x9e   : > { %11044 = vmatmul.mubr.msk.f32.gmra.mrb[26].mxu0 %vm316_vm0, %v252_v41  ;;  %v9534_v41 = vld [vmem:[%s16732_s1 + $0x150] sm:$0xff] }
  0x9f   : > { %11046 = vmatprep.mubr.msk.f32.mxu0 %vm316_vm0, %v253_v42  ;;  %v9535_v42 = vld [vmem:[%s16732_s1 + $0x158] sm:$0xff] }
  0xa2   : > { %11047 = vmatmul.mubr.msk.f32.gmra.mrb[28].mxu0 %vm316_vm0, %v254_v43  ;;  %v12196_v43 = vpack.c.bf16 %v9535_v42, %v9534_v41  ;;  %v9622_v42 = vld [vmem:[%s16732_s1 + $0x1d0] sm:$0xff] }
  0xa3   : > { %11049 = vmatprep.mubr.msk.f32.mxu0 %vm316_vm0, %v255_v44  ;;  %v9536_v44 = vld [vmem:[%s16732_s1 + $0x160] sm:$0xff] }
  0xa6   : > { %11050 = vmatmul.mubr.msk.f32.gmra.mrb[30].mxu0 %vm316_vm0, %v256_v45  ;;  %v9573_v45 = vld [vmem:[%s16732_s1 + $0x168] sm:$0xff] }
  0xa7   : > { %11052 = vmatprep.mubr.msk.f32.mxu0 %vm316_vm0, %v257_v46  ;;  %v9574_v46 = vld [vmem:[%s16732_s1 + $0x170] sm:$0xff] }
  0xaa   : > { %11053 = vmatmul.mubr.msk.f32.gmra.mrb[32].mxu0 %vm316_vm0, %v258_v47  ;;  %v12200_v47 = vpack.c.bf16 %v9574_v46, %v9573_v45  ;;  %v13844_v45 = vld [vmem:[%s13218_s14 + $0x34] sm:$0xff] }
  0xab   : > { %11055 = vmatprep.mubr.msk.f32.mxu0 %vm316_vm0, %v259_v48  ;;  %v1491_v48 = vld [vmem:[%s13218_s14 + $0x11a] sm:$0xff] }
  0xae   : > { %11056 = vmatmul.mubr.msk.f32.gmra.mrb[34].mxu0 %vm316_vm0, %v260_v49  ;;  %v1492_v49 = vld [vmem:[%s13218_s14 + $0x122] sm:$0xff] }
  0xaf   : > { %11076 = vmatprep.mubr.msk.f32.mxu0 %vm316_vm0, %v1023_v50  ;;  %v1493_v50 = vld [vmem:[%s13218_s14 + $0x12a] sm:$0x3f] }
  0xb2   : > { %11077 = vmatmul.mubr.msk.f32.vlgmr.msra.gmra.mrb[0].mxu0 %vm316_vm0, %v1024_v53  ;;  %v9576_v53 = vld [vmem:[%s16732_s1 + $0x180] sm:$0xff] }
  0xb3   : > { %12171 = vmatpush3.bf16.msra.mxu0 %v13379_v24  ;;  %11079 = vmatprep.mubr.msk.f32.mxu0 %vm316_vm0, %v13444_v54  ;;  %v13582_v24 = vld [vmem:[%s13218_s14 + $0xca] sm:$0xff]  ;;  %v12204_v56 = vpack.c.bf16 %v9576_v53, %v9575_v52  ;;  %v13870_v53 = vld [vmem:[%s13218_s14 + $0x54] sm:$0xff] }
  0xb4   : > { %12173 = vmatprep.subr.bf16.mxu0 %v12172_v55  ;;  %v13867_v52 = vld [vmem:[%s13218_s14 + $0x4c] sm:$0xff] }
  0xb6   : > { %11080 = vmatmul.mubr.msk.f32.gmra.mrb[2].mxu0 %vm316_vm0, %v13457_v58 }
  0xb7   : > { %11082 = vmatprep.mubr.msk.f32.mxu0 %vm316_vm0, %v13460_v59  ;;  %12175 = vmatpush3.bf16.msra.mxu0 %v12172_v55  ;;  %v1895_v55 = vld [vmem:[%s13218_s14 + $0x23] sm:$0xff] }
  0xb8   : > { %12177 = vmatprep.subr.bf16.mxu0 %v12176_v60 }
  0xba   : > { %11083 = vmatmul.mubr.msk.f32.gmra.mrb[4].mxu0 %vm316_vm0, %v13473_v63 }
  0xbb   : > { %11085 = vmatprep.mubr.msk.f32.mxu0 %vm316_vm0, %v13476_v0  ;;  %12179 = vmatpush3.bf16.msra.mxu0 %v12176_v60  ;;  %v1897_v60 = vld [vmem:[%s13218_s14 + $0x33] sm:$0xff] }
  0xbc   : > { %12181 = vmatprep.subr.bf16.mxu0 %v12180_v1 }
  0xbe   : > { %11086 = vmatmul.mubr.msk.f32.gmra.mrb[6].mxu0 %vm316_vm0, %v13483_v2 }
  0xbf   : > { %11088 = vmatprep.mubr.msk.f32.mxu0 %vm316_vm0, %v13486_v3  ;;  %12183 = vmatpush3.bf16.msra.mxu0 %v12180_v1  ;;  %v1899_v1 = vld [vmem:[%s13218_s14 + $0x43] sm:$0xff] }
  0xc0   : > { %11146 = vmatprep.subr.mxu0 %v9491_v4 }
  0xc2   : > { %11089 = vmatmul.mubr.msk.f32.gmra.mrb[8].mxu0 %vm316_vm0, %v13502_v7 }
  0xc3   : > { %11091 = vmatprep.mubr.msk.f32.mxu0 %vm316_vm0, %v13505_v8  ;;  %11147 = vmatpush3.msra.mxu0 %v9491_v4  ;;  %v1901_v4 = vld [vmem:[%s13218_s14 + $0x53] sm:$0xff] }
  0xc4   : > { %12185 = vmatprep.subr.bf16.mxu0 %v12184_v9 }
  0xc6   : > { %11092 = vmatmul.mubr.msk.f32.gmra.mrb[10].mxu0 %vm316_vm0, %v13512_v10 }
  0xc7   : > { %11094 = vmatprep.mubr.msk.f32.mxu0 %vm316_vm0, %v13515_v11 }
  0xca   : > { %11095 = vmatmul.mubr.msk.f32.gmra.mrb[12].mxu0 %vm316_vm0, %v13522_v12 }
  0xcb   : > { %11097 = vmatprep.mubr.msk.f32.mxu0 %vm316_vm0, %v13525_v13 }
  0xce   : > { %11098 = vmatmul.mubr.msk.f32.gmra.mrb[14].mxu0 %vm316_vm0, %v13532_v14 }
  0xcf   : > { %11100 = vmatprep.mubr.msk.f32.mxu0 %vm316_vm0, %v13535_v15 }
  0xd2   : > { %11101 = vmatmul.mubr.msk.f32.gmra.mrb[16].mxu0 %vm316_vm0, %v13542_v16 }
  0xd3   : > { %11103 = vmatprep.mubr.msk.f32.mxu0 %vm316_vm0, %v13545_v17 }
  0xd6   : > { %11104 = vmatmul.mubr.msk.f32.gmra.mrb[18].mxu0 %vm316_vm0, %v13552_v18 }
  0xd7   : > { %11106 = vmatprep.mubr.msk.f32.mxu0 %vm316_vm0, %v13555_v19 }
  0xda   : > { %11107 = vmatmul.mubr.msk.f32.gmra.mrb[20].mxu0 %vm316_vm0, %v13562_v20 }
  0xdb   : > { %11109 = vmatprep.mubr.msk.f32.mxu0 %vm316_vm0, %v13565_v21 }
  0xde   : > { %11110 = vmatmul.mubr.msk.f32.gmra.mrb[22].mxu0 %vm316_vm0, %v13572_v22 }
  0xdf   : > { %11112 = vmatprep.mubr.msk.f32.mxu0 %vm316_vm0, %v13575_v23 }
  0xe2   : > { %11113 = vmatmul.mubr.msk.f32.gmra.mrb[24].mxu0 %vm316_vm0, %v13582_v24 }
  0xe3   : > { %11115 = vmatprep.mubr.msk.f32.mxu0 %vm316_vm0, %v13585_v25 }
  0xe6   : > { %11116 = vmatmul.mubr.msk.f32.gmra.mrb[26].mxu0 %vm316_vm0, %v13592_v26 }
  0xe7   : > { %11118 = vmatprep.mubr.msk.f32.mxu0 %vm316_vm0, %v13595_v27 }
  0xea   : > { %11119 = vmatmul.mubr.msk.f32.gmra.mrb[28].mxu0 %vm316_vm0, %v13602_v28 }
  0xeb   : > { %11121 = vmatprep.mubr.msk.f32.mxu0 %vm316_vm0, %v13605_v29 }
  0xee   : > { %11122 = vmatmul.mubr.msk.f32.gmra.mrb[30].mxu0 %vm316_vm0, %v1054_v30 }
  0xef   : > { %11124 = vmatprep.mubr.msk.f32.mxu0 %vm316_vm0, %v1055_v31 }
  0xf2   : > { %11125 = vmatmul.mubr.msk.f32.gmra.mrb[32].mxu0 %vm316_vm0, %v1056_v32 }
  0xf3   : > { %11127 = vmatprep.mubr.msk.f32.mxu0 %vm316_vm0, %v1057_v33 }
  0xf6   : > { %11128 = vmatmul.mubr.msk.f32.gmra.mrb[34].mxu0 %vm316_vm0, %v1058_v34  ;;  %v1927_v34 = vld [vmem:[%s13218_s14 + $0x123] sm:$0xff] }
  0xf7   : > { %11148 = vmatprep.mubr.msk.f32.mxu0 %vm316_vm0, %v13444_v54  ;;  %v1894_v54 = vld [vmem:[%s13218_s14 + $0x1b] sm:$0xff] }
  0xfa   : > { %11149 = vmatmul.mubr.msk.f32.vlgmr.msra.gmra.mrb[0].mxu0 %vm316_vm0, %v13457_v58  ;;  %v9578_v58 = vld [vmem:[%s16732_s1 + $0x190] sm:$0xff] }
  0xfb   : > { %12187 = vmatpush3.bf16.msra.mxu0 %v12184_v9  ;;  %11151 = vmatprep.mubr.msk.f32.mxu0 %vm316_vm0, %v13460_v59  ;;  %v1896_v59 = vld [vmem:[%s13218_s14 + $0x2b] sm:$0xff]  ;;  %v12208_v61 = vpack.c.bf16 %v9578_v58, %v9577_v57  ;;  %v1903_v9 = vld [vmem:[%s13218_s14 + $0x63] sm:$0xff] }
  0xfc   : > { %12189 = vmatprep.subr.bf16.mxu0 %v12188_v37  ;;  %v13886_v57 = vld [vmem:[%s13218_s14 + $0x5c] sm:$0xff]  ;;  %v13889_v58 = vld [vmem:[%s13218_s14 + $0x64] sm:$0xff] }
  0xfe   : > { %11152 = vmatmul.mubr.msk.f32.gmra.mrb[2].mxu0 %vm316_vm0, %v13473_v63  ;;  %v9580_v63 = vld [vmem:[%s16732_s1 + $0x1a0] sm:$0xff] }
  0xff   : > { %11154 = vmatprep.mubr.msk.f32.mxu0 %vm316_vm0, %v13476_v0  ;;  %12191 = vmatpush3.bf16.msra.mxu0 %v12188_v37  ;;  %v1898_v0 = vld [vmem:[%s13218_s14 + $0x3b] sm:$0xff] }
 0x100   : > { %12193 = vmatprep.subr.bf16.mxu0 %v12192_v40  ;;  %v9620_v37 = vld [vmem:[%s16732_s1 + $0x1c0] sm:$0xff] }
 0x101   : > { %v12220_v41 = vpack.c.bf16 %v9621_v38, %v9620_v37  ;;  %v3198_v37 = vld [vmem:[%s13218_s14 + $0x25] sm:$0xff]  ;;  %v9710_v38 = vld [vmem:[%s16732_s1 + $0x250] sm:$0xff] }
 0x102   : > { %11155 = vmatmul.mubr.msk.f32.gmra.mrb[4].mxu0 %vm316_vm0, %v13483_v2  ;;  %v12212_v2 = vpack.c.bf16 %v9580_v63, %v9579_v62  ;;  %v13906_v62 = vld [vmem:[%s13218_s14 + $0x7c] sm:$0xff]  ;;  %v13909_v63 = vld [vmem:[%s13218_s14 + $0x84] sm:$0xff] }
 0x103   : > { %11157 = vmatprep.mubr.msk.f32.mxu0 %vm316_vm0, %v13486_v3  ;;  %12195 = vmatpush3.bf16.msra.mxu0 %v12192_v40  ;;  %v1900_v3 = vld [vmem:[%s13218_s14 + $0x4b] sm:$0xff] }
 0x104   : > { %12197 = vmatprep.subr.bf16.mxu0 %v12196_v43  ;;  %v13828_v40 = vld [vmem:[%s13218_s14 + $0x24] sm:$0xff] }
 0x106   : > { %11158 = vmatmul.mubr.msk.f32.gmra.mrb[6].mxu0 %vm316_vm0, %v13502_v7  ;;  %v9619_v7 = vld [vmem:[%s16732_s1 + $0x1b8] sm:$0xff] }
 0x107   : > { %11160 = vmatprep.mubr.msk.f32.mxu0 %vm316_vm0, %v13505_v8  ;;  %12199 = vmatpush3.bf16.msra.mxu0 %v12196_v43  ;;  %v1902_v8 = vld [vmem:[%s13218_s14 + $0x5b] sm:$0xff] }
 0x108   : > { %11218 = vmatprep.subr.mxu0 %v9536_v44  ;;  %v9623_v43 = vld [vmem:[%s16732_s1 + $0x1d8] sm:$0xff] }
 0x109   : > { %v12224_v46 = vpack.c.bf16 %v9623_v43, %v9622_v42  ;;  %v9712_v43 = vld [vmem:[%s16732_s1 + $0x260] sm:$0xff] }
 0x10a   : > { %11161 = vmatmul.mubr.msk.f32.gmra.mrb[8].mxu0 %vm316_vm0, %v13512_v10  ;;  %v13763_v10 = vpack.c.bf16 %v9619_v7, %v9618_v6  ;;  %v13946_v6 = vld [vmem:[%s13218_s14 + $0xbc] sm:$0xff]  ;;  %v13949_v7 = vld [vmem:[%s13218_s14 + $0xc4] sm:$0xff] }
 0x10b   : > { %11163 = vmatprep.mubr.msk.f32.mxu0 %vm316_vm0, %v13515_v11  ;;  %11219 = vmatpush3.msra.mxu0 %v9536_v44  ;;  %v1904_v11 = vld [vmem:[%s13218_s14 + $0x6b] sm:$0xff] }
 0x10c   : > { %12201 = vmatprep.subr.bf16.mxu0 %v12200_v47  ;;  %v13841_v44 = vld [vmem:[%s13218_s14 + $0x2c] sm:$0xff] }
 0x10e   : > { %11164 = vmatmul.mubr.msk.f32.gmra.mrb[10].mxu0 %vm316_vm0, %v13522_v12  ;;  %v1905_v12 = vld [vmem:[%s13218_s14 + $0x73] sm:$0xff] }
 0x10f   : > { %11166 = vmatprep.mubr.msk.f32.mxu0 %vm316_vm0, %v13525_v13  ;;  %v1906_v13 = vld [vmem:[%s13218_s14 + $0x7b] sm:$0xff] }
 0x112   : > { %11167 = vmatmul.mubr.msk.f32.gmra.mrb[12].mxu0 %vm316_vm0, %v13532_v14  ;;  %v1907_v14 = vld [vmem:[%s13218_s14 + $0x83] sm:$0xff] }
 0x113   : > { %11169 = vmatprep.mubr.msk.f32.mxu0 %vm316_vm0, %v13535_v15  ;;  %v1908_v15 = vld [vmem:[%s13218_s14 + $0x8b] sm:$0xff] }
 0x116   : > { %11170 = vmatmul.mubr.msk.f32.gmra.mrb[14].mxu0 %vm316_vm0, %v13542_v16  ;;  %v1909_v16 = vld [vmem:[%s13218_s14 + $0x93] sm:$0xff] }
 0x117   : > { %11172 = vmatprep.mubr.msk.f32.mxu0 %vm316_vm0, %v13545_v17  ;;  %v1910_v17 = vld [vmem:[%s13218_s14 + $0x9b] sm:$0xff] }
 0x11a   : > { %11173 = vmatmul.mubr.msk.f32.gmra.mrb[16].mxu0 %vm316_vm0, %v13552_v18  ;;  %v1911_v18 = vld [vmem:[%s13218_s14 + $0xa3] sm:$0xff] }
 0x11b   : > { %11175 = vmatprep.mubr.msk.f32.mxu0 %vm316_vm0, %v13555_v19  ;;  %v1912_v19 = vld [vmem:[%s13218_s14 + $0xab] sm:$0xff] }
 0x11e   : > { %11176 = vmatmul.mubr.msk.f32.gmra.mrb[18].mxu0 %vm316_vm0, %v13562_v20  ;;  %v1913_v20 = vld [vmem:[%s13218_s14 + $0xb3] sm:$0xff] }
 0x11f   : > { %11178 = vmatprep.mubr.msk.f32.mxu0 %vm316_vm0, %v13565_v21  ;;  %v1914_v21 = vld [vmem:[%s13218_s14 + $0xbb] sm:$0xff] }
 0x122   : > { %11179 = vmatmul.mubr.msk.f32.gmra.mrb[20].mxu0 %vm316_vm0, %v13572_v22  ;;  %v1915_v22 = vld [vmem:[%s13218_s14 + $0xc3] sm:$0xff] }
 0x123   : > { %11181 = vmatprep.mubr.msk.f32.mxu0 %vm316_vm0, %v13575_v23  ;;  %v1916_v23 = vld [vmem:[%s13218_s14 + $0xcb] sm:$0xff] }
 0x126   : > { %11182 = vmatmul.mubr.msk.f32.gmra.mrb[22].mxu0 %vm316_vm0, %v13582_v24  ;;  %v1917_v24 = vld [vmem:[%s13218_s14 + $0xd3] sm:$0xff] }
 0x127   : > { %11184 = vmatprep.mubr.msk.f32.mxu0 %vm316_vm0, %v13585_v25  ;;  %v1918_v25 = vld [vmem:[%s13218_s14 + $0xdb] sm:$0xff] }
 0x12a   : > { %11185 = vmatmul.mubr.msk.f32.gmra.mrb[24].mxu0 %vm316_vm0, %v13592_v26  ;;  %v1919_v26 = vld [vmem:[%s13218_s14 + $0xe3] sm:$0xff] }
 0x12b   : > { %11187 = vmatprep.mubr.msk.f32.mxu0 %vm316_vm0, %v13595_v27  ;;  %v1920_v27 = vld [vmem:[%s13218_s14 + $0xeb] sm:$0xff] }
 0x12e   : > { %11188 = vmatmul.mubr.msk.f32.gmra.mrb[26].mxu0 %vm316_vm0, %v13602_v28  ;;  %v1921_v28 = vld [vmem:[%s13218_s14 + $0xf3] sm:$0xff] }
 0x12f   : > { %11190 = vmatprep.mubr.msk.f32.mxu0 %vm316_vm0, %v13605_v29  ;;  %v1922_v29 = vld [vmem:[%s13218_s14 + $0xfb] sm:$0xff] }
 0x132   : > { %11191 = vmatmul.mubr.msk.f32.gmra.mrb[28].mxu0 %vm316_vm0, %v1054_v30  ;;  %v1923_v30 = vld [vmem:[%s13218_s14 + $0x103] sm:$0xff] }
 0x133   : > { %11193 = vmatprep.mubr.msk.f32.mxu0 %vm316_vm0, %v1055_v31  ;;  %v1924_v31 = vld [vmem:[%s13218_s14 + $0x10b] sm:$0xff] }
 0x136   : > { %11194 = vmatmul.mubr.msk.f32.gmra.mrb[30].mxu0 %vm316_vm0, %v1056_v32  ;;  %v1925_v32 = vld [vmem:[%s13218_s14 + $0x113] sm:$0xff] }
 0x137   : > { %11196 = vmatprep.mubr.msk.f32.mxu0 %vm316_vm0, %v1057_v33  ;;  %v1926_v33 = vld [vmem:[%s13218_s14 + $0x11b] sm:$0xff] }
 0x13a   : > { %11197 = vmatmul.mubr.msk.f32.gmra.mrb[32].mxu0 %vm316_vm0, %v1491_v48  ;;  %v9625_v48 = vld [vmem:[%s16732_s1 + $0x1e8] sm:$0xff] }
 0x13b   : > { %11199 = vmatprep.mubr.msk.f32.mxu0 %vm316_vm0, %v1492_v49  ;;  %v13857_v49 = vld [vmem:[%s13218_s14 + $0x3c] sm:$0xff] }
 0x13e   : > { %11200 = vmatmul.mubr.msk.f32.gmra.mrb[34].mxu0 %vm316_vm0, %v1493_v50  ;;  %v13860_v50 = vld [vmem:[%s13218_s14 + $0x44] sm:$0xff] }
 0x13f   : > { %11220 = vmatprep.mubr.msk.f32.mxu0 %vm316_vm0, %v1893_v51 }
 0x142   : > { %11221 = vmatmul.mubr.msk.f32.vlgmr.msra.gmra.mrb[0].mxu0 %vm316_vm0, %v1894_v54  ;;  %v9626_v54 = vld [vmem:[%s16732_s1 + $0x1f0] sm:$0xff] }
 0x143   : > { %12203 = vmatpush3.bf16.msra.mxu0 %v12200_v47  ;;  %11223 = vmatprep.mubr.msk.f32.mxu0 %vm316_vm0, %v1895_v55  ;;  %v9624_v47 = vld [vmem:[%s16732_s1 + $0x1e0] sm:$0xff]  ;;  %v9663_v55 = vld [vmem:[%s16732_s1 + $0x1f8] sm:$0xff] }
 0x144   : > { %12205 = vmatprep.subr.bf16.mxu0 %v12204_v56  ;;  %v12228_v51 = vpack.c.bf16 %v9625_v48, %v9624_v47  ;;  %v9714_v48 = vld [vmem:[%s16732_s1 + $0x270] sm:$0xff] }
 0x146   : > { %11224 = vmatmul.mubr.msk.f32.gmra.mrb[2].mxu0 %vm316_vm0, %v1896_v59 }
 0x147   : > { %11226 = vmatprep.mubr.msk.f32.mxu0 %vm316_vm0, %v1897_v60  ;;  %12207 = vmatpush3.bf16.msra.mxu0 %v12204_v56  ;;  %v9664_v56 = vld [vmem:[%s16732_s1 + $0x200] sm:$0xff]  ;;  %v13896_v60 = vld [vmem:[%s13218_s14 + $0x6c] sm:$0xff] }
 0x148   : > { %12209 = vmatprep.subr.bf16.mxu0 %v12208_v61  ;;  %v12232_v59 = vpack.c.bf16 %v9664_v56, %v9663_v55  ;;  %v9716_v55 = vld [vmem:[%s16732_s1 + $0x280] sm:$0xff]  ;;  %v3207_v56 = vld [vmem:[%s13218_s14 + $0x6d] sm:$0xff] }
 0x14a   : > { %11227 = vmatmul.mubr.msk.f32.gmra.mrb[4].mxu0 %vm316_vm0, %v1898_v0  ;;  %v13916_v0 = vld [vmem:[%s13218_s14 + $0x8c] sm:$0xff] }
 0x14b   : > { %11229 = vmatprep.mubr.msk.f32.mxu0 %vm316_vm0, %v1899_v1  ;;  %12211 = vmatpush3.bf16.msra.mxu0 %v12208_v61  ;;  %v13899_v61 = vld [vmem:[%s13218_s14 + $0x74] sm:$0xff] }
 0x14c   : > { %12213 = vmatprep.subr.bf16.mxu0 %v12212_v2  ;;  %v13919_v1 = vld [vmem:[%s13218_s14 + $0x94] sm:$0xff] }
 0x14e   : > { %11230 = vmatmul.mubr.msk.f32.gmra.mrb[6].mxu0 %vm316_vm0, %v1900_v3  ;;  %v13929_v3 = vld [vmem:[%s13218_s14 + $0xa4] sm:$0xff] }
 0x14f   : > { %11232 = vmatprep.mubr.msk.f32.mxu0 %vm316_vm0, %v1901_v4  ;;  %12215 = vmatpush3.bf16.msra.mxu0 %v12212_v2  ;;  %v13926_v2 = vld [vmem:[%s13218_s14 + $0x9c] sm:$0xff]  ;;  %v13936_v4 = vld [vmem:[%s13218_s14 + $0xac] sm:$0xff] }
 0x150   : > { %11290 = vmatprep.subr.mxu0 %v9581_v5 }
 0x152   : > { %11233 = vmatmul.mubr.msk.f32.gmra.mrb[8].mxu0 %vm316_vm0, %v1902_v8  ;;  %v13956_v8 = vld [vmem:[%s13218_s14 + $0xcc] sm:$0xff] }
 0x153   : > { %11235 = vmatprep.mubr.msk.f32.mxu0 %vm316_vm0, %v1903_v9  ;;  %11291 = vmatpush3.msra.mxu0 %v9581_v5  ;;  %v13939_v5 = vld [vmem:[%s13218_s14 + $0xb4] sm:$0xff] }
 0x154   : > { %12217 = vmatprep.subr.bf16.mxu0 %v13763_v10  ;;  %v13959_v9 = vld [vmem:[%s13218_s14 + $0xd4] sm:$0xff] }
 0x156   : > { %11236 = vmatmul.mubr.msk.f32.gmra.mrb[10].mxu0 %vm316_vm0, %v1904_v11  ;;  %v13969_v11 = vld [vmem:[%s13218_s14 + $0xe4] sm:$0xff] }
 0x157   : > { %11238 = vmatprep.mubr.msk.f32.mxu0 %vm316_vm0, %v1905_v12  ;;  %v13976_v12 = vld [vmem:[%s13218_s14 + $0xec] sm:$0xff] }
 0x15a   : > { %11239 = vmatmul.mubr.msk.f32.gmra.mrb[12].mxu0 %vm316_vm0, %v1906_v13  ;;  %v13979_v13 = vld [vmem:[%s13218_s14 + $0xf4] sm:$0xff] }
 0x15b   : > { %11241 = vmatprep.mubr.msk.f32.mxu0 %vm316_vm0, %v1907_v14  ;;  %v13986_v14 = vld [vmem:[%s13218_s14 + $0xfc] sm:$0xff] }
 0x15e   : > { %11242 = vmatmul.mubr.msk.f32.gmra.mrb[14].mxu0 %vm316_vm0, %v1908_v15  ;;  %v13989_v15 = vld [vmem:[%s13218_s14 + $0x104] sm:$0xff] }
 0x15f   : > { %11244 = vmatprep.mubr.msk.f32.mxu0 %vm316_vm0, %v1909_v16  ;;  %v2359_v16 = vld [vmem:[%s13218_s14 + $0x10c] sm:$0xff] }
 0x162   : > { %11245 = vmatmul.mubr.msk.f32.gmra.mrb[16].mxu0 %vm316_vm0, %v1910_v17  ;;  %v2360_v17 = vld [vmem:[%s13218_s14 + $0x114] sm:$0xff] }
 0x163   : > { %11247 = vmatprep.mubr.msk.f32.mxu0 %vm316_vm0, %v1911_v18  ;;  %v2361_v18 = vld [vmem:[%s13218_s14 + $0x11c] sm:$0xff] }
 0x166   : > { %11248 = vmatmul.mubr.msk.f32.gmra.mrb[18].mxu0 %vm316_vm0, %v1912_v19  ;;  %v2362_v19 = vld [vmem:[%s13218_s14 + $0x124] sm:$0xff] }
 0x167   : > { %11250 = vmatprep.mubr.msk.f32.mxu0 %vm316_vm0, %v1913_v20  ;;  %v2363_v20 = vld [vmem:[%s13218_s14 + $0x12c] sm:$0x3f] }
 0x16a   : > { %11251 = vmatmul.mubr.msk.f32.gmra.mrb[20].mxu0 %vm316_vm0, %v1914_v21  ;;  %v9665_v21 = vld [vmem:[%s16732_s1 + $0x208] sm:$0xff] }
 0x16b   : > { %11253 = vmatprep.mubr.msk.f32.mxu0 %vm316_vm0, %v1915_v22  ;;  %v9666_v22 = vld [vmem:[%s16732_s1 + $0x210] sm:$0xff] }
 0x16e   : > { %11254 = vmatmul.mubr.msk.f32.gmra.mrb[22].mxu0 %vm316_vm0, %v1916_v23  ;;  %v12236_v23 = vpack.c.bf16 %v9666_v22, %v9665_v21  ;;  %v3635_v21 = vld [vmem:[%s13218_s14 + $0x36] sm:$0xff]  ;;  %v3636_v22 = vld [vmem:[%s13218_s14 + $0x3e] sm:$0xff] }
 0x16f   : > { %11256 = vmatprep.mubr.msk.f32.mxu0 %vm316_vm0, %v1917_v24  ;;  %v9667_v24 = vld [vmem:[%s16732_s1 + $0x218] sm:$0xff] }
 0x172   : > { %11257 = vmatmul.mubr.msk.f32.gmra.mrb[24].mxu0 %vm316_vm0, %v1918_v25  ;;  %v9668_v25 = vld [vmem:[%s16732_s1 + $0x220] sm:$0xff] }
 0x173   : > { %11259 = vmatprep.mubr.msk.f32.mxu0 %vm316_vm0, %v1919_v26  ;;  %v12240_v26 = vpack.c.bf16 %v9668_v25, %v9667_v24  ;;  %v3638_v24 = vld [vmem:[%s13218_s14 + $0x4e] sm:$0xff]  ;;  %v3639_v25 = vld [vmem:[%s13218_s14 + $0x56] sm:$0xff] }
 0x176   : > { %11260 = vmatmul.mubr.msk.f32.gmra.mrb[26].mxu0 %vm316_vm0, %v1920_v27  ;;  %v9669_v27 = vld [vmem:[%s16732_s1 + $0x228] sm:$0xff] }
 0x177   : > { %11262 = vmatprep.mubr.msk.f32.mxu0 %vm316_vm0, %v1921_v28  ;;  %v9670_v28 = vld [vmem:[%s16732_s1 + $0x230] sm:$0xff] }
 0x17a   : > { %11263 = vmatmul.mubr.msk.f32.gmra.mrb[28].mxu0 %vm316_vm0, %v1922_v29  ;;  %v12244_v29 = vpack.c.bf16 %v9670_v28, %v9669_v27  ;;  %v3641_v27 = vld [vmem:[%s13218_s14 + $0x66] sm:$0xff]  ;;  %v3642_v28 = vld [vmem:[%s13218_s14 + $0x6e] sm:$0xff] }
 0x17b   : > { %11265 = vmatprep.mubr.msk.f32.mxu0 %vm316_vm0, %v1923_v30  ;;  %v9671_v30 = vld [vmem:[%s16732_s1 + $0x238] sm:$0xff] }
 0x17e   : > { %11266 = vmatmul.mubr.msk.f32.gmra.mrb[30].mxu0 %vm316_vm0, %v1924_v31  ;;  %v9708_v31 = vld [vmem:[%s16732_s1 + $0x240] sm:$0xff] }
 0x17f   : > { %11268 = vmatprep.mubr.msk.f32.mxu0 %vm316_vm0, %v1925_v32  ;;  %v9709_v32 = vld [vmem:[%s16732_s1 + $0x248] sm:$0xff] }
 0x182   : > { %11269 = vmatmul.mubr.msk.f32.gmra.mrb[32].mxu0 %vm316_vm0, %v1926_v33  ;;  %v12248_v33 = vpack.c.bf16 %v9709_v32, %v9708_v31  ;;  %v3645_v31 = vld [vmem:[%s13218_s14 + $0x86] sm:$0xff]  ;;  %v3646_v32 = vld [vmem:[%s13218_s14 + $0x8e] sm:$0xff] }
 0x183   : > { %11271 = vmatprep.mubr.msk.f32.mxu0 %vm316_vm0, %v1927_v34  ;;  %v2796_v34 = vld [vmem:[%s13218_s14 + $0x12c] sm:$0xff] }
 0x186   : > { %11272 = vmatmul.mubr.msk.f32.gmra.mrb[34].mxu0 %vm316_vm0, %v1928_v35  ;;  %v2797_v35 = vld [vmem:[%s13218_s14 + $0x134] sm:$0xff] }
 0x187   : > { %11292 = vmatprep.mubr.msk.f32.mxu0 %vm316_vm0, %v2328_v36  ;;  %v2798_v36 = vld [vmem:[%s13218_s14 + $0x13c] sm:$0x3f] }
 0x18a   : > { %11293 = vmatmul.mubr.msk.f32.vlgmr.msra.gmra.mrb[0].mxu0 %vm316_vm0, %v2329_v39  ;;  %v9711_v39 = vld [vmem:[%s16732_s1 + $0x258] sm:$0xff] }
 0x18b   : > { %12219 = vmatpush3.bf16.msra.mxu0 %v13763_v10  ;;  %11295 = vmatprep.mubr.msk.f32.mxu0 %vm316_vm0, %v13828_v40  ;;  %v13966_v10 = vld [vmem:[%s13218_s14 + $0xdc] sm:$0xff]  ;;  %v12252_v42 = vpack.c.bf16 %v9711_v39, %v9710_v38  ;;  %v3653_v39 = vld [vmem:[%s13218_s14 + $0xc6] sm:$0xff] }
 0x18c   : > { %12221 = vmatprep.subr.bf16.mxu0 %v12220_v41  ;;  %v3652_v38 = vld [vmem:[%s13218_s14 + $0xbe] sm:$0xff] }
 0x18e   : > { %11296 = vmatmul.mubr.msk.f32.gmra.mrb[2].mxu0 %vm316_vm0, %v13841_v44 }
 0x18f   : > { %11298 = vmatprep.mubr.msk.f32.mxu0 %vm316_vm0, %v13844_v45  ;;  %12223 = vmatpush3.bf16.msra.mxu0 %v12220_v41  ;;  %v3200_v41 = vld [vmem:[%s13218_s14 + $0x35] sm:$0xff] }
 0x190   : > { %12225 = vmatprep.subr.bf16.mxu0 %v12224_v46 }
 0x192   : > { %11299 = vmatmul.mubr.msk.f32.gmra.mrb[4].mxu0 %vm316_vm0, %v13857_v49 }
 0x193   : > { %11301 = vmatprep.mubr.msk.f32.mxu0 %vm316_vm0, %v13860_v50  ;;  %12227 = vmatpush3.bf16.msra.mxu0 %v12224_v46  ;;  %v3202_v46 = vld [vmem:[%s13218_s14 + $0x45] sm:$0xff] }
 0x194   : > { %12229 = vmatprep.subr.bf16.mxu0 %v12228_v51 }
 0x196   : > { %11302 = vmatmul.mubr.msk.f32.gmra.mrb[6].mxu0 %vm316_vm0, %v13867_v52 }
 0x197   : > { %11304 = vmatprep.mubr.msk.f32.mxu0 %vm316_vm0, %v13870_v53  ;;  %12231 = vmatpush3.bf16.msra.mxu0 %v12228_v51  ;;  %v3204_v51 = vld [vmem:[%s13218_s14 + $0x55] sm:$0xff] }
 0x198   : > { %11362 = vmatprep.subr.mxu0 %v9626_v54 }
 0x19a   : > { %11305 = vmatmul.mubr.msk.f32.gmra.mrb[8].mxu0 %vm316_vm0, %v13886_v57 }
 0x19b   : > { %11307 = vmatprep.mubr.msk.f32.mxu0 %vm316_vm0, %v13889_v58  ;;  %11363 = vmatpush3.msra.mxu0 %v9626_v54  ;;  %v3206_v54 = vld [vmem:[%s13218_s14 + $0x65] sm:$0xff] }
 0x19c   : > { %12233 = vmatprep.subr.bf16.mxu0 %v12232_v59 }
 0x19e   : > { %11308 = vmatmul.mubr.msk.f32.gmra.mrb[10].mxu0 %vm316_vm0, %v13896_v60 }
 0x19f   : > { %11310 = vmatprep.mubr.msk.f32.mxu0 %vm316_vm0, %v13899_v61 }
 0x1a2   : > { %11311 = vmatmul.mubr.msk.f32.gmra.mrb[12].mxu0 %vm316_vm0, %v13906_v62 }
 0x1a3   : > { %11313 = vmatprep.mubr.msk.f32.mxu0 %vm316_vm0, %v13909_v63 }
 0x1a6   : > { %11314 = vmatmul.mubr.msk.f32.gmra.mrb[14].mxu0 %vm316_vm0, %v13916_v0 }
 0x1a7   : > { %11316 = vmatprep.mubr.msk.f32.mxu0 %vm316_vm0, %v13919_v1 }
 0x1aa   : > { %11317 = vmatmul.mubr.msk.f32.gmra.mrb[16].mxu0 %vm316_vm0, %v13926_v2 }
 0x1ab   : > { %11319 = vmatprep.mubr.msk.f32.mxu0 %vm316_vm0, %v13929_v3 }
 0x1ae   : > { %11320 = vmatmul.mubr.msk.f32.gmra.mrb[18].mxu0 %vm316_vm0, %v13936_v4 }
 0x1af   : > { %11322 = vmatprep.mubr.msk.f32.mxu0 %vm316_vm0, %v13939_v5 }
 0x1b2   : > { %11323 = vmatmul.mubr.msk.f32.gmra.mrb[20].mxu0 %vm316_vm0, %v13946_v6 }
 0x1b3   : > { %11325 = vmatprep.mubr.msk.f32.mxu0 %vm316_vm0, %v13949_v7 }
 0x1b6   : > { %11326 = vmatmul.mubr.msk.f32.gmra.mrb[22].mxu0 %vm316_vm0, %v13956_v8 }
 0x1b7   : > { %11328 = vmatprep.mubr.msk.f32.mxu0 %vm316_vm0, %v13959_v9 }
 0x1ba   : > { %11329 = vmatmul.mubr.msk.f32.gmra.mrb[24].mxu0 %vm316_vm0, %v13966_v10 }
 0x1bb   : > { %11331 = vmatprep.mubr.msk.f32.mxu0 %vm316_vm0, %v13969_v11 }
 0x1be   : > { %11332 = vmatmul.mubr.msk.f32.gmra.mrb[26].mxu0 %vm316_vm0, %v13976_v12 }
 0x1bf   : > { %11334 = vmatprep.mubr.msk.f32.mxu0 %vm316_vm0, %v13979_v13 }
 0x1c2   : > { %11335 = vmatmul.mubr.msk.f32.gmra.mrb[28].mxu0 %vm316_vm0, %v13986_v14 }
 0x1c3   : > { %11337 = vmatprep.mubr.msk.f32.mxu0 %vm316_vm0, %v13989_v15 }
 0x1c6   : > { %11338 = vmatmul.mubr.msk.f32.gmra.mrb[30].mxu0 %vm316_vm0, %v2359_v16 }
 0x1c7   : > { %11340 = vmatprep.mubr.msk.f32.mxu0 %vm316_vm0, %v2360_v17 }
 0x1ca   : > { %11341 = vmatmul.mubr.msk.f32.gmra.mrb[32].mxu0 %vm316_vm0, %v2361_v18 }
 0x1cb   : > { %11343 = vmatprep.mubr.msk.f32.mxu0 %vm316_vm0, %v2362_v19 }
 0x1ce   : > { %11344 = vmatmul.mubr.msk.f32.gmra.mrb[34].mxu0 %vm316_vm0, %v2363_v20  ;;  %v3634_v20 = vld [vmem:[%s13218_s14 + $0x2e] sm:$0xff] }
 0x1cf   : > { %11364 = vmatprep.mubr.msk.f32.mxu0 %vm316_vm0, %v13828_v40  ;;  %v3199_v40 = vld [vmem:[%s13218_s14 + $0x2d] sm:$0xff] }
 0x1d2   : > { %11365 = vmatmul.mubr.msk.f32.vlgmr.msra.gmra.mrb[0].mxu0 %vm316_vm0, %v13841_v44  ;;  %v9713_v44 = vld [vmem:[%s16732_s1 + $0x268] sm:$0xff] }
 0x1d3   : > { %12235 = vmatpush3.bf16.msra.mxu0 %v12232_v59  ;;  %11367 = vmatprep.mubr.msk.f32.mxu0 %vm316_vm0, %v13844_v45  ;;  %v3201_v45 = vld [vmem:[%s13218_s14 + $0x3d] sm:$0xff]  ;;  %v12256_v47 = vpack.c.bf16 %v9713_v44, %v9712_v43  ;;  %v3210_v59 = vld [vmem:[%s13218_s14 + $0x85] sm:$0xff]  ;;  %v3658_v44 = vld [vmem:[%s13218_s14 + $0xee] sm:$0xff] }
 0x1d4   : > { %12237 = vmatprep.subr.bf16.mxu0 %v12236_v23  ;;  %v3657_v43 = vld [vmem:[%s13218_s14 + $0xe6] sm:$0xff] }
 0x1d6   : > { %11368 = vmatmul.mubr.msk.f32.gmra.mrb[2].mxu0 %vm316_vm0, %v13857_v49  ;;  %v9715_v49 = vld [vmem:[%s16732_s1 + $0x278] sm:$0xff] }
 0x1d7   : > { %11370 = vmatprep.mubr.msk.f32.mxu0 %vm316_vm0, %v13860_v50  ;;  %12239 = vmatpush3.bf16.msra.mxu0 %v12236_v23  ;;  %v3203_v50 = vld [vmem:[%s13218_s14 + $0x4d] sm:$0xff] }
 0x1d8   : > { %12241 = vmatprep.subr.bf16.mxu0 %v12240_v26  ;;  %v3637_v23 = vld [vmem:[%s13218_s14 + $0x46] sm:$0xff] }
 0x1da   : > { %11371 = vmatmul.mubr.msk.f32.gmra.mrb[4].mxu0 %vm316_vm0, %v13867_v52  ;;  %v12260_v52 = vpack.c.bf16 %v9715_v49, %v9714_v48  ;;  %v3662_v48 = vld [vmem:[%s13218_s14 + $0x10e] sm:$0xff]  ;;  %v3663_v49 = vld [vmem:[%s13218_s14 + $0x116] sm:$0xff] }
 0x1db   : > { %11373 = vmatprep.mubr.msk.f32.mxu0 %vm316_vm0, %v13870_v53  ;;  %12243 = vmatpush3.bf16.msra.mxu0 %v12240_v26  ;;  %v3205_v53 = vld [vmem:[%s13218_s14 + $0x5d] sm:$0xff] }
 0x1dc   : > { %12245 = vmatprep.subr.bf16.mxu0 %v12244_v29  ;;  %v3640_v26 = vld [vmem:[%s13218_s14 + $0x5e] sm:$0xff] }
 0x1de   : > { %11374 = vmatmul.mubr.msk.f32.gmra.mrb[6].mxu0 %vm316_vm0, %v13886_v57  ;;  %v3208_v57 = vld [vmem:[%s13218_s14 + $0x75] sm:$0xff] }
 0x1df   : > { %11376 = vmatprep.mubr.msk.f32.mxu0 %vm316_vm0, %v13889_v58  ;;  %12247 = vmatpush3.bf16.msra.mxu0 %v12244_v29  ;;  %v3209_v58 = vld [vmem:[%s13218_s14 + $0x7d] sm:$0xff] }
 0x1e0   : > { %11434 = vmatprep.subr.mxu0 %v9671_v30  ;;  %v3643_v29 = vld [vmem:[%s13218_s14 + $0x76] sm:$0xff] }
 0x1e2   : > { %11377 = vmatmul.mubr.msk.f32.gmra.mrb[8].mxu0 %vm316_vm0, %v13896_v60  ;;  %v3211_v60 = vld [vmem:[%s13218_s14 + $0x8d] sm:$0xff] }
 0x1e3   : > { %11379 = vmatprep.mubr.msk.f32.mxu0 %vm316_vm0, %v13899_v61  ;;  %11435 = vmatpush3.msra.mxu0 %v9671_v30  ;;  %v3212_v61 = vld [vmem:[%s13218_s14 + $0x95] sm:$0xff]  ;;  %v3644_v30 = vld [vmem:[%s13218_s14 + $0x7e] sm:$0xff] }
 0x1e4   : > { %12249 = vmatprep.subr.bf16.mxu0 %v12248_v33 }
 0x1e6   : > { %11380 = vmatmul.mubr.msk.f32.gmra.mrb[10].mxu0 %vm316_vm0, %v13906_v62  ;;  %v3213_v62 = vld [vmem:[%s13218_s14 + $0x9d] sm:$0xff] }
 0x1e7   : > { %11382 = vmatprep.mubr.msk.f32.mxu0 %vm316_vm0, %v13909_v63  ;;  %v3214_v63 = vld [vmem:[%s13218_s14 + $0xa5] sm:$0xff] }
 0x1ea   : > { %11383 = vmatmul.mubr.msk.f32.gmra.mrb[12].mxu0 %vm316_vm0, %v13916_v0  ;;  %v3215_v0 = vld [vmem:[%s13218_s14 + $0xad] sm:$0xff] }
 0x1eb   : > { %11385 = vmatprep.mubr.msk.f32.mxu0 %vm316_vm0, %v13919_v1  ;;  %v3216_v1 = vld [vmem:[%s13218_s14 + $0xb5] sm:$0xff] }
 0x1ee   : > { %11386 = vmatmul.mubr.msk.f32.gmra.mrb[14].mxu0 %vm316_vm0, %v13926_v2  ;;  %v3217_v2 = vld [vmem:[%s13218_s14 + $0xbd] sm:$0xff] }
 0x1ef   : > { %11388 = vmatprep.mubr.msk.f32.mxu0 %vm316_vm0, %v13929_v3  ;;  %v3218_v3 = vld [vmem:[%s13218_s14 + $0xc5] sm:$0xff] }
 0x1f2   : > { %11389 = vmatmul.mubr.msk.f32.gmra.mrb[16].mxu0 %vm316_vm0, %v13936_v4  ;;  %v3219_v4 = vld [vmem:[%s13218_s14 + $0xcd] sm:$0xff] }
 0x1f3   : > { %11391 = vmatprep.mubr.msk.f32.mxu0 %vm316_vm0, %v13939_v5  ;;  %v3220_v5 = vld [vmem:[%s13218_s14 + $0xd5] sm:$0xff] }
 0x1f6   : > { %11392 = vmatmul.mubr.msk.f32.gmra.mrb[18].mxu0 %vm316_vm0, %v13946_v6  ;;  %v3221_v6 = vld [vmem:[%s13218_s14 + $0xdd] sm:$0xff] }
 0x1f7   : > { %11394 = vmatprep.mubr.msk.f32.mxu0 %vm316_vm0, %v13949_v7  ;;  %v3222_v7 = vld [vmem:[%s13218_s14 + $0xe5] sm:$0xff] }
 0x1fa   : > { %11395 = vmatmul.mubr.msk.f32.gmra.mrb[20].mxu0 %vm316_vm0, %v13956_v8  ;;  %v3223_v8 = vld [vmem:[%s13218_s14 + $0xed] sm:$0xff] }
 0x1fb   : > { %11397 = vmatprep.mubr.msk.f32.mxu0 %vm316_vm0, %v13959_v9  ;;  %v3224_v9 = vld [vmem:[%s13218_s14 + $0xf5] sm:$0xff] }
 0x1fe   : > { %11398 = vmatmul.mubr.msk.f32.gmra.mrb[22].mxu0 %vm316_vm0, %v13966_v10  ;;  %v3225_v10 = vld [vmem:[%s13218_s14 + $0xfd] sm:$0xff] }
 0x1ff   : > { %11400 = vmatprep.mubr.msk.f32.mxu0 %vm316_vm0, %v13969_v11  ;;  %v3226_v11 = vld [vmem:[%s13218_s14 + $0x105] sm:$0xff] }
 0x202   : > { %11401 = vmatmul.mubr.msk.f32.gmra.mrb[24].mxu0 %vm316_vm0, %v13976_v12  ;;  %v3227_v12 = vld [vmem:[%s13218_s14 + $0x10d] sm:$0xff] }
 0x203   : > { %11403 = vmatprep.mubr.msk.f32.mxu0 %vm316_vm0, %v13979_v13  ;;  %v3228_v13 = vld [vmem:[%s13218_s14 + $0x115] sm:$0xff] }
 0x206   : > { %11404 = vmatmul.mubr.msk.f32.gmra.mrb[26].mxu0 %vm316_vm0, %v13986_v14  ;;  %v3229_v14 = vld [vmem:[%s13218_s14 + $0x11d] sm:$0xff] }
 0x207   : > { %11406 = vmatprep.mubr.msk.f32.mxu0 %vm316_vm0, %v13989_v15  ;;  %v3230_v15 = vld [vmem:[%s13218_s14 + $0x125] sm:$0xff] }
 0x20a   : > { %11407 = vmatmul.mubr.msk.f32.gmra.mrb[28].mxu0 %vm316_vm0, %v2359_v16  ;;  %v3231_v16 = vld [vmem:[%s13218_s14 + $0x12d] sm:$0xff] }
 0x20b   : > { %11409 = vmatprep.mubr.msk.f32.mxu0 %vm316_vm0, %v2360_v17  ;;  %v3232_v17 = vld [vmem:[%s13218_s14 + $0x135] sm:$0xff] }
 0x20e   : > { %11410 = vmatmul.mubr.msk.f32.gmra.mrb[30].mxu0 %vm316_vm0, %v2361_v18  ;;  %v3233_v18 = vld [vmem:[%s13218_s14 + $0x13d] sm:$0x3f] }
 0x20f   : > { %11412 = vmatprep.mubr.msk.f32.mxu0 %vm316_vm0, %v2362_v19  ;;  %v3633_v19 = vld [vmem:[%s13218_s14 + $0x26] sm:$0xff] }
 0x212   : > { %11413 = vmatmul.mubr.msk.f32.gmra.mrb[32].mxu0 %vm316_vm0, %v2796_v34  ;;  %v3648_v34 = vld [vmem:[%s13218_s14 + $0x9e] sm:$0xff] }
 0x213   : > { %11415 = vmatprep.mubr.msk.f32.mxu0 %vm316_vm0, %v2797_v35  ;;  %v3649_v35 = vld [vmem:[%s13218_s14 + $0xa6] sm:$0xff] }
 0x216   : > { %11416 = vmatmul.mubr.msk.f32.gmra.mrb[34].mxu0 %vm316_vm0, %v2798_v36  ;;  %v3650_v36 = vld [vmem:[%s13218_s14 + $0xae] sm:$0xff] }
 0x217   : > { %11436 = vmatprep.mubr.msk.f32.mxu0 %vm316_vm0, %v3198_v37  ;;  %v3651_v37 = vld [vmem:[%s13218_s14 + $0xb6] sm:$0xff] }
 0x21a   : > { %11437 = vmatmul.mubr.msk.f32.vlgmr.msra.gmra.mrb[0].mxu0 %vm316_vm0, %v3199_v40  ;;  %v3654_v40 = vld [vmem:[%s13218_s14 + $0xce] sm:$0xff] }
 0x21b   : > { %12251 = vmatpush3.bf16.msra.mxu0 %v12248_v33  ;;  %11439 = vmatprep.mubr.msk.f32.mxu0 %vm316_vm0, %v3200_v41  ;;  %v3647_v33 = vld [vmem:[%s13218_s14 + $0x96] sm:$0xff] }
 0x21c   : > { %12253 = vmatprep.subr.bf16.mxu0 %v12252_v42  ;;  %v3655_v41 = vld [vmem:[%s13218_s14 + $0xd6] sm:$0xff] }
 0x21e   : > { %11440 = vmatmul.mubr.msk.f32.gmra.mrb[2].mxu0 %vm316_vm0, %v3201_v45  ;;  %v3659_v45 = vld [vmem:[%s13218_s14 + $0xf6] sm:$0xff] }
 0x21f   : > { %11442 = vmatprep.mubr.msk.f32.mxu0 %vm316_vm0, %v3202_v46  ;;  %12255 = vmatpush3.bf16.msra.mxu0 %v12252_v42  ;;  %v3656_v42 = vld [vmem:[%s13218_s14 + $0xde] sm:$0xff] }
 0x220   : > { %12257 = vmatprep.subr.bf16.mxu0 %v12256_v47  ;;  %v3660_v46 = vld [vmem:[%s13218_s14 + $0xfe] sm:$0xff] }
 0x222   : > { %11443 = vmatmul.mubr.msk.f32.gmra.mrb[4].mxu0 %vm316_vm0, %v3203_v50  ;;  %v3664_v50 = vld [vmem:[%s13218_s14 + $0x11e] sm:$0xff] }
 0x223   : > { %11445 = vmatprep.mubr.msk.f32.mxu0 %vm316_vm0, %v3204_v51  ;;  %12259 = vmatpush3.bf16.msra.mxu0 %v12256_v47  ;;  %v3661_v47 = vld [vmem:[%s13218_s14 + $0x106] sm:$0xff] }
 0x224   : > { %12261 = vmatprep.subr.bf16.mxu0 %v12260_v52  ;;  %v3665_v51 = vld [vmem:[%s13218_s14 + $0x126] sm:$0xff] }
 0x226   : > { %11446 = vmatmul.mubr.msk.f32.gmra.mrb[6].mxu0 %vm316_vm0, %v3205_v53  ;;  %v3667_v53 = vld [vmem:[%s13218_s14 + $0x136] sm:$0xff] }
 0x227   : > { %11448 = vmatprep.mubr.msk.f32.mxu0 %vm316_vm0, %v3206_v54  ;;  %12263 = vmatpush3.bf16.msra.mxu0 %v12260_v52  ;;  %v3666_v52 = vld [vmem:[%s13218_s14 + $0x12e] sm:$0xff]  ;;  %v3668_v54 = vld [vmem:[%s13218_s14 + $0x13e] sm:$0x3f] }
 0x228   : > { %11506 = vmatprep.subr.mxu0 %v9716_v55 }
 0x22a   : > { %11449 = vmatmul.mubr.msk.f32.gmra.mrb[8].mxu0 %vm316_vm0, %v3207_v56 }
 0x22b   : > { %11451 = vmatprep.mubr.msk.f32.mxu0 %vm316_vm0, %v3208_v57  ;;  %11507 = vmatpush3.msra.mxu0 %v9716_v55  ;;  %v14268_v55 = vld [vmem:[%s16733_s2] ss:$0 sm:$0xff] }
 0x22e   : > { %11452 = vmatmul.mubr.msk.f32.gmra.mrb[10].mxu0 %vm316_vm0, %v3209_v58 }
 0x22f   : > { %11454 = vmatprep.mubr.msk.f32.mxu0 %vm316_vm0, %v3210_v59 }
 0x232   : > { %11455 = vmatmul.mubr.msk.f32.gmra.mrb[12].mxu0 %vm316_vm0, %v3211_v60 }
 0x233   : > { %11457 = vmatprep.mubr.msk.f32.mxu0 %vm316_vm0, %v3212_v61 }
 0x236   : > { %11458 = vmatmul.mubr.msk.f32.gmra.mrb[14].mxu0 %vm316_vm0, %v3213_v62 }
 0x237   : > { %11460 = vmatprep.mubr.msk.f32.mxu0 %vm316_vm0, %v3214_v63 }
 0x23a   : > { %11461 = vmatmul.mubr.msk.f32.gmra.mrb[16].mxu0 %vm316_vm0, %v3215_v0 }
 0x23b   : > { %11463 = vmatprep.mubr.msk.f32.mxu0 %vm316_vm0, %v3216_v1 }
 0x23e   : > { %11464 = vmatmul.mubr.msk.f32.gmra.mrb[18].mxu0 %vm316_vm0, %v3217_v2 }
 0x23f   : > { %11466 = vmatprep.mubr.msk.f32.mxu0 %vm316_vm0, %v3218_v3 }
 0x242   : > { %11467 = vmatmul.mubr.msk.f32.gmra.mrb[20].mxu0 %vm316_vm0, %v3219_v4 }
 0x243   : > { %11469 = vmatprep.mubr.msk.f32.mxu0 %vm316_vm0, %v3220_v5 }
 0x246   : > { %11470 = vmatmul.mubr.msk.f32.gmra.mrb[22].mxu0 %vm316_vm0, %v3221_v6 }
 0x247   : > { %11472 = vmatprep.mubr.msk.f32.mxu0 %vm316_vm0, %v3222_v7 }
 0x24a   : > { %11473 = vmatmul.mubr.msk.f32.gmra.mrb[24].mxu0 %vm316_vm0, %v3223_v8 }
 0x24b   : > { %11475 = vmatprep.mubr.msk.f32.mxu0 %vm316_vm0, %v3224_v9 }
 0x24e   : > { %11476 = vmatmul.mubr.msk.f32.gmra.mrb[26].mxu0 %vm316_vm0, %v3225_v10 }
 0x24f   : > { %11478 = vmatprep.mubr.msk.f32.mxu0 %vm316_vm0, %v3226_v11 }
 0x252   : > { %11479 = vmatmul.mubr.msk.f32.gmra.mrb[28].mxu0 %vm316_vm0, %v3227_v12 }
 0x253   : > { %11481 = vmatprep.mubr.msk.f32.mxu0 %vm316_vm0, %v3228_v13 }
 0x256   : > { %11482 = vmatmul.mubr.msk.f32.gmra.mrb[30].mxu0 %vm316_vm0, %v3229_v14 }
 0x257   : > { %11484 = vmatprep.mubr.msk.f32.mxu0 %vm316_vm0, %v3230_v15 }
 0x25a   : > { %11485 = vmatmul.mubr.msk.f32.gmra.mrb[32].mxu0 %vm316_vm0, %v3231_v16 }
 0x25b   : > { %11487 = vmatprep.mubr.msk.f32.mxu0 %vm316_vm0, %v3232_v17 }
 0x25e   : > { %11488 = vmatmul.mubr.msk.f32.gmra.mrb[34].mxu0 %vm316_vm0, %v3233_v18 }
 0x25f   : > { %11508 = vmatprep.mubr.msk.f32.mxu0 %vm316_vm0, %v3633_v19 }
 0x262   : > { %11509 = vmatmul.mubr.msk.f32.vlgmr.msra.gmra.mrb[0].mxu0 %vm316_vm0, %v3634_v20 }
 0x263   : > { %11511 = vmatprep.mubr.msk.f32.mxu0 %vm316_vm0, %v3635_v21 }
 0x266   : > { %11512 = vmatmul.mubr.msk.f32.gmra.mrb[2].mxu0 %vm316_vm0, %v3636_v22 }
 0x267   : > { %11514 = vmatprep.mubr.msk.f32.mxu0 %vm316_vm0, %v3637_v23 }
 0x26a   : > { %11515 = vmatmul.mubr.msk.f32.gmra.mrb[4].mxu0 %vm316_vm0, %v3638_v24 }
 0x26b   : > { %11517 = vmatprep.mubr.msk.f32.mxu0 %vm316_vm0, %v3639_v25 }
 0x26e   : > { %11518 = vmatmul.mubr.msk.f32.gmra.mrb[6].mxu0 %vm316_vm0, %v3640_v26  ;;  %v9790_v26 = vld [vmem:[%s16734_s3 + $0x20] sm:$0xff] }
 0x26f   : > { %11520 = vmatprep.mubr.msk.f32.mxu0 %vm316_vm0, %v3641_v27  ;;  %v9791_v27 = vld [vmem:[%s16734_s3 + $0x28] sm:$0xff] }
 0x272   : > { %11521 = vmatmul.mubr.msk.f32.gmra.mrb[8].mxu0 %vm316_vm0, %v3642_v28 }
 0x273   : > { %11523 = vmatprep.mubr.msk.f32.mxu0 %vm316_vm0, %v3643_v29 }
 0x276   : > { %11524 = vmatmul.mubr.msk.f32.gmra.mrb[10].mxu0 %vm316_vm0, %v3644_v30 }
 0x277   : > { %11526 = vmatprep.mubr.msk.f32.mxu0 %vm316_vm0, %v3645_v31  ;;  %v12264_v31 = vpack.c.bf16 %v9791_v27, %v9790_v26 }
 0x279   : > { %12265 = vmatprep.subr.bf16.mxu1 %v12264_v31 }
 0x27a   : > { %11527 = vmatmul.mubr.msk.f32.gmra.mrb[12].mxu0 %vm316_vm0, %v3646_v32  ;;  %12267 = vmatpush3.bf16.msra.mxu1 %v12264_v31 }
 0x27b   : > { %11529 = vmatprep.mubr.msk.f32.mxu0 %vm316_vm0, %v3647_v33 }
 0x27e   : > { %11530 = vmatmul.mubr.msk.f32.gmra.mrb[14].mxu0 %vm316_vm0, %v3648_v34 }
 0x27f   : > { %11532 = vmatprep.mubr.msk.f32.mxu0 %vm316_vm0, %v3649_v35 }
 0x282   : > { %11533 = vmatmul.mubr.msk.f32.gmra.mrb[16].mxu0 %vm316_vm0, %v3650_v36 }
 0x283   : > { %11535 = vmatprep.mubr.msk.f32.mxu0 %vm316_vm0, %v3651_v37 }
 0x286   : > { %11536 = vmatmul.mubr.msk.f32.gmra.mrb[18].mxu0 %vm316_vm0, %v3652_v38 }
 0x287   : > { %11538 = vmatprep.mubr.msk.f32.mxu0 %vm316_vm0, %v3653_v39  ;;  %v13148_v39 = vmov 0.0  }
 0x288   : > { %5373 = vst.msk [vmem:[#allocation2] sm:$0xff] %vm16763_vm1, %v13148_v39  ;;  %5374 = vst.msk [vmem:[#allocation2 + $0x8] sm:$0xff] %vm16763_vm1, %v13148_v39 }
 0x289   : > { %5414 = vst.msk [vmem:[#allocation2 + $0x131] sm:$0xff] %vm16763_vm1, %v13148_v39  ;;  %5415 = vst.msk [vmem:[#allocation2 + $0x139] sm:$0xff] %vm16763_vm1, %v13148_v39 }
 0x28a   : > { %11539 = vmatmul.mubr.msk.f32.gmra.mrb[20].mxu0 %vm316_vm0, %v3654_v40  ;;  %5376 = vst.msk [vmem:[#allocation2 + $0x10] sm:$0x7] %vm5375_vm2, %v13148_v39  ;;  %5416 = vst.msk [vmem:[#allocation2 + $0x141] sm:$0x7] %vm5375_vm2, %v13148_v39 }
 0x28b   : > { %11541 = vmatprep.mubr.msk.f32.mxu0 %vm316_vm0, %v3655_v41 }
 0x28e   : > { %11542 = vmatmul.mubr.msk.f32.gmra.mrb[22].mxu0 %vm316_vm0, %v3656_v42 }
 0x28f   : > { %11544 = vmatprep.mubr.msk.f32.mxu0 %vm316_vm0, %v3657_v43 }
 0x292   : > { %11545 = vmatmul.mubr.msk.f32.gmra.mrb[24].mxu0 %vm316_vm0, %v3658_v44 }
 0x293   : > { %11547 = vmatprep.mubr.msk.f32.mxu0 %vm316_vm0, %v3659_v45 }
 0x296   : > { %11548 = vmatmul.mubr.msk.f32.gmra.mrb[26].mxu0 %vm316_vm0, %v3660_v46  ;;  %v9792_v46 = vld [vmem:[%s16734_s3 + $0x30] sm:$0xff] }
 0x297   : > { %11550 = vmatprep.mubr.msk.f32.mxu0 %vm316_vm0, %v3661_v47  ;;  %v9793_v47 = vld [vmem:[%s16734_s3 + $0x38] sm:$0xff] }
 0x29a   : > { %11551 = vmatmul.mubr.msk.f32.gmra.mrb[28].mxu0 %vm316_vm0, %v3662_v48 }
 0x29b   : > { %11553 = vmatprep.mubr.msk.f32.mxu0 %vm316_vm0, %v3663_v49 }
 0x29e   : > { %11554 = vmatmul.mubr.msk.f32.gmra.mrb[30].mxu0 %vm316_vm0, %v3664_v50 }
 0x29f   : > { %11556 = vmatprep.mubr.msk.f32.mxu0 %vm316_vm0, %v3665_v51 }
 0x2a2   : > { %11557 = vmatmul.mubr.msk.f32.gmra.mrb[32].mxu0 %vm316_vm0, %v3666_v52 }
 0x2a3   : > { %11559 = vmatprep.mubr.msk.f32.mxu0 %vm316_vm0, %v3667_v53 }
 0x2a6   : > { %11560 = vmatmul.mubr.msk.f32.gmra.mrb[34].mxu0 %vm316_vm0, %v3668_v54  ;;  %v12268_v54 = vpack.c.bf16 %v9793_v47, %v9792_v46 }
 0x2a8   : > { %12269 = vmatprep.subr.bf16.mxu1 %v12268_v54 }
 0x2a9   : > { %12271 = vmatpush3.bf16.msra.mxu1 %v12268_v54 }
 0x335   : > { %v11510_v56 = vpop.f32.mrb[0].mxu0 }
 0x336   : > { %v14271_v57 = vadd.f32 %v11510_v56, %v14268_v55  ;;  %v3853_v58 = vpop.f32.mrb[1].mxu0 }
 0x337   : > { %v14274_v59 = vadd.f32 %v14268_v55, %v3853_v58 }
 0x338   : > { %v9755_v60 = vmul.f32 -1.442695, %v14271_v57  ;;  %vm4112_vm5 = vcmp.gt.f32.partialorder %v14271_v57, 0.0 }
 0x339   : > { %v9754_v61 = vmul.f32 -1.442695, %v14274_v59  ;;  %v11513_v62 = vpop.f32.mrb[2].mxu0  ;;  %vm4111_vm7 = vcmp.gt.f32.partialorder %v14274_v59, 0.0 }
 0x33a   : > { %12996 = vpow2.f32 %v9755_v60  ;;  %v14279_v63 = vadd.f32 %v11513_v62, %v14268_v55  ;;  %v3863_v0 = vpop.f32.mrb[3].mxu0  ;;  %v5454_v62 = vld [vmem:[%s16734_s3 + $0x8] sm:$0xff] }
 0x33b   : > { %12998 = vpow2.f32 %v9754_v61  ;;  %v14282_v1 = vadd.f32 %v14268_v55, %v3863_v0  ;;  %v5453_v61 = vld [vmem:[%s16734_s3] sm:$0xff] }
 0x33c   : > { %v9757_v2 = vmul.f32 -1.442695, %v14279_v63  ;;  %vm4114_vm8 = vcmp.gt.f32.partialorder %v14279_v63, 0.0 }
 0x33d   : > { %v9756_v3 = vmul.f32 -1.442695, %v14282_v1  ;;  %v11516_v4 = vpop.f32.mrb[4].mxu0  ;;  %vm4113_vm9 = vcmp.gt.f32.partialorder %v14282_v1, 0.0 }
 0x33e   : > { %13000 = vpow2.f32 %v9757_v2  ;;  %v14287_v5 = vadd.f32 %v11516_v4, %v14268_v55  ;;  %v3873_v6 = vpop.f32.mrb[5].mxu0 }
 0x33f   : > { %13002 = vpow2.f32 %v9756_v3  ;;  %v14290_v7 = vadd.f32 %v14268_v55, %v3873_v6  ;;  %v5457_v6 = vld [vmem:[#allocation2 + $0x1] sm:$0xff] }
 0x340   : > { %v9759_v8 = vmul.f32 -1.442695, %v14287_v5  ;;  %11570 = vmatprep.mubr.msk.f32.mxu1 %vm16763_vm1, %v5457_v6  ;;  %vm4116_vm10 = vcmp.gt.f32.partialorder %v14287_v5, 0.0 }
 0x341   : > { %v9758_v9 = vmul.f32 -1.442695, %v14290_v7  ;;  %v11519_v10 = vpop.f32.mrb[6].mxu0  ;;  %vm4115_vm11 = vcmp.gt.f32.partialorder %v14290_v7, 0.0 }
 0x342   : > { %13004 = vpow2.f32 %v9759_v8  ;;  %v14295_v11 = vadd.f32 %v11519_v10, %v14268_v55  ;;  %v3883_v12 = vpop.f32.mrb[7].mxu0 }
 0x343   : > { %13006 = vpow2.f32 %v9758_v9  ;;  %v14298_v13 = vadd.f32 %v14268_v55, %v3883_v12 }
 0x344   : > { %v12997_v14 = vpop.eup %12996  ;;  %v9761_v15 = vmul.f32 -1.442695, %v14295_v11  ;;  %vm4118_vm0 = vcmp.gt.f32.partialorder %v14295_v11, 0.0 }
 0x345   : > { %v12999_v16 = vpop.eup %12998  ;;  %v9760_v17 = vmul.f32 -1.442695, %v14298_v13  ;;  %v11522_v18 = vpop.f32.mrb[8].mxu0  ;;  %v4328_v19 = vadd.f32 1.0, %v12997_v14 }
 0x346   : > { %13008 = vpow2.f32 %v9761_v15  ;;  %v14303_v20 = vadd.f32 %v11522_v18, %v14268_v55  ;;  %v3893_v21 = vpop.f32.mrb[9].mxu0  ;;  %v4327_v22 = vadd.f32 1.0, %v12999_v16  ;;  %v12272_v15 = vpack.c.bf16 %v5454_v62, %v5453_v61 }
 0x347   : > { %v14306_v23 = vadd.f32 %v14268_v55, %v3893_v21  ;;  %13010 = vpow2.f32 %v9760_v17 }
 0x348   : > { %v13001_v24 = vpop.eup %13000  ;;  %v9763_v25 = vmul.f32 -1.442695, %v14303_v20  ;;  %13012 = vrcp.f32 %v4327_v22  ;;  %12273 = vmatprep.subr.bf16.mxu1 %v12272_v15 }
 0x349   : > { %v13003_v28 = vpop.eup %13002  ;;  %v9762_v29 = vmul.f32 -1.442695, %v14306_v23  ;;  %v11525_v30 = vpop.f32.mrb[10].mxu0  ;;  %13014 = vrcp.f32 %v4328_v19  ;;  %v4330_v35 = vadd.f32 1.0, %v13001_v24 }
 0x34a   : > { %v14317_v32 = vadd.f32 %v11525_v30, %v14268_v55  ;;  %v3903_v33 = vpop.f32.mrb[11].mxu0  ;;  %v4329_v34 = vadd.f32 1.0, %v13003_v28  ;;  %13016 = vpow2.f32 %v9763_v25 }
 0x34b   : > { %v14320_v36 = vadd.f32 %v14268_v55, %v3903_v33  ;;  %13018 = vpow2.f32 %v9762_v29 }
 0x34c   : > { %v13005_v37 = vpop.eup %13004  ;;  %v9765_v38 = vmul.f32 -1.442695, %v14317_v32  ;;  %13020 = vrcp.f32 %v4329_v34  ;;  %v5458_v34 = vld [vmem:[#allocation2 + $0x9] sm:$0xff] }
 0x34d   : > { %v13007_v40 = vpop.eup %13006  ;;  %v9764_v41 = vmul.f32 -1.442695, %v14320_v36  ;;  %v11528_v42 = vpop.f32.mrb[12].mxu0  ;;  %v4332_v48 = vadd.f32 1.0, %v13005_v37  ;;  %11571 = vmatmul.mubr.msk.f32.vlgmr.msra.gmra.mrb[0].mxu1 %vm16763_vm1, %v5458_v34 }
 0x34e   : > { %v4331_v43 = vadd.f32 1.0, %v13007_v40  ;;  %13022 = vpow2.f32 %v9765_v38  ;;  %v14329_v44 = vadd.f32 %v11528_v42, %v14268_v55  ;;  %v3913_v45 = vpop.f32.mrb[13].mxu0  ;;  %12275 = vmatpush3.bf16.msra.mxu1 %v12272_v15 }
 0x34f   : > { %13024 = vrcp.f32 %v4330_v35  ;;  %v14338_v49 = vadd.f32 %v14268_v55, %v3913_v45 }
 0x350   : > { %v13009_v50 = vpop.eup %13008  ;;  %13026 = vrcp.f32 %v4331_v43  ;;  %v9767_v51 = vmul.f32 -1.442695, %v14329_v44 }
 0x351   : > { %13028 = vpow2.f32 %v9764_v41  ;;  %v9766_v52 = vmul.f32 -1.442695, %v14338_v49  ;;  %v11531_v53 = vpop.f32.mrb[14].mxu0  ;;  %v13011_v56 = vpop.eup %13010  ;;  %v4334_v2 = vadd.f32 1.0, %v13009_v50 }
 0x352   : > { %13030 = vpow2.f32 %v9767_v51  ;;  %v14343_v58 = vadd.f32 %v11531_v53, %v14268_v55  ;;  %v3923_v60 = vpop.f32.mrb[15].mxu0  ;;  %v13013_v0 = vpop.eup %13012  ;;  %v4333_v3 = vadd.f32 1.0, %v13011_v56 }
 0x353   : > { %13032 = vrcp.f32 %v4332_v48  ;;  %v14352_v4 = vadd.f32 %v14268_v55, %v3923_v60  ;;  %v13015_v8 = vpop.eup %13014  ;;  %4471 = vrot.lane.b32.xlu0 %v13013_v0, %s13149_s22 }
 0x354   : > { %13034 = vpow2.f32 %v9766_v52  ;;  %v9769_v9 = vmul.f32 -1.442695, %v14343_v58  ;;  %v13017_v10 = vpop.eup %13016 }
 0x355   : > { %13036 = vrcp.f32 %v4333_v3  ;;  %v9768_v12 = vmul.f32 -1.442695, %v14352_v4  ;;  %v11534_v14 = vpop.f32.mrb[16].mxu0  ;;  %v13019_v16 = vpop.eup %13018  ;;  %v4336_v27 = vadd.f32 1.0, %v13017_v10 }
 0x356   : > { %13038 = vpow2.f32 %v9769_v9  ;;  %v14359_v17 = vadd.f32 %v11534_v14, %v14268_v55  ;;  %v3933_v18 = vpop.f32.mrb[17].mxu0  ;;  %v13021_v19 = vpop.eup %13020  ;;  %v4335_v21 = vadd.f32 1.0, %v13019_v16 }
 0x357   : > { %13040 = vrcp.f32 %v4334_v2  ;;  %v14362_v22 = vadd.f32 %v14268_v55, %v3933_v18  ;;  %4473 = vrot.lane.b32.xlu0 %v13015_v8, %s13149_s22  ;;  %4475 = vrot.lane.b32.xlu1 %v13021_v19, %s13149_s22 }
 0x358   : > { %v13023_v24 = vpop.eup %13022  ;;  %13042 = vpow2.f32 %v9768_v12  ;;  %v9771_v25 = vmul.f32 -1.442695, %v14359_v17 }
 0x359   : > { %v13025_v26 = vpop.eup %13024  ;;  %13044 = vrcp.f32 %v4335_v21  ;;  %v9770_v28 = vmul.f32 -1.442695, %v14362_v22  ;;  %v11537_v29 = vpop.f32.mrb[18].mxu0  ;;  %v4338_v37 = vadd.f32 1.0, %v13023_v24  ;;  %v4615_v24 = vlaneseq }
 0x35a   : > { %v13027_v30 = vpop.eup %13026  ;;  %v14369_v31 = vadd.f32 %v11537_v29, %v14268_v55  ;;  %v3943_v33 = vpop.f32.mrb[19].mxu0  ;;  %13046 = vpow2.f32 %v9771_v25 }
 0x35b   : > { %v13029_v35 = vpop.eup %13028  ;;  %v14372_v38 = vadd.f32 %v14268_v55, %v3943_v33  ;;  %13048 = vpow2.f32 %v9770_v28  ;;  %4477 = vrot.lane.b32.xlu1 %v13025_v26, %s13149_s22  ;;  %4479 = vrot.lane.b32.xlu0 %v13027_v30, %s13149_s22 }
 0x35c   : > { %v13031_v39 = vpop.eup %13030  ;;  %v4337_v40 = vadd.f32 1.0, %v13029_v35  ;;  %v9773_v41 = vmul.f32 -1.442695, %v14369_v31  ;;  %13050 = vrcp.f32 %v4336_v27 }
 0x35d   : > { %v13033_v42 = vpop.eup %13032  ;;  %v11540_v43 = vpop.f32.mrb[20].mxu0  ;;  %v9772_v46 = vmul.f32 -1.442695, %v14372_v38  ;;  %v4340_v51 = vadd.f32 1.0, %v13031_v39 }
 0x35e   : > { %v13035_v45 = vpop.eup %13034  ;;  %13052 = vrcp.f32 %v4337_v40  ;;  %v14380_v47 = vadd.f32 %v11540_v43, %v14268_v55  ;;  %v3953_v48 = vpop.f32.mrb[21].mxu0 }
 0x35f   : > { %v13037_v50 = vpop.eup %13036  ;;  %13054 = vrcp.f32 %v4338_v37  ;;  %v4339_v52 = vadd.f32 1.0, %v13035_v45  ;;  %v14383_v53 = vadd.f32 %v14268_v55, %v3953_v48  ;;  %4481 = vrot.lane.b32.xlu1 %v13033_v42, %s13149_s22 }
 0x360   : > { %16792 = vst [vmem:[#allocation3_spill] sm:$0xff] %v14380_v47  ;;  %v13039_v54 = vpop.eup %13038  ;;  %13056 = vpow2.f32 %v9773_v41  ;;  %v9775_v56 = vmul.f32 -1.442695, %v14380_v47  ;;  %4483 = vrot.lane.b32.xlu0 %v13037_v50, %s13149_s22  ;;  %v14412_v41 = vshrl.u32 %v4615_v24, 7 }
 0x361   : > { %v13041_v60 = vpop.eup %13040  ;;  %13058 = vrcp.f32 %v4339_v52  ;;  %v11543_v61 = vpop.f32.mrb[22].mxu0  ;;  %v9774_v0 = vmul.f32 -1.442695, %v14383_v53  ;;  %v4342_v8 = vadd.f32 1.0, %v13039_v54 }
 0x362   : > { %v13043_v62 = vpop.eup %13042  ;;  %13060 = vpow2.f32 %v9772_v46  ;;  %v14390_v2 = vadd.f32 %v11543_v61, %v14268_v55  ;;  %v3963_v3 = vpop.f32.mrb[23].mxu0 }
 0x363   : > { %v13045_v6 = vpop.eup %13044  ;;  %13062 = vrcp.f32 %v4340_v51  ;;  %v4341_v9 = vadd.f32 1.0, %v13043_v62  ;;  %v14393_v10 = vadd.f32 %v14268_v55, %v3963_v3  ;;  %4485 = vrot.lane.b32.xlu1 %v13041_v60, %s13149_s22 }
 0x364   : > { %16793 = vst [vmem:[#allocation4_spill] sm:$0xff] %v14390_v2  ;;  %13064 = vpow2.f32 %v9775_v56  ;;  %v9777_v12 = vmul.f32 -1.442695, %v14390_v2  ;;  %4487 = vrot.lane.b32.xlu0 %v13045_v6, %s13149_s22  ;;  %v13047_v14 = vpop.eup %13046  ;;  %v14744_v2 = vadd.s32 112, %v14412_v41 }
 0x365   : > { %16794 = vst [vmem:[#allocation5_spill] sm:$0xff] %v14393_v10  ;;  %13066 = vrcp.f32 %v4341_v9  ;;  %v11546_v15 = vpop.f32.mrb[24].mxu0  ;;  %v13049_v16 = vpop.eup %13048  ;;  %v9776_v18 = vmul.f32 -1.442695, %v14393_v10  ;;  %v4344_v33 = vadd.f32 1.0, %v13047_v14 }
 0x366   : > { %13068 = vpow2.f32 %v9774_v0  ;;  %v14400_v19 = vadd.f32 %v11546_v15, %v14268_v55  ;;  %v3973_v21 = vpop.f32.mrb[25].mxu0  ;;  %v13051_v25 = vpop.eup %13050  ;;  %v4343_v26 = vadd.f32 1.0, %v13049_v16 }
 0x367   : > { %13070 = vrcp.f32 %v4342_v8  ;;  %v14403_v27 = vadd.f32 %v14268_v55, %v3973_v21  ;;  %4489 = vrot.lane.b32.xlu1 %v13051_v25, %s13149_s22  ;;  %v14425_v62 = vmul.u32.u64.low 3817748708, %v14412_v41  ;;  %v14426_v0 = vmul.u32.u64.high 3817748708, %v14412_v41, %v14425_v62 }
 0x368   : > { %16795 = vst [vmem:[#allocation6_spill] sm:$0xff] %v14400_v19  ;;  %v13053_v28 = vpop.eup %13052  ;;  %13072 = vpow2.f32 %v9777_v12  ;;  %v9779_v29 = vmul.f32 -1.442695, %v14400_v19 }
 0x369   : > { %16796 = vst [vmem:[#allocation7_spill] sm:$0xff] %v14403_v27  ;;  %v13055_v30 = vpop.eup %13054  ;;  %13074 = vrcp.f32 %v4343_v26  ;;  %v9778_v34 = vmul.f32 -1.442695, %v14403_v27  ;;  %4491 = vrot.lane.b32.xlu0 %v13053_v28, %s13149_s22  ;;  %v11549_v35 = vpop.f32.mrb[26].mxu0 }
 0x36a   : > { %v13057_v37 = vpop.eup %13056  ;;  %13076 = vpow2.f32 %v9776_v18  ;;  %v14410_v39 = vadd.f32 %v11549_v35, %v14268_v55  ;;  %v3983_v40 = vpop.f32.mrb[27].mxu0 }
 0x36b   : > { %v13059_v42 = vpop.eup %13058  ;;  %13078 = vpow2.f32 %v9779_v29  ;;  %v14415_v43 = vadd.f32 %v14268_v55, %v3983_v40  ;;  %4493 = vrot.lane.b32.xlu1 %v13055_v30, %s13149_s22  ;;  %v4346_v50 = vadd.f32 1.0, %v13057_v37 }
 0x36c   : > { %16797 = vst [vmem:[#allocation8_spill] sm:$0xff] %v14410_v39  ;;  %v13061_v45 = vpop.eup %13060  ;;  %13080 = vpow2.f32 %v9778_v34  ;;  %v9781_v46 = vmul.f32 -1.442695, %v14410_v39  ;;  %v14725_v39 = vadd.s32 96, %v14412_v41 }
 0x36d   : > { %16798 = vst [vmem:[#allocation9_spill] sm:$0xff] %v14415_v43  ;;  %v13063_v48 = vpop.eup %13062  ;;  %13082 = vrcp.f32 %v4344_v33  ;;  %v4345_v51 = vadd.f32 1.0, %v13061_v45  ;;  %v9780_v52 = vmul.f32 -1.442695, %v14415_v43  ;;  %4495 = vrot.lane.b32.xlu0 %v13059_v42, %s13149_s22  ;;  %v11552_v54 = vpop.f32.mrb[28].mxu0 }
 0x36e   : > { %v13065_v56 = vpop.eup %13064  ;;  %13084 = vpow2.f32 %v9781_v46  ;;  %v14422_v60 = vadd.f32 %v11552_v54, %v14268_v55  ;;  %v3993_v61 = vpop.f32.mrb[29].mxu0 }
 0x36f   : > { %v13067_v3 = vpop.eup %13066  ;;  %13086 = vrcp.f32 %v4345_v51  ;;  %v14429_v6 = vadd.f32 %v14268_v55, %v3993_v61  ;;  %4497 = vrot.lane.b32.xlu1 %v13063_v48, %s13149_s22  ;;  %v4348_v14 = vadd.f32 1.0, %v13065_v56  ;;  %v4658_v48 = vshrl.u32 %v14426_v0, 4 }
 0x370   : > { %16799 = vst [vmem:[#allocation10_spill] sm:$0xff] %v14422_v60  ;;  %v13069_v8 = vpop.eup %13068  ;;  %13088 = vpow2.f32 %v9780_v52  ;;  %v9783_v9 = vmul.f32 -1.442695, %v14422_v60 }
 0x371   : > { %16800 = vst [vmem:[#allocation11_spill] sm:$0xff] %v14429_v6  ;;  %v13071_v12 = vpop.eup %13070  ;;  %13090 = vrcp.f32 %v4346_v50  ;;  %v4347_v15 = vadd.f32 1.0, %v13069_v8  ;;  %v9782_v16 = vmul.f32 -1.442695, %v14429_v6  ;;  %4499 = vrot.lane.b32.xlu0 %v13067_v3, %s13149_s22  ;;  %v11555_v18 = vpop.f32.mrb[30].mxu0 }
 0x372   : > { %v13073_v21 = vpop.eup %13072  ;;  %13092 = vpow2.f32 %v9783_v9  ;;  %v14436_v24 = vadd.f32 %v11555_v18, %v14268_v55  ;;  %v4003_v25 = vpop.f32.mrb[31].mxu0 }
 0x373   : > { %v13075_v26 = vpop.eup %13074  ;;  %13094 = vrcp.f32 %v4347_v15  ;;  %v4350_v28 = vadd.f32 1.0, %v13073_v21  ;;  %v14439_v29 = vadd.f32 %v14268_v55, %v4003_v25  ;;  %4501 = vrot.lane.b32.xlu1 %v13071_v12, %s13149_s22 }
 0x374   : > { %16801 = vst [vmem:[#allocation12_spill] sm:$0xff] %v14436_v24  ;;  %v13077_v30 = vpop.eup %13076  ;;  %13096 = vpow2.f32 %v9782_v16  ;;  %v9785_v33 = vmul.f32 -1.442695, %v14436_v24  ;;  %v4154_v24 = vmul.f32 0.2, %v14295_v11 }
 0x375   : > { %16802 = vst [vmem:[#allocation13_spill] sm:$0xff] %v14439_v29  ;;  %v13079_v34 = vpop.eup %13078  ;;  %13098 = vrcp.f32 %v4348_v14  ;;  %v4349_v35 = vadd.f32 1.0, %v13077_v30  ;;  %4503 = vrot.lane.b32.xlu0 %v13075_v26, %s13149_s22  ;;  %v11558_v37 = vpop.f32.mrb[32].mxu0  ;;  %v9784_v42 = vmul.f32 -1.442695, %v14439_v29  ;;  %v4659_v14 = vmul.u32 18, %v4658_v48 }
 0x376   : > { %v13081_v40 = vpop.eup %13080  ;;  %13100 = vrcp.f32 %v4350_v28  ;;  %v14446_v45 = vadd.f32 %v11558_v37, %v14268_v55  ;;  %v4013_v46 = vpop.f32.mrb[33].mxu0  ;;  %v4352_v51 = vadd.f32 1.0, %v13079_v34  ;;  %v14465_v28 = vadd.s32 8, %v14412_v41 }
 0x377   : > { %v13083_v50 = vpop.eup %13082  ;;  %13102 = vrcp.f32 %v4349_v35  ;;  %v4351_v52 = vadd.f32 1.0, %v13081_v40  ;;  %v14450_v54 = vadd.f32 %v14268_v55, %v4013_v46  ;;  %v14473_v40 = vsub.s32 %v14412_v41, %v4659_v14 }
 0x378   : > { %16803 = vst [vmem:[#allocation14_spill] sm:$0xff] %v14446_v45  ;;  %v13085_v56 = vpop.eup %13084  ;;  %13104 = vpow2.f32 %v9785_v33  ;;  %v9787_v61 = vmul.f32 -1.442695, %v14446_v45  ;;  %4505 = vrot.lane.b32.xlu1 %v13083_v50, %s13149_s22  ;;  %v14477_v46 = vmul.u32.u64.low 3817748708, %v14465_v28  ;;  %v14478_v48 = vmul.u32.u64.high 3817748708, %v14465_v28, %v14477_v46 }
 0x379   : > { %16804 = vst [vmem:[#allocation15_spill] sm:$0xff] %v14450_v54  ;;  %v13087_v62 = vpop.eup %13086  ;;  %13106 = vrcp.f32 %v4351_v52  ;;  %v11561_v3 = vpop.f32.mrb[34].mxu0  ;;  %v9786_v0 = vmul.f32 -1.442695, %v14450_v54  ;;  %v4354_v16 = vadd.f32 1.0, %v13085_v56  ;;  %v14481_v50 = vadd.s32 24, %v14412_v41 }
 0x37a   : > { %v13089_v8 = vpop.eup %13088  ;;  %13108 = vpow2.f32 %v9784_v42  ;;  %4507 = vrot.lane.b32.xlu0 %v13087_v62, %s13149_s22  ;;  %v14457_v9 = vadd.f32 %v11561_v3, %v14268_v55  ;;  %v4023_v12 = vpop.f32.mrb[35].mxu0  ;;  %v14489_v3 = vadd.s32 32, %v14412_v41  ;;  %vm5048_vm3 = vcmp.ne.s32.totalorder %v14473_v40, 0 }
 0x37b   : > { %v13091_v15 = vpop.eup %13090  ;;  %13110 = vrcp.f32 %v4352_v51  ;;  %v4353_v18 = vadd.f32 1.0, %v13089_v8  ;;  %v14460_v21 = vadd.f32 %v14268_v55, %v4023_v12  ;;  %v14470_v55 = vadd.s32 16, %v14412_v41 }
 0x37c   : > { %16805 = vst [vmem:[#allocation16_spill] sm:$0xff] %v14457_v9  ;;  %v13093_v25 = vpop.eup %13092  ;;  %13112 = vpow2.f32 %v9787_v61  ;;  %v9789_v26 = vmul.f32 -1.442695, %v14457_v9  ;;  %4509 = vrot.lane.b32.xlu1 %v13091_v15, %s13149_s22  ;;  %vm5084_vm4 = vcmp.lt.s32.totalorder %v14473_v40, 0  ;;  %v14498_v14 = vadd.s32 18, %v14473_v40 }
 0x37d   : > { %16806 = vst [vmem:[#allocation17_spill] sm:$0xff] %v14460_v21  ;;  %v13095_v30 = vpop.eup %13094  ;;  %13114 = vrcp.f32 %v4353_v18  ;;  %v9788_v34 = vmul.f32 -1.442695, %v14460_v21  ;;  %v4356_v52 = vadd.f32 1.0, %v13093_v25  ;;  %vm14516_vm6 = vmand %vm5084_vm4, %vm5048_vm3  ;;  %v4155_v29 = vmul.f32 0.2, %v14306_v23 }
 0x37e   : > { %v13097_v33 = vpop.eup %13096  ;;  %13116 = vpow2.f32 %v9786_v0  ;;  %4511 = vrot.lane.b32.xlu0 %v13095_v30, %s13149_s22  ;;  %v14485_v61 = vmul.u32.u64.low 3817748708, %v14470_v55  ;;  %v14486_v62 = vmul.u32.u64.high 3817748708, %v14470_v55, %v14485_v61  ;;  %v14493_v0 = vadd.s32 40, %v14412_v41 }
 0x37f   : > { %v13099_v35 = vpop.eup %13098  ;;  %13118 = vrcp.f32 %v4354_v16  ;;  %v4355_v37 = vadd.f32 1.0, %v13097_v33  ;;  %v14501_v15 = vmul.u32.u64.low 3817748708, %v14481_v50  ;;  %v14502_v16 = vmul.u32.u64.high 3817748708, %v14481_v50, %v14501_v15 }
 0x380   : > { %v13101_v42 = vpop.eup %13100  ;;  %13120 = vpow2.f32 %v9789_v26  ;;  %4513 = vrot.lane.b32.xlu1 %v13099_v35, %s13149_s22  ;;  %v4147_v33 = vmul.f32 0.2, %v14274_v59  ;;  %v4669_v61 = vshrl.u32 %v14478_v48, 4  ;;  %v4680_v48 = vshrl.u32 %v14486_v62, 4 }
 0x381   : > { %v13103_v51 = vpop.eup %13102  ;;  %13122 = vrcp.f32 %v4355_v37  ;;  %v14509_v35 = vmul.u32.u64.low 3817748708, %v14489_v3  ;;  %v14510_v37 = vmul.u32.u64.high 3817748708, %v14489_v3, %v14509_v35  ;;  %v4164_v46 = vmul.f32 0.2, %v14359_v17 }
 0x382   : > { %v13105_v56 = vpop.eup %13104  ;;  %13124 = vpow2.f32 %v9788_v34  ;;  %4515 = vrot.lane.b32.xlu0 %v13103_v51, %s13149_s22  ;;  %v4148_v34 = vmul.f32 0.2, %v14271_v57  ;;  %v14533_v9 = vsel %vm4111_vm7, %v14274_v59, %v4147_v33  ;;  %v4670_v59 = vmul.u32 18, %v4669_v61 }
 0x383   : > { %v13107_v8 = vpop.eup %13106  ;;  %13126 = vrcp.f32 %v4356_v52  ;;  %v4358_v25 = vadd.f32 1.0, %v13105_v56  ;;  %v14522_v51 = vmul.u32.u64.low 3817748708, %v14493_v0  ;;  %v14523_v52 = vmul.u32.u64.high 3817748708, %v14493_v0, %v14522_v51  ;;  %16809 = vst [vmem:[#allocation18_spill] sm:$0xff] %v14533_v9 }
 0x384   : > { %v13109_v12 = vpop.eup %13108  ;;  %4517 = vrot.lane.b32.xlu1 %v13101_v42, %s13149_s22  ;;  %v4152_v35 = vmul.f32 0.2, %v14287_v5  ;;  %v14555_v61 = vadd.s32 56, %v14412_v41  ;;  %vm4117_vm7 = vcmp.gt.f32.partialorder %v14298_v13, 0.0  ;;  %v16848_v9 = vmov 0 }
 0x385   : > { %v13111_v18 = vpop.eup %13110  ;;  %v4357_v26 = vadd.f32 1.0, %v13109_v12  ;;  %v4713_v21 = vshrl.u32 %v14523_v52, 4  ;;  %v14577_v52 = vadd.s32 64, %v14412_v41 }
 0x386   : > { %v13113_v30 = vpop.eup %13112  ;;  %4519 = vrot.lane.b32.xlu0 %v13107_v8, %s13149_s22 }
 0x387   : > { %v13115_v42 = vpop.eup %13114  ;;  %13128 = vrcp.f32 %v4357_v26  ;;  %v4360_v12 = vadd.f32 1.0, %v13113_v30  ;;  %v4150_v30 = vmul.f32 0.2, %v14279_v63 }
 0x388   : > { %v13117_v56 = vpop.eup %13116  ;;  %4521 = vrot.lane.b32.xlu1 %v13111_v18, %s13149_s22  ;;  %13130 = vrcp.f32 %v4358_v25  ;;  %v14538_v18 = vsel %vm4112_vm5, %v14271_v57, %v4148_v34  ;;  %v4149_v57 = vmul.f32 0.2, %v14282_v1  ;;  %v4691_v34 = vshrl.u32 %v14502_v16, 4 }
 0x389   : > { %v13119_v8 = vpop.eup %13118  ;;  %v4359_v15 = vadd.f32 1.0, %v13117_v56  ;;  %16810 = vst [vmem:[#allocation19_spill] sm:$0xff] %v14538_v18  ;;  %v4681_v56 = vmul.u32 18, %v4680_v48  ;;  %v14564_v16 = vsub.s32 %v14465_v28, %v4670_v59  ;;  %v14574_v48 = vsel %vm4114_vm8, %v14279_v63, %v4150_v30 }
 0x38a   : > { %v13121_v26 = vpop.eup %13120  ;;  %4523 = vrot.lane.b32.xlu0 %v13115_v42, %s13149_s22  ;;  %v14544_v42 = vadd.s32 48, %v14412_v41  ;;  %16812 = vst [vmem:[#allocation21_spill] sm:$0xff] %v14574_v48  ;;  %v14581_v28 = vadd.s32 72, %v14412_v41  ;;  %v4151_v63 = vmul.f32 0.2, %v14290_v7  ;;  %v14591_v30 = vsel %vm4116_vm10, %v14287_v5, %v4152_v35  ;;  %v5456_v48 = vld [vmem:[%s16734_s3 + $0x18] sm:$0xff] }
 0x38b   : > { %v13123_v25 = vpop.eup %13122  ;;  %13132 = vrcp.f32 %v4359_v15  ;;  %v4362_v62 = vadd.f32 1.0, %v13121_v26  ;;  %v4702_v15 = vshrl.u32 %v14510_v37, 4  ;;  %v14569_v37 = vsel %vm4113_vm9, %v14282_v1, %v4149_v57  ;;  %16813 = vst [vmem:[#allocation22_spill] sm:$0xff] %v14591_v30 }
 0x38c   : > { %v13125_v51 = vpop.eup %13124  ;;  %4525 = vrot.lane.b32.xlu1 %v13119_v8, %s13149_s22  ;;  %13134 = vrcp.f32 %v4360_v12  ;;  %v14559_v12 = vmul.u32.u64.low 3817748708, %v14544_v42  ;;  %v14560_v26 = vmul.u32.u64.high 3817748708, %v14544_v42, %v14559_v12  ;;  %16811 = vst [vmem:[#allocation20_spill] sm:$0xff] %v14569_v37  ;;  %v14585_v1 = vsub.s32 %v14470_v55, %v4681_v56 }
 0x38d   : > { %v4361_v33 = vadd.f32 1.0, %v13125_v51  ;;  %v13127_v8 = vpop.eup %13126  ;;  %v4692_v51 = vmul.u32 18, %v4691_v34  ;;  %v4703_v59 = vmul.u32 18, %v4702_v15  ;;  %vm5049_vm12 = vcmp.ne.s32.totalorder %v14564_v16, 0 }
 0x38e   : > { %4527 = vrot.lane.b32.xlu0 %v13123_v25, %s13149_s22  ;;  %v14603_v55 = vmul.u32.u64.low 3817748708, %v14577_v52  ;;  %v14604_v56 = vmul.u32.u64.high 3817748708, %v14577_v52, %v14603_v55  ;;  %v14607_v5 = vadd.s32 88, %v14412_v41  ;;  %vm5085_vm13 = vcmp.lt.s32.totalorder %v14564_v16, 0 }
 0x38f   : > { %13136 = vrcp.f32 %v4361_v33  ;;  %v14594_v33 = vmul.u32.u64.low 3817748708, %v14555_v61  ;;  %v14595_v34 = vmul.u32.u64.high 3817748708, %v14555_v61, %v14594_v33  ;;  %vm5050_vm14 = vcmp.ne.s32.totalorder %v14585_v1, 0  ;;  %vm14635_vm2 = vmand %vm5085_vm13, %vm5049_vm12 }
 0x390   : > { %4529 = vrot.lane.b32.xlu1 %v13127_v8, %s13149_s22  ;;  %13138 = vrcp.f32 %v4362_v62  ;;  %v4714_v62 = vmul.u32 18, %v4713_v21  ;;  %v14598_v8 = vadd.s32 80, %v14412_v41  ;;  %v14611_v21 = vsub.s32 %v14481_v50, %v4692_v51 }
 0x391   : > { %v13129_v25 = vpop.eup %13128  ;;  %v14614_v15 = vmul.u32.u64.low 3817748708, %v14581_v28  ;;  %v14615_v12 = vmul.u32.u64.high 3817748708, %v14581_v28, %v14614_v15  ;;  %vm5086_vm15 = vcmp.lt.s32.totalorder %v14585_v1, 0  ;;  %v4724_v50 = vshrl.u32 %v14560_v26, 4 }
 0x392   : > { %4531 = vrot.lane.b32.xlu0 %v13129_v25, %s13149_s22  ;;  %v13131_v57 = vpop.eup %13130  ;;  %v14621_v25 = vsub.s32 %v14489_v3, %v4703_v59  ;;  %v14625_v33 = vsub.s32 %v14493_v0, %v4714_v62  ;;  %v14629_v51 = vmul.u32.u64.low 3817748708, %v14598_v8  ;;  %v14630_v55 = vmul.u32.u64.high 3817748708, %v14598_v8, %v14629_v51  ;;  %vm14653_vm3 = vmand %vm5086_vm15, %vm5050_vm14 }
 0x393   : > { %v14640_v3 = vadd.s32 18, %v14564_v16  ;;  %v14643_v0 = vadd.s32 18, %v14585_v1  ;;  %v14646_v26 = vmul.u32.u64.low 3817748708, %v14607_v5  ;;  %v14647_v59 = vmul.u32.u64.high 3817748708, %v14607_v5, %v14646_v26 }
 0x394   : > { %4533 = vrot.lane.b32.xlu1 %v13131_v57, %s13149_s22  ;;  %16814 = vst [vmem:[#allocation23_spill] sm:$0xff] %v14621_v25  ;;  %16815 = vst [vmem:[#allocation24_spill] sm:$0xff] %v14625_v33  ;;  %vm5051_vm4 = vcmp.ne.s32.totalorder %v14611_v21, 0  ;;  %vm5087_vm5 = vcmp.lt.s32.totalorder %v14611_v21, 0  ;;  %v14667_v51 = vadd.s32 18, %v14611_v21  ;;  %vm5052_vm8 = vcmp.ne.s32.totalorder %v14621_v25, 0 }
 0x395   : > { %v13133_v35 = vpop.eup %13132  ;;  %vm5088_vm9 = vcmp.lt.s32.totalorder %v14621_v25, 0  ;;  %v4153_v26 = vmul.f32 0.2, %v14298_v13  ;;  %vm5053_vm10 = vcmp.ne.s32.totalorder %v14625_v33, 0  ;;  %vm5089_vm12 = vcmp.lt.s32.totalorder %v14625_v33, 0 }
 0x396   : > { %4535 = vrot.lane.b32.xlu0 %v13133_v35, %s13149_s22  ;;  %v13135_v57 = vpop.eup %13134  ;;  %vm14700_vm13 = vmand %vm5088_vm9, %vm5052_vm8  ;;  %v14705_v54 = vadd.s32 18, %v14625_v33  ;;  %v4757_v60 = vshrl.u32 %v14615_v12, 4  ;;  %vm4119_vm15 = vcmp.gt.f32.partialorder %v14306_v23, 0.0  ;;  %v14728_v12 = vadd.s32 104, %v14412_v41 }
 0x397   : > { %vm14714_vm14 = vmand %vm5089_vm12, %vm5053_vm10  ;;  %v14721_v6 = vsel %vm4117_vm7, %v14298_v13, %v4153_v26  ;;  %v4768_v13 = vshrl.u32 %v14630_v55, 4  ;;  %v4779_v30 = vshrl.u32 %v14647_v59, 4  ;;  %v14753_v55 = vsel %vm4118_vm0, %v14295_v11, %v4154_v24 }
 0x398   : > { %4537 = vrot.lane.b32.xlu1 %v13135_v57, %s13149_s22  ;;  %v14662_v57 = vsel %vm4115_vm11, %v14290_v7, %v4151_v63  ;;  %v4725_v7 = vmul.u32 18, %v4724_v50  ;;  %v4735_v63 = vshrl.u32 %v14595_v34, 4  ;;  %vm14688_vm11 = vmand %vm5087_vm5, %vm5051_vm4  ;;  %v4746_v34 = vshrl.u32 %v14604_v56, 4  ;;  %16827 = vst [vmem:[#allocation28_spill] sm:$0xff] %v14705_v54 }
 0x399   : > { %v13137_v62 = vpop.eup %13136  ;;  %16820 = vst [vmem:[#allocation25_spill] sm:$0xff] %v14662_v57  ;;  %v16828_v56 = vmov 0  ;;  %16831 = vst [vmem:[#allocation30_spill] sm:$0xff] %v14721_v6  ;;  %v14763_v26 = vmul.u32.u64.low 3817748708, %v14728_v12  ;;  %v14764_v43 = vmul.u32.u64.high 3817748708, %v14728_v12, %v14763_v26  ;;  %v4780_v24 = vmul.u32 18, %v4779_v30 }
 0x39a   : > { %4539 = vrot.lane.b32.xlu0 %v13137_v62, %s13149_s22  ;;  %v13139_v45 = vpop.eup %13138  ;;  %v16824_v62 = vmov 0  ;;  %v16829_v56 = vsel %vm14714_vm14, 4294967295, %v16828_v56  ;;  %v14735_v19 = vsub.s32 %v14544_v42, %v4725_v7  ;;  %v4736_v27 = vmul.u32 18, %v4735_v63  ;;  %16832 = vst [vmem:[#allocation31_spill] sm:$0xff] %v14753_v55  ;;  %v5455_v57 = vld [vmem:[%s16734_s3 + $0x10] sm:$0xff] }
 0x39b   : > { %v16825_v62 = vsel %vm14700_vm13, 4294967295, %v16824_v62  ;;  %16830 = vst [vmem:[#allocation29_spill] sm:$0xff] %v16829_v56  ;;  %v4747_v6 = vmul.u32 18, %v4746_v34  ;;  %v14756_v7 = vsel %vm4119_vm15, %v14306_v23, %v4155_v29  ;;  %v4758_v63 = vmul.u32 18, %v4757_v60 }
 0x39c   : > { %4541 = vrot.lane.b32.xlu1 %v13139_v45, %s13149_s22  ;;  %v14693_v45 = vadd.s32 18, %v14621_v25  ;;  %16826 = vst [vmem:[#allocation27_spill] sm:$0xff] %v16825_v62  ;;  %16833 = vst [vmem:[#allocation32_spill] sm:$0xff] %v14756_v7  ;;  %v14759_v34 = vmul.u32.u64.low 3817748708, %v14725_v39  ;;  %v14760_v59 = vmul.u32.u64.high 3817748708, %v14725_v39, %v14759_v34  ;;  %vm5054_vm4 = vcmp.ne.s32.totalorder %v14735_v19, 0 }
 0x39d   : > { %v14768_v42 = vsub.s32 %v14555_v61, %v4736_v27  ;;  %v4156_v11 = vmul.f32 0.2, %v14303_v20  ;;  %v4769_v23 = vmul.u32 18, %v4768_v13  ;;  %v14773_v60 = vsub.s32 %v14577_v52, %v4747_v6 }
 0x39e   : > { %16823 = vst [vmem:[#allocation26_spill] sm:$0xff] %v14693_v45  ;;  %v14776_v29 = vmul.u32.u64.low 3817748708, %v14744_v2  ;;  %v14777_v34 = vmul.u32.u64.high 3817748708, %v14744_v2, %v14776_v29  ;;  %vm5090_vm5 = vcmp.lt.s32.totalorder %v14735_v19, 0  ;;  %v14781_v26 = vadd.s32 18, %v14735_v19 }
 0x39f   : > { %v14784_v27 = vsub.s32 %v14581_v28, %v4758_v63  ;;  %v4157_v61 = vmul.f32 0.2, %v14320_v36  ;;  %v4158_v6 = vmul.f32 0.2, %v14317_v32  ;;  %v14791_v52 = vadd.s32 120, %v14412_v41  ;;  %vm14821_vm7 = vmand %vm5090_vm5, %vm5054_vm4 }
 0x3a0   : > { %vm5055_vm9 = vcmp.ne.s32.totalorder %v14768_v42, 0  ;;  %vm5091_vm10 = vcmp.lt.s32.totalorder %v14768_v42, 0  ;;  %v14796_v30 = vsub.s32 %v14598_v8, %v4769_v23  ;;  %v14799_v28 = vadd.s32 128, %v14412_v41  ;;  %v16918_v23 = vld [vmem:[#allocation20_spill] sm:$0xff] }
 0x3a1   : > { %v14802_v13 = vadd.s32 18, %v14768_v42  ;;  %vm5056_vm12 = vcmp.ne.s32.totalorder %v14773_v60, 0  ;;  %vm5092_vm15 = vcmp.lt.s32.totalorder %v14773_v60, 0  ;;  %v14807_v63 = vsub.s32 %v14607_v5, %v4780_v24  ;;  %vm14841_vm4 = vmand %vm5091_vm10, %vm5055_vm9 }
 0x3a2   : > { %16834 = vst [vmem:[#allocation33_spill] sm:$0xff] %v14796_v30  ;;  %v14810_v29 = vadd.s32 18, %v14773_v60  ;;  %vm5057_vm1 = vcmp.ne.s32.totalorder %v14784_v27, 0  ;;  %v14815_v8 = vadd.s32 136, %v14412_v41  ;;  %v4790_v5 = vshrl.u32 %v14760_v59, 4  ;;  %vm14855_vm8 = vmand %vm5092_vm15, %vm5056_vm12 }
 0x3a3   : > { %16835 = vst [vmem:[#allocation34_spill] sm:$0xff] %v14807_v63  ;;  %v4801_v24 = vshrl.u32 %v14764_v43, 4  ;;  %v14828_v7 = vmul.u32.u64.low 3817748708, %v14791_v52  ;;  %v14829_v55 = vmul.u32.u64.high 3817748708, %v14791_v52, %v14828_v7  ;;  %vm5058_vm5 = vcmp.ne.s32.totalorder %v14796_v30, 0 }
 0x3a4   : > { %vm5094_vm0 = vcmp.lt.s32.totalorder %v14796_v30, 0  ;;  %v14848_v43 = vmul.u32.u64.low 3817748708, %v14799_v28  ;;  %v14849_v7 = vmul.u32.u64.high 3817748708, %v14799_v28, %v14848_v43  ;;  %v14860_v18 = vadd.s32 18, %v14784_v27 }
 0x3a5   : > { %vm5059_vm9 = vcmp.ne.s32.totalorder %v14807_v63, 0  ;;  %vm5095_vm10 = vcmp.lt.s32.totalorder %v14807_v63, 0  ;;  %v4812_v33 = vshrl.u32 %v14777_v34, 4  ;;  %vm16842_vm14 = vcmp.lt.s32.totalorder %v14784_v27, 0  ;;  %vm14885_vm15 = vmand %vm5094_vm0, %vm5058_vm5 }
 0x3a6   : > { %vm14869_vm13 = vmand %vm16842_vm14, %vm5057_vm1  ;;  %v16843_v43 = vmov 0  ;;  %v14874_v54 = vadd.s32 18, %v14796_v30  ;;  %v14877_v56 = vmul.u32.u64.low 3817748708, %v14815_v8  ;;  %v14878_v10 = vmul.u32.u64.high 3817748708, %v14815_v8, %v14877_v56 }
 0x3a7   : > { %v16844_v43 = vsel %vm14869_vm13, 4294967295, %v16843_v43  ;;  %v12276_v47 = vpack.c.bf16 %v5456_v48, %v5455_v57  ;;  %vm16846_vm12 = vcmp.gt.f32.partialorder %v14303_v20, 0.0  ;;  %v16849_v9 = vsel %vm14885_vm15, 4294967295, %v16848_v9  ;;  %vm14909_vm14 = vmand %vm5095_vm10, %vm5059_vm9 }
 0x3a8   : > { %16845 = vst [vmem:[#allocation35_spill] sm:$0xff] %v14874_v54  ;;  %v14883_v34 = vsel %vm16846_vm12, %v14303_v20, %v4156_v11  ;;  %v14890_v25 = vadd.s32 18, %v14807_v63  ;;  %v4791_v45 = vmul.u32 18, %v4790_v5  ;;  %v4802_v62 = vmul.u32 18, %v4801_v24 }
 0x3a9   : > { %16847 = vst [vmem:[#allocation36_spill] sm:$0xff] %v14883_v34  ;;  %vm16851_vm1 = vcmp.gt.f32.partialorder %v14320_v36, 0.0  ;;  %v16853_v57 = vmov 0  ;;  %v4159_v11 = vmul.f32 0.2, %v14338_v49  ;;  %12277 = vmatprep.subr.bf16.mxu1 %v12276_v47  ;;  %vm16856_vm0 = vcmp.gt.f32.partialorder %v14317_v32, 0.0 }
 0x3aa   : > { %16850 = vst [vmem:[#allocation37_spill] sm:$0xff] %v14890_v25  ;;  %v14903_v48 = vsel %vm16851_vm1, %v14320_v36, %v4157_v61  ;;  %v16854_v57 = vsel %vm14909_vm14, 4294967295, %v16853_v57  ;;  %v14921_v36 = vsel %vm16856_vm0, %v14317_v32, %v4158_v6  ;;  %vm4123_vm5 = vcmp.gt.f32.partialorder %v14338_v49, 0.0  ;;  %12279 = vmatpush3.bf16.msra.mxu1 %v12276_v47 }
 0x3ab   : > { %16852 = vst [vmem:[#allocation38_spill] sm:$0xff] %v14903_v48  ;;  %16855 = vst [vmem:[#allocation39_spill] sm:$0xff] %v16854_v57  ;;  %v4813_v61 = vmul.u32 18, %v4812_v33  ;;  %v14934_v5 = vadd.s32 144, %v14412_v41  ;;  %v14941_v47 = vsub.s32 %v14725_v39, %v4791_v45  ;;  %v14944_v33 = vsub.s32 %v14728_v12, %v4802_v62 }
 0x3ac   : > { %16857 = vst [vmem:[#allocation40_spill] sm:$0xff] %v14921_v36  ;;  %v4823_v6 = vshrl.u32 %v14829_v55, 4  ;;  %v14948_v20 = vsel %vm4123_vm5, %v14338_v49, %v4159_v11  ;;  %v4160_v24 = vmul.f32 0.2, %v14329_v44  ;;  %v4834_v56 = vshrl.u32 %v14849_v7, 4 }
 0x3ad   : > { %16858 = vst [vmem:[#allocation41_spill] sm:$0xff] %v14948_v20  ;;  %v14953_v36 = vadd.s32 152, %v14412_v41  ;;  %v14956_v32 = vsub.s32 %v14744_v2, %v4813_v61  ;;  %v4161_v39 = vmul.f32 0.2, %v14352_v4  ;;  %v4845_v62 = vshrl.u32 %v14878_v10, 4 }
 0x3ae   : > { %v14963_v49 = vmul.u32.u64.low 3817748708, %v14934_v5  ;;  %v14964_v45 = vmul.u32.u64.high 3817748708, %v14934_v5, %v14963_v49  ;;  %v14967_v12 = vadd.s32 160, %v14412_v41  ;;  %vm5060_vm1 = vcmp.ne.s32.totalorder %v14941_v47, 0 }
 0x3af   : > { %16859 = vst [vmem:[#allocation42_spill] sm:$0xff] %v14956_v32  ;;  %vm5096_vm0 = vcmp.lt.s32.totalorder %v14941_v47, 0  ;;  %vm5061_vm5 = vcmp.ne.s32.totalorder %v14944_v33, 0  ;;  %v4824_v2 = vmul.u32 18, %v4823_v6  ;;  %vm5097_vm10 = vcmp.lt.s32.totalorder %v14944_v33, 0 }
 0x3b0   : > { %v4835_v55 = vmul.u32 18, %v4834_v56  ;;  %v14974_v7 = vmul.u32.u64.low 3817748708, %v14953_v36  ;;  %v14975_v10 = vmul.u32.u64.high 3817748708, %v14953_v36, %v14974_v7  ;;  %vm5062_vm12 = vcmp.ne.s32.totalorder %v14956_v32, 0  ;;  %vm14983_vm14 = vmand %vm5096_vm0, %vm5060_vm1 }
 0x3b1   : > { %vm5098_vm9 = vcmp.lt.s32.totalorder %v14956_v32, 0  ;;  %v4162_v11 = vmul.f32 0.2, %v14343_v58  ;;  %v14981_v61 = vadd.s32 168, %v14412_v41  ;;  %v16860_v49 = vmov 0  ;;  %vm14994_vm15 = vmand %vm5097_vm10, %vm5061_vm5 }
 0x3b2   : > { %v16861_v49 = vsel %vm14983_vm14, 4294967295, %v16860_v49  ;;  %v14988_v6 = vadd.s32 18, %v14941_v47  ;;  %v4846_v56 = vmul.u32 18, %v4845_v62  ;;  %v16862_v48 = vmov 0  ;;  %vm15010_vm0 = vmand %vm5098_vm9, %vm5062_vm12 }
 0x3b3   : > { %v14991_v20 = vmul.u32.u64.low 3817748708, %v14967_v12  ;;  %v14992_v7 = vmul.u32.u64.high 3817748708, %v14967_v12, %v14991_v20  ;;  %v16863_v48 = vsel %vm14994_vm15, 4294967295, %v16862_v48  ;;  %v14999_v34 = vadd.s32 18, %v14944_v33 }
 0x3b4   : > { %vm16864_vm1 = vcmp.gt.f32.partialorder %v14329_v44, 0.0  ;;  %v15007_v25 = vadd.s32 18, %v14956_v32  ;;  %v4163_v62 = vmul.f32 0.2, %v14362_v22  ;;  %v16866_v57 = vmov 0 }
 0x3b5   : > { %v15004_v63 = vsel %vm16864_vm1, %v14329_v44, %v4160_v24  ;;  %v16867_v57 = vsel %vm15010_vm0, 4294967295, %v16866_v57  ;;  %vm16868_vm10 = vcmp.gt.f32.partialorder %v14352_v4, 0.0  ;;  %v15020_v30 = vsub.s32 %v14791_v52, %v4824_v2 }
 0x3b6   : > { %16865 = vst [vmem:[#allocation43_spill] sm:$0xff] %v15004_v63  ;;  %v15017_v20 = vsel %vm16868_vm10, %v14352_v4, %v4161_v39  ;;  %v15023_v44 = vsub.s32 %v14799_v28, %v4835_v55  ;;  %vm4127_vm5 = vcmp.gt.f32.partialorder %v14362_v22, 0.0  ;;  %vm16870_vm1 = vcmp.gt.f32.partialorder %v14343_v58, 0.0 }
 0x3b7   : > { %16869 = vst [vmem:[#allocation44_spill] sm:$0xff] %v15017_v20  ;;  %v15029_v24 = vsel %vm16870_vm1, %v14343_v58, %v4162_v11  ;;  %v15032_v63 = vmul.u32.u64.low 3817748708, %v14981_v61  ;;  %v15033_v54 = vmul.u32.u64.high 3817748708, %v14981_v61, %v15032_v63  ;;  %v15036_v4 = vadd.s32 176, %v14412_v41 }
 0x3b8   : > { %16871 = vst [vmem:[#allocation45_spill] sm:$0xff] %v15029_v24  ;;  %v15043_v28 = vsub.s32 %v14815_v8, %v4846_v56  ;;  %v4856_v58 = vshrl.u32 %v14964_v45, 4  ;;  %v16872_v63 = vsel %vm14516_vm6, %v14498_v14, %v14473_v40  ;;  %v15065_v45 = vsel %vm4127_vm5, %v14362_v22, %v4163_v62 }
 0x3b9   : > { %vm15052_vm12 = vcmp.lt.s32.totalorder %v16872_v63, 16  ;;  %16875 = vst [vmem:[#allocation46_spill] sm:$0xff] %v15065_v45  ;;  %vm5063_vm6 = vcmp.ne.s32.totalorder %v15020_v30, 0  ;;  %vm5099_vm10 = vcmp.lt.s32.totalorder %v15020_v30, 0  ;;  %vm5064_vm1 = vcmp.ne.s32.totalorder %v15023_v44, 0 }
 0x3ba   : > { %v4867_v40 = vshrl.u32 %v14975_v10, 4  ;;  %v15074_v14 = vmul.u32.u64.low 3817748708, %v15036_v4  ;;  %v15075_v55 = vmul.u32.u64.high 3817748708, %v15036_v4, %v15074_v14  ;;  %v15078_v11 = vadd.s32 184, %v14412_v41  ;;  %vm15101_vm0 = vmand %vm5099_vm10, %vm5063_vm6 }
 0x3bb   : > { %v4857_v22 = vmul.u32 18, %v4856_v58  ;;  %v4878_v56 = vshrl.u32 %v14992_v7, 4  ;;  %v16876_v10 = vsel %vm14635_vm2, %v14640_v3, %v14564_v16  ;;  %v16879_v63 = vsel %vm14653_vm3, %v14643_v0, %v14585_v1 }
 0x3bc   : > { %vm15088_vm9 = vcmp.lt.s32.totalorder %v16876_v10, 16  ;;  %vm15097_vm5 = vcmp.lt.s32.totalorder %v16879_v63, 16  ;;  %v15106_v35 = vadd.s32 18, %v15020_v30  ;;  %v15109_v16 = vadd.s32 18, %v15023_v44 }
 0x3bd   : > { %v4165_v3 = vmul.f32 0.2, %v14372_v38  ;;  %v4166_v15 = vmul.f32 0.2, %v14369_v31  ;;  %vm16884_vm2 = vcmp.lt.s32.totalorder %v15023_v44, 0  ;;  %v15122_v0 = vadd.s32 18, %v15043_v28 }
 0x3be   : > { %vm15117_vm3 = vmand %vm16884_vm2, %vm5064_vm1  ;;  %vm4129_vm6 = vcmp.gt.f32.partialorder %v14372_v38, 0.0  ;;  %v4868_v58 = vmul.u32 18, %v4867_v40  ;;  %vm4130_vm10 = vcmp.gt.f32.partialorder %v14369_v31, 0.0  ;;  %vm16887_vm15 = vcmp.ne.s32.totalorder %v15043_v28, 0 }
 0x3bf   : > { %vm16888_vm14 = vcmp.lt.s32.totalorder %v15043_v28, 0  ;;  %v16889_v10 = vmov 0  ;;  %v4167_v63 = vmul.f32 0.2, %v14383_v53  ;;  %v4889_v8 = vshrl.u32 %v15033_v54, 4 }
 0x3c0   : > { %vm15130_vm13 = vmand %vm16888_vm14, %vm16887_vm15  ;;  %v15137_v2 = vmul.u32.u64.low 3817748708, %v15078_v11  ;;  %v15138_v52 = vmul.u32.u64.high 3817748708, %v15078_v11, %v15137_v2  ;;  %vm16891_vm1 = vcmp.gt.f32.partialorder %v14359_v17, 0.0  ;;  %v15146_v45 = vsub.s32 %v14934_v5, %v4857_v22 }
 0x3c1   : > { %v16890_v10 = vsel %vm15130_vm13, 4294967295, %v16889_v10  ;;  %v15143_v40 = vsel %vm16891_vm1, %v14359_v17, %v4164_v46  ;;  %v4879_v24 = vmul.u32 18, %v4878_v56  ;;  %vm4131_vm15 = vcmp.gt.f32.partialorder %v14383_v53, 0.0  ;;  %v16896_v2 = vld [vmem:[#allocation27_spill] sm:$0xff]  ;;  %v16898_v17 = vld [vmem:[#allocation26_spill] sm:$0xff] }
 0x3c2   : > { %16892 = vst [vmem:[#allocation47_spill] sm:$0xff] %v15143_v40  ;;  %v16893_v54 = vsel %vm14688_vm11, %v14667_v51, %v14611_v21  ;;  %vm16897_vm2 = vnez %v16896_v2  ;;  %v16899_v46 = vld [vmem:[#allocation23_spill] sm:$0xff]  ;;  %v15178_v51 = vsel %vm4129_vm6, %v14372_v38, %v4165_v3  ;;  %v15183_v22 = vsel %vm4130_vm10, %v14369_v31, %v4166_v15  ;;  %v16903_v56 = vld [vmem:[#allocation18_spill] sm:$0xff] }
 0x3c3   : > { %vm15154_vm14 = vcmp.lt.s32.totalorder %v16893_v54, 16  ;;  %v16900_v40 = vsel %vm16897_vm2, %v16898_v17, %v16899_v46  ;;  %v15191_v2 = vsub.s32 %v14953_v36, %v4868_v58  ;;  %v16904_v17 = vld [vmem:[#allocation3_spill] sm:$0xff]  ;;  %v15195_v38 = vsel %vm4131_vm15, %v14383_v53, %v4167_v63  ;;  %v16905_v36 = vld [vmem:[#allocation5_spill] sm:$0xff] }
 0x3c4   : > { %vm15163_vm1 = vcmp.lt.s32.totalorder %v16900_v40, 16  ;;  %v4890_v3 = vmul.u32 18, %v4889_v8  ;;  %v4168_v46 = vmul.f32 0.2, %v16904_v17  ;;  %v4900_v31 = vshrl.u32 %v15075_v55, 4  ;;  %v16907_v63 = vld [vmem:[#allocation29_spill] sm:$0xff] }
 0x3c5   : > { %v4472_v20 = vpop.permute.xlu0 %4471  ;;  %vm5066_vm6 = vcmp.ne.s32.totalorder %v15146_v45, 0  ;;  %v15203_v15 = vsub.s32 %v14967_v12, %v4879_v24  ;;  %vm16906_vm2 = vcmask 261120   ;;  %vm16908_vm15 = vnez %v16907_v63  ;;  %v16909_v8 = vld [vmem:[#allocation28_spill] sm:$0xff]  ;;  %v16965_v55 = vld [vmem:[#allocation37_spill] sm:$0xff] }
 0x3c6   : > { %v4579_v40 = vmul.f32 %v4472_v20, %v16903_v56  ;;  %v16910_v56 = vld [vmem:[#allocation24_spill] sm:$0xff]  ;;  %v16914_v12 = vsel %vm14821_vm7, %v14781_v26, %v14735_v19  ;;  %v15227_v39 = vadd.s32 18, %v15146_v45  ;;  %v15237_v19 = vadd.s32 200, %v14412_v41 }
 0x3c7   : > { %v16911_v54 = vsel %vm16908_vm15, %v16909_v8, %v16910_v56  ;;  %v15241_v26 = vsub.s32 %v14981_v61, %v4890_v3  ;;  %v4901_v56 = vmul.u32 18, %v4900_v31  ;;  %vm16919_vm7 = vcmask 261120   ;;  %v16927_v31 = vld [vmem:[#allocation21_spill] sm:$0xff] }
 0x3c8   : > { %v5336_v20 = vsel %vm15052_vm12, %v4579_v40, 0.0  ;;  %vm15212_vm11 = vcmp.lt.s32.totalorder %v16911_v54, 16  ;;  %vm15221_vm12 = vcmp.lt.s32.totalorder %v16914_v12, 16  ;;  %v4169_v40 = vmul.f32 0.2, %v16905_v36  ;;  %vm16920_vm15 = vmmov %vm16919_vm7 }
 0x3c9   : > { %5377 = vst.msk [vmem:[#allocation2 + $0x13] sm:$0xff] %vm16906_vm2, %v5336_v20  ;;  %v4474_v58 = vpop.permute.xlu0 %4473  ;;  %v4476_v53 = vpop.permute.xlu1 %4475  ;;  %vm5102_vm2 = vcmp.lt.s32.totalorder %v15146_v45, 0  ;;  %v15231_v54 = vadd.s32 192, %v14412_v41  ;;  %v16917_v20 = vld [vmem:[#allocation19_spill] sm:$0xff]  ;;  %v4911_v12 = vshrl.u32 %v15138_v52, 4  ;;  %v16921_v52 = vsel %vm14841_vm4, %v14802_v13, %v14768_v42 }
 0x3ca   : > { %v4580_v63 = vmul.f32 %v4474_v58, %v16917_v20  ;;  %v4581_v8 = vmul.f32 %v4476_v53, %v16918_v23  ;;  %v15249_v53 = vadd.s32 18, %v15191_v2  ;;  %v16924_v14 = vsel %vm14855_vm8, %v14810_v29, %v14773_v60  ;;  %vm15286_vm8 = vmand %vm5102_vm2, %vm5066_vm6 }
 0x3cb   : > { %v15274_v59 = vadd.s32 18, %v15203_v15  ;;  %v15277_v42 = vmul.u32.u64.low 3817748708, %v15231_v54  ;;  %v15278_v13 = vmul.u32.u64.high 3817748708, %v15231_v54, %v15277_v42  ;;  %vm16931_vm4 = vcmp.ne.s32.totalorder %v15191_v2, 0 }
 0x3cc   : > { %v5337_v21 = vsel %vm15088_vm9, %v4580_v63, 0.0  ;;  %v5338_v58 = vsel %vm15097_vm5, %v4581_v8, 0.0  ;;  %vm15259_vm9 = vcmp.lt.s32.totalorder %v16921_v52, 16  ;;  %vm15268_vm5 = vcmp.lt.s32.totalorder %v16924_v14, 16  ;;  %v16928_v63 = vld [vmem:[#allocation25_spill] sm:$0xff] }
 0x3cd   : > { %5378 = vst.msk [vmem:[#allocation2 + $0x1b] sm:$0xff] %vm16919_vm7, %v5337_v21  ;;  %v4478_v61 = vpop.permute.xlu1 %4477  ;;  %v4480_v3 = vpop.permute.xlu0 %4479  ;;  %v15291_v29 = vmul.u32.u64.low 3817748708, %v15237_v19  ;;  %v15292_v23 = vmul.u32.u64.high 3817748708, %v15237_v19, %v15291_v29  ;;  %vm5069_vm10 = vcmp.ne.s32.totalorder %v15241_v26, 0  ;;  %vm16935_vm6 = vcmp.ne.s32.totalorder %v15203_v15, 0 }
 0x3ce   : > { %5379 = vst.msk [vmem:[#allocation2 + $0x23] sm:$0xff] %vm16920_vm15, %v5338_v58  ;;  %v4582_v20 = vmul.f32 %v4478_v61, %v16927_v31  ;;  %v4583_v37 = vmul.f32 %v4480_v3, %v16928_v63  ;;  %vm16932_vm15 = vcmp.lt.s32.totalorder %v15191_v2, 0  ;;  %v15305_v58 = vsub.s32 %v15036_v4, %v4901_v56  ;;  %v16949_v29 = vld [vmem:[#allocation30_spill] sm:$0xff] }
 0x3cf   : > { %vm15298_vm7 = vmand %vm16932_vm15, %vm16931_vm4  ;;  %v4912_v61 = vmul.u32 18, %v4911_v12  ;;  %vm16936_vm2 = vcmp.lt.s32.totalorder %v15203_v15, 0  ;;  %v16937_v42 = vmov 0  ;;  %vm16939_vm15 = vcmp.gt.f32.partialorder %v16904_v17, 0.0 }
 0x3d0   : > { %v5339_v3 = vsel %vm15154_vm14, %v4582_v20, 0.0  ;;  %v5340_v52 = vsel %vm15163_vm1, %v4583_v37, 0.0  ;;  %v5459_v14 = vld [vmem:[#allocation2 + $0x11] sm:$0xff]  ;;  %vm15315_vm4 = vmand %vm16936_vm2, %vm16935_vm6  ;;  %v15322_v4 = vsel %vm16939_vm15, %v16904_v17, %v4168_v46  ;;  %v15325_v32 = vadd.s32 208, %v14412_v41 }
 0x3d1   : > { %v16938_v42 = vsel %vm15315_vm4, 4294967295, %v16937_v42  ;;  %vm16940_vm14 = vcmask 261120   ;;  %v4482_v5 = vpop.permute.xlu1 %4481  ;;  %vm16943_vm6 = vnez %v16844_v43  ;;  %v15344_v46 = vadd.s32 18, %v15241_v26  ;;  %v16947_v20 = vld [vmem:[#allocation4_spill] sm:$0xff]  ;;  %v16948_v43 = vld [vmem:[#allocation22_spill] sm:$0xff] }
 0x3d2   : > { %5380 = vst.msk [vmem:[#allocation2 + $0x2b] sm:$0xff] %vm16940_vm14, %v5339_v3  ;;  %vm16941_vm1 = vmmov %vm16940_vm14  ;;  %v4484_v56 = vpop.permute.xlu0 %4483  ;;  %v16944_v12 = vsel %vm16943_vm6, %v14860_v18, %v14784_v27  ;;  %v4170_v63 = vmul.f32 0.2, %v16947_v20  ;;  %v4584_v37 = vmul.f32 %v4482_v5, %v16948_v43  ;;  %vm16950_vm15 = vnez %v16849_v9  ;;  %v16951_v27 = vld [vmem:[#allocation35_spill] sm:$0xff]  ;;  %v16952_v3 = vld [vmem:[#allocation33_spill] sm:$0xff] }
 0x3d3   : > { %5381 = vst.msk [vmem:[#allocation2 + $0x33] sm:$0xff] %vm16941_vm1, %v5340_v52  ;;  %vm16942_vm13 = vmmov %vm16941_vm1  ;;  %vm15335_vm2 = vcmp.lt.s32.totalorder %v16944_v12, 16  ;;  %v4585_v18 = vmul.f32 %v4484_v56, %v16949_v29  ;;  %v16953_v52 = vsel %vm16950_vm15, %v16951_v27, %v16952_v3  ;;  %vm16956_vm1 = vcmp.lt.s32.totalorder %v15241_v26, 0  ;;  %v16963_v56 = vld [vmem:[#allocation39_spill] sm:$0xff] }
 0x3d4   : > { %11573 = vmatprep.mubr.msk.f32.mxu1 %vm16942_vm13, %v5459_v14  ;;  %vm15355_vm14 = vcmp.lt.s32.totalorder %v16953_v52, 16  ;;  %vm15367_vm6 = vmand %vm16956_vm1, %vm5069_vm10  ;;  %v16957_v5 = vmov 0  ;;  %vm16959_vm15 = vcmp.gt.f32.partialorder %v16905_v36, 0.0  ;;  %v15382_v43 = vsub.s32 %v15078_v11, %v4912_v61 }
 0x3d5   : > { %v16958_v5 = vsel %vm15367_vm6, 4294967295, %v16957_v5  ;;  %v15374_v9 = vsel %vm16959_vm15, %v16905_v36, %v4169_v40  ;;  %v15385_v29 = vadd.s32 216, %v14412_v41  ;;  %v5341_v27 = vsel %vm15212_vm11, %v4584_v37, 0.0  ;;  %v5460_v40 = vld [vmem:[#allocation2 + $0x19] sm:$0xff]  ;;  %v5461_v3 = vld [vmem:[#allocation2 + $0x21] sm:$0xff]  ;;  %vm16960_vm10 = vmmov %vm16942_vm13  ;;  %v4486_v11 = vpop.permute.xlu1 %4485 }
 0x3d6   : > { %v5342_v36 = vsel %vm15221_vm12, %v4585_v18, 0.0  ;;  %v15392_v52 = vmul.u32.u64.low 3817748708, %v15325_v32  ;;  %v15393_v12 = vmul.u32.u64.high 3817748708, %v15325_v32, %v15392_v52  ;;  %5382 = vst.msk [vmem:[#allocation2 + $0x3b] sm:$0xff] %vm16960_vm10, %v5341_v27  ;;  %vm16961_vm1 = vmmov %vm16960_vm10  ;;  %v4488_v61 = vpop.permute.xlu0 %4487  ;;  %vm16964_vm13 = vnez %v16963_v56  ;;  %v16966_v37 = vld [vmem:[#allocation34_spill] sm:$0xff] }
 0x3d7   : > { %5383 = vst.msk [vmem:[#allocation2 + $0x43] sm:$0xff] %vm16961_vm1, %v5342_v36  ;;  %vm16962_vm15 = vmmov %vm16961_vm1  ;;  %v16967_v24 = vsel %vm16964_vm13, %v16965_v55, %v16966_v37  ;;  %v15413_v36 = vadd.s32 18, %v15305_v58  ;;  %vm16970_vm10 = vcmp.gt.f32.partialorder %v16947_v20, 0.0  ;;  %v9867_v52 = vld [vmem:[%s16734_s3 + $0x48] sm:$0xff]  ;;  %v4922_v17 = vshrl.u32 %v15278_v13, 4 }
 0x3d8   : > { %11574 = vmatmul.mubr.msk.f32.gmra.mrb[2].mxu1 %vm16962_vm15, %v5460_v40  ;;  %vm15403_vm11 = vcmp.lt.s32.totalorder %v16967_v24, 16  ;;  %v15418_v56 = vsel %vm16970_vm10, %v16947_v20, %v4170_v63  ;;  %v9866_v40 = vld [vmem:[%s16734_s3 + $0x40] sm:$0xff]  ;;  %v16972_v55 = vld [vmem:[#allocation31_spill] sm:$0xff]  ;;  %v16973_v24 = vld [vmem:[#allocation32_spill] sm:$0xff]  ;;  %v4933_v50 = vshrl.u32 %v15292_v23, 4  ;;  %vm16985_vm12 = vcmask 261120  }
 0x3d9   : > { %16971 = vst [vmem:[#allocation27_spill] sm:$0xff] %v15418_v56  ;;  %v4586_v37 = vmul.f32 %v4486_v11, %v16972_v55  ;;  %v4587_v27 = vmul.f32 %v4488_v61, %v16973_v24  ;;  %vm16974_vm13 = vmmov %vm16961_vm1  ;;  %vm16975_vm1 = vnez %v16861_v49  ;;  %v16983_v23 = vld [vmem:[#allocation7_spill] sm:$0xff]  ;;  %v15459_v24 = vpack.c.bf16 %v9867_v52, %v9866_v40  ;;  %v4490_v62 = vpop.permute.xlu1 %4489  ;;  %v16992_v40 = vld [vmem:[#allocation6_spill] sm:$0xff] }
 0x3da   : > { %11576 = vmatprep.mubr.msk.f32.mxu1 %vm16974_vm13, %v5461_v3  ;;  %v16976_v20 = vsel %vm16975_vm1, %v14988_v6, %v14941_v47  ;;  %v15443_v11 = vmul.u32.u64.low 3817748708, %v15385_v29  ;;  %v15444_v3 = vmul.u32.u64.high 3817748708, %v15385_v29, %v15443_v11  ;;  %v5462_v6 = vld [vmem:[#allocation2 + $0x29] sm:$0xff]  ;;  %v5463_v61 = vld [vmem:[#allocation2 + $0x31] sm:$0xff]  ;;  %vm16979_vm13 = vcmp.ne.s32.totalorder %v15305_v58, 0 }
 0x3db   : > { %vm15434_vm15 = vcmp.lt.s32.totalorder %v16976_v20, 16  ;;  %v5343_v49 = vsel %vm15259_vm9, %v4586_v37, 0.0  ;;  %v5344_v47 = vsel %vm15268_vm5, %v4587_v27, 0.0  ;;  %vm16980_vm1 = vcmp.lt.s32.totalorder %v15305_v58, 0  ;;  %16984 = vst [vmem:[#allocation26_spill] sm:$0xff] %v15459_v24  ;;  %vm16986_vm9 = vmmov %vm16985_vm12  ;;  %v16993_v20 = vld [vmem:[#allocation36_spill] sm:$0xff]  ;;  %12281 = vmatprep.subr.bf16.mxu1 %v15459_v24 }
 0x3dc   : > { %vm15454_vm6 = vmand %vm16980_vm1, %vm16979_vm13  ;;  %v4171_v55 = vmul.f32 0.2, %v16983_v23  ;;  %5384 = vst.msk [vmem:[#allocation2 + $0x4b] sm:$0xff] %vm16985_vm12, %v5343_v49  ;;  %vm16988_vm5 = vnez %v16863_v48  ;;  %v15474_v37 = vadd.s32 18, %v15382_v43  ;;  %v4172_v52 = vmul.f32 0.2, %v16992_v40  ;;  %v4492_v49 = vpop.permute.xlu0 %4491 }
 0x3dd   : > { %5385 = vst.msk [vmem:[#allocation2 + $0x53] sm:$0xff] %vm16986_vm9, %v5344_v47  ;;  %vm16987_vm10 = vmmov %vm16986_vm9  ;;  %v16989_v21 = vsel %vm16988_vm5, %v14999_v34, %v14944_v33  ;;  %v4588_v11 = vmul.f32 %v4490_v62, %v16993_v20  ;;  %v16996_v34 = vld [vmem:[#allocation42_spill] sm:$0xff]  ;;  %vm17000_vm1 = vcmp.ne.s32.totalorder %v15382_v43, 0  ;;  %vm17001_vm12 = vcmp.lt.s32.totalorder %v15382_v43, 0  ;;  %v4494_v31 = vpop.permute.xlu1 %4493  ;;  %v17030_v63 = vld [vmem:[#allocation43_spill] sm:$0xff] }
 0x3de   : > { %11577 = vmatmul.mubr.msk.f32.gmra.mrb[4].mxu1 %vm16987_vm10, %v5462_v6  ;;  %vm15469_vm13 = vcmp.lt.s32.totalorder %v16989_v21, 16  ;;  %vm16994_vm10 = vmmov %vm16986_vm9  ;;  %vm16995_vm9 = vnez %v16867_v57  ;;  %v4923_v6 = vmul.u32 18, %v4922_v17  ;;  %v4934_v62 = vmul.u32 18, %v4933_v50  ;;  %v17005_v57 = vld [vmem:[#allocation38_spill] sm:$0xff] }
 0x3df   : > { %11579 = vmatprep.mubr.msk.f32.mxu1 %vm16994_vm10, %v5463_v61  ;;  %v16997_v48 = vsel %vm16995_vm9, %v15007_v25, %v16996_v34  ;;  %vm15494_vm4 = vmand %vm17001_vm12, %vm17000_vm1  ;;  %v17004_v61 = vld [vmem:[#allocation9_spill] sm:$0xff]  ;;  %v4589_v25 = vmul.f32 %v4492_v49, %v17005_v57  ;;  %v5214_v20 = vsel %vm15454_vm6, %v15413_v36, %v15305_v58  ;;  %v17006_v34 = vld [vmem:[#allocation8_spill] sm:$0xff]  ;;  %v5345_v56 = vsel %vm15335_vm2, %v4588_v11, 0.0 }
 0x3e0   : > { %vm15486_vm5 = vcmp.lt.s32.totalorder %v16997_v48, 16  ;;  %v4173_v21 = vmul.f32 0.2, %v17004_v61  ;;  %v4174_v48 = vmul.f32 0.2, %v17006_v34  ;;  %v5464_v17 = vld [vmem:[#allocation2 + $0x39] sm:$0xff]  ;;  %vm17008_vm9 = vmmov %vm16994_vm10  ;;  %v17010_v11 = vsel %vm15101_vm0, %v15106_v35, %v15020_v30  ;;  %v4496_v35 = vpop.permute.xlu0 %4495 }
 0x3e1   : > { %v5465_v50 = vld [vmem:[#allocation2 + $0x41] sm:$0xff]  ;;  %vm17007_vm1 = vcmp.gt.f32.partialorder %v16983_v23, 0.0  ;;  %v4944_v49 = vshrl.u32 %v15393_v12, 4  ;;  %vm4138_vm12 = vcmp.gt.f32.partialorder %v17006_v34, 0.0  ;;  %5386 = vst.msk [vmem:[#allocation2 + $0x5b] sm:$0xff] %vm17008_vm9, %v5345_v56  ;;  %v5346_v57 = vsel %vm15355_vm14, %v4589_v25, 0.0  ;;  %vm17009_vm10 = vmmov %vm17008_vm9 }
 0x3e2   : > { %v15512_v24 = vsel %vm17007_vm1, %v16983_v23, %v4171_v55  ;;  %11580 = vmatmul.mubr.msk.f32.gmra.mrb[6].mxu1 %vm17009_vm10, %v5464_v17  ;;  %vm15525_vm2 = vcmp.lt.s32.totalorder %v17010_v11, 16  ;;  %v5215_v12 = vsel %vm15494_vm4, %v15474_v37, %v15382_v43  ;;  %vm17013_vm14 = vcmp.gt.f32.partialorder %v16992_v40, 0.0  ;;  %vm17014_vm10 = vmmov %vm17008_vm9  ;;  %v17015_v30 = vld [vmem:[#allocation40_spill] sm:$0xff]  ;;  %v17058_v25 = vld [vmem:[#allocation47_spill] sm:$0xff] }
 0x3e3   : > { %v15536_v14 = vsel %vm17013_vm14, %v16992_v40, %v4172_v52  ;;  %v15539_v56 = vadd.s32 224, %v14412_v41  ;;  %5387 = vst.msk [vmem:[#allocation2 + $0x63] sm:$0xff] %vm17014_vm10, %v5346_v57  ;;  %v4590_v7 = vmul.f32 %v4494_v31, %v17015_v30  ;;  %vm17016_vm0 = vmmov %vm17008_vm9  ;;  %v17017_v55 = vsel %vm15117_vm3, %v15109_v16, %v15023_v44  ;;  %v17022_v16 = vld [vmem:[#allocation11_spill] sm:$0xff] }
 0x3e4   : > { %11582 = vmatprep.mubr.msk.f32.mxu1 %vm17016_vm0, %v5465_v50  ;;  %vm15549_vm1 = vcmp.lt.s32.totalorder %v17017_v55, 16  ;;  %v15554_v40 = vsub.s32 %v15231_v54, %v4923_v6  ;;  %v15557_v52 = vsub.s32 %v15237_v19, %v4934_v62  ;;  %vm17020_vm9 = vcmp.gt.f32.partialorder %v17004_v61, 0.0  ;;  %v17021_v50 = vld [vmem:[#allocation41_spill] sm:$0xff]  ;;  %v5466_v6 = vld [vmem:[#allocation2 + $0x49] sm:$0xff]  ;;  %vm17023_vm14 = vmmov %vm17016_vm0 }
 0x3e5   : > { %v15562_v17 = vsel %vm17020_vm9, %v17004_v61, %v4173_v21  ;;  %v4591_v1 = vmul.f32 %v4496_v35, %v17021_v50  ;;  %v15568_v44 = vsel %vm4138_vm12, %v17006_v34, %v4174_v48  ;;  %v4175_v57 = vmul.f32 0.2, %v17022_v16  ;;  %v5467_v62 = vld [vmem:[#allocation2 + $0x51] sm:$0xff]  ;;  %vm17024_vm12 = vmmov %vm17016_vm0  ;;  %v4498_v34 = vpop.permute.xlu1 %4497 }
 0x3e6   : > { %v15572_v54 = vadd.s32 232, %v14412_v41  ;;  %v5347_v19 = vsel %vm15403_vm11, %v4590_v7, 0.0  ;;  %v4945_v31 = vmul.u32 18, %v4944_v49  ;;  %v4955_v61 = vshrl.u32 %v15444_v3, 4  ;;  %11583 = vmatmul.mubr.msk.f32.gmra.mrb[8].mxu1 %vm17024_vm12, %v5466_v6  ;;  %v4500_v7 = vpop.permute.xlu0 %4499 }
 0x3e7   : > { %vm4139_vm3 = vcmp.gt.f32.partialorder %v17022_v16, 0.0  ;;  %5388 = vst.msk [vmem:[#allocation2 + $0x6b] sm:$0xff] %vm17023_vm14, %v5347_v19  ;;  %v5348_v21 = vsel %vm15434_vm15, %v4591_v1, 0.0  ;;  %vm17025_vm10 = vnez %v16890_v10  ;;  %v15596_v11 = vadd.s32 240, %v14412_v41  ;;  %vm17029_vm15 = vmmov %vm17016_vm0  ;;  %11585 = vmatprep.mubr.msk.f32.mxu1 %vm17016_vm0, %v5467_v62 }
 0x3e8   : > { %v17026_v18 = vsel %vm17025_vm10, %v15122_v0, %v15043_v28  ;;  %v15592_v3 = vmul.u32.u64.low 3817748708, %v15539_v56  ;;  %v15593_v49 = vmul.u32.u64.high 3817748708, %v15539_v56, %v15592_v3  ;;  %5389 = vst.msk [vmem:[#allocation2 + $0x73] sm:$0xff] %vm17029_vm15, %v5348_v21  ;;  %v4592_v30 = vmul.f32 %v4498_v34, %v17030_v63  ;;  %v17031_v28 = vld [vmem:[#allocation44_spill] sm:$0xff]  ;;  %v5468_v6 = vld [vmem:[#allocation2 + $0x59] sm:$0xff] }
 0x3e9   : > { %vm15587_vm11 = vcmp.lt.s32.totalorder %v17026_v18, 16  ;;  %vm5072_vm9 = vcmp.ne.s32.totalorder %v15554_v40, 0  ;;  %vm5108_vm14 = vcmp.lt.s32.totalorder %v15554_v40, 0  ;;  %vm5073_vm12 = vcmp.ne.s32.totalorder %v15557_v52, 0  ;;  %v4502_v62 = vpop.permute.xlu1 %4501 }
 0x3ea   : > { %v4593_v0 = vmul.f32 %v4500_v7, %v17031_v28  ;;  %v17032_v10 = vsel %vm15286_vm8, %v15227_v39, %v15146_v45  ;;  %v15615_v55 = vmul.u32.u64.low 3817748708, %v15572_v54  ;;  %v15616_v50 = vmul.u32.u64.high 3817748708, %v15572_v54, %v15615_v55  ;;  %vm17035_vm8 = vmmov %vm17016_vm0  ;;  %11586 = vmatmul.mubr.msk.f32.gmra.mrb[10].mxu1 %vm17016_vm0, %v5468_v6  ;;  %v5469_v21 = vld [vmem:[#allocation2 + $0x61] sm:$0xff]  ;;  %v4504_v3 = vpop.permute.xlu0 %4503 }
 0x3eb   : > { %vm15610_vm10 = vcmp.lt.s32.totalorder %v17032_v10, 16  ;;  %v15619_v1 = vadd.s32 248, %v14412_v41  ;;  %v5349_v19 = vsel %vm15469_vm13, %v4592_v30, 0.0  ;;  %vm5109_vm15 = vcmp.lt.s32.totalorder %v15557_v52, 0  ;;  %v17044_v30 = vld [vmem:[#allocation46_spill] sm:$0xff] }
 0x3ec   : > { %v15625_v60 = vsub.s32 %v15325_v32, %v4945_v31  ;;  %v4956_v45 = vmul.u32 18, %v4955_v61  ;;  %5390 = vst.msk [vmem:[#allocation2 + $0x7b] sm:$0xff] %vm17035_vm8, %v5349_v19  ;;  %v5350_v39 = vsel %vm15486_vm5, %v4593_v0, 0.0  ;;  %v17036_v27 = vsel %vm15298_vm7, %v15249_v53, %v15191_v2  ;;  %vm17039_vm5 = vmmov %vm17016_vm0  ;;  %v17040_v61 = vld [vmem:[#allocation45_spill] sm:$0xff]  ;;  %v17051_v19 = vld [vmem:[#allocation10_spill] sm:$0xff] }
 0x3ed   : > { %vm15636_vm13 = vcmp.lt.s32.totalorder %v17036_v27, 16  ;;  %v15641_v32 = vmul.u32.u64.low 3817748708, %v15596_v11  ;;  %v15642_v31 = vmul.u32.u64.high 3817748708, %v15596_v11, %v15641_v32  ;;  %v15645_v33 = vadd.s32 256, %v14412_v41  ;;  %5391 = vst.msk [vmem:[#allocation2 + $0x83] sm:$0xff] %vm17039_vm5, %v5350_v39  ;;  %vm17041_vm8 = vmmov %vm17016_vm0  ;;  %v4506_v39 = vpop.permute.xlu1 %4505 }
 0x3ee   : > { %v4594_v18 = vmul.f32 %v4502_v62, %v17040_v61  ;;  %11588 = vmatprep.mubr.msk.f32.mxu1 %vm17041_vm8, %v5469_v21  ;;  %vm15654_vm7 = vmand %vm5108_vm14, %vm5072_vm9  ;;  %v5180_v53 = vadd.s32 18, %v15554_v40  ;;  %v15660_v8 = vadd.s32 18, %v15557_v52  ;;  %v15665_v63 = vsel %vm4139_vm3, %v17022_v16, %v4175_v57 }
 0x3ef   : > { %v4595_v7 = vmul.f32 %v4504_v3, %v17044_v30  ;;  %vm17045_vm0 = vnez %v16938_v42  ;;  %vm15681_vm14 = vmand %vm5109_vm15, %vm5073_vm12  ;;  %v15686_v16 = vmul.u32.u64.low 3817748708, %v15619_v1  ;;  %v15687_v57 = vmul.u32.u64.high 3817748708, %v15619_v1, %v15686_v16  ;;  %v5471_v23 = vld [vmem:[#allocation2 + $0x71] sm:$0xff] }
 0x3f0   : > { %v17046_v28 = vsel %vm17045_vm0, %v15274_v59, %v15203_v15  ;;  %v15690_v42 = vadd.s32 264, %v14412_v41  ;;  %v5351_v15 = vsel %vm15525_vm2, %v4594_v18, 0.0  ;;  %v5470_v59 = vld [vmem:[#allocation2 + $0x69] sm:$0xff]  ;;  %vm5074_vm3 = vcmp.ne.s32.totalorder %v15625_v60, 0  ;;  %vm17052_vm15 = vmmov %vm17041_vm8 }
 0x3f1   : > { %vm15673_vm9 = vcmp.lt.s32.totalorder %v17046_v28, 16  ;;  %vm5110_vm5 = vcmp.lt.s32.totalorder %v15625_v60, 0  ;;  %v15697_v55 = vsub.s32 %v15385_v29, %v4956_v45  ;;  %vm4140_vm12 = vcmp.gt.f32.partialorder %v17051_v19, 0.0  ;;  %5392 = vst.msk [vmem:[#allocation2 + $0x8b] sm:$0xff] %vm17052_vm15, %v5351_v15  ;;  %11589 = vmatmul.mubr.msk.f32.gmra.mrb[12].mxu1 %vm17041_vm8, %v5470_v59  ;;  %v4510_v48 = vpop.permute.xlu1 %4509 }
 0x3f2   : > { %v5352_v6 = vsel %vm15549_vm1, %v4595_v7, 0.0  ;;  %vm17053_vm2 = vnez %v16958_v5  ;;  %v4966_v29 = vshrl.u32 %v15593_v49, 4  ;;  %vm17057_vm1 = vmmov %vm17041_vm8  ;;  %v4596_v32 = vmul.f32 %v4506_v39, %v17058_v25  ;;  %v4508_v49 = vpop.permute.xlu0 %4507 }
 0x3f3   : > { %v17054_v62 = vsel %vm17053_vm2, %v15344_v46, %v15241_v26  ;;  %v15715_v45 = vmul.u32.u64.low 3817748708, %v15645_v33  ;;  %v15716_v27 = vmul.u32.u64.high 3817748708, %v15645_v33, %v15715_v45  ;;  %5393 = vst.msk [vmem:[#allocation2 + $0x93] sm:$0xff] %vm17057_vm1, %v5352_v6  ;;  %vm17059_vm15 = vmmov %vm17057_vm1  ;;  %v5216_v26 = vsel %vm15654_vm7, %v5180_v53, %v15554_v40  ;;  %v5472_v53 = vld [vmem:[#allocation2 + $0x79] sm:$0xff] }
 0x3f4   : > { %vm15709_vm0 = vcmp.lt.s32.totalorder %v17054_v62, 16  ;;  %11591 = vmatprep.mubr.msk.f32.mxu1 %vm17059_vm15, %v5471_v23  ;;  %v5217_v46 = vsel %vm15681_vm14, %v15660_v8, %v15557_v52  ;;  %v15729_v5 = vadd.s32 272, %v14412_v41  ;;  %vm15736_vm8 = vcmp.lt.s32.totalorder %v5214_v20, 16  ;;  %vm15753_vm6 = vmand %vm5110_vm5, %vm5074_vm3  ;;  %v17076_v23 = vld [vmem:[#allocation13_spill] sm:$0xff] }
 0x3f5   : > { %v5182_v40 = vadd.s32 18, %v15625_v60  ;;  %v4977_v18 = vshrl.u32 %v15616_v50, 4  ;;  %v15743_v3 = vmul.u32.u64.low 3817748708, %v15690_v42  ;;  %v15744_v52 = vmul.u32.u64.high 3817748708, %v15690_v42, %v15743_v3  ;;  %vm17064_vm7 = vmmov %vm17057_vm1 }
 0x3f6   : > { %v5353_v2 = vsel %vm15587_vm11, %v4596_v32, 0.0  ;;  %v4597_v13 = vmul.f32 %v4508_v49, %v15178_v51  ;;  %v4176_v36 = vmul.f32 0.2, %v17051_v19  ;;  %v15759_v20 = vadd.s32 280, %v14412_v41  ;;  %vm17065_vm14 = vmmov %vm17057_vm1  ;;  %v5473_v51 = vld [vmem:[#allocation2 + $0x81] sm:$0xff]  ;;  %v4512_v47 = vpop.permute.xlu0 %4511 }
 0x3f7   : > { %5394 = vst.msk [vmem:[#allocation2 + $0x9b] sm:$0xff] %vm17064_vm7, %v5353_v2  ;;  %11592 = vmatmul.mubr.msk.f32.gmra.mrb[14].mxu1 %vm17065_vm14, %v5472_v53  ;;  %vm15768_vm11 = vcmp.lt.s32.totalorder %v5215_v12, 16  ;;  %vm5075_vm3 = vcmp.ne.s32.totalorder %v15697_v55, 0  ;;  %vm5111_vm5 = vcmp.lt.s32.totalorder %v15697_v55, 0  ;;  %v4967_v41 = vmul.u32 18, %v4966_v29  ;;  %vm17068_vm2 = vmmov %vm17057_vm1 }
 0x3f8   : > { %v4988_v8 = vshrl.u32 %v15642_v31, 4  ;;  %v5354_v30 = vsel %vm15610_vm10, %v4597_v13, 0.0  ;;  %v4598_v7 = vmul.f32 %v4510_v48, %v15183_v22  ;;  %11594 = vmatprep.mubr.msk.f32.mxu1 %vm17068_vm2, %v5473_v51  ;;  %vm17069_vm4 = vmmov %vm17057_vm1  ;;  %vm15784_vm1 = vcmp.lt.s32.totalorder %v5216_v26, 16  ;;  %v5474_v15 = vld [vmem:[#allocation2 + $0x89] sm:$0xff] }
 0x3f9   : > { %v15780_v43 = vmul.u32.u64.low 3817748708, %v15729_v5  ;;  %v15781_v37 = vmul.u32.u64.high 3817748708, %v15729_v5, %v15780_v43  ;;  %5395 = vst.msk [vmem:[#allocation2 + $0xa3] sm:$0xff] %vm17069_vm4, %v5354_v30  ;;  %v5218_v35 = vsel %vm15753_vm6, %v5182_v40, %v15625_v60  ;;  %v5183_v31 = vadd.s32 18, %v15697_v55  ;;  %vm17072_vm10 = vmmov %vm17068_vm2  ;;  %v4514_v60 = vpop.permute.xlu1 %4513 }
 0x3fa   : > { %v4978_v22 = vmul.u32 18, %v4977_v18  ;;  %v4999_v28 = vshrl.u32 %v15687_v57, 4  ;;  %v5355_v10 = vsel %vm15636_vm13, %v4598_v7, 0.0  ;;  %v4599_v16 = vmul.f32 %v4512_v47, %v15195_v38  ;;  %vm17073_vm15 = vmmov %vm17068_vm2  ;;  %v5475_v39 = vld [vmem:[#allocation2 + $0x91] sm:$0xff] }
 0x3fb   : > { %v15797_v59 = vmul.u32.u64.low 3817748708, %v15759_v20  ;;  %v15798_v6 = vmul.u32.u64.high 3817748708, %v15759_v20, %v15797_v59  ;;  %5396 = vst.msk [vmem:[#allocation2 + $0xab] sm:$0xff] %vm17072_vm10, %v5355_v10  ;;  %11595 = vmatmul.mubr.msk.f32.gmra.mrb[16].mxu1 %vm17073_vm15, %v5474_v15  ;;  %vm15806_vm6 = vmand %vm5111_vm5, %vm5075_vm3  ;;  %v15811_v38 = vsub.s32 %v15539_v56, %v4967_v41  ;;  %v4989_v57 = vmul.u32 18, %v4988_v8  ;;  %v4516_v56 = vpop.permute.xlu0 %4515 }
 0x3fc   : > { %v4177_v62 = vmul.f32 0.2, %v17076_v23  ;;  %v5010_v29 = vshrl.u32 %v15716_v27, 4  ;;  %v5356_v45 = vsel %vm15673_vm9, %v4599_v16, 0.0  ;;  %v4600_v25 = vmul.f32 %v4514_v60, %v15322_v4  ;;  %vm17077_vm13 = vmmov %vm17068_vm2 }
 0x3fd   : > { %11597 = vmatprep.mubr.msk.f32.mxu1 %vm17077_vm13, %v5475_v39  ;;  %vm15819_vm7 = vcmp.lt.s32.totalorder %v5217_v46, 16  ;;  %vm4141_vm14 = vcmp.gt.f32.partialorder %v17076_v23, 0.0  ;;  %vm17080_vm3 = vmmov %vm17068_vm2  ;;  %v15826_v26 = vsub.s32 %v15572_v54, %v4978_v22  ;;  %v15831_v0 = vsel %vm4140_vm12, %v17051_v19, %v4176_v36  ;;  %v4518_v19 = vpop.permute.xlu1 %4517 }
 0x3fe   : > { %5397 = vst.msk [vmem:[#allocation2 + $0xb3] sm:$0xff] %vm17080_vm3, %v5356_v45  ;;  %v5000_v4 = vmul.u32 18, %v4999_v28  ;;  %v5021_v27 = vshrl.u32 %v15744_v52, 4  ;;  %v5357_v46 = vsel %vm15709_vm0, %v4600_v25, 0.0  ;;  %v4601_v49 = vmul.f32 %v4516_v56, %v15374_v9  ;;  %v5476_v40 = vld [vmem:[#allocation2 + $0x99] sm:$0xff]  ;;  %vm17083_vm5 = vmmov %vm17068_vm2 }
 0x3ff   : > { %vm15837_vm9 = vcmp.lt.s32.totalorder %v5218_v35, 16  ;;  %v5219_v54 = vsel %vm15806_vm6, %v5183_v31, %v15697_v55  ;;  %5398 = vst.msk [vmem:[#allocation2 + $0xbb] sm:$0xff] %vm17083_vm5, %v5357_v46  ;;  %vm17084_vm12 = vmmov %vm17068_vm2  ;;  %vm5076_vm2 = vcmp.ne.s32.totalorder %v15811_v38, 0  ;;  %v15848_v21 = vsub.s32 %v15596_v11, %v4989_v57  ;;  %v17085_v55 = vld [vmem:[#allocation27_spill] sm:$0xff]  ;;  %v4520_v11 = vpop.permute.xlu0 %4519  ;;  %v17094_v35 = vld [vmem:[#allocation12_spill] sm:$0xff] }
 0x400   : > { %11598 = vmatmul.mubr.msk.f32.gmra.mrb[18].mxu1 %vm17084_vm12, %v5476_v40  ;;  %v15853_v9 = vsel %vm4141_vm14, %v17076_v23, %v4177_v62  ;;  %v5011_v3 = vmul.u32 18, %v5010_v29  ;;  %v5358_v52 = vsel %vm15736_vm8, %v4601_v49, 0.0  ;;  %v4602_v2 = vmul.f32 %v4518_v19, %v17085_v55  ;;  %v5477_v13 = vld [vmem:[#allocation2 + $0xa1] sm:$0xff]  ;;  %vm17086_vm4 = vmmov %vm17080_vm3  ;;  %v5420_v19 = vld [vmem:[#allocation2 + $0x18] sm:$0xff] }
 0x401   : > { %vm5112_vm0 = vcmp.lt.s32.totalorder %v15811_v38, 0  ;;  %v5032_v53 = vshrl.u32 %v15781_v37, 4  ;;  %5399 = vst.msk [vmem:[#allocation2 + $0xc3] sm:$0xff] %vm17086_vm4, %v5358_v52  ;;  %vm17087_vm10 = vmmov %vm17080_vm3  ;;  %v5184_v58 = vadd.s32 18, %v15811_v38  ;;  %vm5077_vm15 = vcmp.ne.s32.totalorder %v15826_v26, 0  ;;  %v4522_v30 = vpop.permute.xlu1 %4521  ;;  %v17115_v49 = vld [vmem:[#allocation15_spill] sm:$0xff] }
 0x402   : > { %11600 = vmatprep.mubr.msk.f32.mxu1 %vm17087_vm10, %v5477_v13  ;;  %v15865_v36 = vsub.s32 %v15619_v1, %v5000_v4  ;;  %v5022_v61 = vmul.u32 18, %v5021_v27  ;;  %v5359_v48 = vsel %vm15768_vm11, %v4602_v2, 0.0  ;;  %v4603_v51 = vmul.f32 %v4520_v11, %v15512_v24  ;;  %v5478_v41 = vld [vmem:[#allocation2 + $0xa9] sm:$0xff]  ;;  %vm17088_vm6 = vmmov %vm17080_vm3  ;;  %v5424_v52 = vld [vmem:[#allocation2 + $0x38] sm:$0xff] }
 0x403   : > { %vm5113_vm8 = vcmp.lt.s32.totalorder %v15826_v26, 0  ;;  %v5043_v8 = vshrl.u32 %v15798_v6, 4  ;;  %5400 = vst.msk [vmem:[#allocation2 + $0xcb] sm:$0xff] %vm17088_vm6, %v5359_v48  ;;  %vm17089_vm13 = vmmov %vm17080_vm3  ;;  %vm15874_vm14 = vcmp.lt.s32.totalorder %v5219_v54, 16  ;;  %vm5078_vm3 = vcmp.ne.s32.totalorder %v15848_v21, 0  ;;  %v4524_v22 = vpop.permute.xlu0 %4523  ;;  %v5429_v11 = vld [vmem:[#allocation2 + $0x60] sm:$0xff] }
 0x404   : > { %11601 = vmatmul.mubr.msk.f32.gmra.mrb[20].mxu1 %vm17089_vm13, %v5478_v41  ;;  %vm15882_vm11 = vmand %vm5112_vm0, %vm5076_vm2  ;;  %vm5114_vm5 = vcmp.lt.s32.totalorder %v15848_v21, 0  ;;  %v15889_v1 = vsub.s32 %v15645_v33, %v5011_v3  ;;  %v5360_v50 = vsel %vm15784_vm1, %v4603_v51, 0.0  ;;  %v4604_v43 = vmul.f32 %v4522_v30, %v15536_v14  ;;  %v5434_v48 = vld [vmem:[#allocation2 + $0x88] sm:$0xff] }
 0x405   : > { %v5479_v37 = vld [vmem:[#allocation2 + $0xb1] sm:$0xff]  ;;  %v5185_v47 = vadd.s32 18, %v15826_v26  ;;  %vm4142_vm12 = vcmp.gt.f32.partialorder %v17094_v35, 0.0  ;;  %v5033_v31 = vmul.u32 18, %v5032_v53  ;;  %vm17095_vm2 = vmmov %vm17086_vm4  ;;  %v5186_v14 = vadd.s32 18, %v15848_v21  ;;  %v4526_v6 = vpop.permute.xlu1 %4525 }
 0x406   : > { %5401 = vst.msk [vmem:[#allocation2 + $0xd3] sm:$0xff] %vm17095_vm2, %v5360_v50  ;;  %vm17096_vm0 = vmmov %vm17095_vm2  ;;  %vm5079_vm1 = vcmp.ne.s32.totalorder %v15865_v36, 0  ;;  %vm5115_vm10 = vcmp.lt.s32.totalorder %v15865_v36, 0  ;;  %v15910_v12 = vsub.s32 %v15690_v42, %v5022_v61  ;;  %v5361_v28 = vsel %vm15819_vm7, %v4604_v43, 0.0  ;;  %v5480_v16 = vld [vmem:[#allocation2 + $0xb9] sm:$0xff] }
 0x407   : > { %11603 = vmatprep.mubr.msk.f32.mxu1 %vm17096_vm0, %v5479_v37  ;;  %vm15902_vm4 = vmand %vm5113_vm8, %vm5077_vm15  ;;  %v4605_v10 = vmul.f32 %v4524_v22, %v15562_v17  ;;  %v5220_v15 = vsel %vm15882_vm11, %v5184_v58, %v15811_v38  ;;  %v5044_v42 = vmul.u32 18, %v5043_v8  ;;  %v5187_v17 = vadd.s32 18, %v15865_v36  ;;  %v4528_v29 = vpop.permute.xlu0 %4527  ;;  %v17126_v61 = vld [vmem:[#allocation14_spill] sm:$0xff]  ;;  %v17133_v43 = vld [vmem:[#allocation17_spill] sm:$0xff] }
 0x408   : > { %vm15922_vm15 = vmand %vm5114_vm5, %vm5078_vm3  ;;  %v4178_v60 = vmul.f32 0.2, %v17094_v35  ;;  %vm5080_vm7 = vcmp.ne.s32.totalorder %v15889_v1, 0  ;;  %vm5116_vm13 = vcmp.lt.s32.totalorder %v15889_v1, 0  ;;  %v4606_v34 = vmul.f32 %v4526_v6, %v15568_v44  ;;  %v5481_v38 = vld [vmem:[#allocation2 + $0xc1] sm:$0xff]  ;;  %v5440_v24 = vld [vmem:[#allocation2 + $0xb8] sm:$0xff] }
 0x409   : > { %vm17101_vm8 = vmmov %vm17096_vm0  ;;  %v5362_v39 = vsel %vm15837_vm9, %v4605_v10, 0.0  ;;  %v5221_v57 = vsel %vm15902_vm4, %v5185_v47, %v15826_v26  ;;  %v15947_v62 = vsub.s32 %v15729_v5, %v5033_v31  ;;  %vm15950_vm9 = vcmp.lt.s32.totalorder %v5220_v15, 16  ;;  %v4530_v27 = vpop.permute.xlu1 %4529  ;;  %v17140_v10 = vld [vmem:[#allocation16_spill] sm:$0xff] }
 0x40a   : > { %5402 = vst.msk [vmem:[#allocation2 + $0xdb] sm:$0xff] %vm17101_vm8, %v5361_v28  ;;  %vm17102_vm6 = vmmov %vm17096_vm0  ;;  %v5222_v45 = vsel %vm15922_vm15, %v5186_v14, %v15848_v21  ;;  %v5188_v25 = vadd.s32 18, %v15889_v1  ;;  %vm5081_vm2 = vcmp.ne.s32.totalorder %v15910_v12, 0  ;;  %v5363_v5 = vsel %vm15874_vm14, %v4606_v34, 0.0  ;;  %v5482_v56 = vld [vmem:[#allocation2 + $0xc9] sm:$0xff] }
 0x40b   : > { %11604 = vmatmul.mubr.msk.f32.gmra.mrb[22].mxu1 %vm17102_vm6, %v5480_v16  ;;  %vm15942_vm11 = vmand %vm5115_vm10, %vm5079_vm1  ;;  %v4607_v32 = vmul.f32 %v4528_v29, %v15665_v63  ;;  %vm5117_vm4 = vcmp.lt.s32.totalorder %v15910_v12, 0  ;;  %v15973_v4 = vsub.s32 %v15759_v20, %v5044_v42  ;;  %vm15977_vm14 = vcmp.lt.s32.totalorder %v5221_v57, 16  ;;  %v4532_v21 = vpop.permute.xlu0 %4531  ;;  %v9869_v63 = vld [vmem:[%s16734_s3 + $0x58] sm:$0xff] }
 0x40c   : > { %vm17105_vm3 = vmmov %vm17096_vm0  ;;  %v5223_v46 = vsel %vm15942_vm11, %v5187_v17, %v15865_v36  ;;  %vm4143_vm15 = vcmp.gt.f32.partialorder %v17115_v49, 0.0  ;;  %v5189_v40 = vadd.s32 18, %v15910_v12  ;;  %v4608_v18 = vmul.f32 %v4530_v27, %v15831_v0  ;;  %v5418_v27 = vld [vmem:[#allocation2 + $0x8] sm:$0xff] }
 0x40d   : > { %5403 = vst.msk [vmem:[#allocation2 + $0xe3] sm:$0xff] %vm17105_vm3, %v5362_v39  ;;  %vm17108_vm5 = vmmov %vm17096_vm0  ;;  %v5364_v20 = vsel %vm15950_vm9, %v4607_v32, 0.0  ;;  %v5483_v54 = vld [vmem:[#allocation2 + $0xd1] sm:$0xff]  ;;  %vm5082_vm8 = vcmp.ne.s32.totalorder %v15947_v62, 0  ;;  %vm5118_vm6 = vcmp.lt.s32.totalorder %v15947_v62, 0  ;;  %v5190_v55 = vadd.s32 18, %v15947_v62  ;;  %v4534_v58 = vpop.permute.xlu1 %4533 }
 0x40e   : > { %11606 = vmatprep.mubr.msk.f32.mxu1 %vm17108_vm5, %v5481_v38  ;;  %vm15967_vm0 = vmand %vm5116_vm13, %vm5080_vm7  ;;  %vm15992_vm13 = vcmp.lt.s32.totalorder %v5222_v45, 16  ;;  %v4179_v0 = vmul.f32 0.2, %v17115_v49  ;;  %v5365_v2 = vsel %vm15977_vm14, %v4608_v18, 0.0  ;;  %v4609_v13 = vmul.f32 %v4532_v21, %v15853_v9  ;;  %v17154_v18 = vld [vmem:[#allocation26_spill] sm:$0xff]  ;;  %v9947_v17 = vld [vmem:[%s16734_s3 + $0x88] sm:$0xff] }
 0x40f   : > { %vm17111_vm1 = vmmov %vm17105_vm3  ;;  %v5224_v3 = vsel %vm15967_vm0, %v5188_v25, %v15889_v1  ;;  %vm5083_vm9 = vcmp.ne.s32.totalorder %v15973_v4, 0  ;;  %vm5119_vm5 = vcmp.lt.s32.totalorder %v15973_v4, 0  ;;  %v4214_v36 = vsel %vm4142_vm12, %v17094_v35, %v4178_v60  ;;  %v4536_v1 = vpop.permute.xlu0 %4535  ;;  %v5421_v21 = vld [vmem:[#allocation2 + $0x20] sm:$0xff] }
 0x410   : > { %5404 = vst.msk [vmem:[#allocation2 + $0xeb] sm:$0xff] %vm17111_vm1, %v5363_v5  ;;  %vm17112_vm10 = vmmov %vm17111_vm1  ;;  %v4180_v9 = vmul.f32 0.2, %v17126_v61  ;;  %v5366_v51 = vsel %vm15992_vm13, %v4609_v13, 0.0  ;;  %v4610_v41 = vmul.f32 %v4534_v58, %v4214_v36  ;;  %v5191_v7 = vadd.s32 18, %v15973_v4  ;;  %v5427_v13 = vld [vmem:[#allocation2 + $0x50] sm:$0xff] }
 0x411   : > { %11607 = vmatmul.mubr.msk.f32.gmra.mrb[24].mxu1 %vm17112_vm10, %v5482_v56  ;;  %vm17116_vm7 = vmmov %vm17111_vm1  ;;  %v5484_v53 = vld [vmem:[#allocation2 + $0xd9] sm:$0xff]  ;;  %vm16041_vm14 = vcmp.lt.s32.totalorder %v5224_v3, 16  ;;  %v4215_v50 = vsel %vm4143_vm15, %v17115_v49, %v4179_v0  ;;  %v4181_v37 = vmul.f32 0.2, %v17133_v43  ;;  %vm4145_vm15 = vcmp.gt.f32.partialorder %v17133_v43, 0.0  ;;  %v5422_v3 = vld [vmem:[#allocation2 + $0x28] sm:$0xff] }
 0x412   : > { %5405 = vst.msk [vmem:[#allocation2 + $0xf3] sm:$0xff] %vm17116_vm7, %v5364_v20  ;;  %vm17119_vm11 = vmmov %vm17111_vm1  ;;  %v4611_v31 = vmul.f32 %v4536_v1, %v4215_v50  ;;  %v4182_v16 = vmul.f32 0.2, %v17140_v10  ;;  %v5417_v56 = vld [vmem:[#allocation2] sm:$0xff]  ;;  %v5419_v20 = vld [vmem:[#allocation2 + $0x10] sm:$0xff] }
 0x413   : > { %11609 = vmatprep.mubr.msk.f32.mxu1 %vm17119_vm11, %v5483_v54  ;;  %vm16005_vm3 = vmand %vm5117_vm4, %vm5081_vm2  ;;  %vm16017_vm2 = vcmp.lt.s32.totalorder %v5223_v46, 16  ;;  %vm4144_vm4 = vcmp.gt.f32.partialorder %v17126_v61, 0.0  ;;  %v4540_v60 = vpop.permute.xlu0 %4539  ;;  %v4217_v39 = vsel %vm4145_vm15, %v17133_v43, %v4181_v37  ;;  %v9906_v49 = vld [vmem:[%s16734_s3 + $0x60] sm:$0xff]  ;;  %v5423_v0 = vld [vmem:[#allocation2 + $0x30] sm:$0xff] }
 0x414   : > { %vm17122_vm0 = vmmov %vm17111_vm1  ;;  %v5485_v8 = vld [vmem:[#allocation2 + $0xe1] sm:$0xff]  ;;  %v5225_v30 = vsel %vm16005_vm3, %v5189_v40, %v15910_v12  ;;  %v5367_v35 = vsel %vm16017_vm2, %v4610_v41, 0.0  ;;  %v4538_v12 = vpop.permute.xlu1 %4537  ;;  %v4216_v28 = vsel %vm4144_vm4, %v17126_v61, %v4180_v9  ;;  %v5368_v15 = vsel %vm16041_vm14, %v4611_v31, 0.0  ;;  %v5431_v36 = vld [vmem:[#allocation2 + $0x70] sm:$0xff] }
 0x415   : > { %5406 = vst.msk [vmem:[#allocation2 + $0xfb] sm:$0xff] %vm17122_vm0, %v5365_v2  ;;  %vm17123_vm1 = vmmov %vm17122_vm0  ;;  %vm16066_vm11 = vcmp.lt.s32.totalorder %v5225_v30, 16  ;;  %v4612_v59 = vmul.f32 %v4538_v12, %v4216_v28  ;;  %vm4146_vm3 = vcmp.gt.f32.partialorder %v17140_v10, 0.0  ;;  %v4613_v38 = vmul.f32 %v4540_v60, %v4217_v39  ;;  %v9907_v40 = vld [vmem:[%s16734_s3 + $0x68] sm:$0xff]  ;;  %v5432_v61 = vld [vmem:[#allocation2 + $0x78] sm:$0xff] }
 0x416   : > { %11610 = vmatmul.mubr.msk.f32.gmra.mrb[26].mxu1 %vm17123_vm1, %v5484_v53  ;;  %vm16030_vm10 = vmand %vm5118_vm6, %vm5082_vm8  ;;  %v16115_v54 = vpack.c.bf16 %v9907_v40, %v9906_v49  ;;  %v5426_v2 = vld [vmem:[#allocation2 + $0x48] sm:$0xff]  ;;  %v5428_v53 = vld [vmem:[#allocation2 + $0x58] sm:$0xff] }
 0x417   : > { %vm17129_vm12 = vmmov %vm17122_vm0  ;;  %v5486_v22 = vld [vmem:[#allocation2 + $0xe9] sm:$0xff]  ;;  %v5226_v33 = vsel %vm16030_vm10, %v5190_v55, %v15947_v62  ;;  %v5369_v34 = vsel %vm16066_vm11, %v4612_v59, 0.0  ;;  %v4218_v62 = vsel %vm4146_vm3, %v17140_v10, %v4182_v16  ;;  %vm5412_vm10 = vcmask 259072   ;;  %v5425_v55 = vld [vmem:[#allocation2 + $0x40] sm:$0xff] }
 0x418   : > { %5407 = vst.msk [vmem:[#allocation2 + $0x103] sm:$0xff] %vm17129_vm12, %v5366_v51  ;;  %vm17132_vm8 = vmmov %vm17122_vm0  ;;  %v4542_v23 = vpop.permute.xlu1 %4541  ;;  %v5430_v58 = vld [vmem:[#allocation2 + $0x68] sm:$0xff]  ;;  %v5433_v9 = vld [vmem:[#allocation2 + $0x80] sm:$0xff] }
 0x419   : > { %11612 = vmatprep.mubr.msk.f32.mxu1 %vm17132_vm8, %v5485_v8  ;;  %vm16054_vm6 = vmand %vm5119_vm5, %vm5083_vm9  ;;  %v5487_v42 = vld [vmem:[#allocation2 + $0xf1] sm:$0xff]  ;;  %vm16081_vm5 = vcmp.lt.s32.totalorder %v5226_v33, 16  ;;  %v4614_v29 = vmul.f32 %v4542_v23, %v4218_v62  ;;  %v5437_v8 = vld [vmem:[#allocation2 + $0xa0] sm:$0xff] }
 0x41a   : > { %vm17136_vm7 = vmmov %vm17122_vm0  ;;  %v5227_v6 = vsel %vm16054_vm6, %v5191_v7, %v15973_v4  ;;  %v5370_v44 = vsel %vm16081_vm5, %v4613_v38, 0.0  ;;  %v9868_v4 = vld [vmem:[%s16734_s3 + $0x50] sm:$0xff]  ;;  %v5436_v41 = vld [vmem:[#allocation2 + $0x98] sm:$0xff] }
 0x41b   : > { %5408 = vst.msk [vmem:[#allocation2 + $0x10b] sm:$0xff] %vm17136_vm7, %v5367_v35  ;;  %vm17137_vm13 = vmmov %vm17122_vm0  ;;  %vm5263_vm4 = vcmp.lt.s32.totalorder %v5227_v6, 16  ;;  %v12284_v46 = vpack.c.bf16 %v9869_v63, %v9868_v4  ;;  %v5435_v51 = vld [vmem:[#allocation2 + $0x90] sm:$0xff]  ;;  %v5438_v30 = vld [vmem:[#allocation2 + $0xa8] sm:$0xff] }
 0x41c   : > { %11613 = vmatmul.mubr.msk.f32.gmra.mrb[28].mxu1 %vm17137_vm13, %v5486_v22  ;;  %vm17141_vm9 = vmmov %vm17122_vm0  ;;  %v5488_v57 = vld [vmem:[#allocation2 + $0xf9] sm:$0xff]  ;;  %v5371_v25 = vsel %vm5263_vm4, %v4614_v29, 0.0  ;;  %v5439_v7 = vld [vmem:[#allocation2 + $0xb0] sm:$0xff] }
 0x41d   : > { %5409 = vst.msk [vmem:[#allocation2 + $0x113] sm:$0xff] %vm17141_vm9, %v5368_v15  ;;  %11615 = vmatprep.mubr.msk.f32.mxu1 %vm17122_vm0, %v5487_v42  ;;  %vm17144_vm1 = vmmov %vm17122_vm0  ;;  %v5441_v1 = vld [vmem:[#allocation2 + $0xc0] sm:$0xff]  ;;  %v5442_v50 = vld [vmem:[#allocation2 + $0xc8] sm:$0xff] }
 0x41e   : > { %5410 = vst.msk [vmem:[#allocation2 + $0x11b] sm:$0xff] %vm17144_vm1, %v5369_v34  ;;  %vm17145_vm2 = vmmov %vm17122_vm0  ;;  %v5443_v43 = vld [vmem:[#allocation2 + $0xd0] sm:$0xff]  ;;  %v5444_v37 = vld [vmem:[#allocation2 + $0xd8] sm:$0xff] }
 0x41f   : > { %v5489_v45 = vld [vmem:[#allocation2 + $0x101] sm:$0xff]  ;;  %vm17146_vm12 = vmmov %vm17122_vm0  ;;  %5413 = vst.msk [vmem:[#allocation2 + $0x12b] sm:$0x3f] %vm5412_vm10, %v5371_v25  ;;  %v5447_v31 = vld [vmem:[#allocation2 + $0xf0] sm:$0xff] }
 0x420   : > { %11616 = vmatmul.mubr.msk.f32.gmra.mrb[30].mxu1 %vm17145_vm2, %v5488_v57  ;;  %5411 = vst.msk [vmem:[#allocation2 + $0x123] sm:$0xff] %vm17146_vm12, %v5370_v44  ;;  %vm17147_vm14 = vmmov %vm17122_vm0  ;;  %v5445_v47 = vld [vmem:[#allocation2 + $0xe0] sm:$0xff]  ;;  %v5446_v35 = vld [vmem:[#allocation2 + $0xe8] sm:$0xff] }
 0x421   : > { %11618 = vmatprep.mubr.msk.f32.mxu1 %vm17147_vm14, %v5489_v45  ;;  %vm17148_vm8 = vmmov %vm17122_vm0  ;;  %v5448_v22 = vld [vmem:[#allocation2 + $0xf8] sm:$0xff]  ;;  %v5449_v33 = vld [vmem:[#allocation2 + $0x100] sm:$0xff] }
 0x422   : > { %v5490_v5 = vld [vmem:[#allocation2 + $0x109] sm:$0xff]  ;;  %vm17149_vm6 = vmmov %vm17122_vm0  ;;  %v9909_v15 = vld [vmem:[%s16734_s3 + $0x78] sm:$0xff] }
 0x423   : > { %vm17150_vm15 = vmmov %vm17122_vm0  ;;  %v5450_v14 = vld [vmem:[#allocation2 + $0x108] sm:$0xff]  ;;  %v9908_v16 = vld [vmem:[%s16734_s3 + $0x70] sm:$0xff] }
 0x424   : > { %11619 = vmatmul.mubr.msk.f32.gmra.mrb[32].mxu1 %vm17148_vm8, %v5490_v5  ;;  %v5491_v32 = vld [vmem:[#allocation2 + $0x111] sm:$0xff]  ;;  %vm17151_vm7 = vmmov %vm17122_vm0  ;;  %v6204_v28 = vld [vmem:[#allocation2 + $0x2] sm:$0xff]  ;;  %v12292_v42 = vpack.c.bf16 %v9909_v15, %v9908_v16 }
 0x425   : > { %11621 = vmatprep.mubr.msk.f32.mxu1 %vm17149_vm6, %v5491_v32  ;;  %v5492_v26 = vld [vmem:[#allocation2 + $0x119] sm:$0x3f]  ;;  %vm17152_vm13 = vmmov %vm17122_vm0  ;;  %v5451_v12 = vld [vmem:[#allocation2 + $0x110] sm:$0xff] }
 0x426   : > { %vm17153_vm11 = vmmov %vm17122_vm0  ;;  %v5452_v10 = vld [vmem:[#allocation2 + $0x118] sm:$0x3f]  ;;  %v6205_v59 = vld [vmem:[#allocation2 + $0xa] sm:$0xff] }
 0x427   : > { %vm17155_vm3 = vmmov %vm17122_vm0  ;;  %v9946_v6 = vld [vmem:[%s16734_s3 + $0x80] sm:$0xff]  ;;  %v16165_v60 = vld [vmem:[#allocation2 + $0x12] sm:$0xff] }
 0x428   : > { %11622 = vmatmul.mubr.msk.f32.gmra.mrb[34].mxu1 %vm17150_vm15, %v5492_v26  ;;  %vm17156_vm9 = vmmov %vm17122_vm0  ;;  %v16170_v39 = vpack.c.bf16 %v9947_v17, %v9946_v6  ;;  %v16172_v34 = vld [vmem:[#allocation2 + $0x1a] sm:$0xff]  ;;  %v16176_v38 = vld [vmem:[#allocation2 + $0x22] sm:$0xff] }
 0x429   : > { %11632 = vmatprep.mubr.msk.f32.mxu1 %vm17151_vm7, %v5417_v56  ;;  %vm17157_vm5 = vmmov %vm17122_vm0  ;;  %v16181_v57 = vld [vmem:[#allocation2 + $0x2a] sm:$0xff]  ;;  %v16185_v23 = vld [vmem:[#allocation2 + $0x32] sm:$0xff] }
 0x42a   : > { %vm17158_vm1 = vmmov %vm17122_vm0  ;;  %v16189_v62 = vld [vmem:[#allocation2 + $0x3a] sm:$0xff]  ;;  %v16193_v44 = vld [vmem:[#allocation2 + $0x42] sm:$0xff] }
 0x42b   : > { %vm17159_vm2 = vmmov %vm17122_vm0  ;;  %v16197_v29 = vld [vmem:[#allocation2 + $0x4a] sm:$0xff]  ;;  %v16201_v45 = vld [vmem:[#allocation2 + $0x52] sm:$0xff] }
 0x42c   : > { %11633 = vmatmul.mubr.msk.f32.vlgmr.msra.gmra.mrb[0].mxu1 %vm17152_vm13, %v5418_v27  ;;  %vm17160_vm4 = vmmov %vm17122_vm0  ;;  %v16205_v25 = vld [vmem:[#allocation2 + $0x5a] sm:$0xff]  ;;  %v16209_v5 = vld [vmem:[#allocation2 + $0x62] sm:$0xff] }
 0x42d   : > { %11635 = vmatprep.mubr.msk.f32.mxu1 %vm17153_vm11, %v5419_v20  ;;  %12283 = vmatpush3.bf16.msra.mxu1 %v17154_v18  ;;  %vm17161_vm10 = vmmov %vm17122_vm0  ;;  %v16213_v32 = vld [vmem:[#allocation2 + $0x6a] sm:$0xff]  ;;  %v16217_v56 = vld [vmem:[#allocation2 + $0x72] sm:$0xff] }
 0x42e   : > { %12285 = vmatprep.subr.bf16.mxu1 %v12284_v46  ;;  %vm17162_vm12 = vmmov %vm17122_vm0  ;;  %v16221_v26 = vld [vmem:[#allocation2 + $0x7a] sm:$0xff]  ;;  %v16225_v4 = vld [vmem:[#allocation2 + $0x82] sm:$0xff] }
 0x42f   : > { %vm17163_vm14 = vmmov %vm17122_vm0  ;;  %v16229_v63 = vld [vmem:[#allocation2 + $0x8a] sm:$0xff]  ;;  %v6222_v27 = vld [vmem:[#allocation2 + $0x92] sm:$0xff] }
 0x430   : > { %11636 = vmatmul.mubr.msk.f32.gmra.mrb[2].mxu1 %vm17155_vm3, %v5420_v19  ;;  %vm17164_vm8 = vmmov %vm17122_vm0  ;;  %v6224_v49 = vld [vmem:[#allocation2 + $0xa2] sm:$0xff]  ;;  %v6225_v40 = vld [vmem:[#allocation2 + $0xaa] sm:$0xff] }
 0x431   : > { %11638 = vmatprep.mubr.msk.f32.mxu1 %vm17156_vm9, %v5421_v21  ;;  %12287 = vmatpush3.bf16.msra.mxu1 %v12284_v46  ;;  %vm17165_vm6 = vmmov %vm17122_vm0  ;;  %v6223_v46 = vld [vmem:[#allocation2 + $0x9a] sm:$0xff]  ;;  %v6226_v20 = vld [vmem:[#allocation2 + $0xb2] sm:$0xff] }
 0x432   : > { %12289 = vmatprep.subr.bf16.mxu1 %v16115_v54  ;;  %vm17166_vm15 = vmmov %vm17122_vm0  ;;  %v6227_v18 = vld [vmem:[#allocation2 + $0xba] sm:$0xff]  ;;  %v6229_v19 = vld [vmem:[#allocation2 + $0xca] sm:$0xff] }
 0x433   : > { %vm17167_vm7 = vmmov %vm17122_vm0  ;;  %v6230_v21 = vld [vmem:[#allocation2 + $0xd2] sm:$0xff]  ;;  %v7073_v15 = vld [vmem:[#allocation2 + $0x5b] sm:$0xff] }
 0x434   : > { %11639 = vmatmul.mubr.msk.f32.gmra.mrb[4].mxu1 %vm17157_vm5, %v5422_v3  ;;  %vm17168_vm13 = vmmov %vm17122_vm0  ;;  %v6231_v3 = vld [vmem:[#allocation2 + $0xda] sm:$0xff] }
 0x435   : > { %11641 = vmatprep.mubr.msk.f32.mxu1 %vm17122_vm0, %v5423_v0  ;;  %vm17169_vm11 = vmmov %vm17122_vm0  ;;  %v6232_v0 = vld [vmem:[#allocation2 + $0xe2] sm:$0xff]  ;;  %v7072_v16 = vld [vmem:[#allocation2 + $0x53] sm:$0xff] }
 0x436   : > { %vm17170_vm3 = vmmov %vm17122_vm0  ;;  %v7076_v6 = vld [vmem:[#allocation2 + $0x73] sm:$0xff]  ;;  %v7077_v17 = vld [vmem:[#allocation2 + $0x7b] sm:$0xff] }
 0x437   : > { %vm17171_vm9 = vmmov %vm17122_vm0 }
 0x438   : > { %11642 = vmatmul.mubr.msk.f32.gmra.mrb[6].mxu1 %vm17158_vm1, %v5424_v52  ;;  %vm17172_vm5 = vmmov %vm17122_vm0  ;;  %v6233_v52 = vld [vmem:[#allocation2 + $0xea] sm:$0xff] }
 0x439   : > { %11644 = vmatprep.mubr.msk.f32.mxu1 %vm17159_vm2, %v5425_v55  ;;  %vm17173_vm1 = vmmov %vm17122_vm0  ;;  %v6234_v55 = vld [vmem:[#allocation2 + $0xf2] sm:$0xff] }
 0x43a   : > { %vm17174_vm2 = vmmov %vm17122_vm0 }
 0x43c   : > { %11645 = vmatmul.mubr.msk.f32.gmra.mrb[8].mxu1 %vm17160_vm4, %v5426_v2  ;;  %vm17175_vm4 = vmmov %vm17122_vm0  ;;  %v6235_v2 = vld [vmem:[#allocation2 + $0xfa] sm:$0xff] }
 0x43d   : > { %11647 = vmatprep.mubr.msk.f32.mxu1 %vm17161_vm10, %v5427_v13  ;;  %vm17176_vm10 = vmmov %vm17122_vm0  ;;  %v6236_v13 = vld [vmem:[#allocation2 + $0x102] sm:$0xff] }
 0x440   : > { %11648 = vmatmul.mubr.msk.f32.gmra.mrb[10].mxu1 %vm17162_vm12, %v5428_v53  ;;  %vm17177_vm12 = vmmov %vm17122_vm0  ;;  %v6237_v53 = vld [vmem:[#allocation2 + $0x10a] sm:$0xff] }
 0x441   : > { %11650 = vmatprep.mubr.msk.f32.mxu1 %vm17163_vm14, %v5429_v11  ;;  %vm17178_vm14 = vmmov %vm17122_vm0  ;;  %v6238_v11 = vld [vmem:[#allocation2 + $0x112] sm:$0xff] }
 0x444   : > { %11651 = vmatmul.mubr.msk.f32.gmra.mrb[12].mxu1 %vm17164_vm8, %v5430_v58  ;;  %vm17179_vm8 = vmmov %vm17122_vm0  ;;  %v6239_v58 = vld [vmem:[#allocation2 + $0x11a] sm:$0x3f] }
 0x445   : > { %11653 = vmatprep.mubr.msk.f32.mxu1 %vm17165_vm6, %v5431_v36  ;;  %vm17180_vm6 = vmmov %vm17122_vm0  ;;  %v9948_v36 = vld [vmem:[%s16734_s3 + $0x90] sm:$0xff] }
 0x448   : > { %11654 = vmatmul.mubr.msk.f32.gmra.mrb[14].mxu1 %vm17166_vm15, %v5432_v61  ;;  %vm17181_vm15 = vmmov %vm17122_vm0  ;;  %v9949_v61 = vld [vmem:[%s16734_s3 + $0x98] sm:$0xff] }
 0x449   : > { %11656 = vmatprep.mubr.msk.f32.mxu1 %vm17167_vm7, %v5433_v9  ;;  %vm17182_vm7 = vmmov %vm17122_vm0  ;;  %v12300_v9 = vpack.c.bf16 %v9949_v61, %v9948_v36  ;;  %v16405_v36 = vld [vmem:[#allocation2 + $0x4c] sm:$0xff]  ;;  %v16409_v61 = vld [vmem:[#allocation2 + $0x54] sm:$0xff] }
 0x44c   : > { %11657 = vmatmul.mubr.msk.f32.gmra.mrb[16].mxu1 %vm17168_vm13, %v5434_v48  ;;  %vm17183_vm13 = vmmov %vm17122_vm0  ;;  %v9986_v48 = vld [vmem:[%s16734_s3 + $0xa0] sm:$0xff] }
 0x44d   : > { %11659 = vmatprep.mubr.msk.f32.mxu1 %vm17169_vm11, %v5435_v51  ;;  %vm17184_vm11 = vmmov %vm17122_vm0  ;;  %v9987_v51 = vld [vmem:[%s16734_s3 + $0xa8] sm:$0xff] }
 0x450   : > { %11660 = vmatmul.mubr.msk.f32.gmra.mrb[18].mxu1 %vm17170_vm3, %v5436_v41  ;;  %vm17185_vm3 = vmmov %vm17122_vm0  ;;  %v12304_v41 = vpack.c.bf16 %v9987_v51, %v9986_v48  ;;  %v16417_v48 = vld [vmem:[#allocation2 + $0x64] sm:$0xff]  ;;  %v16421_v51 = vld [vmem:[#allocation2 + $0x6c] sm:$0xff] }
 0x451   : > { %11662 = vmatprep.mubr.msk.f32.mxu1 %vm17171_vm9, %v5437_v8  ;;  %vm17186_vm9 = vmmov %vm17122_vm0  ;;  %v6667_v8 = vld [vmem:[#allocation2 + $0x11a] sm:$0xff] }
 0x454   : > { %11663 = vmatmul.mubr.msk.f32.gmra.mrb[20].mxu1 %vm17172_vm5, %v5438_v30  ;;  %vm17187_vm5 = vmmov %vm17122_vm0  ;;  %v6668_v30 = vld [vmem:[#allocation2 + $0x122] sm:$0xff] }
 0x455   : > { %11665 = vmatprep.mubr.msk.f32.mxu1 %vm17122_vm0, %v5439_v7  ;;  %v6669_v7 = vld [vmem:[#allocation2 + $0x12a] sm:$0x3f] }
 0x458   : > { %11666 = vmatmul.mubr.msk.f32.gmra.mrb[22].mxu1 %vm17173_vm1, %v5440_v24  ;;  %vm17188_vm1 = vmmov %vm17122_vm0  ;;  %v9988_v24 = vld [vmem:[%s16734_s3 + $0xb0] sm:$0xff] }
 0x459   : > { %11668 = vmatprep.mubr.msk.f32.mxu1 %vm17174_vm2, %v5441_v1  ;;  %vm17189_vm2 = vmmov %vm17122_vm0  ;;  %v9989_v1 = vld [vmem:[%s16734_s3 + $0xb8] sm:$0xff] }
 0x45c   : > { %11669 = vmatmul.mubr.msk.f32.gmra.mrb[24].mxu1 %vm17175_vm4, %v5442_v50  ;;  %vm17190_vm4 = vmmov %vm17122_vm0  ;;  %v7064_v50 = vld [vmem:[#allocation2 + $0x13] sm:$0xff] }
 0x45d   : > { %11671 = vmatprep.mubr.msk.f32.mxu1 %vm17176_vm10, %v5443_v43  ;;  %vm17191_vm10 = vmmov %vm17122_vm0  ;;  %v12308_v43 = vpack.c.bf16 %v9989_v1, %v9988_v24  ;;  %v16441_v24 = vld [vmem:[#allocation2 + $0x94] sm:$0xff]  ;;  %v16445_v1 = vld [vmem:[#allocation2 + $0x9c] sm:$0xff] }
 0x460   : > { %11672 = vmatmul.mubr.msk.f32.gmra.mrb[26].mxu1 %vm17177_vm12, %v5444_v37  ;;  %vm17192_vm12 = vmmov %vm17122_vm0  ;;  %v7065_v37 = vld [vmem:[#allocation2 + $0x1b] sm:$0xff] }
 0x461   : > { %11674 = vmatprep.mubr.msk.f32.mxu1 %vm17178_vm14, %v5445_v47  ;;  %vm17193_vm14 = vmmov %vm17122_vm0  ;;  %v10026_v47 = vld [vmem:[%s16734_s3 + $0xc0] sm:$0xff] }
 0x464   : > { %11675 = vmatmul.mubr.msk.f32.gmra.mrb[28].mxu1 %vm17179_vm8, %v5446_v35  ;;  %vm17194_vm8 = vmmov %vm17122_vm0  ;;  %v10027_v35 = vld [vmem:[%s16734_s3 + $0xc8] sm:$0xff] }
 0x465   : > { %11677 = vmatprep.mubr.msk.f32.mxu1 %vm17180_vm6, %v5447_v31  ;;  %vm17195_vm6 = vmmov %vm17122_vm0  ;;  %v7066_v31 = vld [vmem:[#allocation2 + $0x23] sm:$0xff] }
 0x468   : > { %11678 = vmatmul.mubr.msk.f32.gmra.mrb[30].mxu1 %vm17181_vm15, %v5448_v22  ;;  %vm17196_vm15 = vmmov %vm17122_vm0  ;;  %v16331_v22 = vpack.c.bf16 %v10027_v35, %v10026_v47  ;;  %v7515_v47 = vld [vmem:[#allocation2 + $0xbc] sm:$0xff]  ;;  %v7516_v35 = vld [vmem:[#allocation2 + $0xc4] sm:$0xff] }
 0x469   : > { %11680 = vmatprep.mubr.msk.f32.mxu1 %vm17182_vm7, %v5449_v33  ;;  %vm17197_vm7 = vmmov %vm17122_vm0  ;;  %v7067_v33 = vld [vmem:[#allocation2 + $0x2b] sm:$0xff] }
 0x46c   : > { %11681 = vmatmul.mubr.msk.f32.gmra.mrb[32].mxu1 %vm17183_vm13, %v5450_v14  ;;  %vm17198_vm13 = vmmov %vm17122_vm0  ;;  %v7068_v14 = vld [vmem:[#allocation2 + $0x33] sm:$0xff] }
 0x46d   : > { %11683 = vmatprep.mubr.msk.f32.mxu1 %vm17184_vm11, %v5451_v12  ;;  %vm17199_vm11 = vmmov %vm17122_vm0  ;;  %v7069_v12 = vld [vmem:[#allocation2 + $0x3b] sm:$0xff] }
 0x470   : > { %11684 = vmatmul.mubr.msk.f32.gmra.mrb[34].mxu1 %vm17185_vm3, %v5452_v10  ;;  %vm17200_vm3 = vmmov %vm17122_vm0  ;;  %v7071_v10 = vld [vmem:[#allocation2 + $0x4b] sm:$0xff] }
 0x471   : > { %11694 = vmatprep.mubr.msk.f32.mxu1 %vm17186_vm9, %v6204_v28  ;;  %vm17201_vm9 = vmmov %vm17122_vm0  ;;  %v7070_v28 = vld [vmem:[#allocation2 + $0x43] sm:$0xff] }
 0x474   : > { %11695 = vmatmul.mubr.msk.f32.vlgmr.msra.gmra.mrb[0].mxu1 %vm17187_vm5, %v6205_v59  ;;  %vm17202_vm5 = vmmov %vm17122_vm0  ;;  %v7074_v59 = vld [vmem:[#allocation2 + $0x63] sm:$0xff] }
 0x475   : > { %11697 = vmatprep.mubr.msk.f32.mxu1 %vm17122_vm0, %v16165_v60  ;;  %12291 = vmatpush3.bf16.msra.mxu1 %v16115_v54  ;;  %v6228_v54 = vld [vmem:[#allocation2 + $0xc2] sm:$0xff] }
 0x476   : > { %12293 = vmatprep.subr.bf16.mxu1 %v12292_v42 }
 0x478   : > { %11698 = vmatmul.mubr.msk.f32.gmra.mrb[2].mxu1 %vm17188_vm1, %v16172_v34  ;;  %vm17203_vm1 = vmmov %vm17122_vm0 }
 0x479   : > { %11700 = vmatprep.mubr.msk.f32.mxu1 %vm17189_vm2, %v16176_v38  ;;  %12295 = vmatpush3.bf16.msra.mxu1 %v12292_v42  ;;  %vm17204_vm2 = vmmov %vm17122_vm0  ;;  %v7075_v42 = vld [vmem:[#allocation2 + $0x6b] sm:$0xff] }
 0x47a   : > { %12297 = vmatprep.subr.bf16.mxu1 %v16170_v39 }
 0x47c   : > { %11701 = vmatmul.mubr.msk.f32.gmra.mrb[4].mxu1 %vm17190_vm4, %v16181_v57  ;;  %vm17205_vm4 = vmmov %vm17122_vm0 }
 0x47d   : > { %11703 = vmatprep.mubr.msk.f32.mxu1 %vm17191_vm10, %v16185_v23  ;;  %vm17206_vm10 = vmmov %vm17122_vm0 }
 0x480   : > { %11704 = vmatmul.mubr.msk.f32.gmra.mrb[6].mxu1 %vm17192_vm12, %v16189_v62  ;;  %vm17207_vm12 = vmmov %vm17122_vm0 }
 0x481   : > { %11706 = vmatprep.mubr.msk.f32.mxu1 %vm17193_vm14, %v16193_v44  ;;  %vm17208_vm14 = vmmov %vm17122_vm0 }
 0x484   : > { %11707 = vmatmul.mubr.msk.f32.gmra.mrb[8].mxu1 %vm17194_vm8, %v16197_v29  ;;  %vm17209_vm8 = vmmov %vm17122_vm0 }
 0x485   : > { %11709 = vmatprep.mubr.msk.f32.mxu1 %vm17195_vm6, %v16201_v45  ;;  %vm17210_vm6 = vmmov %vm17122_vm0 }
 0x488   : > { %11710 = vmatmul.mubr.msk.f32.gmra.mrb[10].mxu1 %vm17196_vm15, %v16205_v25  ;;  %vm17211_vm15 = vmmov %vm17122_vm0 }
 0x489   : > { %11712 = vmatprep.mubr.msk.f32.mxu1 %vm17197_vm7, %v16209_v5  ;;  %vm17212_vm7 = vmmov %vm17122_vm0 }
 0x48c   : > { %11713 = vmatmul.mubr.msk.f32.gmra.mrb[12].mxu1 %vm17198_vm13, %v16213_v32  ;;  %vm17213_vm13 = vmmov %vm17122_vm0 }
 0x48d   : > { %11715 = vmatprep.mubr.msk.f32.mxu1 %vm17199_vm11, %v16217_v56  ;;  %vm17214_vm11 = vmmov %vm17122_vm0 }
 0x490   : > { %11716 = vmatmul.mubr.msk.f32.gmra.mrb[14].mxu1 %vm17200_vm3, %v16221_v26  ;;  %vm17215_vm3 = vmmov %vm17122_vm0 }
 0x491   : > { %11718 = vmatprep.mubr.msk.f32.mxu1 %vm17201_vm9, %v16225_v4  ;;  %vm17216_vm9 = vmmov %vm17122_vm0 }
 0x494   : > { %11719 = vmatmul.mubr.msk.f32.gmra.mrb[16].mxu1 %vm17202_vm5, %v16229_v63  ;;  %vm17217_vm5 = vmmov %vm17122_vm0 }
 0x495   : > { %11721 = vmatprep.mubr.msk.f32.mxu1 %vm17122_vm0, %v6222_v27 }
 0x498   : > { %11722 = vmatmul.mubr.msk.f32.gmra.mrb[18].mxu1 %vm17203_vm1, %v6223_v46  ;;  %vm17218_vm1 = vmmov %vm17122_vm0 }
 0x499   : > { %11724 = vmatprep.mubr.msk.f32.mxu1 %vm17204_vm2, %v6224_v49  ;;  %vm17219_vm2 = vmmov %vm17122_vm0 }
 0x49c   : > { %11725 = vmatmul.mubr.msk.f32.gmra.mrb[20].mxu1 %vm17205_vm4, %v6225_v40  ;;  %vm17220_vm4 = vmmov %vm17122_vm0 }
 0x49d   : > { %11727 = vmatprep.mubr.msk.f32.mxu1 %vm17206_vm10, %v6226_v20  ;;  %vm17221_vm10 = vmmov %vm17122_vm0 }
 0x4a0   : > { %11728 = vmatmul.mubr.msk.f32.gmra.mrb[22].mxu1 %vm17207_vm12, %v6227_v18  ;;  %vm17222_vm12 = vmmov %vm17122_vm0 }
 0x4a1   : > { %11730 = vmatprep.mubr.msk.f32.mxu1 %vm17208_vm14, %v6228_v54  ;;  %vm17223_vm14 = vmmov %vm17122_vm0 }
 0x4a4   : > { %11731 = vmatmul.mubr.msk.f32.gmra.mrb[24].mxu1 %vm17209_vm8, %v6229_v19  ;;  %vm17224_vm8 = vmmov %vm17122_vm0 }
 0x4a5   : > { %11733 = vmatprep.mubr.msk.f32.mxu1 %vm17210_vm6, %v6230_v21  ;;  %vm17225_vm6 = vmmov %vm17122_vm0 }
 0x4a8   : > { %11734 = vmatmul.mubr.msk.f32.gmra.mrb[26].mxu1 %vm17211_vm15, %v6231_v3  ;;  %vm17226_vm15 = vmmov %vm17122_vm0 }
 0x4a9   : > { %11736 = vmatprep.mubr.msk.f32.mxu1 %vm17212_vm7, %v6232_v0  ;;  %vm17227_vm7 = vmmov %vm17122_vm0 }
 0x4ac   : > { %11737 = vmatmul.mubr.msk.f32.gmra.mrb[28].mxu1 %vm17213_vm13, %v6233_v52  ;;  %vm17228_vm13 = vmmov %vm17122_vm0 }
 0x4ad   : > { %11739 = vmatprep.mubr.msk.f32.mxu1 %vm17214_vm11, %v6234_v55  ;;  %vm17229_vm11 = vmmov %vm17122_vm0 }
 0x4b0   : > { %11740 = vmatmul.mubr.msk.f32.gmra.mrb[30].mxu1 %vm17215_vm3, %v6235_v2  ;;  %vm17230_vm3 = vmmov %vm17122_vm0 }
 0x4b1   : > { %11742 = vmatprep.mubr.msk.f32.mxu1 %vm17216_vm9, %v6236_v13  ;;  %vm17231_vm9 = vmmov %vm17122_vm0 }
 0x4b4   : > { %11743 = vmatmul.mubr.msk.f32.gmra.mrb[32].mxu1 %vm17217_vm5, %v6237_v53  ;;  %vm17232_vm5 = vmmov %vm17122_vm0 }
 0x4b5   : > { %11745 = vmatprep.mubr.msk.f32.mxu1 %vm17122_vm0, %v6238_v11 }
 0x4b8   : > { %11746 = vmatmul.mubr.msk.f32.gmra.mrb[34].mxu1 %vm17218_vm1, %v6239_v58  ;;  %vm17233_vm1 = vmmov %vm17122_vm0  ;;  %v16401_v58 = vld [vmem:[#allocation2 + $0x44] sm:$0xff] }
 0x4b9   : > { %11756 = vmatprep.mubr.msk.f32.mxu1 %vm17219_vm2, %v16165_v60  ;;  %vm17234_vm2 = vmmov %vm17122_vm0  ;;  %v7078_v60 = vld [vmem:[#allocation2 + $0x83] sm:$0xff] }
 0x4bc   : > { %11757 = vmatmul.mubr.msk.f32.vlgmr.msra.gmra.mrb[0].mxu1 %vm17220_vm4, %v16172_v34  ;;  %vm17235_vm4 = vmmov %vm17122_vm0  ;;  %v7080_v34 = vld [vmem:[#allocation2 + $0x93] sm:$0xff] }
 0x4bd   : > { %11759 = vmatprep.mubr.msk.f32.mxu1 %vm17221_vm10, %v16176_v38  ;;  %12299 = vmatpush3.bf16.msra.mxu1 %v16170_v39  ;;  %vm17236_vm10 = vmmov %vm17122_vm0  ;;  %v7079_v39 = vld [vmem:[#allocation2 + $0x8b] sm:$0xff]  ;;  %v7081_v38 = vld [vmem:[#allocation2 + $0x9b] sm:$0xff] }
 0x4be   : > { %12301 = vmatprep.subr.bf16.mxu1 %v12300_v9 }
 0x4c0   : > { %11760 = vmatmul.mubr.msk.f32.gmra.mrb[2].mxu1 %vm17222_vm12, %v16181_v57  ;;  %vm17237_vm12 = vmmov %vm17122_vm0  ;;  %v7082_v57 = vld [vmem:[#allocation2 + $0xa3] sm:$0xff] }
 0x4c1   : > { %11762 = vmatprep.mubr.msk.f32.mxu1 %vm17223_vm14, %v16185_v23  ;;  %12303 = vmatpush3.bf16.msra.mxu1 %v12300_v9  ;;  %vm17238_vm14 = vmmov %vm17122_vm0  ;;  %v7083_v23 = vld [vmem:[#allocation2 + $0xab] sm:$0xff]  ;;  %v16413_v9 = vld [vmem:[#allocation2 + $0x5c] sm:$0xff] }
 0x4c2   : > { %12305 = vmatprep.subr.bf16.mxu1 %v12304_v41 }
 0x4c4   : > { %11763 = vmatmul.mubr.msk.f32.gmra.mrb[4].mxu1 %vm17224_vm8, %v16189_v62  ;;  %vm17239_vm8 = vmmov %vm17122_vm0  ;;  %v7084_v62 = vld [vmem:[#allocation2 + $0xb3] sm:$0xff] }
 0x4c5   : > { %11765 = vmatprep.mubr.msk.f32.mxu1 %vm17225_vm6, %v16193_v44  ;;  %vm17240_vm6 = vmmov %vm17122_vm0  ;;  %v7085_v44 = vld [vmem:[#allocation2 + $0xbb] sm:$0xff] }
 0x4c8   : > { %11766 = vmatmul.mubr.msk.f32.gmra.mrb[6].mxu1 %vm17226_vm15, %v16197_v29  ;;  %vm17241_vm15 = vmmov %vm17122_vm0  ;;  %v7086_v29 = vld [vmem:[#allocation2 + $0xc3] sm:$0xff] }
 0x4c9   : > { %11768 = vmatprep.mubr.msk.f32.mxu1 %vm17227_vm7, %v16201_v45  ;;  %vm17242_vm7 = vmmov %vm17122_vm0  ;;  %v7087_v45 = vld [vmem:[#allocation2 + $0xcb] sm:$0xff] }
 0x4cc   : > { %11769 = vmatmul.mubr.msk.f32.gmra.mrb[8].mxu1 %vm17228_vm13, %v16205_v25  ;;  %vm17243_vm13 = vmmov %vm17122_vm0  ;;  %v7088_v25 = vld [vmem:[#allocation2 + $0xd3] sm:$0xff] }
 0x4cd   : > { %11771 = vmatprep.mubr.msk.f32.mxu1 %vm17229_vm11, %v16209_v5  ;;  %vm17244_vm11 = vmmov %vm17122_vm0  ;;  %v7089_v5 = vld [vmem:[#allocation2 + $0xdb] sm:$0xff] }
 0x4d0   : > { %11772 = vmatmul.mubr.msk.f32.gmra.mrb[10].mxu1 %vm17230_vm3, %v16213_v32  ;;  %vm17245_vm3 = vmmov %vm17122_vm0  ;;  %v7090_v32 = vld [vmem:[#allocation2 + $0xe3] sm:$0xff] }
 0x4d1   : > { %11774 = vmatprep.mubr.msk.f32.mxu1 %vm17231_vm9, %v16217_v56  ;;  %vm17246_vm9 = vmmov %vm17122_vm0  ;;  %v7091_v56 = vld [vmem:[#allocation2 + $0xeb] sm:$0xff] }
 0x4d4   : > { %11775 = vmatmul.mubr.msk.f32.gmra.mrb[12].mxu1 %vm17232_vm5, %v16221_v26  ;;  %vm17247_vm5 = vmmov %vm17122_vm0  ;;  %v7092_v26 = vld [vmem:[#allocation2 + $0xf3] sm:$0xff] }
 0x4d5   : > { %11777 = vmatprep.mubr.msk.f32.mxu1 %vm17122_vm0, %v16225_v4  ;;  %v7093_v4 = vld [vmem:[#allocation2 + $0xfb] sm:$0xff] }
 0x4d8   : > { %11778 = vmatmul.mubr.msk.f32.gmra.mrb[14].mxu1 %vm17233_vm1, %v16229_v63  ;;  %vm17248_vm1 = vmmov %vm17122_vm0  ;;  %v7094_v63 = vld [vmem:[#allocation2 + $0x103] sm:$0xff] }
 0x4d9   : > { %11780 = vmatprep.mubr.msk.f32.mxu1 %vm17234_vm2, %v6222_v27  ;;  %vm17249_vm2 = vmmov %vm17122_vm0  ;;  %v7095_v27 = vld [vmem:[#allocation2 + $0x10b] sm:$0xff] }
 0x4dc   : > { %11781 = vmatmul.mubr.msk.f32.gmra.mrb[16].mxu1 %vm17235_vm4, %v6223_v46  ;;  %vm17250_vm4 = vmmov %vm17122_vm0  ;;  %v7096_v46 = vld [vmem:[#allocation2 + $0x113] sm:$0xff] }
 0x4dd   : > { %11783 = vmatprep.mubr.msk.f32.mxu1 %vm17236_vm10, %v6224_v49  ;;  %vm17251_vm10 = vmmov %vm17122_vm0  ;;  %v7097_v49 = vld [vmem:[#allocation2 + $0x11b] sm:$0xff] }
 0x4e0   : > { %11784 = vmatmul.mubr.msk.f32.gmra.mrb[18].mxu1 %vm17237_vm12, %v6225_v40  ;;  %vm17252_vm12 = vmmov %vm17122_vm0  ;;  %v7098_v40 = vld [vmem:[#allocation2 + $0x123] sm:$0xff] }
 0x4e1   : > { %11786 = vmatprep.mubr.msk.f32.mxu1 %vm17238_vm14, %v6226_v20  ;;  %vm17253_vm14 = vmmov %vm17122_vm0  ;;  %v7099_v20 = vld [vmem:[#allocation2 + $0x12b] sm:$0x3f] }
 0x4e4   : > { %11787 = vmatmul.mubr.msk.f32.gmra.mrb[20].mxu1 %vm17239_vm8, %v6227_v18  ;;  %vm17254_vm8 = vmmov %vm17122_vm0  ;;  %v10028_v18 = vld [vmem:[%s16734_s3 + $0xd0] sm:$0xff] }
 0x4e5   : > { %11789 = vmatprep.mubr.msk.f32.mxu1 %vm17240_vm6, %v6228_v54  ;;  %vm17255_vm6 = vmmov %vm17122_vm0  ;;  %v10029_v54 = vld [vmem:[%s16734_s3 + $0xd8] sm:$0xff] }
 0x4e8   : > { %11790 = vmatmul.mubr.msk.f32.gmra.mrb[22].mxu1 %vm17241_vm15, %v6229_v19  ;;  %vm17256_vm15 = vmmov %vm17122_vm0  ;;  %v7494_v19 = vld [vmem:[#allocation2 + $0x14] sm:$0xff] }
 0x4e9   : > { %11792 = vmatprep.mubr.msk.f32.mxu1 %vm17242_vm7, %v6230_v21  ;;  %vm17257_vm7 = vmmov %vm17122_vm0  ;;  %v12316_v21 = vpack.c.bf16 %v10029_v54, %v10028_v18  ;;  %v8364_v18 = vld [vmem:[#allocation2 + $0x75] sm:$0xff]  ;;  %v8365_v54 = vld [vmem:[#allocation2 + $0x7d] sm:$0xff] }
 0x4ec   : > { %11793 = vmatmul.mubr.msk.f32.gmra.mrb[24].mxu1 %vm17243_vm13, %v6231_v3  ;;  %vm17258_vm13 = vmmov %vm17122_vm0  ;;  %v7495_v3 = vld [vmem:[#allocation2 + $0x1c] sm:$0xff] }
 0x4ed   : > { %11795 = vmatprep.mubr.msk.f32.mxu1 %vm17244_vm11, %v6232_v0  ;;  %vm17259_vm11 = vmmov %vm17122_vm0  ;;  %v10066_v0 = vld [vmem:[%s16734_s3 + $0xe0] sm:$0xff] }
 0x4f0   : > { %11796 = vmatmul.mubr.msk.f32.gmra.mrb[26].mxu1 %vm17245_vm3, %v6233_v52  ;;  %vm17260_vm3 = vmmov %vm17122_vm0  ;;  %v10067_v52 = vld [vmem:[%s16734_s3 + $0xe8] sm:$0xff] }
 0x4f1   : > { %11798 = vmatprep.mubr.msk.f32.mxu1 %vm17246_vm9, %v6234_v55  ;;  %vm17261_vm9 = vmmov %vm17122_vm0  ;;  %v16381_v55 = vld [vmem:[#allocation2 + $0x24] sm:$0xff] }
 0x4f4   : > { %11799 = vmatmul.mubr.msk.f32.gmra.mrb[28].mxu1 %vm17247_vm5, %v6235_v2  ;;  %vm17262_vm5 = vmmov %vm17122_vm0  ;;  %v16386_v2 = vpack.c.bf16 %v10067_v52, %v10066_v0  ;;  %v8369_v0 = vld [vmem:[#allocation2 + $0x9d] sm:$0xff]  ;;  %v8370_v52 = vld [vmem:[#allocation2 + $0xa5] sm:$0xff] }
 0x4f5   : > { %11801 = vmatprep.mubr.msk.f32.mxu1 %vm17122_vm0, %v6236_v13  ;;  %v16388_v13 = vld [vmem:[#allocation2 + $0x2c] sm:$0xff] }
 0x4f8   : > { %11802 = vmatmul.mubr.msk.f32.gmra.mrb[30].mxu1 %vm17248_vm1, %v6237_v53  ;;  %vm17263_vm1 = vmmov %vm17122_vm0  ;;  %v16392_v53 = vld [vmem:[#allocation2 + $0x34] sm:$0xff] }
 0x4f9   : > { %11804 = vmatprep.mubr.msk.f32.mxu1 %vm17249_vm2, %v6238_v11  ;;  %vm17264_vm2 = vmmov %vm17122_vm0  ;;  %v16397_v11 = vld [vmem:[#allocation2 + $0x3c] sm:$0xff] }
 0x4fc   : > { %11805 = vmatmul.mubr.msk.f32.gmra.mrb[32].mxu1 %vm17250_vm4, %v6667_v8  ;;  %vm17265_vm4 = vmmov %vm17122_vm0  ;;  %v16429_v8 = vld [vmem:[#allocation2 + $0x7c] sm:$0xff] }
 0x4fd   : > { %11807 = vmatprep.mubr.msk.f32.mxu1 %vm17251_vm10, %v6668_v30  ;;  %vm17266_vm10 = vmmov %vm17122_vm0  ;;  %v16433_v30 = vld [vmem:[#allocation2 + $0x84] sm:$0xff] }
 0x500   : > { %11808 = vmatmul.mubr.msk.f32.gmra.mrb[34].mxu1 %vm17252_vm12, %v6669_v7  ;;  %vm17267_vm12 = vmmov %vm17122_vm0  ;;  %v16437_v7 = vld [vmem:[#allocation2 + $0x8c] sm:$0xff] }
 0x501   : > { %11818 = vmatprep.mubr.msk.f32.mxu1 %vm17253_vm14, %v7064_v50  ;;  %vm17268_vm14 = vmmov %vm17122_vm0  ;;  %v7512_v50 = vld [vmem:[#allocation2 + $0xa4] sm:$0xff] }
 0x504   : > { %11819 = vmatmul.mubr.msk.f32.vlgmr.msra.gmra.mrb[0].mxu1 %vm17254_vm8, %v7065_v37  ;;  %vm17269_vm8 = vmmov %vm17122_vm0  ;;  %v7514_v37 = vld [vmem:[#allocation2 + $0xb4] sm:$0xff] }
 0x505   : > { %11821 = vmatprep.mubr.msk.f32.mxu1 %vm17255_vm6, %v7066_v31  ;;  %12307 = vmatpush3.bf16.msra.mxu1 %v12304_v41  ;;  %vm17270_vm6 = vmmov %vm17122_vm0  ;;  %v16425_v41 = vld [vmem:[#allocation2 + $0x74] sm:$0xff]  ;;  %v7517_v31 = vld [vmem:[#allocation2 + $0xcc] sm:$0xff] }
 0x506   : > { %12309 = vmatprep.subr.bf16.mxu1 %v12308_v43 }
 0x508   : > { %11822 = vmatmul.mubr.msk.f32.gmra.mrb[2].mxu1 %vm17256_vm15, %v7067_v33  ;;  %vm17271_vm15 = vmmov %vm17122_vm0  ;;  %v7519_v33 = vld [vmem:[#allocation2 + $0xdc] sm:$0xff] }
 0x509   : > { %11824 = vmatprep.mubr.msk.f32.mxu1 %vm17257_vm7, %v7068_v14  ;;  %12311 = vmatpush3.bf16.msra.mxu1 %v12308_v43  ;;  %vm17272_vm7 = vmmov %vm17122_vm0  ;;  %v7513_v43 = vld [vmem:[#allocation2 + $0xac] sm:$0xff]  ;;  %v7520_v14 = vld [vmem:[#allocation2 + $0xe4] sm:$0xff] }
 0x50a   : > { %12313 = vmatprep.subr.bf16.mxu1 %v16331_v22 }
 0x50c   : > { %11825 = vmatmul.mubr.msk.f32.gmra.mrb[4].mxu1 %vm17258_vm13, %v7069_v12  ;;  %vm17273_vm13 = vmmov %vm17122_vm0  ;;  %v7521_v12 = vld [vmem:[#allocation2 + $0xec] sm:$0xff] }
 0x50d   : > { %11827 = vmatprep.mubr.msk.f32.mxu1 %vm17259_vm11, %v7070_v28  ;;  %vm17274_vm11 = vmmov %vm17122_vm0  ;;  %v7522_v28 = vld [vmem:[#allocation2 + $0xf4] sm:$0xff] }
 0x510   : > { %11828 = vmatmul.mubr.msk.f32.gmra.mrb[6].mxu1 %vm17260_vm3, %v7071_v10  ;;  %vm17275_vm3 = vmmov %vm17122_vm0  ;;  %v7523_v10 = vld [vmem:[#allocation2 + $0xfc] sm:$0xff] }
 0x511   : > { %11830 = vmatprep.mubr.msk.f32.mxu1 %vm17261_vm9, %v7072_v16  ;;  %vm17276_vm9 = vmmov %vm17122_vm0  ;;  %v7524_v16 = vld [vmem:[#allocation2 + $0x104] sm:$0xff] }
 0x514   : > { %11831 = vmatmul.mubr.msk.f32.gmra.mrb[8].mxu1 %vm17262_vm5, %v7073_v15  ;;  %vm17277_vm5 = vmmov %vm17122_vm0  ;;  %v7525_v15 = vld [vmem:[#allocation2 + $0x10c] sm:$0xff] }
 0x515   : > { %11833 = vmatprep.mubr.msk.f32.mxu1 %vm17122_vm0, %v7074_v59  ;;  %v7526_v59 = vld [vmem:[#allocation2 + $0x114] sm:$0xff] }
 0x518   : > { %11834 = vmatmul.mubr.msk.f32.gmra.mrb[10].mxu1 %vm17263_vm1, %v7075_v42  ;;  %vm17278_vm1 = vmmov %vm17122_vm0  ;;  %v7527_v42 = vld [vmem:[#allocation2 + $0x11c] sm:$0xff] }
 0x519   : > { %11836 = vmatprep.mubr.msk.f32.mxu1 %vm17264_vm2, %v7076_v6  ;;  %vm17279_vm2 = vmmov %vm17122_vm0  ;;  %v7528_v6 = vld [vmem:[#allocation2 + $0x124] sm:$0xff] }
 0x51c   : > { %11837 = vmatmul.mubr.msk.f32.gmra.mrb[12].mxu1 %vm17265_vm4, %v7077_v17  ;;  %vm17280_vm4 = vmmov %vm17122_vm0  ;;  %v7529_v17 = vld [vmem:[#allocation2 + $0x12c] sm:$0x3f] }
 0x51d   : > { %11839 = vmatprep.mubr.msk.f32.mxu1 %vm17266_vm10, %v7078_v60  ;;  %vm17281_vm10 = vmmov %vm17122_vm0  ;;  %v10068_v60 = vld [vmem:[%s16734_s3 + $0xf0] sm:$0xff] }
 0x520   : > { %11840 = vmatmul.mubr.msk.f32.gmra.mrb[14].mxu1 %vm17267_vm12, %v7079_v39  ;;  %vm17282_vm12 = vmmov %vm17122_vm0  ;;  %v10069_v39 = vld [vmem:[%s16734_s3 + $0xf8] sm:$0xff] }
 0x521   : > { %11842 = vmatprep.mubr.msk.f32.mxu1 %vm17268_vm14, %v7080_v34  ;;  %vm17283_vm14 = vmmov %vm17122_vm0  ;;  %v12324_v34 = vpack.c.bf16 %v10069_v39, %v10068_v60  ;;  %v8800_v60 = vld [vmem:[#allocation2 + $0xa6] sm:$0xff]  ;;  %v8801_v39 = vld [vmem:[#allocation2 + $0xae] sm:$0xff] }
 0x524   : > { %11843 = vmatmul.mubr.msk.f32.gmra.mrb[16].mxu1 %vm17269_vm8, %v7081_v38  ;;  %vm17284_vm8 = vmmov %vm17122_vm0  ;;  %v10106_v38 = vld [vmem:[%s16734_s3 + $0x100] sm:$0xff] }
 0x525   : > { %11845 = vmatprep.mubr.msk.f32.mxu1 %vm17270_vm6, %v7082_v57  ;;  %vm17285_vm6 = vmmov %vm17122_vm0  ;;  %v10107_v57 = vld [vmem:[%s16734_s3 + $0x108] sm:$0xff] }
 0x528   : > { %11846 = vmatmul.mubr.msk.f32.gmra.mrb[18].mxu1 %vm17271_vm15, %v7083_v23  ;;  %vm17286_vm15 = vmmov %vm17122_vm0  ;;  %v12328_v23 = vpack.c.bf16 %v10107_v57, %v10106_v38  ;;  %v8803_v38 = vld [vmem:[#allocation2 + $0xbe] sm:$0xff]  ;;  %v8804_v57 = vld [vmem:[#allocation2 + $0xc6] sm:$0xff] }
 0x529   : > { %11848 = vmatprep.mubr.msk.f32.mxu1 %vm17272_vm7, %v7084_v62  ;;  %vm17287_vm7 = vmmov %vm17122_vm0  ;;  %v7958_v62 = vld [vmem:[#allocation2 + $0x134] sm:$0xff] }
 0x52c   : > { %11849 = vmatmul.mubr.msk.f32.gmra.mrb[20].mxu1 %vm17273_vm13, %v7085_v44  ;;  %vm17288_vm13 = vmmov %vm17122_vm0  ;;  %v7957_v44 = vld [vmem:[#allocation2 + $0x12c] sm:$0xff] }
 0x52d   : > { %11851 = vmatprep.mubr.msk.f32.mxu1 %vm17274_vm11, %v7086_v29  ;;  %vm17289_vm11 = vmmov %vm17122_vm0  ;;  %v7959_v29 = vld [vmem:[#allocation2 + $0x13c] sm:$0x3f] }
 0x530   : > { %11852 = vmatmul.mubr.msk.f32.gmra.mrb[22].mxu1 %vm17275_vm3, %v7087_v45  ;;  %vm17290_vm3 = vmmov %vm17122_vm0  ;;  %v10108_v45 = vld [vmem:[%s16734_s3 + $0x110] sm:$0xff] }
 0x531   : > { %11854 = vmatprep.mubr.msk.f32.mxu1 %vm17276_vm9, %v7088_v25  ;;  %vm17291_vm9 = vmmov %vm17122_vm0  ;;  %v10109_v25 = vld [vmem:[%s16734_s3 + $0x118] sm:$0xff] }
 0x534   : > { %11855 = vmatmul.mubr.msk.f32.gmra.mrb[24].mxu1 %vm17277_vm5, %v7089_v5  ;;  %vm17292_vm5 = vmmov %vm17122_vm0  ;;  %v8354_v5 = vld [vmem:[#allocation2 + $0x25] sm:$0xff] }
 0x535   : > { %11857 = vmatprep.mubr.msk.f32.mxu1 %vm17122_vm0, %v7090_v32  ;;  %v12332_v32 = vpack.c.bf16 %v10109_v25, %v10108_v45  ;;  %v8809_v45 = vld [vmem:[#allocation2 + $0xee] sm:$0xff]  ;;  %v8810_v25 = vld [vmem:[#allocation2 + $0xf6] sm:$0xff] }
 0x538   : > { %11858 = vmatmul.mubr.msk.f32.gmra.mrb[26].mxu1 %vm17278_vm1, %v7091_v56  ;;  %vm17293_vm1 = vmmov %vm17122_vm0  ;;  %v8355_v56 = vld [vmem:[#allocation2 + $0x2d] sm:$0xff] }
 0x539   : > { %11860 = vmatprep.mubr.msk.f32.mxu1 %vm17279_vm2, %v7092_v26  ;;  %vm17294_vm2 = vmmov %vm17122_vm0  ;;  %v8356_v26 = vld [vmem:[#allocation2 + $0x35] sm:$0xff] }
 0x53c   : > { %11861 = vmatmul.mubr.msk.f32.gmra.mrb[28].mxu1 %vm17280_vm4, %v7093_v4  ;;  %vm17295_vm4 = vmmov %vm17122_vm0  ;;  %v8357_v4 = vld [vmem:[#allocation2 + $0x3d] sm:$0xff] }
 0x53d   : > { %11863 = vmatprep.mubr.msk.f32.mxu1 %vm17281_vm10, %v7094_v63  ;;  %vm17296_vm10 = vmmov %vm17122_vm0  ;;  %v8358_v63 = vld [vmem:[#allocation2 + $0x45] sm:$0xff] }
 0x540   : > { %11864 = vmatmul.mubr.msk.f32.gmra.mrb[30].mxu1 %vm17282_vm12, %v7095_v27  ;;  %vm17297_vm12 = vmmov %vm17122_vm0  ;;  %v8359_v27 = vld [vmem:[#allocation2 + $0x4d] sm:$0xff] }
 0x541   : > { %11866 = vmatprep.mubr.msk.f32.mxu1 %vm17283_vm14, %v7096_v46  ;;  %vm17298_vm14 = vmmov %vm17122_vm0  ;;  %v8360_v46 = vld [vmem:[#allocation2 + $0x55] sm:$0xff] }
 0x544   : > { %11867 = vmatmul.mubr.msk.f32.gmra.mrb[32].mxu1 %vm17284_vm8, %v7097_v49  ;;  %vm17299_vm8 = vmmov %vm17122_vm0  ;;  %v8361_v49 = vld [vmem:[#allocation2 + $0x5d] sm:$0xff] }
 0x545   : > { %11869 = vmatprep.mubr.msk.f32.mxu1 %vm17285_vm6, %v7098_v40  ;;  %vm17300_vm6 = vmmov %vm17122_vm0  ;;  %v8362_v40 = vld [vmem:[#allocation2 + $0x65] sm:$0xff] }
 0x548   : > { %11870 = vmatmul.mubr.msk.f32.gmra.mrb[34].mxu1 %vm17286_vm15, %v7099_v20  ;;  %vm17301_vm15 = vmmov %vm17122_vm0  ;;  %v8363_v20 = vld [vmem:[#allocation2 + $0x6d] sm:$0xff] }
 0x549   : > { %11880 = vmatprep.mubr.msk.f32.mxu1 %vm17287_vm7, %v7494_v19  ;;  %vm17302_vm7 = vmmov %vm17122_vm0  ;;  %v8366_v19 = vld [vmem:[#allocation2 + $0x85] sm:$0xff] }
 0x54c   : > { %11881 = vmatmul.mubr.msk.f32.vlgmr.msra.gmra.mrb[0].mxu1 %vm17288_vm13, %v7495_v3  ;;  %vm17303_vm13 = vmmov %vm17122_vm0  ;;  %v8368_v3 = vld [vmem:[#allocation2 + $0x95] sm:$0xff] }
 0x54d   : > { %11883 = vmatprep.mubr.msk.f32.mxu1 %vm17289_vm11, %v16381_v55  ;;  %12315 = vmatpush3.bf16.msra.mxu1 %v16331_v22  ;;  %vm17304_vm11 = vmmov %vm17122_vm0  ;;  %v7518_v22 = vld [vmem:[#allocation2 + $0xd4] sm:$0xff] }
 0x54e   : > { %12317 = vmatprep.subr.bf16.mxu1 %v12316_v21 }
 0x550   : > { %11884 = vmatmul.mubr.msk.f32.gmra.mrb[2].mxu1 %vm17290_vm3, %v16388_v13  ;;  %vm17305_vm3 = vmmov %vm17122_vm0 }
 0x551   : > { %11886 = vmatprep.mubr.msk.f32.mxu1 %vm17291_vm9, %v16392_v53  ;;  %12319 = vmatpush3.bf16.msra.mxu1 %v12316_v21  ;;  %vm17306_vm9 = vmmov %vm17122_vm0  ;;  %v8367_v21 = vld [vmem:[#allocation2 + $0x8d] sm:$0xff] }
 0x552   : > { %12321 = vmatprep.subr.bf16.mxu1 %v16386_v2 }
 0x554   : > { %11887 = vmatmul.mubr.msk.f32.gmra.mrb[4].mxu1 %vm17292_vm5, %v16397_v11  ;;  %vm17307_vm5 = vmmov %vm17122_vm0 }
 0x555   : > { %11889 = vmatprep.mubr.msk.f32.mxu1 %vm17122_vm0, %v16401_v58 }
 0x558   : > { %11890 = vmatmul.mubr.msk.f32.gmra.mrb[6].mxu1 %vm17293_vm1, %v16405_v36  ;;  %vm17308_vm1 = vmmov %vm17122_vm0 }
 0x559   : > { %11892 = vmatprep.mubr.msk.f32.mxu1 %vm17294_vm2, %v16409_v61  ;;  %vm17309_vm2 = vmmov %vm17122_vm0 }
 0x55c   : > { %11893 = vmatmul.mubr.msk.f32.gmra.mrb[8].mxu1 %vm17295_vm4, %v16413_v9  ;;  %vm17310_vm4 = vmmov %vm17122_vm0 }
 0x55d   : > { %11895 = vmatprep.mubr.msk.f32.mxu1 %vm17296_vm10, %v16417_v48  ;;  %vm17311_vm10 = vmmov %vm17122_vm0 }
 0x560   : > { %11896 = vmatmul.mubr.msk.f32.gmra.mrb[10].mxu1 %vm17297_vm12, %v16421_v51  ;;  %vm17312_vm12 = vmmov %vm17122_vm0 }
 0x561   : > { %11898 = vmatprep.mubr.msk.f32.mxu1 %vm17298_vm14, %v16425_v41  ;;  %vm17313_vm14 = vmmov %vm17122_vm0 }
 0x564   : > { %11899 = vmatmul.mubr.msk.f32.gmra.mrb[12].mxu1 %vm17299_vm8, %v16429_v8  ;;  %vm17314_vm8 = vmmov %vm17122_vm0 }
 0x565   : > { %11901 = vmatprep.mubr.msk.f32.mxu1 %vm17300_vm6, %v16433_v30  ;;  %vm17315_vm6 = vmmov %vm17122_vm0 }
 0x568   : > { %11902 = vmatmul.mubr.msk.f32.gmra.mrb[14].mxu1 %vm17301_vm15, %v16437_v7  ;;  %vm17316_vm15 = vmmov %vm17122_vm0 }
 0x569   : > { %11904 = vmatprep.mubr.msk.f32.mxu1 %vm17302_vm7, %v16441_v24  ;;  %vm17317_vm7 = vmmov %vm17122_vm0 }
 0x56c   : > { %11905 = vmatmul.mubr.msk.f32.gmra.mrb[16].mxu1 %vm17303_vm13, %v16445_v1  ;;  %vm17318_vm13 = vmmov %vm17122_vm0 }
 0x56d   : > { %11907 = vmatprep.mubr.msk.f32.mxu1 %vm17304_vm11, %v7512_v50  ;;  %vm17319_vm11 = vmmov %vm17122_vm0 }
 0x570   : > { %11908 = vmatmul.mubr.msk.f32.gmra.mrb[18].mxu1 %vm17305_vm3, %v7513_v43  ;;  %vm17320_vm3 = vmmov %vm17122_vm0 }
 0x571   : > { %11910 = vmatprep.mubr.msk.f32.mxu1 %vm17306_vm9, %v7514_v37  ;;  %vm17321_vm9 = vmmov %vm17122_vm0 }
 0x574   : > { %11911 = vmatmul.mubr.msk.f32.gmra.mrb[20].mxu1 %vm17307_vm5, %v7515_v47  ;;  %vm17322_vm5 = vmmov %vm17122_vm0 }
 0x575   : > { %11913 = vmatprep.mubr.msk.f32.mxu1 %vm17122_vm0, %v7516_v35 }
 0x578   : > { %11914 = vmatmul.mubr.msk.f32.gmra.mrb[22].mxu1 %vm17308_vm1, %v7517_v31  ;;  %vm17323_vm1 = vmmov %vm17122_vm0 }
 0x579   : > { %11916 = vmatprep.mubr.msk.f32.mxu1 %vm17309_vm2, %v7518_v22  ;;  %vm17324_vm2 = vmmov %vm17122_vm0 }
 0x57c   : > { %11917 = vmatmul.mubr.msk.f32.gmra.mrb[24].mxu1 %vm17310_vm4, %v7519_v33  ;;  %vm17325_vm4 = vmmov %vm17122_vm0 }
 0x57d   : > { %11919 = vmatprep.mubr.msk.f32.mxu1 %vm17311_vm10, %v7520_v14  ;;  %vm17326_vm10 = vmmov %vm17122_vm0 }
 0x580   : > { %11920 = vmatmul.mubr.msk.f32.gmra.mrb[26].mxu1 %vm17312_vm12, %v7521_v12  ;;  %vm17327_vm12 = vmmov %vm17122_vm0 }
 0x581   : > { %11922 = vmatprep.mubr.msk.f32.mxu1 %vm17313_vm14, %v7522_v28  ;;  %vm17328_vm14 = vmmov %vm17122_vm0 }
 0x584   : > { %11923 = vmatmul.mubr.msk.f32.gmra.mrb[28].mxu1 %vm17314_vm8, %v7523_v10  ;;  %vm17329_vm8 = vmmov %vm17122_vm0 }
 0x585   : > { %11925 = vmatprep.mubr.msk.f32.mxu1 %vm17315_vm6, %v7524_v16  ;;  %vm17330_vm6 = vmmov %vm17122_vm0 }
 0x588   : > { %11926 = vmatmul.mubr.msk.f32.gmra.mrb[30].mxu1 %vm17316_vm15, %v7525_v15  ;;  %vm17331_vm15 = vmmov %vm17122_vm0 }
 0x589   : > { %11928 = vmatprep.mubr.msk.f32.mxu1 %vm17317_vm7, %v7526_v59  ;;  %vm17332_vm7 = vmmov %vm17122_vm0 }
 0x58c   : > { %11929 = vmatmul.mubr.msk.f32.gmra.mrb[32].mxu1 %vm17318_vm13, %v7527_v42  ;;  %vm17333_vm13 = vmmov %vm17122_vm0 }
 0x58d   : > { %11931 = vmatprep.mubr.msk.f32.mxu1 %vm17319_vm11, %v7528_v6  ;;  %vm17334_vm11 = vmmov %vm17122_vm0 }
 0x590   : > { %11932 = vmatmul.mubr.msk.f32.gmra.mrb[34].mxu1 %vm17320_vm3, %v7529_v17  ;;  %vm17335_vm3 = vmmov %vm17122_vm0  ;;  %v8799_v17 = vld [vmem:[#allocation2 + $0x9e] sm:$0xff] }
 0x591   : > { %11942 = vmatprep.mubr.msk.f32.mxu1 %vm17321_vm9, %v16381_v55  ;;  %vm17336_vm9 = vmmov %vm17122_vm0  ;;  %v8371_v55 = vld [vmem:[#allocation2 + $0xad] sm:$0xff] }
 0x594   : > { %11943 = vmatmul.mubr.msk.f32.vlgmr.msra.gmra.mrb[0].mxu1 %vm17322_vm5, %v16388_v13  ;;  %vm17337_vm5 = vmmov %vm17122_vm0  ;;  %v8373_v13 = vld [vmem:[#allocation2 + $0xbd] sm:$0xff] }
 0x595   : > { %11945 = vmatprep.mubr.msk.f32.mxu1 %vm17122_vm0, %v16392_v53  ;;  %12323 = vmatpush3.bf16.msra.mxu1 %v16386_v2  ;;  %v8372_v2 = vld [vmem:[#allocation2 + $0xb5] sm:$0xff]  ;;  %v8374_v53 = vld [vmem:[#allocation2 + $0xc5] sm:$0xff] }
 0x596   : > { %12325 = vmatprep.subr.bf16.mxu1 %v12324_v34 }
 0x598   : > { %11946 = vmatmul.mubr.msk.f32.gmra.mrb[2].mxu1 %vm17323_vm1, %v16397_v11  ;;  %vm17338_vm1 = vmmov %vm17122_vm0  ;;  %v8375_v11 = vld [vmem:[#allocation2 + $0xcd] sm:$0xff] }
 0x599   : > { %11948 = vmatprep.mubr.msk.f32.mxu1 %vm17324_vm2, %v16401_v58  ;;  %12327 = vmatpush3.bf16.msra.mxu1 %v12324_v34  ;;  %vm17339_vm2 = vmmov %vm17122_vm0  ;;  %v8376_v58 = vld [vmem:[#allocation2 + $0xd5] sm:$0xff] }
 0x59a   : > { %12329 = vmatprep.subr.bf16.mxu1 %v12328_v23  ;;  %v8802_v34 = vld [vmem:[#allocation2 + $0xb6] sm:$0xff] }
 0x59c   : > { %11949 = vmatmul.mubr.msk.f32.gmra.mrb[4].mxu1 %vm17325_vm4, %v16405_v36  ;;  %vm17340_vm4 = vmmov %vm17122_vm0  ;;  %v8377_v36 = vld [vmem:[#allocation2 + $0xdd] sm:$0xff] }
 0x59d   : > { %11951 = vmatprep.mubr.msk.f32.mxu1 %vm17326_vm10, %v16409_v61  ;;  %vm17341_vm10 = vmmov %vm17122_vm0  ;;  %v8378_v61 = vld [vmem:[#allocation2 + $0xe5] sm:$0xff] }
 0x5a0   : > { %11952 = vmatmul.mubr.msk.f32.gmra.mrb[6].mxu1 %vm17327_vm12, %v16413_v9  ;;  %vm17342_vm12 = vmmov %vm17122_vm0  ;;  %v8379_v9 = vld [vmem:[#allocation2 + $0xed] sm:$0xff] }
 0x5a1   : > { %11954 = vmatprep.mubr.msk.f32.mxu1 %vm17328_vm14, %v16417_v48  ;;  %vm17343_vm14 = vmmov %vm17122_vm0  ;;  %v8380_v48 = vld [vmem:[#allocation2 + $0xf5] sm:$0xff] }
 0x5a4   : > { %11955 = vmatmul.mubr.msk.f32.gmra.mrb[8].mxu1 %vm17329_vm8, %v16421_v51  ;;  %vm17344_vm8 = vmmov %vm17122_vm0  ;;  %v8381_v51 = vld [vmem:[#allocation2 + $0xfd] sm:$0xff] }
 0x5a5   : > { %11957 = vmatprep.mubr.msk.f32.mxu1 %vm17330_vm6, %v16425_v41  ;;  %vm17345_vm6 = vmmov %vm17122_vm0  ;;  %v8382_v41 = vld [vmem:[#allocation2 + $0x105] sm:$0xff] }
 0x5a8   : > { %11958 = vmatmul.mubr.msk.f32.gmra.mrb[10].mxu1 %vm17331_vm15, %v16429_v8  ;;  %vm17346_vm15 = vmmov %vm17122_vm0  ;;  %v8383_v8 = vld [vmem:[#allocation2 + $0x10d] sm:$0xff] }
 0x5a9   : > { %11960 = vmatprep.mubr.msk.f32.mxu1 %vm17332_vm7, %v16433_v30  ;;  %vm17347_vm7 = vmmov %vm17122_vm0  ;;  %v8384_v30 = vld [vmem:[#allocation2 + $0x115] sm:$0xff] }
 0x5ac   : > { %11961 = vmatmul.mubr.msk.f32.gmra.mrb[12].mxu1 %vm17333_vm13, %v16437_v7  ;;  %vm17348_vm13 = vmmov %vm17122_vm0  ;;  %v8385_v7 = vld [vmem:[#allocation2 + $0x11d] sm:$0xff] }
 0x5ad   : > { %11963 = vmatprep.mubr.msk.f32.mxu1 %vm17334_vm11, %v16441_v24  ;;  %vm17349_vm11 = vmmov %vm17122_vm0  ;;  %v8386_v24 = vld [vmem:[#allocation2 + $0x125] sm:$0xff] }
 0x5b0   : > { %11964 = vmatmul.mubr.msk.f32.gmra.mrb[14].mxu1 %vm17335_vm3, %v16445_v1  ;;  %vm17350_vm3 = vmmov %vm17122_vm0  ;;  %v8388_v1 = vld [vmem:[#allocation2 + $0x135] sm:$0xff] }
 0x5b1   : > { %11966 = vmatprep.mubr.msk.f32.mxu1 %vm17336_vm9, %v7512_v50  ;;  %vm17351_vm9 = vmmov %vm17122_vm0  ;;  %v8387_v50 = vld [vmem:[#allocation2 + $0x12d] sm:$0xff] }
 0x5b4   : > { %11967 = vmatmul.mubr.msk.f32.gmra.mrb[16].mxu1 %vm17337_vm5, %v7513_v43  ;;  %vm17352_vm5 = vmmov %vm17122_vm0  ;;  %v8389_v43 = vld [vmem:[#allocation2 + $0x13d] sm:$0x3f] }
 0x5b5   : > { %11969 = vmatprep.mubr.msk.f32.mxu1 %vm17122_vm0, %v7514_v37  ;;  %v8784_v37 = vld [vmem:[#allocation2 + $0x26] sm:$0xff] }
 0x5b8   : > { %11970 = vmatmul.mubr.msk.f32.gmra.mrb[18].mxu1 %vm17338_vm1, %v7515_v47  ;;  %vm17353_vm1 = vmmov %vm17122_vm0  ;;  %v8785_v47 = vld [vmem:[#allocation2 + $0x2e] sm:$0xff] }
 0x5b9   : > { %11972 = vmatprep.mubr.msk.f32.mxu1 %vm17339_vm2, %v7516_v35  ;;  %vm17354_vm2 = vmmov %vm17122_vm0  ;;  %v8786_v35 = vld [vmem:[#allocation2 + $0x36] sm:$0xff] }
 0x5bc   : > { %11973 = vmatmul.mubr.msk.f32.gmra.mrb[20].mxu1 %vm17340_vm4, %v7517_v31  ;;  %vm17355_vm4 = vmmov %vm17122_vm0  ;;  %v8787_v31 = vld [vmem:[#allocation2 + $0x3e] sm:$0xff] }
 0x5bd   : > { %11975 = vmatprep.mubr.msk.f32.mxu1 %vm17341_vm10, %v7518_v22  ;;  %vm17356_vm10 = vmmov %vm17122_vm0  ;;  %v8788_v22 = vld [vmem:[#allocation2 + $0x46] sm:$0xff] }
 0x5c0   : > { %11976 = vmatmul.mubr.msk.f32.gmra.mrb[22].mxu1 %vm17342_vm12, %v7519_v33  ;;  %vm17357_vm12 = vmmov %vm17122_vm0  ;;  %v8789_v33 = vld [vmem:[#allocation2 + $0x4e] sm:$0xff] }
 0x5c1   : > { %11978 = vmatprep.mubr.msk.f32.mxu1 %vm17343_vm14, %v7520_v14  ;;  %vm17358_vm14 = vmmov %vm17122_vm0  ;;  %v8790_v14 = vld [vmem:[#allocation2 + $0x56] sm:$0xff] }
 0x5c4   : > { %11979 = vmatmul.mubr.msk.f32.gmra.mrb[24].mxu1 %vm17344_vm8, %v7521_v12  ;;  %vm17359_vm8 = vmmov %vm17122_vm0  ;;  %v8791_v12 = vld [vmem:[#allocation2 + $0x5e] sm:$0xff] }
 0x5c5   : > { %11981 = vmatprep.mubr.msk.f32.mxu1 %vm17345_vm6, %v7522_v28  ;;  %vm17360_vm6 = vmmov %vm17122_vm0  ;;  %v8792_v28 = vld [vmem:[#allocation2 + $0x66] sm:$0xff] }
 0x5c8   : > { %11982 = vmatmul.mubr.msk.f32.gmra.mrb[26].mxu1 %vm17346_vm15, %v7523_v10  ;;  %vm17361_vm15 = vmmov %vm17122_vm0  ;;  %v8793_v10 = vld [vmem:[#allocation2 + $0x6e] sm:$0xff] }
 0x5c9   : > { %11984 = vmatprep.mubr.msk.f32.mxu1 %vm17347_vm7, %v7524_v16  ;;  %vm17362_vm7 = vmmov %vm17122_vm0  ;;  %v8794_v16 = vld [vmem:[#allocation2 + $0x76] sm:$0xff] }
 0x5cc   : > { %11985 = vmatmul.mubr.msk.f32.gmra.mrb[28].mxu1 %vm17348_vm13, %v7525_v15  ;;  %vm17363_vm13 = vmmov %vm17122_vm0  ;;  %v8795_v15 = vld [vmem:[#allocation2 + $0x7e] sm:$0xff] }
 0x5cd   : > { %11987 = vmatprep.mubr.msk.f32.mxu1 %vm17349_vm11, %v7526_v59  ;;  %vm17364_vm11 = vmmov %vm17122_vm0  ;;  %v8796_v59 = vld [vmem:[#allocation2 + $0x86] sm:$0xff] }
 0x5d0   : > { %11988 = vmatmul.mubr.msk.f32.gmra.mrb[30].mxu1 %vm17350_vm3, %v7527_v42  ;;  %vm17365_vm3 = vmmov %vm17122_vm0  ;;  %v8797_v42 = vld [vmem:[#allocation2 + $0x8e] sm:$0xff] }
 0x5d1   : > { %11990 = vmatprep.mubr.msk.f32.mxu1 %vm17351_vm9, %v7528_v6  ;;  %vm17366_vm9 = vmmov %vm17122_vm0  ;;  %v8798_v6 = vld [vmem:[#allocation2 + $0x96] sm:$0xff] }
 0x5d4   : > { %11991 = vmatmul.mubr.msk.f32.gmra.mrb[32].mxu1 %vm17352_vm5, %v7957_v44  ;;  %vm17367_vm5 = vmmov %vm17122_vm0  ;;  %v8807_v44 = vld [vmem:[#allocation2 + $0xde] sm:$0xff] }
 0x5d5   : > { %11993 = vmatprep.mubr.msk.f32.mxu1 %vm17122_vm0, %v7958_v62  ;;  %v8806_v62 = vld [vmem:[#allocation2 + $0xd6] sm:$0xff] }
 0x5d8   : > { %11994 = vmatmul.mubr.msk.f32.gmra.mrb[34].mxu1 %vm17353_vm1, %v7959_v29  ;;  %vm17368_vm1 = vmmov %vm17122_vm0  ;;  %v8808_v29 = vld [vmem:[#allocation2 + $0xe6] sm:$0xff] }
 0x5d9   : > { %12004 = vmatprep.mubr.msk.f32.mxu1 %vm17354_vm2, %v8354_v5  ;;  %vm17369_vm2 = vmmov %vm17122_vm0  ;;  %v8811_v5 = vld [vmem:[#allocation2 + $0xfe] sm:$0xff] }
 0x5dc   : > { %12005 = vmatmul.mubr.msk.f32.vlgmr.msra.gmra.mrb[0].mxu1 %vm17355_vm4, %v8355_v56  ;;  %vm17370_vm4 = vmmov %vm17122_vm0  ;;  %v8813_v56 = vld [vmem:[#allocation2 + $0x10e] sm:$0xff] }
 0x5dd   : > { %12007 = vmatprep.mubr.msk.f32.mxu1 %vm17356_vm10, %v8356_v26  ;;  %12331 = vmatpush3.bf16.msra.mxu1 %v12328_v23  ;;  %vm17371_vm10 = vmmov %vm17122_vm0  ;;  %v8805_v23 = vld [vmem:[#allocation2 + $0xce] sm:$0xff]  ;;  %v8814_v26 = vld [vmem:[#allocation2 + $0x116] sm:$0xff] }
 0x5de   : > { %12333 = vmatprep.subr.bf16.mxu1 %v12332_v32 }
 0x5e0   : > { %12008 = vmatmul.mubr.msk.f32.gmra.mrb[2].mxu1 %vm17357_vm12, %v8357_v4  ;;  %vm17372_vm12 = vmmov %vm17122_vm0  ;;  %v8815_v4 = vld [vmem:[#allocation2 + $0x11e] sm:$0xff] }
 0x5e1   : > { %12010 = vmatprep.mubr.msk.f32.mxu1 %vm17358_vm14, %v8358_v63  ;;  %12335 = vmatpush3.bf16.msra.mxu1 %v12332_v32  ;;  %vm17373_vm14 = vmmov %vm17122_vm0  ;;  %v8812_v32 = vld [vmem:[#allocation2 + $0x106] sm:$0xff] }
 0x5e2   : > { %v8816_v63 = vld [vmem:[#allocation2 + $0x126] sm:$0xff] }
 0x5e4   : > { %12011 = vmatmul.mubr.msk.f32.gmra.mrb[4].mxu1 %vm17359_vm8, %v8359_v27  ;;  %vm17374_vm8 = vmmov %vm17122_vm0  ;;  %v8818_v27 = vld [vmem:[#allocation2 + $0x136] sm:$0xff] }
 0x5e5   : > { %12013 = vmatprep.mubr.msk.f32.mxu1 %vm17360_vm6, %v8360_v46  ;;  %vm17375_vm6 = vmmov %vm17122_vm0  ;;  %v8817_v46 = vld [vmem:[#allocation2 + $0x12e] sm:$0xff] }
 0x5e8   : > { %12014 = vmatmul.mubr.msk.f32.gmra.mrb[6].mxu1 %vm17361_vm15, %v8361_v49  ;;  %vm17376_vm15 = vmmov %vm17122_vm0  ;;  %v8819_v49 = vld [vmem:[#allocation2 + $0x13e] sm:$0x3f] }
 0x5e9   : > { %12016 = vmatprep.mubr.msk.f32.mxu1 %vm17362_vm7, %v8362_v40  ;;  %vm17377_vm7 = vmmov %vm17122_vm0  ;;  %v16614_v40 = vld [vmem:[%s16735_s4] ss:$0 sm:$0xff] }
 0x5ec   : > { %12017 = vmatmul.mubr.msk.f32.gmra.mrb[8].mxu1 %vm17363_vm13, %v8363_v20  ;;  %vm17378_vm13 = vmmov %vm17122_vm0 }
 0x5ed   : > { %12019 = vmatprep.mubr.msk.f32.mxu1 %vm17364_vm11, %v8364_v18  ;;  %vm17379_vm11 = vmmov %vm17122_vm0 }
 0x5f0   : > { %12020 = vmatmul.mubr.msk.f32.gmra.mrb[10].mxu1 %vm17365_vm3, %v8365_v54  ;;  %vm17380_vm3 = vmmov %vm17122_vm0 }
 0x5f1   : > { %12022 = vmatprep.mubr.msk.f32.mxu1 %vm17366_vm9, %v8366_v19  ;;  %vm17381_vm9 = vmmov %vm17122_vm0 }
 0x5f4   : > { %12023 = vmatmul.mubr.msk.f32.gmra.mrb[12].mxu1 %vm17367_vm5, %v8367_v21  ;;  %vm17382_vm5 = vmmov %vm17122_vm0 }
 0x5f5   : > { %12025 = vmatprep.mubr.msk.f32.mxu1 %vm17122_vm0, %v8368_v3 }
 0x5f8   : > { %12026 = vmatmul.mubr.msk.f32.gmra.mrb[14].mxu1 %vm17368_vm1, %v8369_v0  ;;  %vm17383_vm1 = vmmov %vm17122_vm0 }
 0x5f9   : > { %12028 = vmatprep.mubr.msk.f32.mxu1 %vm17369_vm2, %v8370_v52  ;;  %vm17384_vm2 = vmmov %vm17122_vm0 }
 0x5fc   : > { %12029 = vmatmul.mubr.msk.f32.gmra.mrb[16].mxu1 %vm17370_vm4, %v8371_v55  ;;  %vm17385_vm4 = vmmov %vm17122_vm0 }
 0x5fd   : > { %12031 = vmatprep.mubr.msk.f32.mxu1 %vm17371_vm10, %v8372_v2  ;;  %vm17386_vm10 = vmmov %vm17122_vm0 }
 0x600   : > { %12032 = vmatmul.mubr.msk.f32.gmra.mrb[18].mxu1 %vm17372_vm12, %v8373_v13  ;;  %vm17387_vm12 = vmmov %vm17122_vm0 }
 0x601   : > { %12034 = vmatprep.mubr.msk.f32.mxu1 %vm17373_vm14, %v8374_v53  ;;  %vm17388_vm14 = vmmov %vm17122_vm0 }
 0x604   : > { %12035 = vmatmul.mubr.msk.f32.gmra.mrb[20].mxu1 %vm17374_vm8, %v8375_v11  ;;  %vm17389_vm8 = vmmov %vm17122_vm0 }
 0x605   : > { %12037 = vmatprep.mubr.msk.f32.mxu1 %vm17375_vm6, %v8376_v58  ;;  %vm17390_vm6 = vmmov %vm17122_vm0 }
 0x608   : > { %12038 = vmatmul.mubr.msk.f32.gmra.mrb[22].mxu1 %vm17376_vm15, %v8377_v36  ;;  %vm17391_vm15 = vmmov %vm17122_vm0 }
 0x609   : > { %12040 = vmatprep.mubr.msk.f32.mxu1 %vm17377_vm7, %v8378_v61  ;;  %vm17392_vm7 = vmmov %vm17122_vm0 }
 0x60c   : > { %12041 = vmatmul.mubr.msk.f32.gmra.mrb[24].mxu1 %vm17378_vm13, %v8379_v9  ;;  %vm17393_vm13 = vmmov %vm17122_vm0 }
 0x60d   : > { %12043 = vmatprep.mubr.msk.f32.mxu1 %vm17379_vm11, %v8380_v48  ;;  %vm17394_vm11 = vmmov %vm17122_vm0 }
 0x610   : > { %12044 = vmatmul.mubr.msk.f32.gmra.mrb[26].mxu1 %vm17380_vm3, %v8381_v51  ;;  %vm17395_vm3 = vmmov %vm17122_vm0 }
 0x611   : > { %12046 = vmatprep.mubr.msk.f32.mxu1 %vm17381_vm9, %v8382_v41  ;;  %vm17396_vm9 = vmmov %vm17122_vm0 }
 0x614   : > { %12047 = vmatmul.mubr.msk.f32.gmra.mrb[28].mxu1 %vm17382_vm5, %v8383_v8  ;;  %vm17397_vm5 = vmmov %vm17122_vm0 }
 0x615   : > { %12049 = vmatprep.mubr.msk.f32.mxu1 %vm17122_vm0, %v8384_v30 }
 0x618   : > { %12050 = vmatmul.mubr.msk.f32.gmra.mrb[30].mxu1 %vm17383_vm1, %v8385_v7  ;;  %vm17398_vm1 = vmmov %vm17122_vm0 }
 0x619   : > { %12052 = vmatprep.mubr.msk.f32.mxu1 %vm17384_vm2, %v8386_v24  ;;  %vm17399_vm2 = vmmov %vm17122_vm0 }
 0x61c   : > { %12053 = vmatmul.mubr.msk.f32.gmra.mrb[32].mxu1 %vm17385_vm4, %v8387_v50  ;;  %vm17400_vm4 = vmmov %vm17122_vm0 }
 0x61d   : > { %12055 = vmatprep.mubr.msk.f32.mxu1 %vm17386_vm10, %v8388_v1  ;;  %vm17401_vm10 = vmmov %vm17122_vm0 }
 0x620   : > { %12056 = vmatmul.mubr.msk.f32.gmra.mrb[34].mxu1 %vm17387_vm12, %v8389_v43  ;;  %vm17402_vm12 = vmmov %vm17122_vm0 }
 0x621   : > { %12066 = vmatprep.mubr.msk.f32.mxu1 %vm17388_vm14, %v8784_v37  ;;  %vm17403_vm14 = vmmov %vm17122_vm0 }
 0x624   : > { %12067 = vmatmul.mubr.msk.f32.vlgmr.msra.gmra.mrb[0].mxu1 %vm17389_vm8, %v8785_v47  ;;  %vm17404_vm8 = vmmov %vm17122_vm0 }
 0x625   : > { %12069 = vmatprep.mubr.msk.f32.mxu1 %vm17390_vm6, %v8786_v35  ;;  %vm17405_vm6 = vmmov %vm17122_vm0 }
 0x628   : > { %12070 = vmatmul.mubr.msk.f32.gmra.mrb[2].mxu1 %vm17391_vm15, %v8787_v31  ;;  %vm17406_vm15 = vmmov %vm17122_vm0 }
 0x629   : > { %12072 = vmatprep.mubr.msk.f32.mxu1 %vm17392_vm7, %v8788_v22  ;;  %vm17407_vm7 = vmmov %vm17122_vm0 }
 0x62c   : > { %12073 = vmatmul.mubr.msk.f32.gmra.mrb[4].mxu1 %vm17393_vm13, %v8789_v33  ;;  %vm17408_vm13 = vmmov %vm17122_vm0 }
 0x62d   : > { %12075 = vmatprep.mubr.msk.f32.mxu1 %vm17394_vm11, %v8790_v14  ;;  %vm17409_vm11 = vmmov %vm17122_vm0 }
 0x630   : > { %12076 = vmatmul.mubr.msk.f32.gmra.mrb[6].mxu1 %vm17395_vm3, %v8791_v12  ;;  %vm17410_vm3 = vmmov %vm17122_vm0 }
 0x631   : > { %12078 = vmatprep.mubr.msk.f32.mxu1 %vm17396_vm9, %v8792_v28  ;;  %vm17411_vm9 = vmmov %vm17122_vm0 }
 0x634   : > { %12079 = vmatmul.mubr.msk.f32.gmra.mrb[8].mxu1 %vm17397_vm5, %v8793_v10  ;;  %vm17412_vm5 = vmmov %vm17122_vm0 }
 0x635   : > { %12081 = vmatprep.mubr.msk.f32.mxu1 %vm17122_vm0, %v8794_v16 }
 0x638   : > { %12082 = vmatmul.mubr.msk.f32.gmra.mrb[10].mxu1 %vm17398_vm1, %v8795_v15  ;;  %vm17413_vm1 = vmmov %vm17122_vm0 }
 0x639   : > { %12084 = vmatprep.mubr.msk.f32.mxu1 %vm17399_vm2, %v8796_v59  ;;  %vm17414_vm2 = vmmov %vm17122_vm0 }
 0x63c   : > { %12085 = vmatmul.mubr.msk.f32.gmra.mrb[12].mxu1 %vm17400_vm4, %v8797_v42  ;;  %vm17415_vm4 = vmmov %vm17122_vm0 }
 0x63d   : > { %12087 = vmatprep.mubr.msk.f32.mxu1 %vm17401_vm10, %v8798_v6  ;;  %vm17416_vm10 = vmmov %vm17122_vm0 }
 0x640   : > { %12088 = vmatmul.mubr.msk.f32.gmra.mrb[14].mxu1 %vm17402_vm12, %v8799_v17  ;;  %vm17417_vm12 = vmmov %vm17122_vm0 }
 0x641   : > { %12090 = vmatprep.mubr.msk.f32.mxu1 %vm17403_vm14, %v8800_v60  ;;  %vm17418_vm14 = vmmov %vm17122_vm0 }
 0x644   : > { %12091 = vmatmul.mubr.msk.f32.gmra.mrb[16].mxu1 %vm17404_vm8, %v8801_v39  ;;  %vm17419_vm8 = vmmov %vm17122_vm0 }
 0x645   : > { %12093 = vmatprep.mubr.msk.f32.mxu1 %vm17405_vm6, %v8802_v34  ;;  %vm17420_vm6 = vmmov %vm17122_vm0 }
 0x648   : > { %12094 = vmatmul.mubr.msk.f32.gmra.mrb[18].mxu1 %vm17406_vm15, %v8803_v38  ;;  %vm17421_vm15 = vmmov %vm17122_vm0 }
 0x649   : > { %12096 = vmatprep.mubr.msk.f32.mxu1 %vm17407_vm7, %v8804_v57  ;;  %vm9257_vm7 = vcmask 64512  }
 0x64c   : > { %12097 = vmatmul.mubr.msk.f32.gmra.mrb[20].mxu1 %vm17408_vm13, %v8805_v23  ;;  %vm9293_vm13 = vcmask 62464  }
 0x64d   : > { %12099 = vmatprep.mubr.msk.f32.mxu1 %vm17409_vm11, %v8806_v62 }
 0x650   : > { %12100 = vmatmul.mubr.msk.f32.gmra.mrb[22].mxu1 %vm17410_vm3, %v8807_v44 }
 0x651   : > { %12102 = vmatprep.mubr.msk.f32.mxu1 %vm17411_vm9, %v8808_v29 }
 0x654   : > { %12103 = vmatmul.mubr.msk.f32.gmra.mrb[24].mxu1 %vm17412_vm5, %v8809_v45 }
 0x655   : > { %12105 = vmatprep.mubr.msk.f32.mxu1 %vm17122_vm0, %v8810_v25 }
 0x658   : > { %12106 = vmatmul.mubr.msk.f32.gmra.mrb[26].mxu1 %vm17413_vm1, %v8811_v5 }
 0x659   : > { %12108 = vmatprep.mubr.msk.f32.mxu1 %vm17414_vm2, %v8812_v32 }
 0x65c   : > { %12109 = vmatmul.mubr.msk.f32.gmra.mrb[28].mxu1 %vm17415_vm4, %v8813_v56 }
 0x65d   : > { %12111 = vmatprep.mubr.msk.f32.mxu1 %vm17416_vm10, %v8814_v26 }
 0x660   : > { %12112 = vmatmul.mubr.msk.f32.gmra.mrb[30].mxu1 %vm17417_vm12, %v8815_v4 }
 0x661   : > { %12114 = vmatprep.mubr.msk.f32.mxu1 %vm17418_vm14, %v8816_v63 }
 0x664   : > { %12115 = vmatmul.mubr.msk.f32.gmra.mrb[32].mxu1 %vm17419_vm8, %v8817_v46 }
 0x665   : > { %12117 = vmatprep.mubr.msk.f32.mxu1 %vm17420_vm6, %v8818_v27 }
 0x668   : > { %12118 = vmatmul.mubr.msk.f32.gmra.mrb[34].mxu1 %vm17421_vm15, %v8819_v49 }
 0x6f7   : > { %v12068_v20 = vpop.f32.mrb[0].mxu1 }
 0x6f8   : > { %v9222_v18 = vadd.f32 %v12068_v20, %v16614_v40  ;;  %v8999_v54 = vpop.f32.mrb[1].mxu1 }
 0x6f9   : > { %v9221_v19 = vadd.f32 %v16614_v40, %v8999_v54 }
 0x6fa   : > { %9259 = vst.msk [vmem:[%s16619_s17 + $0x8] sm:$0xff] %vm9257_vm7, %v9222_v18 }
 0x6fb   : > { %9258 = vst.msk [vmem:[%s16619_s17] sm:$0xff] %vm9257_vm7, %v9221_v19  ;;  %v12071_v21 = vpop.f32.mrb[2].mxu1 }
 0x6fc   : > { %v9224_v3 = vadd.f32 %v12071_v21, %v16614_v40  ;;  %v9009_v0 = vpop.f32.mrb[3].mxu1 }
 0x6fd   : > { %v9223_v52 = vadd.f32 %v16614_v40, %v9009_v0 }
 0x6fe   : > { %9261 = vst.msk [vmem:[%s16619_s17 + $0x18] sm:$0xff] %vm9257_vm7, %v9224_v3 }
 0x6ff   : > { %9260 = vst.msk [vmem:[%s16619_s17 + $0x10] sm:$0xff] %vm9257_vm7, %v9223_v52  ;;  %v12074_v55 = vpop.f32.mrb[4].mxu1 }
 0x700   : > { %v9226_v2 = vadd.f32 %v12074_v55, %v16614_v40  ;;  %v9019_v13 = vpop.f32.mrb[5].mxu1 }
 0x701   : > { %v9225_v53 = vadd.f32 %v16614_v40, %v9019_v13 }
 0x702   : > { %9263 = vst.msk [vmem:[%s16619_s17 + $0x28] sm:$0xff] %vm9257_vm7, %v9226_v2 }
 0x703   : > { %9262 = vst.msk [vmem:[%s16619_s17 + $0x20] sm:$0xff] %vm9257_vm7, %v9225_v53  ;;  %v12077_v11 = vpop.f32.mrb[6].mxu1 }
 0x704   : > { %v9228_v58 = vadd.f32 %v12077_v11, %v16614_v40  ;;  %v9029_v36 = vpop.f32.mrb[7].mxu1 }
 0x705   : > { %v9227_v61 = vadd.f32 %v16614_v40, %v9029_v36 }
 0x706   : > { %9265 = vst.msk [vmem:[%s16619_s17 + $0x38] sm:$0xff] %vm9257_vm7, %v9228_v58 }
 0x707   : > { %9264 = vst.msk [vmem:[%s16619_s17 + $0x30] sm:$0xff] %vm9257_vm7, %v9227_v61  ;;  %v12080_v9 = vpop.f32.mrb[8].mxu1 }
 0x708   : > { %v9230_v48 = vadd.f32 %v12080_v9, %v16614_v40  ;;  %v9039_v51 = vpop.f32.mrb[9].mxu1 }
 0x709   : > { %v9229_v41 = vadd.f32 %v16614_v40, %v9039_v51 }
 0x70a   : > { %9267 = vst.msk [vmem:[%s16619_s17 + $0x48] sm:$0xff] %vm9257_vm7, %v9230_v48 }
 0x70b   : > { %9266 = vst.msk [vmem:[%s16619_s17 + $0x40] sm:$0xff] %vm9257_vm7, %v9229_v41  ;;  %v12083_v8 = vpop.f32.mrb[10].mxu1 }
 0x70c   : > { %v9232_v30 = vadd.f32 %v12083_v8, %v16614_v40  ;;  %v9049_v7 = vpop.f32.mrb[11].mxu1 }
 0x70d   : > { %v9231_v24 = vadd.f32 %v16614_v40, %v9049_v7 }
 0x70e   : > { %9269 = vst.msk [vmem:[%s16619_s17 + $0x58] sm:$0xff] %vm9257_vm7, %v9232_v30 }
 0x70f   : > { %9268 = vst.msk [vmem:[%s16619_s17 + $0x50] sm:$0xff] %vm9257_vm7, %v9231_v24  ;;  %v12086_v1 = vpop.f32.mrb[12].mxu1 }
 0x710   : > { %v9234_v50 = vadd.f32 %v12086_v1, %v16614_v40  ;;  %v9059_v43 = vpop.f32.mrb[13].mxu1 }
 0x711   : > { %v9233_v37 = vadd.f32 %v16614_v40, %v9059_v43 }
 0x712   : > { %9271 = vst.msk [vmem:[%s16619_s17 + $0x68] sm:$0xff] %vm9257_vm7, %v9234_v50 }
 0x713   : > { %9270 = vst.msk [vmem:[%s16619_s17 + $0x60] sm:$0xff] %vm9257_vm7, %v9233_v37  ;;  %v12089_v47 = vpop.f32.mrb[14].mxu1 }
 0x714   : > { %v9236_v35 = vadd.f32 %v12089_v47, %v16614_v40  ;;  %v9069_v31 = vpop.f32.mrb[15].mxu1 }
 0x715   : > { %v9235_v22 = vadd.f32 %v16614_v40, %v9069_v31 }
 0x716   : > { %9273 = vst.msk [vmem:[%s16619_s17 + $0x78] sm:$0xff] %vm9257_vm7, %v9236_v35 }
 0x717   : > { %9272 = vst.msk [vmem:[%s16619_s17 + $0x70] sm:$0xff] %vm9257_vm7, %v9235_v22  ;;  %v12092_v33 = vpop.f32.mrb[16].mxu1 }
 0x718   : > { %v9238_v14 = vadd.f32 %v12092_v33, %v16614_v40  ;;  %v9079_v12 = vpop.f32.mrb[17].mxu1 }
 0x719   : > { %v9237_v28 = vadd.f32 %v16614_v40, %v9079_v12 }
 0x71a   : > { %9275 = vst.msk [vmem:[%s16619_s17 + $0x88] sm:$0xff] %vm9257_vm7, %v9238_v14 }
 0x71b   : > { %9274 = vst.msk [vmem:[%s16619_s17 + $0x80] sm:$0xff] %vm9257_vm7, %v9237_v28  ;;  %v12095_v10 = vpop.f32.mrb[18].mxu1 }
 0x71c   : > { %v9240_v16 = vadd.f32 %v12095_v10, %v16614_v40  ;;  %v9089_v15 = vpop.f32.mrb[19].mxu1 }
 0x71d   : > { %v9239_v59 = vadd.f32 %v16614_v40, %v9089_v15 }
 0x71e   : > { %9277 = vst.msk [vmem:[%s16619_s17 + $0x98] sm:$0xff] %vm9257_vm7, %v9240_v16 }
 0x71f   : > { %9276 = vst.msk [vmem:[%s16619_s17 + $0x90] sm:$0xff] %vm9257_vm7, %v9239_v59  ;;  %v12098_v42 = vpop.f32.mrb[20].mxu1 }
 0x720   : > { %v9242_v6 = vadd.f32 %v12098_v42, %v16614_v40  ;;  %v9099_v17 = vpop.f32.mrb[21].mxu1 }
 0x721   : > { %v9241_v60 = vadd.f32 %v16614_v40, %v9099_v17 }
 0x722   : > { %9279 = vst.msk [vmem:[%s16619_s17 + $0xa8] sm:$0xff] %vm9257_vm7, %v9242_v6 }
 0x723   : > { %9278 = vst.msk [vmem:[%s16619_s17 + $0xa0] sm:$0xff] %vm9257_vm7, %v9241_v60  ;;  %v12101_v39 = vpop.f32.mrb[22].mxu1 }
 0x724   : > { %v9244_v34 = vadd.f32 %v12101_v39, %v16614_v40  ;;  %v9109_v38 = vpop.f32.mrb[23].mxu1 }
 0x725   : > { %v9243_v57 = vadd.f32 %v16614_v40, %v9109_v38 }
 0x726   : > { %9281 = vst.msk [vmem:[%s16619_s17 + $0xb8] sm:$0xff] %vm9257_vm7, %v9244_v34 }
 0x727   : > { %9280 = vst.msk [vmem:[%s16619_s17 + $0xb0] sm:$0xff] %vm9257_vm7, %v9243_v57  ;;  %v12104_v23 = vpop.f32.mrb[24].mxu1 }
 0x728   : > { %v9246_v62 = vadd.f32 %v12104_v23, %v16614_v40  ;;  %v9119_v44 = vpop.f32.mrb[25].mxu1 }
 0x729   : > { %v9245_v29 = vadd.f32 %v16614_v40, %v9119_v44 }
 0x72a   : > { %9283 = vst.msk [vmem:[%s16619_s17 + $0xc8] sm:$0xff] %vm9257_vm7, %v9246_v62 }
 0x72b   : > { %9282 = vst.msk [vmem:[%s16619_s17 + $0xc0] sm:$0xff] %vm9257_vm7, %v9245_v29  ;;  %v12107_v45 = vpop.f32.mrb[26].mxu1 }
 0x72c   : > { %v9248_v25 = vadd.f32 %v12107_v45, %v16614_v40  ;;  %v9129_v5 = vpop.f32.mrb[27].mxu1 }
 0x72d   : > { %v9247_v32 = vadd.f32 %v16614_v40, %v9129_v5 }
 0x72e   : > { %9285 = vst.msk [vmem:[%s16619_s17 + $0xd8] sm:$0xff] %vm9257_vm7, %v9248_v25 }
 0x72f   : > { %9284 = vst.msk [vmem:[%s16619_s17 + $0xd0] sm:$0xff] %vm9257_vm7, %v9247_v32  ;;  %v12110_v56 = vpop.f32.mrb[28].mxu1 }
 0x730   : > { %v9250_v26 = vadd.f32 %v12110_v56, %v16614_v40  ;;  %v9139_v4 = vpop.f32.mrb[29].mxu1 }
 0x731   : > { %v9249_v63 = vadd.f32 %v16614_v40, %v9139_v4 }
 0x732   : > { %9287 = vst.msk [vmem:[%s16619_s17 + $0xe8] sm:$0xff] %vm9257_vm7, %v9250_v26 }
 0x733   : > { %9286 = vst.msk [vmem:[%s16619_s17 + $0xe0] sm:$0xff] %vm9257_vm7, %v9249_v63  ;;  %v12113_v27 = vpop.f32.mrb[30].mxu1 }
 0x734   : > { %v9252_v46 = vadd.f32 %v12113_v27, %v16614_v40  ;;  %v9149_v49 = vpop.f32.mrb[31].mxu1 }
 0x735   : > { %v9251_v20 = vadd.f32 %v16614_v40, %v9149_v49 }
 0x736   : > { %9289 = vst.msk [vmem:[%s16619_s17 + $0xf8] sm:$0xff] %vm9257_vm7, %v9252_v46 }
 0x737   : > { %9288 = vst.msk [vmem:[%s16619_s17 + $0xf0] sm:$0xff] %vm9257_vm7, %v9251_v20  ;;  %v12116_v18 = vpop.f32.mrb[32].mxu1 }
 0x738   : > { %v9254_v54 = vadd.f32 %v12116_v18, %v16614_v40  ;;  %v9159_v19 = vpop.f32.mrb[33].mxu1 }
 0x739   : > { %v9253_v21 = vadd.f32 %v16614_v40, %v9159_v19 }
 0x73a   : > { %9291 = vst.msk [vmem:[%s16619_s17 + $0x108] sm:$0xff] %vm9257_vm7, %v9254_v54 }
 0x73b   : > { %9290 = vst.msk [vmem:[%s16619_s17 + $0x100] sm:$0xff] %vm9257_vm7, %v9253_v21  ;;  %v12119_v3 = vpop.f32.mrb[34].mxu1 }
 0x73c   : > { %v9256_v0 = vadd.f32 %v12119_v3, %v16614_v40  ;;  %v9169_v52 = vpop.f32.mrb[35].mxu1 }
 0x73d   : > { %v9255_v55 = vadd.f32 %v16614_v40, %v9169_v52 }
 0x73e   : > { %9294 = vst.msk [vmem:[%s16619_s17 + $0x118] sm:$0x3f] %vm9293_vm13, %v9256_v0 }
 0x73f   : > { %9292 = vst.msk [vmem:[%s16619_s17 + $0x110] sm:$0xff] %vm9257_vm7, %v9255_v55 }
 0x740 PF: > { %s15_s18 = sadd.s32 1, %s13146_s18  }
 0x741   : > { %p12_p4 = scmp.ge.s32.totalorder %s15_s18, 4  }
 0x743   :  { %14 = sbr.rel (!%p12_p4) target bundleno = 1 (0x1), region = 86 }

</bundles_post_ra>
